<compile_context>
chip_gen: v7x
topology: tpu7x:2x2x1
jax: 0.10.0
libtpu: 0.0.40
codegen_flags: <defaults>
</compile_context>

<pallas_src>
import jax
import jax.numpy as jnp
from jax.experimental import pallas as pl
from jax.experimental.pallas import tpu as pltpu

# ----------------------------- configuration --------------------------------
B = 2
N_STAGES, N_PARTS, SEQ_LEN, N_FINGERS = 3, 2, 10, 5
REF_DIM = 7
SEQ_FEAT = 15
FEAT = REF_DIM + 2 * SEQ_FEAT + 2                      # 39
D = N_STAGES * N_PARTS * SEQ_LEN * N_FINGERS * FEAT    # 11700
LATENT = 32
TEMB = 32
COND = 32
HID = 128
TIMESTEPS = 100
N_OBJ = 64

LANE = 128
def _round_up(x, m):
    return (x + m - 1) // m * m

D_PAD = _round_up(D, LANE)          # 11776 (pad lanes are kept exactly zero end-to-end)
TC_PAD = LANE                       # padded width of [t_emb | cond] (64 -> 128)


# ------------- kernel 1: fused q_sample + eps_model MLP + MSE sum -----------
# TODO(synk): eps_model is an external module in the reference; synthesized here as a
#             deterministic 2-layer MLP conditioned on [x_t, timestep-embedding, cond].
def _eps_fused_kernel(c1_ref, c2_ref, x0_ref, noise_ref, tc_ref,
                      w1x_ref, w1tc_ref, b1_ref, w2_ref, b2_ref,
                      out_ref, mse_ref):
    noise = noise_ref[...]
    # q_sample: x_t = sqrt(ac[t]) * x0 + sqrt(1-ac[t]) * noise   (pad lanes stay zero)
    x_t = c1_ref[...] * x0_ref[...] + c2_ref[...] * noise

    # layer 1: h = relu(x_t @ W1x + [t_emb|cond] @ W1tc + b1)   (bf16 weights, f32 acc)
    h = (jnp.dot(x_t.astype(jnp.bfloat16), w1x_ref[...],
                 preferred_element_type=jnp.float32)
         + jnp.dot(tc_ref[...].astype(jnp.bfloat16), w1tc_ref[...],
                   preferred_element_type=jnp.float32)
         + b1_ref[...])
    h = jnp.maximum(h, 0.0)

    # layer 2
    out = jnp.dot(h.astype(jnp.bfloat16), w2_ref[...],
                  preferred_element_type=jnp.float32) + b2_ref[...]
    out_ref[...] = out

    # MSE partial sum; pad lanes of `out` (zero w2/b2 columns) and `noise` are both
    # zero, so the full-width sum equals the D-wide sum exactly.
    d = out - noise
    mse_ref[0] = jnp.sum(d * d)


def eps_fused(c1, c2, x0_p, noise_p, tc_p, w1x, w1tc, b1, w2, b2):
    B_ = x0_p.shape[0]
    return pl.pallas_call(
        _eps_fused_kernel,
        out_shape=(jax.ShapeDtypeStruct((B_, D_PAD), jnp.float32),
                   jax.ShapeDtypeStruct((1,), jnp.float32)),
        in_specs=[pl.BlockSpec(memory_space=pltpu.MemorySpace.VMEM)] * 10,
        out_specs=(pl.BlockSpec(memory_space=pltpu.MemorySpace.VMEM),
                   pl.BlockSpec(memory_space=pltpu.MemorySpace.SMEM)),
        compiler_params=pltpu.CompilerParams(vmem_limit_bytes=32 * 1024 * 1024),
    )(c1, c2, x0_p, noise_p, tc_p, w1x, w1tc, b1, w2, b2)


# ----------------------------- kernel 2: loss sums ---------------------------
def _bce_logits_sum(y, x):
    # sum of BCE-with-logits: max(x,0) - x*y + log(1 + exp(-|x|))  (stable, no eps clamp)
    return jnp.sum(jnp.maximum(x, 0.0) - x * y + jnp.log(1.0 + jnp.exp(-jnp.abs(x))))


def _loss_kernel(gtflag_ref, reflogit_ref, gtc_ref, clogit_ref, gtn_ref, nlogit_ref,
                 flag3_ref, gtpos_ref, ppos_ref, gtdir_ref, pdir_ref,
                 mu_ref, logvar_ref,
                 m1_ref, gts1_ref, ps1_ref, m2_ref, gts2_ref, ps2_ref,
                 tipmask_ref, sums_ref):
    # 0,1,2: BCE partial sums (ref flag / contact flag / near flag)
    sums_ref[0] = _bce_logits_sum(gtflag_ref[...], reflogit_ref[...])
    sums_ref[1] = _bce_logits_sum(gtc_ref[...], clogit_ref[...])
    sums_ref[2] = _bce_logits_sum(gtn_ref[...], nlogit_ref[...])

    # 3,4,5: masked pos / dir squared-error sums, and sum(gt_flag)
    f3 = flag3_ref[...]
    dp = gtpos_ref[...] - ppos_ref[...]
    dd = gtdir_ref[...] - pdir_ref[...]
    sums_ref[3] = jnp.sum(f3 * dp * dp)
    sums_ref[4] = jnp.sum(f3 * dd * dd)
    sums_ref[5] = jnp.sum(gtflag_ref[...])

    # 6: KLD partial sum
    mu = mu_ref[...]
    lv = logvar_ref[...]
    sums_ref[6] = jnp.sum(1.0 + lv - mu * mu - jnp.exp(lv))

    # 7..10: masked sequence losses; each 15-lane group = 5 joints x 3 coords,
    #        tip = joint 4 (last 3 lanes of each group), joints = remaining 12.
    tip = tipmask_ref[...]
    d1 = gts1_ref[...] - ps1_ref[...]
    e1 = m1_ref[...] * d1 * d1
    t1 = jnp.sum(e1 * tip)
    sums_ref[7] = t1
    sums_ref[8] = jnp.sum(e1) - t1

    d2 = gts2_ref[...] - ps2_ref[...]
    e2 = m2_ref[...] * d2 * d2
    t2 = jnp.sum(e2 * tip)
    sums_ref[9] = t2
    sums_ref[10] = jnp.sum(e2) - t2


def loss_sums(*arrays):
    return pl.pallas_call(
        _loss_kernel,
        out_shape=jax.ShapeDtypeStruct((11,), jnp.float32),
        in_specs=[pl.BlockSpec(memory_space=pltpu.MemorySpace.VMEM)] * len(arrays),
        out_specs=pl.BlockSpec(memory_space=pltpu.MemorySpace.SMEM),
    )(*arrays)


# --------------------------------- glue --------------------------------------
def timestep_embedding(ts, dim):
    half = dim // 2
    freqs = jnp.exp(-jnp.log(10000.0) * jnp.arange(half, dtype=jnp.float32) / half)
    args = ts.astype(jnp.float32)[:, None] * freqs[None, :]
    return jnp.concatenate([jnp.sin(args), jnp.cos(args)], axis=-1)


def init_params(key):
    ks = jax.random.split(key, 4)
    # make_schedule_ddpm equivalent (linear beta schedule); only the two buffers
    # used in DDPM.forward/q_sample are needed here.
    betas = jnp.linspace(1e-4, 0.02, TIMESTEPS, dtype=jnp.float32)
    alphas_cumprod = jnp.cumprod(1.0 - betas)
    w1x = jax.random.normal(ks[0], (D, HID), jnp.float32) * 0.02
    w1tc = jax.random.normal(ks[1], (TEMB + COND, HID), jnp.float32) * 0.02
    w2 = jax.random.normal(ks[2], (HID, D), jnp.float32) * 0.02
    return {
        "sqrt_alphas_cumprod": jnp.sqrt(alphas_cumprod),
        "sqrt_one_minus_alphas_cumprod": jnp.sqrt(1.0 - alphas_cumprod),
        # eps_model weights stored in bf16; pad rows/cols are exactly zero.
        "w1x": jnp.pad(w1x, ((0, D_PAD - D), (0, 0))).astype(jnp.bfloat16),
        "w1tc": jnp.pad(w1tc, ((0, TC_PAD - (TEMB + COND)), (0, 0))).astype(jnp.bfloat16),
        "b1": jnp.zeros((1, HID), jnp.float32),
        "w2": jnp.pad(w2, ((0, 0), (0, D_PAD - D))).astype(jnp.bfloat16),
        "b2": jnp.zeros((1, D_PAD), jnp.float32),
        "wc": jax.random.normal(ks[3], (N_OBJ * 3, COND), jnp.float32) * 0.05,
        "bc": jnp.zeros((COND,), jnp.float32),
    }


@jax.jit
def ddpm_forward(data, params, key):
    contact_ref = data["contact_ref"]                    # (B,3,2,5,7)
    in_seq_1 = data["in_seq_1"]                          # (B,3,2,10,5,15)
    in_seq_2 = data["in_seq_2"]
    in_c = data["in_contact_flag_seq"]                   # (B,3,2,10,5)
    in_n = data["in_near_flag_seq"]
    obj_vertices = data["obj_vertices"]                  # (B,64,3)
    B_ = contact_ref.shape[0]

    # ---- build the diffused target `seq` (B, D), zero-padded to (B, D_PAD) ----
    in_seq = jnp.concatenate(
        [in_seq_1, in_seq_2, in_c[..., None], in_n[..., None]], axis=-1)
    cref_t = jnp.tile(contact_ref[:, :, :, None], (1, 1, 1, SEQ_LEN, 1, 1))
    seq = jnp.concatenate([cref_t, in_seq], axis=-1).reshape(B_, -1)   # (B, 11700)
    seq_p = jnp.pad(seq, ((0, 0), (0, D_PAD - D)))

    k_t, k_noise = jax.random.split(key)
    ts = jax.random.randint(k_t, (B_,), 0, TIMESTEPS)                  # rand_t_type='all'
    noise = jax.random.normal(k_noise, (B_, D), dtype=jnp.float32)
    noise_p = jnp.pad(noise, ((0, 0), (0, D_PAD - D)))

    c1 = params["sqrt_alphas_cumprod"][ts].reshape(B_, 1)
    c2 = params["sqrt_one_minus_alphas_cumprod"][ts].reshape(B_, 1)

    # ---- condition + time embedding (tiny; XLA glue, fused under jit) ----
    t_emb = timestep_embedding(ts, TEMB)
    cond = jnp.tanh(obj_vertices.reshape(B_, -1) @ params["wc"] + params["bc"])
    tc = jnp.concatenate([t_emb, cond], axis=-1)                       # (B, 64)
    tc_p = jnp.pad(tc, ((0, 0), (0, TC_PAD - tc.shape[-1])))           # (B, 128)

    # ---- fused q_sample + eps_model + MSE partial-sum (single Pallas call) ----
    # apply_observation: has_observation=False -> identity
    out_pad, mse_sum = eps_fused(c1, c2, seq_p, noise_p, tc_p,
                                 params["w1x"], params["w1tc"], params["b1"],
                                 params["w2"], params["b2"])
    output = out_pad[:, :D]                                            # (B, 11700)

    # ---- slice the prediction heads (XLA glue; lane-dense reshapes) ----
    out6 = output.reshape(B_, N_STAGES, N_PARTS, SEQ_LEN, N_FINGERS, FEAT)
    state_out = jnp.mean(out6[..., 0:7], axis=3)                       # (B,3,2,5,7)
    ref_logit = state_out[..., 0].reshape(B_, -1)                      # (B,30)
    pred_ref = state_out[..., 1:]                                      # (B,3,2,5,6)
    pred_pos = pred_ref[..., :3].reshape(B_, -1)                       # (B,90)
    pred_dir = pred_ref[..., 3:].reshape(B_, -1)                       # (B,90)
    c_logit = out6[..., 37].reshape(B_, -1)                            # (B,300)
    n_logit = out6[..., 38].reshape(B_, -1)                            # (B,300)
    pred_seq1 = out6[..., 7:22].reshape(B_ * N_STAGES * N_PARTS, -1)   # (6B,750)
    pred_seq2 = out6[..., 22:37].reshape(B_ * N_STAGES * N_PARTS, -1)

    # ---- ground-truth side of the CVAE loss ----
    # TODO(synk): the reference passes the prediction tuple `y` into CVAEALLLoss (which
    #             indexes a dict) — not runnable as written; reconstructed here by
    #             pairing predictions with GT tensors and mu/logvar taken from `data`.
    gt_flag = contact_ref[..., 0:1]                                    # (B,3,2,5,1)
    gt_flag_lane = gt_flag.reshape(B_, -1)                             # (B,30)
    flag3 = jnp.broadcast_to(
        gt_flag, (B_, N_STAGES, N_PARTS, N_FINGERS, 3)).reshape(B_, -1)  # (B,90)
    gt_rest = contact_ref[..., 1:]                                     # (B,3,2,5,6)
    gt_pos = gt_rest[..., :3].reshape(B_, -1)
    gt_dir = gt_rest[..., 3:].reshape(B_, -1)
    gt_c = data["out_contact_flag_seq"].reshape(B_, -1)                # (B,300)
    gt_n = data["out_near_flag_seq"].reshape(B_, -1)
    gt_seq1 = data["out_seq_1"].reshape(B_ * N_STAGES * N_PARTS, -1)   # (6B,750)
    gt_seq2 = data["out_seq_2"].reshape(B_ * N_STAGES * N_PARTS, -1)
    mu, logvar = data["mu"], data["logvar"]

    gt_flag_1 = jnp.expand_dims(gt_flag[:, :-1], -3)                   # (B,2,2,1,5,1)
    gt_flag_1 = jnp.concatenate(
        [jnp.zeros_like(gt_flag_1[:, :1]), gt_flag_1], axis=1)         # (B,3,2,1,5,1)
    gt_flag_2 = jnp.expand_dims(gt_flag, -3)                           # (B,3,2,1,5,1)
    n_mask = data["out_near_flag_seq"][..., None]                      # (B,3,2,10,5,1)
    full = (B_, N_STAGES, N_PARTS, SEQ_LEN, N_FINGERS, SEQ_FEAT)
    mask1 = jnp.broadcast_to(gt_flag_1 * n_mask, full).reshape(B_ * N_STAGES * N_PARTS, -1)
    mask2 = jnp.broadcast_to(gt_flag_2 * n_mask, full).reshape(B_ * N_STAGES * N_PARTS, -1)

    # tip lanes = last 3 of every 15-lane (5 joints x 3 coords) group
    tipmask = jnp.tile(
        jnp.concatenate([jnp.zeros((12,), jnp.float32), jnp.ones((3,), jnp.float32)]),
        SEQ_LEN * N_FINGERS)[None, :]                                  # (1,750)

    # ---- all loss reductions in one Pallas kernel ----
    sums = loss_sums(
        gt_flag_lane, ref_logit, gt_c, c_logit, gt_n, n_logit,
        flag3, gt_pos, pred_pos, gt_dir, pred_dir,
        mu, logvar,
        mask1, gt_seq1, pred_seq1, mask2, gt_seq2, pred_seq2,
        tipmask,
    )

    # ---- scalar finalization (fused XLA glue) ----
    N1 = B_ * N_STAGES * N_PARTS * N_FINGERS             # 60
    N2 = N1 * SEQ_LEN                                     # 600
    binary_loss = sums[0] / N1 + sums[1] / N2 + sums[2] / N2
    flag_sum = jnp.maximum(sums[5], 1.0)                  # guard divide-by-zero
    pos_L2_loss = sums[3] / flag_sum
    dir_L2_loss = sums[4] / flag_sum
    KLD_loss = -0.5 * sums[6] / (B_ * LATENT)
    tip_loss = sums[7] / (N2 * 3) + sums[9] / (N2 * 3)
    joints_loss = sums[8] / (N2 * 12) + sums[10] / (N2 * 12)

    # CVAEALLLoss(lambda_dir=100, lambda_seq_joints=1) weights
    cams = (0.1 * binary_loss + 500.0 * pos_L2_loss + 100.0 * dir_L2_loss
            + 5.0 * KLD_loss + 100.0 * tip_loss + 1.0 * joints_loss)
    # TODO(synk): F.mse_loss(output, noise) in the reference has mismatched shapes
    #             ((B,3,2,10,5,39) vs (B,11700)); implemented as elementwise MSE over
    #             the common flat (B, D) layout (summed inside the fused eps kernel).
    mse = mse_sum[0] / (B_ * D)
    return {"loss": mse + cams}


# --------------------------------- main ---------------------------------------
if __name__ == "__main__":
    root = jax.random.PRNGKey(0)
    ks = jax.random.split(root, 20)

    data = {
        "contact_ref": jnp.concatenate(
            [(jax.random.uniform(ks[0], (B, 3, 2, 5, 1)) > 0.3).astype(jnp.float32),
             jax.random.normal(ks[1], (B, 3, 2, 5, 6), jnp.float32)], axis=-1),
        "in_seq_1": jax.random.normal(ks[2], (B, 3, 2, 10, 5, 15), jnp.float32),
        "in_seq_2": jax.random.normal(ks[3], (B, 3, 2, 10, 5, 15), jnp.float32),
        "in_contact_flag_seq": (jax.random.uniform(ks[4], (B, 3, 2, 10, 5)) > 0.5).astype(jnp.float32),
        "in_near_flag_seq": (jax.random.uniform(ks[5], (B, 3, 2, 10, 5)) > 0.5).astype(jnp.float32),
        "obj_vertices": jax.random.normal(ks[6], (B, N_OBJ, 3), jnp.float32),
        "t_seq": jax.random.normal(ks[7], (B, SEQ_LEN), jnp.float32),     # extracted but unused (as in reference)
        "control": jax.random.normal(ks[8], (B, 16), jnp.float32),        # extracted but unused (as in reference)
        # GT / latent terms consumed by the reconstructed CVAE loss:
        "out_seq_1": jax.random.normal(ks[9], (B, 3, 2, 10, 5, 15), jnp.float32),
        "out_seq_2": jax.random.normal(ks[10], (B, 3, 2, 10, 5, 15), jnp.float32),
        "out_contact_flag_seq": (jax.random.uniform(ks[11], (B, 3, 2, 10, 5)) > 0.5).astype(jnp.float32),
        "out_near_flag_seq": (jax.random.uniform(ks[12], (B, 3, 2, 10, 5)) > 0.5).astype(jnp.float32),
        "mu": jax.random.normal(ks[13], (B, LATENT), jnp.float32),
        "logvar": 0.1 * jax.random.normal(ks[14], (B, LATENT), jnp.float32),
    }

    params = init_params(ks[15])
    out = ddpm_forward(data, params, ks[16])
    loss = jax.block_until_ready(out["loss"])
    assert loss.shape == () and bool(jnp.isfinite(loss))
    print("KERNEL_OK")
</pallas_src>

<mosaic_0001>
module attributes {stable_mosaic.version = 11 : i64} {
  func.func @_eps_fused_kernel(%arg0: memref<2x1xf32, #tpu.memory_space<vmem>>, %arg1: memref<2x1xf32, #tpu.memory_space<vmem>>, %arg2: memref<2x11776xf32, #tpu.memory_space<vmem>>, %arg3: memref<2x11776xf32, #tpu.memory_space<vmem>>, %arg4: memref<2x128xf32, #tpu.memory_space<vmem>>, %arg5: memref<11776x128xbf16, #tpu.memory_space<vmem>>, %arg6: memref<128x128xbf16, #tpu.memory_space<vmem>>, %arg7: memref<1x128xf32, #tpu.memory_space<vmem>>, %arg8: memref<128x11776xbf16, #tpu.memory_space<vmem>>, %arg9: memref<1x11776xf32, #tpu.memory_space<vmem>>, %arg10: memref<2x11776xf32, #tpu.memory_space<vmem>>, %arg11: memref<1xf32, #tpu.memory_space<smem>>) attributes {dimension_semantics = [], scalar_prefetch = 0 : i64, scratch_operands = 0 : i64, tpu.core_type = #tpu.core_type<tc>} {
    %c0 = arith.constant 0 : index
    %c0_0 = arith.constant 0 : index
    %0 = vector.load %arg3[%c0, %c0_0] : memref<2x11776xf32, #tpu.memory_space<vmem>>, vector<2x11776xf32>
    %c0_1 = arith.constant 0 : index
    %c0_2 = arith.constant 0 : index
    %1 = vector.load %arg0[%c0_1, %c0_2] : memref<2x1xf32, #tpu.memory_space<vmem>>, vector<2x1xf32>
    %c0_3 = arith.constant 0 : index
    %c0_4 = arith.constant 0 : index
    %2 = vector.load %arg2[%c0_3, %c0_4] : memref<2x11776xf32, #tpu.memory_space<vmem>>, vector<2x11776xf32>
    %3 = vector.broadcast %1 : vector<2x1xf32> to vector<2x11776xf32>
    %4 = arith.mulf %3, %2 : vector<2x11776xf32>
    %c0_5 = arith.constant 0 : index
    %c0_6 = arith.constant 0 : index
    %5 = vector.load %arg1[%c0_5, %c0_6] : memref<2x1xf32, #tpu.memory_space<vmem>>, vector<2x1xf32>
    %6 = vector.broadcast %5 : vector<2x1xf32> to vector<2x11776xf32>
    %7 = arith.mulf %6, %0 : vector<2x11776xf32>
    %8 = arith.addf %4, %7 : vector<2x11776xf32>
    %9 = arith.truncf %8 : vector<2x11776xf32> to vector<2x11776xbf16>
    %c0_7 = arith.constant 0 : index
    %c0_8 = arith.constant 0 : index
    %10 = vector.load %arg5[%c0_7, %c0_8] : memref<11776x128xbf16, #tpu.memory_space<vmem>>, vector<11776x128xbf16>
    %cst = arith.constant dense<0.000000e+00> : vector<2x128xf32>
    %11 = tpu.matmul %9, %10, %cst {dimension_numbers = #tpu.dot_dimension_numbers<[1], [0], [0], [1], [0, 0, 1, 1], [], []>} : vector<2x11776xbf16>, vector<11776x128xbf16>, vector<2x128xf32> -> vector<2x128xf32>
    %c0_9 = arith.constant 0 : index
    %c0_10 = arith.constant 0 : index
    %12 = vector.load %arg4[%c0_9, %c0_10] : memref<2x128xf32, #tpu.memory_space<vmem>>, vector<2x128xf32>
    %13 = arith.truncf %12 : vector<2x128xf32> to vector<2x128xbf16>
    %c0_11 = arith.constant 0 : index
    %c0_12 = arith.constant 0 : index
    %14 = vector.load %arg6[%c0_11, %c0_12] : memref<128x128xbf16, #tpu.memory_space<vmem>>, vector<128x128xbf16>
    %cst_13 = arith.constant dense<0.000000e+00> : vector<2x128xf32>
    %15 = tpu.matmul %13, %14, %cst_13 {dimension_numbers = #tpu.dot_dimension_numbers<[1], [0], [0], [1], [0, 0, 1, 1], [], []>} : vector<2x128xbf16>, vector<128x128xbf16>, vector<2x128xf32> -> vector<2x128xf32>
    %16 = arith.addf %11, %15 : vector<2x128xf32>
    %c0_14 = arith.constant 0 : index
    %c0_15 = arith.constant 0 : index
    %17 = vector.load %arg7[%c0_14, %c0_15] : memref<1x128xf32, #tpu.memory_space<vmem>>, vector<1x128xf32>
    %18 = vector.broadcast %17 : vector<1x128xf32> to vector<2x128xf32>
    %19 = arith.addf %16, %18 : vector<2x128xf32>
    %cst_16 = arith.constant 0.000000e+00 : f32
    %20 = vector.broadcast %cst_16 : f32 to vector<2x128xf32>
    %21 = arith.maximumf %19, %20 : vector<2x128xf32>
    %22 = arith.truncf %21 : vector<2x128xf32> to vector<2x128xbf16>
    %c0_17 = arith.constant 0 : index
    %c0_18 = arith.constant 0 : index
    %23 = vector.load %arg8[%c0_17, %c0_18] : memref<128x11776xbf16, #tpu.memory_space<vmem>>, vector<128x11776xbf16>
    %cst_19 = arith.constant dense<0.000000e+00> : vector<2x11776xf32>
    %24 = tpu.matmul %22, %23, %cst_19 {dimension_numbers = #tpu.dot_dimension_numbers<[1], [0], [0], [1], [0, 0, 1, 1], [], []>} : vector<2x128xbf16>, vector<128x11776xbf16>, vector<2x11776xf32> -> vector<2x11776xf32>
    %c0_20 = arith.constant 0 : index
    %c0_21 = arith.constant 0 : index
    %25 = vector.load %arg9[%c0_20, %c0_21] : memref<1x11776xf32, #tpu.memory_space<vmem>>, vector<1x11776xf32>
    %26 = vector.broadcast %25 : vector<1x11776xf32> to vector<2x11776xf32>
    %27 = arith.addf %24, %26 : vector<2x11776xf32>
    %c0_22 = arith.constant 0 : index
    %c0_23 = arith.constant 0 : index
    %28 = vector.load %arg10[%c0_22, %c0_23] : memref<2x11776xf32, #tpu.memory_space<vmem>>, vector<2x11776xf32>
    tpu.vector_store %arg10[%c0_22, %c0_23], %27 {strides = array<i32>} : memref<2x11776xf32, #tpu.memory_space<vmem>>, vector<2x11776xf32>,
    %29 = arith.subf %27, %0 : vector<2x11776xf32>
    %30 = arith.mulf %29, %29 : vector<2x11776xf32>
    %31 = vector.shape_cast %30 : vector<2x11776xf32> to vector<1x2x11776xf32>
    %cst_24 = arith.constant dense<0.000000e+00> : vector<1xf32>
    %32 = vector.multi_reduction <add>, %31, %cst_24 [1, 2] : vector<1x2x11776xf32> to vector<1xf32>
    %33 = vector.shape_cast %32 : vector<1xf32> to vector<1x1x1xf32>
    %34 = vector.extract %33[0, 0, 0] : f32 from vector<1x1x1xf32>
    %c0_25 = arith.constant 0 : index
    %35 = memref.load %arg11[%c0_25] : memref<1xf32, #tpu.memory_space<smem>>
    memref.store %34, %arg11[%c0_25] : memref<1xf32, #tpu.memory_space<smem>>
    return
  }
}

module attributes {stable_mosaic.version = 11 : i64} {
  func.func @_loss_kernel(%arg0: memref<2x30xf32, #tpu.memory_space<vmem>>, %arg1: memref<2x30xf32, #tpu.memory_space<vmem>>, %arg2: memref<2x300xf32, #tpu.memory_space<vmem>>, %arg3: memref<2x300xf32, #tpu.memory_space<vmem>>, %arg4: memref<2x300xf32, #tpu.memory_space<vmem>>, %arg5: memref<2x300xf32, #tpu.memory_space<vmem>>, %arg6: memref<2x90xf32, #tpu.memory_space<vmem>>, %arg7: memref<2x90xf32, #tpu.memory_space<vmem>>, %arg8: memref<2x90xf32, #tpu.memory_space<vmem>>, %arg9: memref<2x90xf32, #tpu.memory_space<vmem>>, %arg10: memref<2x90xf32, #tpu.memory_space<vmem>>, %arg11: memref<2x32xf32, #tpu.memory_space<vmem>>, %arg12: memref<2x32xf32, #tpu.memory_space<vmem>>, %arg13: memref<12x750xf32, #tpu.memory_space<vmem>>, %arg14: memref<12x750xf32, #tpu.memory_space<vmem>>, %arg15: memref<12x750xf32, #tpu.memory_space<vmem>>, %arg16: memref<12x750xf32, #tpu.memory_space<vmem>>, %arg17: memref<12x750xf32, #tpu.memory_space<vmem>>, %arg18: memref<12x750xf32, #tpu.memory_space<vmem>>, %arg19: memref<1x750xf32, #tpu.memory_space<vmem>>, %arg20: memref<11xf32, #tpu.memory_space<smem>>) attributes {dimension_semantics = [], scalar_prefetch = 0 : i64, scratch_operands = 0 : i64, tpu.core_type = #tpu.core_type<tc>} {
    %c0 = arith.constant 0 : index
    %c0_0 = arith.constant 0 : index
    %0 = vector.load %arg0[%c0, %c0_0] : memref<2x30xf32, #tpu.memory_space<vmem>>, vector<2x30xf32>
    %c0_1 = arith.constant 0 : index
    %c0_2 = arith.constant 0 : index
    %1 = vector.load %arg1[%c0_1, %c0_2] : memref<2x30xf32, #tpu.memory_space<vmem>>, vector<2x30xf32>
    %cst = arith.constant 0.000000e+00 : f32
    %2 = vector.broadcast %cst : f32 to vector<2x30xf32>
    %3 = arith.maximumf %1, %2 : vector<2x30xf32>
    %4 = arith.mulf %1, %0 : vector<2x30xf32>
    %5 = arith.subf %3, %4 : vector<2x30xf32>
    %6 = math.absf %1 : vector<2x30xf32>
    %cst_3 = arith.constant 0.000000e+00 : f32
    %7 = vector.broadcast %cst_3 : f32 to vector<2x30xf32>
    %8 = arith.subf %7, %6 : vector<2x30xf32>
    %9 = math.exp %8 : vector<2x30xf32>
    %cst_4 = arith.constant 1.000000e+00 : f32
    %10 = vector.broadcast %cst_4 : f32 to vector<2x30xf32>
    %11 = arith.addf %10, %9 : vector<2x30xf32>
    %12 = math.log %11 : vector<2x30xf32>
    %13 = arith.addf %5, %12 : vector<2x30xf32>
    %14 = vector.shape_cast %13 : vector<2x30xf32> to vector<1x2x30xf32>
    %cst_5 = arith.constant dense<0.000000e+00> : vector<1xf32>
    %15 = vector.multi_reduction <add>, %14, %cst_5 [1, 2] : vector<1x2x30xf32> to vector<1xf32>
    %16 = vector.shape_cast %15 : vector<1xf32> to vector<1x1x1xf32>
    %17 = vector.extract %16[0, 0, 0] : f32 from vector<1x1x1xf32>
    %c0_6 = arith.constant 0 : index
    %18 = memref.load %arg20[%c0_6] : memref<11xf32, #tpu.memory_space<smem>>
    memref.store %17, %arg20[%c0_6] : memref<11xf32, #tpu.memory_space<smem>>
    %c0_7 = arith.constant 0 : index
    %c0_8 = arith.constant 0 : index
    %19 = vector.load %arg2[%c0_7, %c0_8] : memref<2x300xf32, #tpu.memory_space<vmem>>, vector<2x300xf32>
    %c0_9 = arith.constant 0 : index
    %c0_10 = arith.constant 0 : index
    %20 = vector.load %arg3[%c0_9, %c0_10] : memref<2x300xf32, #tpu.memory_space<vmem>>, vector<2x300xf32>
    %cst_11 = arith.constant 0.000000e+00 : f32
    %21 = vector.broadcast %cst_11 : f32 to vector<2x300xf32>
    %22 = arith.maximumf %20, %21 : vector<2x300xf32>
    %23 = arith.mulf %20, %19 : vector<2x300xf32>
    %24 = arith.subf %22, %23 : vector<2x300xf32>
    %25 = math.absf %20 : vector<2x300xf32>
    %cst_12 = arith.constant 0.000000e+00 : f32
    %26 = vector.broadcast %cst_12 : f32 to vector<2x300xf32>
    %27 = arith.subf %26, %25 : vector<2x300xf32>
    %28 = math.exp %27 : vector<2x300xf32>
    %cst_13 = arith.constant 1.000000e+00 : f32
    %29 = vector.broadcast %cst_13 : f32 to vector<2x300xf32>
    %30 = arith.addf %29, %28 : vector<2x300xf32>
    %31 = math.log %30 : vector<2x300xf32>
    %32 = arith.addf %24, %31 : vector<2x300xf32>
    %33 = vector.shape_cast %32 : vector<2x300xf32> to vector<1x2x300xf32>
    %cst_14 = arith.constant dense<0.000000e+00> : vector<1xf32>
    %34 = vector.multi_reduction <add>, %33, %cst_14 [1, 2] : vector<1x2x300xf32> to vector<1xf32>
    %35 = vector.shape_cast %34 : vector<1xf32> to vector<1x1x1xf32>
    %36 = vector.extract %35[0, 0, 0] : f32 from vector<1x1x1xf32>
    %c1 = arith.constant 1 : index
    %37 = memref.load %arg20[%c1] : memref<11xf32, #tpu.memory_space<smem>>
    memref.store %36, %arg20[%c1] : memref<11xf32, #tpu.memory_space<smem>>
    %c0_15 = arith.constant 0 : index
    %c0_16 = arith.constant 0 : index
    %38 = vector.load %arg4[%c0_15, %c0_16] : memref<2x300xf32, #tpu.memory_space<vmem>>, vector<2x300xf32>
    %c0_17 = arith.constant 0 : index
    %c0_18 = arith.constant 0 : index
    %39 = vector.load %arg5[%c0_17, %c0_18] : memref<2x300xf32, #tpu.memory_space<vmem>>, vector<2x300xf32>
    %cst_19 = arith.constant 0.000000e+00 : f32
    %40 = vector.broadcast %cst_19 : f32 to vector<2x300xf32>
    %41 = arith.maximumf %39, %40 : vector<2x300xf32>
    %42 = arith.mulf %39, %38 : vector<2x300xf32>
    %43 = arith.subf %41, %42 : vector<2x300xf32>
    %44 = math.absf %39 : vector<2x300xf32>
    %cst_20 = arith.constant 0.000000e+00 : f32
    %45 = vector.broadcast %cst_20 : f32 to vector<2x300xf32>
    %46 = arith.subf %45, %44 : vector<2x300xf32>
    %47 = math.exp %46 : vector<2x300xf32>
    %cst_21 = arith.constant 1.000000e+00 : f32
    %48 = vector.broadcast %cst_21 : f32 to vector<2x300xf32>
    %49 = arith.addf %48, %47 : vector<2x300xf32>
    %50 = math.log %49 : vector<2x300xf32>
    %51 = arith.addf %43, %50 : vector<2x300xf32>
    %52 = vector.shape_cast %51 : vector<2x300xf32> to vector<1x2x300xf32>
    %cst_22 = arith.constant dense<0.000000e+00> : vector<1xf32>
    %53 = vector.multi_reduction <add>, %52, %cst_22 [1, 2] : vector<1x2x300xf32> to vector<1xf32>
    %54 = vector.shape_cast %53 : vector<1xf32> to vector<1x1x1xf32>
    %55 = vector.extract %54[0, 0, 0] : f32 from vector<1x1x1xf32>
    %c2 = arith.constant 2 : index
    %56 = memref.load %arg20[%c2] : memref<11xf32, #tpu.memory_space<smem>>
    memref.store %55, %arg20[%c2] : memref<11xf32, #tpu.memory_space<smem>>
    %c0_23 = arith.constant 0 : index
    %c0_24 = arith.constant 0 : index
    %57 = vector.load %arg6[%c0_23, %c0_24] : memref<2x90xf32, #tpu.memory_space<vmem>>, vector<2x90xf32>
    %c0_25 = arith.constant 0 : index
    %c0_26 = arith.constant 0 : index
    %58 = vector.load %arg7[%c0_25, %c0_26] : memref<2x90xf32, #tpu.memory_space<vmem>>, vector<2x90xf32>
    %c0_27 = arith.constant 0 : index
    %c0_28 = arith.constant 0 : index
    %59 = vector.load %arg8[%c0_27, %c0_28] : memref<2x90xf32, #tpu.memory_space<vmem>>, vector<2x90xf32>
    %60 = arith.subf %58, %59 : vector<2x90xf32>
    %c0_29 = arith.constant 0 : index
    %c0_30 = arith.constant 0 : index
    %61 = vector.load %arg9[%c0_29, %c0_30] : memref<2x90xf32, #tpu.memory_space<vmem>>, vector<2x90xf32>
    %c0_31 = arith.constant 0 : index
    %c0_32 = arith.constant 0 : index
    %62 = vector.load %arg10[%c0_31, %c0_32] : memref<2x90xf32, #tpu.memory_space<vmem>>, vector<2x90xf32>
    %63 = arith.subf %61, %62 : vector<2x90xf32>
    %64 = arith.mulf %57, %60 : vector<2x90xf32>
    %65 = arith.mulf %64, %60 : vector<2x90xf32>
    %66 = vector.shape_cast %65 : vector<2x90xf32> to vector<1x2x90xf32>
    %cst_33 = arith.constant dense<0.000000e+00> : vector<1xf32>
    %67 = vector.multi_reduction <add>, %66, %cst_33 [1, 2] : vector<1x2x90xf32> to vector<1xf32>
    %68 = vector.shape_cast %67 : vector<1xf32> to vector<1x1x1xf32>
    %69 = vector.extract %68[0, 0, 0] : f32 from vector<1x1x1xf32>
    %c3 = arith.constant 3 : index
    %70 = memref.load %arg20[%c3] : memref<11xf32, #tpu.memory_space<smem>>
    memref.store %69, %arg20[%c3] : memref<11xf32, #tpu.memory_space<smem>>
    %71 = arith.mulf %57, %63 : vector<2x90xf32>
    %72 = arith.mulf %71, %63 : vector<2x90xf32>
    %73 = vector.shape_cast %72 : vector<2x90xf32> to vector<1x2x90xf32>
    %cst_34 = arith.constant dense<0.000000e+00> : vector<1xf32>
    %74 = vector.multi_reduction <add>, %73, %cst_34 [1, 2] : vector<1x2x90xf32> to vector<1xf32>
    %75 = vector.shape_cast %74 : vector<1xf32> to vector<1x1x1xf32>
    %76 = vector.extract %75[0, 0, 0] : f32 from vector<1x1x1xf32>
    %c4 = arith.constant 4 : index
    %77 = memref.load %arg20[%c4] : memref<11xf32, #tpu.memory_space<smem>>
    memref.store %76, %arg20[%c4] : memref<11xf32, #tpu.memory_space<smem>>
    %c0_35 = arith.constant 0 : index
    %c0_36 = arith.constant 0 : index
    %78 = vector.load %arg0[%c0_35, %c0_36] : memref<2x30xf32, #tpu.memory_space<vmem>>, vector<2x30xf32>
    %79 = vector.shape_cast %78 : vector<2x30xf32> to vector<1x2x30xf32>
    %cst_37 = arith.constant dense<0.000000e+00> : vector<1xf32>
    %80 = vector.multi_reduction <add>, %79, %cst_37 [1, 2] : vector<1x2x30xf32> to vector<1xf32>
    %81 = vector.shape_cast %80 : vector<1xf32> to vector<1x1x1xf32>
    %82 = vector.extract %81[0, 0, 0] : f32 from vector<1x1x1xf32>
    %c5 = arith.constant 5 : index
    %83 = memref.load %arg20[%c5] : memref<11xf32, #tpu.memory_space<smem>>
    memref.store %82, %arg20[%c5] : memref<11xf32, #tpu.memory_space<smem>>
    %c0_38 = arith.constant 0 : index
    %c0_39 = arith.constant 0 : index
    %84 = vector.load %arg11[%c0_38, %c0_39] : memref<2x32xf32, #tpu.memory_space<vmem>>, vector<2x32xf32>
    %c0_40 = arith.constant 0 : index
    %c0_41 = arith.constant 0 : index
    %85 = vector.load %arg12[%c0_40, %c0_41] : memref<2x32xf32, #tpu.memory_space<vmem>>, vector<2x32xf32>
    %cst_42 = arith.constant 1.000000e+00 : f32
    %86 = vector.broadcast %cst_42 : f32 to vector<2x32xf32>
    %87 = arith.addf %86, %85 : vector<2x32xf32>
    %88 = arith.mulf %84, %84 : vector<2x32xf32>
    %89 = arith.subf %87, %88 : vector<2x32xf32>
    %90 = math.exp %85 : vector<2x32xf32>
    %91 = arith.subf %89, %90 : vector<2x32xf32>
    %92 = vector.shape_cast %91 : vector<2x32xf32> to vector<1x2x32xf32>
    %cst_43 = arith.constant dense<0.000000e+00> : vector<1xf32>
    %93 = vector.multi_reduction <add>, %92, %cst_43 [1, 2] : vector<1x2x32xf32> to vector<1xf32>
    %94 = vector.shape_cast %93 : vector<1xf32> to vector<1x1x1xf32>
    %95 = vector.extract %94[0, 0, 0] : f32 from vector<1x1x1xf32>
    %c6 = arith.constant 6 : index
    %96 = memref.load %arg20[%c6] : memref<11xf32, #tpu.memory_space<smem>>
    memref.store %95, %arg20[%c6] : memref<11xf32, #tpu.memory_space<smem>>
    %c0_44 = arith.constant 0 : index
    %c0_45 = arith.constant 0 : index
    %97 = vector.load %arg19[%c0_44, %c0_45] : memref<1x750xf32, #tpu.memory_space<vmem>>, vector<1x750xf32>
    %c0_46 = arith.constant 0 : index
    %c0_47 = arith.constant 0 : index
    %98 = vector.load %arg14[%c0_46, %c0_47] : memref<12x750xf32, #tpu.memory_space<vmem>>, vector<12x750xf32>
    %c0_48 = arith.constant 0 : index
    %c0_49 = arith.constant 0 : index
    %99 = vector.load %arg15[%c0_48, %c0_49] : memref<12x750xf32, #tpu.memory_space<vmem>>, vector<12x750xf32>
    %100 = arith.subf %98, %99 : vector<12x750xf32>
    %c0_50 = arith.constant 0 : index
    %c0_51 = arith.constant 0 : index
    %101 = vector.load %arg13[%c0_50, %c0_51] : memref<12x750xf32, #tpu.memory_space<vmem>>, vector<12x750xf32>
    %102 = arith.mulf %101, %100 : vector<12x750xf32>
    %103 = arith.mulf %102, %100 : vector<12x750xf32>
    %104 = vector.broadcast %97 : vector<1x750xf32> to vector<12x750xf32>
    %105 = arith.mulf %103, %104 : vector<12x750xf32>
    %106 = vector.shape_cast %105 : vector<12x750xf32> to vector<1x12x750xf32>
    %cst_52 = arith.constant dense<0.000000e+00> : vector<1xf32>
    %107 = vector.multi_reduction <add>, %106, %cst_52 [1, 2] : vector<1x12x750xf32> to vector<1xf32>
    %108 = vector.shape_cast %107 : vector<1xf32> to vector<1x1x1xf32>
    %109 = vector.extract %108[0, 0, 0] : f32 from vector<1x1x1xf32>
    %c7 = arith.constant 7 : index
    %110 = memref.load %arg20[%c7] : memref<11xf32, #tpu.memory_space<smem>>
    memref.store %109, %arg20[%c7] : memref<11xf32, #tpu.memory_space<smem>>
    %111 = vector.shape_cast %103 : vector<12x750xf32> to vector<1x12x750xf32>
    %cst_53 = arith.constant dense<0.000000e+00> : vector<1xf32>
    %112 = vector.multi_reduction <add>, %111, %cst_53 [1, 2] : vector<1x12x750xf32> to vector<1xf32>
    %113 = vector.shape_cast %112 : vector<1xf32> to vector<1x1x1xf32>
    %114 = vector.extract %113[0, 0, 0] : f32 from vector<1x1x1xf32>
    %115 = arith.subf %114, %109 : f32
    %c8 = arith.constant 8 : index
    %116 = memref.load %arg20[%c8] : memref<11xf32, #tpu.memory_space<smem>>
    memref.store %115, %arg20[%c8] : memref<11xf32, #tpu.memory_space<smem>>
    %c0_54 = arith.constant 0 : index
    %c0_55 = arith.constant 0 : index
    %117 = vector.load %arg17[%c0_54, %c0_55] : memref<12x750xf32, #tpu.memory_space<vmem>>, vector<12x750xf32>
    %c0_56 = arith.constant 0 : index
    %c0_57 = arith.constant 0 : index
    %118 = vector.load %arg18[%c0_56, %c0_57] : memref<12x750xf32, #tpu.memory_space<vmem>>, vector<12x750xf32>
    %119 = arith.subf %117, %118 : vector<12x750xf32>
    %c0_58 = arith.constant 0 : index
    %c0_59 = arith.constant 0 : index
    %120 = vector.load %arg16[%c0_58, %c0_59] : memref<12x750xf32, #tpu.memory_space<vmem>>, vector<12x750xf32>
    %121 = arith.mulf %120, %119 : vector<12x750xf32>
    %122 = arith.mulf %121, %119 : vector<12x750xf32>
    %123 = vector.broadcast %97 : vector<1x750xf32> to vector<12x750xf32>
    %124 = arith.mulf %122, %123 : vector<12x750xf32>
    %125 = vector.shape_cast %124 : vector<12x750xf32> to vector<1x12x750xf32>
    %cst_60 = arith.constant dense<0.000000e+00> : vector<1xf32>
    %126 = vector.multi_reduction <add>, %125, %cst_60 [1, 2] : vector<1x12x750xf32> to vector<1xf32>
    %127 = vector.shape_cast %126 : vector<1xf32> to vector<1x1x1xf32>
    %128 = vector.extract %127[0, 0, 0] : f32 from vector<1x1x1xf32>
    %c9 = arith.constant 9 : index
    %129 = memref.load %arg20[%c9] : memref<11xf32, #tpu.memory_space<smem>>
    memref.store %128, %arg20[%c9] : memref<11xf32, #tpu.memory_space<smem>>
    %130 = vector.shape_cast %122 : vector<12x750xf32> to vector<1x12x750xf32>
    %cst_61 = arith.constant dense<0.000000e+00> : vector<1xf32>
    %131 = vector.multi_reduction <add>, %130, %cst_61 [1, 2] : vector<1x12x750xf32> to vector<1xf32>
    %132 = vector.shape_cast %131 : vector<1xf32> to vector<1x1x1xf32>
    %133 = vector.extract %132[0, 0, 0] : f32 from vector<1x1x1xf32>
    %134 = arith.subf %133, %128 : f32
    %c10 = arith.constant 10 : index
    %135 = memref.load %arg20[%c10] : memref<11xf32, #tpu.memory_space<smem>>
    memref.store %134, %arg20[%c10] : memref<11xf32, #tpu.memory_space<smem>>
    return
  }
}

</mosaic_0001>

<bundles_post_ra>
// kernel: squeeze.40
= control target key start
LH: loop header
LB: loop body
LE: loop exit
PB: predicated region body
PF: predicated region fallthrough
CT: control target
= control target key end

     0   :  { %vm5_vm0 = vcmask 1041409   ;;  %vm21_vm1 = vcmask 7168   ;;  %s857_s26 = smov 127   ;;  %s858_s27 = smov 122   ;;  %vm43_vm2 = vcmask 23552   ;;  %vm7_vm3 = vcmask 39936   ;;  %s1369_s0 = inlined_call_operand.vmem [shape: f32[2,3,2,10,5], index: 0, kind: input, shape index: {}]   ;;  %s1370_s1 = inlined_call_operand.vmem [shape: f32[2,300], index: 1, kind: output, shape index: {}]  }
   0x1   :  { %v674_v0 = vld [vmem:[%s1369_s0 + $0x51] sm:$0x1]   ;;  %v682_v6 = vld [vmem:[%s1369_s0 + $0x50] sm:$0x1]   ;;  %v678_v8 = vld [vmem:[%s1369_s0 + $0x25] sm:$0x1]  }
   0x2   :  { %v675_v1 = vld [vmem:[%s1369_s0 + $0xb0] sm:$0x2]   ;;  %v683_v7 = vld [vmem:[%s1369_s0 + $0xaf] sm:$0x2]   ;;  %v679_v11 = vld [vmem:[%s1369_s0 + $0x84] sm:$0x2]  }
   0x3   :  { %v14_v2 = vsel %vm5_vm0, %v675_v1, %v674_v0  ;;  %v676_v3 = vld [vmem:[%s1369_s0 + $0x51] sm:$0x1]   ;;  %v57_v10 = vsel %vm5_vm0, %v683_v7, %v682_v6  ;;  %v680_v12 = vld [vmem:[%s1369_s0 + $0x25] sm:$0x1]   ;;  %v36_v14 = vsel %vm5_vm0, %v679_v11, %v678_v8  ;;  %v684_v16 = vld [vmem:[%s1369_s0 + $0x24] sm:$0x1]  }
   0x4   :  { %v677_v4 = vld [vmem:[%s1369_s0 + $0xb0] sm:$0x2]   ;;  %v681_v13 = vld [vmem:[%s1369_s0 + $0x84] sm:$0x2]   ;;  %58 = vrot.lane.b32.xlu1 %v57_v10, %s858_s27  ;;  %v685_v17 = vld [vmem:[%s1369_s0 + $0x83] sm:$0x2]  }
   0x5   :  { %v20_v5 = vsel %vm5_vm0, %v677_v4, %v676_v3  ;;  %v42_v15 = vsel %vm5_vm0, %v681_v13, %v680_v12  ;;  %v68_v19 = vsel %vm5_vm0, %v685_v17, %v684_v16  ;;  %v686_v20 = vld [vmem:[%s1369_s0 + $0x49] sm:$0x1]   ;;  %v688_v22 = vld [vmem:[%s1369_s0 + $0x23] sm:$0x1]   ;;  %s859_s11 = smov 125   ;;  %s860_s12 = smov 120  }
   0x6   :  { %v22_v9 = vsel %vm21_vm1, %v20_v5, %v14_v2  ;;  %v44_v18 = vsel %vm43_vm2, %v42_v15, %v36_v14  ;;  %v687_v21 = vld [vmem:[%s1369_s0 + $0xa8] sm:$0x2]   ;;  %v689_v23 = vld [vmem:[%s1369_s0 + $0x82] sm:$0x2]   ;;  %v690_v26 = vld [vmem:[%s1369_s0 + $0x48] sm:$0x1]  }
   0x7   :  { %23 = vrot.lane.b32.xlu0 %v22_v9, %s857_s26  ;;  %v78_v24 = vsel %vm5_vm0, %v687_v21, %v686_v20  ;;  %v89_v25 = vsel %vm5_vm0, %v689_v23, %v688_v22  ;;  %v691_v27 = vld [vmem:[%s1369_s0 + $0xa7] sm:$0x2]   ;;  %v692_v28 = vld [vmem:[%s1369_s0 + $0x22] sm:$0x1]   ;;  %s861_s21 = smov 117   ;;  %s862_s22 = smov 115  }
   0x8   :  { %69 = vrot.lane.b32.xlu1 %v68_v19, %s860_s12  ;;  %v693_v29 = vld [vmem:[%s1369_s0 + $0x81] sm:$0x2]   ;;  %v99_v30 = vsel %vm5_vm0, %v691_v27, %v690_v26  ;;  %v694_v32 = vld [vmem:[%s1369_s0 + $0x47] sm:$0x1]   ;;  %v696_v34 = vld [vmem:[%s1369_s0 + $0x21] sm:$0x1]  }
   0x9   :  { %v110_v31 = vsel %vm5_vm0, %v693_v29, %v692_v28  ;;  %v695_v33 = vld [vmem:[%s1369_s0 + $0xa6] sm:$0x2]   ;;  %v697_v35 = vld [vmem:[%s1369_s0 + $0x80] sm:$0x2]   ;;  %s863_s2 = smov 112   ;;  %s864_s3 = smov 110  }
   0xa   :  { %v120_v36 = vsel %vm5_vm0, %v695_v33, %v694_v32  ;;  %v131_v37 = vsel %vm5_vm0, %v697_v35, %v696_v34  ;;  %v698_v38 = vld [vmem:[%s1369_s0 + $0x46] sm:$0x1]   ;;  %v700_v40 = vld [vmem:[%s1369_s0 + $0x20] sm:$0x1]   ;;  %s865_s12 = smov 107   ;;  %s866_s13 = smov 105  }
   0xb   :  { %45 = vrot.lane.b32.xlu0 %v44_v18, %s859_s11  ;;  %v699_v39 = vld [vmem:[%s1369_s0 + $0xa5] sm:$0x2]   ;;  %v701_v41 = vld [vmem:[%s1369_s0 + $0x7f] sm:$0x2]   ;;  %v702_v44 = vld [vmem:[%s1369_s0 + $0x45] sm:$0x1]  }
   0xc   :  { %90 = vrot.lane.b32.xlu1 %v89_v25, %s862_s22  ;;  %v141_v42 = vsel %vm5_vm0, %v699_v39, %v698_v38  ;;  %v152_v43 = vsel %vm5_vm0, %v701_v41, %v700_v40  ;;  %v703_v45 = vld [vmem:[%s1369_s0 + $0xa4] sm:$0x2]   ;;  %v704_v46 = vld [vmem:[%s1369_s0 + $0x19] sm:$0x1]   ;;  %s867_s22 = smov 102   ;;  %s868_s23 = smov 100  }
   0xd   :  { %v705_v47 = vld [vmem:[%s1369_s0 + $0x78] sm:$0x2]   ;;  %v162_v48 = vsel %vm5_vm0, %v703_v45, %v702_v44  ;;  %v706_v50 = vld [vmem:[%s1369_s0 + $0x44] sm:$0x1]   ;;  %v708_v52 = vld [vmem:[%s1369_s0 + $0x18] sm:$0x1]  }
   0xe   :  { %v173_v49 = vsel %vm5_vm0, %v705_v47, %v704_v46  ;;  %v707_v51 = vld [vmem:[%s1369_s0 + $0xa3] sm:$0x2]   ;;  %v709_v53 = vld [vmem:[%s1369_s0 + $0x77] sm:$0x2]   ;;  %s870_s4 = smov 95   ;;  %s872_s14 = smov 90  }
   0xf   :  { %79 = vrot.lane.b32.xlu0 %v78_v24, %s861_s21  ;;  %v183_v54 = vsel %vm5_vm0, %v707_v51, %v706_v50  ;;  %v194_v55 = vsel %vm5_vm0, %v709_v53, %v708_v52  ;;  %v710_v56 = vld [vmem:[%s1369_s0 + $0x43] sm:$0x1]   ;;  %v712_v58 = vld [vmem:[%s1369_s0 + $0x17] sm:$0x1]   ;;  %v714_v62 = vld [vmem:[%s1369_s0 + $0x42] sm:$0x1]  }
  0x10   :  { %111 = vrot.lane.b32.xlu1 %v110_v31, %s864_s3  ;;  %s869_s3 = smov 97   ;;  %v711_v57 = vld [vmem:[%s1369_s0 + $0xa2] sm:$0x2]   ;;  %v713_v59 = vld [vmem:[%s1369_s0 + $0x76] sm:$0x2]   ;;  %s874_s24 = smov 85  }
  0x11   :  { %v204_v60 = vsel %vm5_vm0, %v711_v57, %v710_v56  ;;  %v215_v61 = vsel %vm5_vm0, %v713_v59, %v712_v58  ;;  %v715_v63 = vld [vmem:[%s1369_s0 + $0xa1] sm:$0x2]   ;;  %v716_v0 = vld [vmem:[%s1369_s0 + $0x16] sm:$0x1]   ;;  %v718_v4 = vld [vmem:[%s1369_s0 + $0x41] sm:$0x1]  }
  0x12   :  { %v717_v1 = vld [vmem:[%s1369_s0 + $0x75] sm:$0x2]   ;;  %v225_v2 = vsel %vm5_vm0, %v715_v63, %v714_v62  ;;  %v719_v5 = vld [vmem:[%s1369_s0 + $0xa0] sm:$0x2]   ;;  %v720_v6 = vld [vmem:[%s1369_s0 + $0x15] sm:$0x1]  }
  0x13   :  { %100 = vrot.lane.b32.xlu0 %v99_v30, %s863_s2  ;;  %v236_v3 = vsel %vm5_vm0, %v717_v1, %v716_v0  ;;  %v721_v7 = vld [vmem:[%s1369_s0 + $0x74] sm:$0x2]   ;;  %s876_s5 = smov 80   ;;  %v246_v8 = vsel %vm5_vm0, %v719_v5, %v718_v4  ;;  %v722_v10 = vld [vmem:[%s1369_s0 + $0x40] sm:$0x1]   ;;  %s878_s15 = smov 75  }
  0x14   :  { %132 = vrot.lane.b32.xlu1 %v131_v37, %s866_s13  ;;  %s871_s13 = smov 92   ;;  %v257_v9 = vsel %vm5_vm0, %v721_v7, %v720_v6  ;;  %v723_v11 = vld [vmem:[%s1369_s0 + $0x9f] sm:$0x2]   ;;  %v724_v12 = vld [vmem:[%s1369_s0 + $0x14] sm:$0x1]   ;;  %s880_s25 = smov 70  }
  0x15   :  { %v725_v13 = vld [vmem:[%s1369_s0 + $0x73] sm:$0x2]   ;;  %v267_v14 = vsel %vm5_vm0, %v723_v11, %v722_v10  ;;  %v726_v16 = vld [vmem:[%s1369_s0 + $0x39] sm:$0x1]   ;;  %v728_v18 = vld [vmem:[%s1369_s0 + $0x13] sm:$0x1]  }
  0x16   :  { %v278_v15 = vsel %vm5_vm0, %v725_v13, %v724_v12  ;;  %v727_v17 = vld [vmem:[%s1369_s0 + $0x98] sm:$0x2]   ;;  %v729_v19 = vld [vmem:[%s1369_s0 + $0x72] sm:$0x2]   ;;  %v730_v22 = vld [vmem:[%s1369_s0 + $0x38] sm:$0x1]  }
  0x17   :  { %121 = vrot.lane.b32.xlu0 %v120_v36, %s865_s12  ;;  %v288_v20 = vsel %vm5_vm0, %v727_v17, %v726_v16  ;;  %v299_v21 = vsel %vm5_vm0, %v729_v19, %v728_v18  ;;  %v731_v23 = vld [vmem:[%s1369_s0 + $0x97] sm:$0x2]   ;;  %v732_v24 = vld [vmem:[%s1369_s0 + $0x12] sm:$0x1]   ;;  %s882_s6 = smov 65   ;;  %s883_s19 = smov 62  }
  0x18   :  { %153 = vrot.lane.b32.xlu1 %v152_v43, %s868_s23  ;;  %s873_s23 = smov 87   ;;  %v733_v25 = vld [vmem:[%s1369_s0 + $0x71] sm:$0x2]   ;;  %v2_v26 = vld [vmem:[%s1369_s0] sm:$0x1]   ;;  %v309_v28 = vsel %vm5_vm0, %v731_v23, %v730_v22  ;;  %s884_s20 = smov 60  }
  0x19   :  { %v673_v27 = vld [vmem:[%s1369_s0 + $0x5f] sm:$0x2]   ;;  %v320_v29 = vsel %vm5_vm0, %v733_v25, %v732_v24  ;;  %v734_v30 = vld [vmem:[%s1369_s0 + $0x37] sm:$0x1]   ;;  %v736_v33 = vld [vmem:[%s1369_s0 + $0x11] sm:$0x1]  }
  0x1a   :  { %v6_v31 = vsel %vm5_vm0, %v673_v27, %v2_v26  ;;  %v735_v32 = vld [vmem:[%s1369_s0 + $0x96] sm:$0x2]   ;;  %v737_v34 = vld [vmem:[%s1369_s0 + $0x70] sm:$0x2]   ;;  %v738_v37 = vld [vmem:[%s1369_s0 + $0x36] sm:$0x1]  }
  0x1b   :  { %142 = vrot.lane.b32.xlu0 %v141_v42, %s867_s22  ;;  %8 = vst.msk [vmem:[#allocation0] sm:$0x3] %vm7_vm3, %v6_v31   ;;  %v330_v35 = vsel %vm5_vm0, %v735_v32, %v734_v30  ;;  %v341_v36 = vsel %vm5_vm0, %v737_v34, %v736_v33  ;;  %v739_v38 = vld [vmem:[%s1369_s0 + $0x95] sm:$0x2]   ;;  %v740_v39 = vld [vmem:[%s1369_s0 + $0x10] sm:$0x1]  }
  0x1c   :  { %174 = vrot.lane.b32.xlu1 %v173_v49, %s870_s4  ;;  %s875_s4 = smov 82   ;;  %v741_v40 = vld [vmem:[%s1369_s0 + $0x6f] sm:$0x2]   ;;  %s885_s29 = smov 57   ;;  %v351_v41 = vsel %vm5_vm0, %v739_v38, %v738_v37  ;;  %v742_v43 = vld [vmem:[%s1369_s0 + $0x35] sm:$0x1]  }
  0x1d   :  { %s886_s30 = smov 55   ;;  %v362_v42 = vsel %vm5_vm0, %v741_v40, %v740_v39  ;;  %v743_v44 = vld [vmem:[%s1369_s0 + $0x94] sm:$0x2]   ;;  %v744_v45 = vld [vmem:[%s1369_s0 + $0x9] sm:$0x1]   ;;  %s887_s10 = smov 52  }
  0x1e   :  { %v745_v46 = vld [vmem:[%s1369_s0 + $0x68] sm:$0x2]   ;;  %s888_s11 = smov 50   ;;  %v372_v47 = vsel %vm5_vm0, %v743_v44, %v742_v43  ;;  %v746_v49 = vld [vmem:[%s1369_s0 + $0x34] sm:$0x1]   ;;  %s890_s21 = smov 45  }
  0x1f   :  { %163 = vrot.lane.b32.xlu0 %v162_v48, %s869_s3  ;;  %v383_v48 = vsel %vm5_vm0, %v745_v46, %v744_v45  ;;  %v747_v50 = vld [vmem:[%s1369_s0 + $0x93] sm:$0x2]   ;;  %v748_v51 = vld [vmem:[%s1369_s0 + $0x8] sm:$0x1]   ;;  %v751_v56 = vld [vmem:[%s1369_s0 + $0xb8] sm:$0x2]  }
  0x20   :  { %195 = vrot.lane.b32.xlu1 %v194_v55, %s872_s14  ;;  %s877_s14 = smov 77   ;;  %v749_v52 = vld [vmem:[%s1369_s0 + $0x67] sm:$0x2]   ;;  %v393_v53 = vsel %vm5_vm0, %v747_v50, %v746_v49  ;;  %v750_v55 = vld [vmem:[%s1369_s0 + $0x59] sm:$0x1]   ;;  %s892_s2 = smov 40  }
  0x21   :  { %v752_v57 = vld [vmem:[%s1369_s0 + $0x33] sm:$0x1]   ;;  %v414_v59 = vsel %vm5_vm0, %v751_v56, %v750_v55  ;;  %v755_v62 = vld [vmem:[%s1369_s0 + $0x66] sm:$0x2]   ;;  %v756_v63 = vld [vmem:[%s1369_s0 + $0x58] sm:$0x1]  }
  0x22   :  { %v753_v58 = vld [vmem:[%s1369_s0 + $0x92] sm:$0x2]   ;;  %v757_v0 = vld [vmem:[%s1369_s0 + $0xb7] sm:$0x2]   ;;  %s894_s12 = smov 37   ;;  %s896_s22 = smov 34  }
  0x23   :  { %184 = vrot.lane.b32.xlu0 %v183_v54, %s871_s13  ;;  %v404_v54 = vsel %vm5_vm0, %v749_v52, %v748_v51  ;;  %v759_v4 = vld [vmem:[%s1369_s0 + $0x91] sm:$0x2]   ;;  %v760_v5 = vld [vmem:[%s1369_s0 + $0x6] sm:$0x1]   ;;  %v763_v10 = vld [vmem:[%s1369_s0 + $0xb6] sm:$0x2]  }
  0x24   :  { %216 = vrot.lane.b32.xlu1 %v215_v61, %s874_s24  ;;  %s879_s24 = smov 72   ;;  %v754_v61 = vld [vmem:[%s1369_s0 + $0x7] sm:$0x1]   ;;  %v761_v6 = vld [vmem:[%s1369_s0 + $0x65] sm:$0x2]   ;;  %s898_s3 = smov 30  }
  0x25   :  { %v436_v1 = vsel %vm5_vm0, %v755_v62, %v754_v61  ;;  %v764_v11 = vld [vmem:[%s1369_s0 + $0x31] sm:$0x1]   ;;  %v767_v16 = vld [vmem:[%s1369_s0 + $0x64] sm:$0x2]   ;;  %v768_v17 = vld [vmem:[%s1369_s0 + $0x56] sm:$0x1]  }
  0x26   :  { %v765_v12 = vld [vmem:[%s1369_s0 + $0x90] sm:$0x2]   ;;  %v769_v18 = vld [vmem:[%s1369_s0 + $0xb5] sm:$0x2]   ;;  %s900_s13 = smov 27   ;;  %vm25_vm4 = vcmask 31744  }
  0x27   :  { %205 = vrot.lane.b32.xlu0 %v204_v60, %s873_s23  ;;  %v425_v60 = vsel %vm5_vm0, %v753_v58, %v752_v57  ;;  %v771_v22 = vld [vmem:[%s1369_s0 + $0x8f] sm:$0x2]   ;;  %v772_v23 = vld [vmem:[%s1369_s0 + $0x4] sm:$0x1]   ;;  %s902_s23 = smov 24   ;;  %vm28_vm5 = vcmask 1048568  }
  0x28   :  { %237 = vrot.lane.b32.xlu1 %v236_v3, %s876_s5  ;;  %s881_s5 = smov 67   ;;  %v758_v3 = vld [vmem:[%s1369_s0 + $0x32] sm:$0x1]   ;;  %v773_v24 = vld [vmem:[%s1369_s0 + $0x63] sm:$0x2]   ;;  %vm47_vm6 = vcmask 15360  }
  0x29   :  { %v457_v7 = vsel %vm5_vm0, %v759_v4, %v758_v3  ;;  %v532_v26 = vsel %vm5_vm0, %v773_v24, %v772_v23  ;;  %v774_v27 = vld [vmem:[%s1369_s0 + $0x55] sm:$0x1]   ;;  %v777_v30 = vld [vmem:[%s1369_s0 + $0x88] sm:$0x2]   ;;  %v778_v33 = vld [vmem:[%s1369_s0 + $0x3] sm:$0x1]  }
  0x2a   :  { %v779_v34 = vld [vmem:[%s1369_s0 + $0x62] sm:$0x2]   ;;  %v782_v39 = vld [vmem:[%s1369_s0 + $0x28] sm:$0x1]   ;;  %v786_v45 = vld [vmem:[%s1369_s0 + $0x53] sm:$0x1]  }
  0x2b   :  { %226 = vrot.lane.b32.xlu0 %v225_v2, %s875_s4  ;;  %v446_v2 = vsel %vm5_vm0, %v757_v0, %v756_v63  ;;  %s904_s4 = smov 20   ;;  %v564_v37 = vsel %vm5_vm0, %v779_v34, %v778_v33  ;;  %v783_v40 = vld [vmem:[%s1369_s0 + $0x87] sm:$0x2]   ;;  %v787_v46 = vld [vmem:[%s1369_s0 + $0xb2] sm:$0x2]   ;;  %vm50_vm7 = vcmask 1048552  }
  0x2c   :  { %258 = vrot.lane.b32.xlu1 %v257_v9, %s878_s15  ;;  %v762_v9 = vld [vmem:[%s1369_s0 + $0x57] sm:$0x1]   ;;  %v585_v43 = vsel %vm5_vm0, %v783_v40, %v782_v39  ;;  %v606_v49 = vsel %vm5_vm0, %v787_v46, %v786_v45  ;;  %v790_v51 = vld [vmem:[%s1369_s0 + $0x1] sm:$0x1]   ;;  %s912_s15 = smov 7   ;;  %vm60_vm8 = vcmask 1040336  }
  0x2d   :  { %v478_v13 = vsel %vm5_vm0, %v763_v10, %v762_v9  ;;  %v791_v52 = vld [vmem:[%s1369_s0 + $0x60] sm:$0x2]   ;;  %v794_v57 = vld [vmem:[%s1369_s0 + $0x26] sm:$0x1]   ;;  %vm71_vm9 = vcmask 1023936   ;;  %vm81_vm10 = vcmask 999336  }
  0x2e   :  { %v628_v55 = vsel %vm5_vm0, %v791_v52, %v790_v51  ;;  %v795_v58 = vld [vmem:[%s1369_s0 + $0x85] sm:$0x2]   ;;  %vm92_vm11 = vcmask 982936   ;;  %vm102_vm12 = vcmask 958336   ;;  %vm113_vm13 = vcmask 941936  }
  0x2f   :  { %247 = vrot.lane.b32.xlu0 %v246_v8, %s877_s14  ;;  %v468_v8 = vsel %vm5_vm0, %v761_v6, %v760_v5  ;;  %s906_s14 = smov 17   ;;  %vm123_vm14 = vcmask 917336   ;;  %vm134_vm15 = vcmask 900936   ;;  %vm155_vm1 = vcmask 859936  }
  0x30   :  { %279 = vrot.lane.b32.xlu1 %v278_v15, %s880_s25  ;;  %v766_v15 = vld [vmem:[%s1369_s0 + $0x5] sm:$0x1]   ;;  %vm165_vm2 = vcmask 835336   ;;  %vm176_vm3 = vcmask 818936  }
  0x31   :  { %v500_v19 = vsel %vm5_vm0, %v767_v16, %v766_v15 }
  0x33   :  { %268 = vrot.lane.b32.xlu0 %v267_v14, %s879_s24  ;;  %v489_v14 = vsel %vm5_vm0, %v765_v12, %v764_v11  ;;  %s908_s24 = smov 14  }
  0x34   :  { %300 = vrot.lane.b32.xlu1 %v299_v21, %s882_s6  ;;  %v770_v21 = vld [vmem:[%s1369_s0 + $0x30] sm:$0x1]  }
  0x35   :  { %v521_v25 = vsel %vm5_vm0, %v771_v22, %v770_v21 }
  0x37   :  { %289 = vrot.lane.b32.xlu0 %v288_v20, %s881_s5  ;;  %v510_v20 = vsel %vm5_vm0, %v769_v18, %v768_v17  ;;  %s910_s5 = smov 10  }
  0x38   :  { %321 = vrot.lane.b32.xlu1 %v320_v29, %s884_s20  ;;  %s889_s20 = smov 47   ;;  %v776_v29 = vld [vmem:[%s1369_s0 + $0x29] sm:$0x1]  }
  0x39   :  { %v553_v32 = vsel %vm5_vm0, %v777_v30, %v776_v29 }
  0x3b   :  { %310 = vrot.lane.b32.xlu0 %v309_v28, %s883_s19  ;;  %v775_v28 = vld [vmem:[%s1369_s0 + $0xb4] sm:$0x2]  }
  0x3c   :  { %342 = vrot.lane.b32.xlu1 %v341_v36, %s886_s30  ;;  %s891_s30 = smov 42   ;;  %v542_v31 = vsel %vm5_vm0, %v775_v28, %v774_v27  ;;  %v781_v36 = vld [vmem:[%s1369_s0 + $0xb3] sm:$0x2]  }
  0x3f   :  { %331 = vrot.lane.b32.xlu0 %v330_v35, %s885_s29  ;;  %v780_v35 = vld [vmem:[%s1369_s0 + $0x54] sm:$0x1]  }
  0x40   :  { %363 = vrot.lane.b32.xlu1 %v362_v42, %s888_s11  ;;  %s893_s11 = smov 39   ;;  %v574_v38 = vsel %vm5_vm0, %v781_v36, %v780_v35  ;;  %v785_v42 = vld [vmem:[%s1369_s0 + $0x61] sm:$0x2]  }
  0x43   :  { %352 = vrot.lane.b32.xlu0 %v351_v41, %s887_s10  ;;  %v784_v41 = vld [vmem:[%s1369_s0 + $0x2] sm:$0x1]  }
  0x44   :  { %384 = vrot.lane.b32.xlu1 %v383_v48, %s890_s21  ;;  %s895_s21 = smov 35   ;;  %v596_v44 = vsel %vm5_vm0, %v785_v42, %v784_v41  ;;  %v789_v48 = vld [vmem:[%s1369_s0 + $0x86] sm:$0x2]  }
  0x47   :  { %373 = vrot.lane.b32.xlu0 %v372_v47, %s889_s20  ;;  %v788_v47 = vld [vmem:[%s1369_s0 + $0x27] sm:$0x1]   ;;  %s914_s20 = smov 4  }
  0x48   :  { %405 = vrot.lane.b32.xlu1 %v404_v54, %s892_s2  ;;  %s897_s2 = smov 32   ;;  %v617_v50 = vsel %vm5_vm0, %v789_v48, %v788_v47  ;;  %v793_v54 = vld [vmem:[%s1369_s0 + $0xb1] sm:$0x2]  }
  0x4b   :  { %394 = vrot.lane.b32.xlu0 %v393_v53, %s891_s30  ;;  %v792_v53 = vld [vmem:[%s1369_s0 + $0x52] sm:$0x1]   ;;  %s913_s0 = smov 5  }
  0x4c   :  { %426 = vrot.lane.b32.xlu1 %v425_v60, %s894_s12  ;;  %s899_s12 = smov 29   ;;  %v638_v56 = vsel %vm5_vm0, %v793_v54, %v792_v53 }
  0x4f   :  { %415 = vrot.lane.b32.xlu0 %v414_v59, %s893_s11  ;;  %v649_v59 = vsel %vm5_vm0, %v795_v58, %v794_v57  ;;  %vm144_vm0 = vcmask 876336  }
  0x50   :  { %447 = vrot.lane.b32.xlu1 %v446_v2, %s896_s22  ;;  %s901_s22 = smov 25  }
  0x53   :  { %437 = vrot.lane.b32.xlu0 %v436_v1, %s895_s21  ;;  %s915_s21 = smov 2  }
  0x54   :  { %469 = vrot.lane.b32.xlu1 %v468_v8, %s898_s3  ;;  %s903_s3 = smov 22  }
  0x57   :  { %458 = vrot.lane.b32.xlu0 %v457_v7, %s897_s2 }
  0x58   :  { %490 = vrot.lane.b32.xlu1 %v489_v14, %s900_s13  ;;  %s905_s13 = smov 19  }
  0x5b   :  { %479 = vrot.lane.b32.xlu0 %v478_v13, %s899_s12 }
  0x5c   :  { %511 = vrot.lane.b32.xlu1 %v510_v20, %s902_s23  ;;  %s907_s23 = smov 15  }
  0x5f   :  { %501 = vrot.lane.b32.xlu0 %v500_v19, %s901_s22 }
  0x60   :  { %533 = vrot.lane.b32.xlu1 %v532_v26, %s904_s4  ;;  %s909_s4 = smov 12  }
  0x63   :  { %522 = vrot.lane.b32.xlu0 %v521_v25, %s903_s3 }
  0x64   :  { %554 = vrot.lane.b32.xlu1 %v553_v32, %s906_s14  ;;  %s911_s14 = smov 9  }
  0x67   :  { %543 = vrot.lane.b32.xlu0 %v542_v31, %s905_s13 }
  0x68   :  { %575 = vrot.lane.b32.xlu1 %v574_v38, %s908_s24 }
  0x6b   :  { %565 = vrot.lane.b32.xlu0 %v564_v37, %s907_s23 }
  0x6c   :  { %597 = vrot.lane.b32.xlu1 %v596_v44, %s910_s5 }
  0x6f   :  { %586 = vrot.lane.b32.xlu0 %v585_v43, %s909_s4 }
  0x70   :  { %618 = vrot.lane.b32.xlu1 %v617_v50, %s912_s15 }
  0x73   :  { %607 = vrot.lane.b32.xlu0 %v606_v49, %s911_s14 }
  0x74   :  { %639 = vrot.lane.b32.xlu1 %v638_v56, %s914_s20 }
  0x76   :  { %v59_v61 = vpop.permute.xlu1 %58  }
  0x77   :  { %629 = vrot.lane.b32.xlu0 %v628_v55, %s913_s0 }
  0x79   :  { %v24_v60 = vpop.permute.xlu0 %23  }
  0x7a   :  { %27 = vst.msk [vmem:[#allocation0 + $0x10] sm:$0x3] %vm25_vm4, %v24_v60   ;;  %v70_v63 = vpop.permute.xlu1 %69   ;;  %vm186_vm4 = vcmask 794336  }
  0x7b   :  { %30 = vst.msk [vmem:[#allocation0 + $0x8] sm:$0x3] %vm28_vm5, %v24_v60   ;;  %650 = vrot.lane.b32.xlu0 %v649_v59, %s915_s21  ;;  %vm197_vm5 = vcmask 777936  }
  0x7d   :  { %v46_v62 = vpop.permute.xlu0 %45  }
  0x7e   :  { %49 = vst.msk [vmem:[#allocation0 + $0x8] sm:$0x3] %vm47_vm6, %v46_v62   ;;  %v91_v1 = vpop.permute.xlu1 %90   ;;  %vm207_vm6 = vcmask 753336  }
  0x7f   :  { %51 = vst.msk [vmem:[#allocation0] sm:$0x3] %vm50_vm7, %v46_v62   ;;  %vm218_vm7 = vcmask 736936  }
  0x80   :  { %62 = vst.msk [vmem:[#allocation0 + $0x8] sm:$0x3] %vm60_vm8, %v59_v61   ;;  %vm228_vm8 = vcmask 712336  }
  0x81   :  { %72 = vst.msk [vmem:[#allocation0] sm:$0x3] %vm71_vm9, %v70_v63   ;;  %v80_v0 = vpop.permute.xlu0 %79   ;;  %vm239_vm9 = vcmask 695936  }
  0x82   :  { %83 = vst.msk [vmem:[#allocation0 + $0x8] sm:$0x3] %vm81_vm10, %v80_v0   ;;  %v112_v3 = vpop.permute.xlu1 %111   ;;  %vm249_vm10 = vcmask 671336  }
  0x83   :  { %93 = vst.msk [vmem:[#allocation0] sm:$0x3] %vm92_vm11, %v91_v1   ;;  %vm260_vm11 = vcmask 654936  }
  0x84   :  { %114 = vst.msk [vmem:[#allocation0] sm:$0x3] %vm113_vm13, %v112_v3   ;;  %vm281_vm13 = vcmask 613936  }
  0x85   :  { %v101_v2 = vpop.permute.xlu0 %100  }
  0x86   :  { %104 = vst.msk [vmem:[#allocation0 + $0x8] sm:$0x3] %vm102_vm12, %v101_v2   ;;  %v133_v5 = vpop.permute.xlu1 %132   ;;  %vm270_vm12 = vcmask 630336  }
  0x87   :  { %135 = vst.msk [vmem:[#allocation0] sm:$0x3] %vm134_vm15, %v133_v5   ;;  %vm302_vm15 = vcmask 572936  }
  0x89   :  { %v122_v4 = vpop.permute.xlu0 %121  }
  0x8a   :  { %125 = vst.msk [vmem:[#allocation0 + $0x8] sm:$0x3] %vm123_vm14, %v122_v4   ;;  %v154_v7 = vpop.permute.xlu1 %153   ;;  %vm291_vm14 = vcmask 589336  }
  0x8b   :  { %156 = vst.msk [vmem:[#allocation0] sm:$0x3] %vm155_vm1, %v154_v7   ;;  %vm323_vm1 = vcmask 531936  }
  0x8d   :  { %v143_v6 = vpop.permute.xlu0 %142  }
  0x8e   :  { %146 = vst.msk [vmem:[#allocation0 + $0x8] sm:$0x3] %vm144_vm0, %v143_v6   ;;  %v175_v9 = vpop.permute.xlu1 %174   ;;  %vm312_vm0 = vcmask 548336  }
  0x8f   :  { %177 = vst.msk [vmem:[#allocation0] sm:$0x3] %vm176_vm3, %v175_v9   ;;  %vm344_vm3 = vcmask 490936  }
  0x91   :  { %v164_v8 = vpop.permute.xlu0 %163  }
  0x92   :  { %167 = vst.msk [vmem:[#allocation0 + $0x8] sm:$0x3] %vm165_vm2, %v164_v8   ;;  %v196_v11 = vpop.permute.xlu1 %195   ;;  %vm333_vm2 = vcmask 507336  }
  0x93   :  { %198 = vst.msk [vmem:[#allocation0] sm:$0x3] %vm197_vm5, %v196_v11   ;;  %vm365_vm5 = vcmask 449936  }
  0x95   :  { %v185_v10 = vpop.permute.xlu0 %184  }
  0x96   :  { %188 = vst.msk [vmem:[#allocation0 + $0x8] sm:$0x3] %vm186_vm4, %v185_v10   ;;  %v217_v13 = vpop.permute.xlu1 %216   ;;  %vm354_vm4 = vcmask 466336  }
  0x97   :  { %219 = vst.msk [vmem:[#allocation0] sm:$0x3] %vm218_vm7, %v217_v13   ;;  %vm386_vm7 = vcmask 408936  }
  0x99   :  { %v206_v12 = vpop.permute.xlu0 %205  }
  0x9a   :  { %209 = vst.msk [vmem:[#allocation0 + $0x8] sm:$0x3] %vm207_vm6, %v206_v12   ;;  %v238_v15 = vpop.permute.xlu1 %237   ;;  %vm375_vm6 = vcmask 425336  }
  0x9b   :  { %240 = vst.msk [vmem:[#allocation0] sm:$0x3] %vm239_vm9, %v238_v15   ;;  %vm407_vm9 = vcmask 367936  }
  0x9d   :  { %v227_v14 = vpop.permute.xlu0 %226  }
  0x9e   :  { %230 = vst.msk [vmem:[#allocation0 + $0x8] sm:$0x3] %vm228_vm8, %v227_v14   ;;  %v259_v17 = vpop.permute.xlu1 %258   ;;  %vm396_vm8 = vcmask 384336  }
  0x9f   :  { %261 = vst.msk [vmem:[#allocation0] sm:$0x3] %vm260_vm11, %v259_v17   ;;  %vm428_vm11 = vcmask 343336  }
  0xa1   :  { %v248_v16 = vpop.permute.xlu0 %247  }
  0xa2   :  { %251 = vst.msk [vmem:[#allocation0 + $0x8] sm:$0x3] %vm249_vm10, %v248_v16   ;;  %v280_v19 = vpop.permute.xlu1 %279   ;;  %vm417_vm10 = vcmask 359736  }
  0xa3   :  { %282 = vst.msk [vmem:[#allocation0] sm:$0x3] %vm281_vm13, %v280_v19   ;;  %vm449_vm13 = vcmask 318736  }
  0xa5   :  { %v269_v18 = vpop.permute.xlu0 %268  }
  0xa6   :  { %272 = vst.msk [vmem:[#allocation0 + $0x8] sm:$0x3] %vm270_vm12, %v269_v18   ;;  %v301_v21 = vpop.permute.xlu1 %300   ;;  %vm439_vm12 = vcmask 326936  }
  0xa7   :  { %303 = vst.msk [vmem:[#allocation0] sm:$0x3] %vm302_vm15, %v301_v21   ;;  %vm471_vm15 = vcmask 285936  }
  0xa9   :  { %v290_v20 = vpop.permute.xlu0 %289  }
  0xaa   :  { %293 = vst.msk [vmem:[#allocation0 + $0x8] sm:$0x3] %vm291_vm14, %v290_v20   ;;  %v322_v23 = vpop.permute.xlu1 %321   ;;  %vm460_vm14 = vcmask 302336  }
  0xab   :  { %324 = vst.msk [vmem:[#allocation0] sm:$0x3] %vm323_vm1, %v322_v23   ;;  %vm492_vm1 = vcmask 261336  }
  0xad   :  { %v311_v22 = vpop.permute.xlu0 %310  }
  0xae   :  { %314 = vst.msk [vmem:[#allocation0 + $0x8] sm:$0x3] %vm312_vm0, %v311_v22   ;;  %v343_v25 = vpop.permute.xlu1 %342   ;;  %vm481_vm0 = vcmask 277736  }
  0xaf   :  { %345 = vst.msk [vmem:[#allocation0] sm:$0x3] %vm344_vm3, %v343_v25   ;;  %vm513_vm3 = vcmask 236736  }
  0xb1   :  { %v332_v24 = vpop.permute.xlu0 %331  }
  0xb2   :  { %335 = vst.msk [vmem:[#allocation0 + $0x8] sm:$0x3] %vm333_vm2, %v332_v24   ;;  %v364_v27 = vpop.permute.xlu1 %363   ;;  %vm503_vm2 = vcmask 244936  }
  0xb3   :  { %366 = vst.msk [vmem:[#allocation0] sm:$0x3] %vm365_vm5, %v364_v27   ;;  %vm535_vm5 = vcmask 203936  }
  0xb5   :  { %v353_v26 = vpop.permute.xlu0 %352  }
  0xb6   :  { %356 = vst.msk [vmem:[#allocation0 + $0x8] sm:$0x3] %vm354_vm4, %v353_v26   ;;  %v385_v29 = vpop.permute.xlu1 %384   ;;  %vm524_vm4 = vcmask 220336  }
  0xb7   :  { %387 = vst.msk [vmem:[#allocation0] sm:$0x3] %vm386_vm7, %v385_v29   ;;  %vm556_vm7 = vcmask 179336  }
  0xb9   :  { %v374_v28 = vpop.permute.xlu0 %373  }
  0xba   :  { %377 = vst.msk [vmem:[#allocation0 + $0x8] sm:$0x3] %vm375_vm6, %v374_v28   ;;  %v406_v31 = vpop.permute.xlu1 %405   ;;  %vm545_vm6 = vcmask 195736  }
  0xbb   :  { %408 = vst.msk [vmem:[#allocation0] sm:$0x3] %vm407_vm9, %v406_v31   ;;  %vm577_vm9 = vcmask 154736  }
  0xbd   :  { %v395_v30 = vpop.permute.xlu0 %394  }
  0xbe   :  { %398 = vst.msk [vmem:[#allocation0 + $0x8] sm:$0x3] %vm396_vm8, %v395_v30   ;;  %v427_v33 = vpop.permute.xlu1 %426   ;;  %vm567_vm8 = vcmask 162936  }
  0xbf   :  { %430 = vst.msk [vmem:[#allocation0 + $0x8] sm:$0x3] %vm428_vm11, %v427_v33   ;;  %vm599_vm11 = vcmask 121936  }
  0xc1   :  { %v416_v32 = vpop.permute.xlu0 %415  }
  0xc2   :  { %419 = vst.msk [vmem:[#allocation0 + $0x10] sm:$0x3] %vm417_vm10, %v416_v32   ;;  %v448_v35 = vpop.permute.xlu1 %447   ;;  %vm588_vm10 = vcmask 138336  }
  0xc3   :  { %451 = vst.msk [vmem:[#allocation0 + $0x10] sm:$0x3] %vm449_vm13, %v448_v35   ;;  %vm620_vm13 = vcmask 97336  }
  0xc5   :  { %v438_v34 = vpop.permute.xlu0 %437  }
  0xc6   :  { %440 = vst.msk [vmem:[#allocation0] sm:$0x3] %vm439_vm12, %v438_v34   ;;  %v470_v37 = vpop.permute.xlu1 %469   ;;  %vm609_vm12 = vcmask 113736  }
  0xc7   :  { %472 = vst.msk [vmem:[#allocation0] sm:$0x3] %vm471_vm15, %v470_v37   ;;  %vm641_vm15 = vcmask 72736  }
  0xc9   :  { %v459_v36 = vpop.permute.xlu0 %458  }
  0xca   :  { %462 = vst.msk [vmem:[#allocation0 + $0x8] sm:$0x3] %vm460_vm14, %v459_v36   ;;  %v491_v39 = vpop.permute.xlu1 %490   ;;  %vm631_vm14 = vcmask 80936  }
  0xcb   :  { %494 = vst.msk [vmem:[#allocation0 + $0x8] sm:$0x3] %vm492_vm1, %v491_v39  }
  0xcd   :  { %v480_v38 = vpop.permute.xlu0 %479  }
  0xce   :  { %483 = vst.msk [vmem:[#allocation0 + $0x10] sm:$0x3] %vm481_vm0, %v480_v38   ;;  %v512_v41 = vpop.permute.xlu1 %511   ;;  %vm652_vm0 = vcmask 56336  }
  0xcf   :  { %515 = vst.msk [vmem:[#allocation0 + $0x10] sm:$0x3] %vm513_vm3, %v512_v41  }
  0xd1   :  { %v502_v40 = vpop.permute.xlu0 %501  }
  0xd2   :  { %504 = vst.msk [vmem:[#allocation0] sm:$0x3] %vm503_vm2, %v502_v40   ;;  %v534_v43 = vpop.permute.xlu1 %533  }
  0xd3   :  { %536 = vst.msk [vmem:[#allocation0] sm:$0x3] %vm535_vm5, %v534_v43  }
  0xd5   :  { %v523_v42 = vpop.permute.xlu0 %522  }
  0xd6   :  { %526 = vst.msk [vmem:[#allocation0 + $0x8] sm:$0x3] %vm524_vm4, %v523_v42   ;;  %v555_v45 = vpop.permute.xlu1 %554  }
  0xd7   :  { %558 = vst.msk [vmem:[#allocation0 + $0x8] sm:$0x3] %vm556_vm7, %v555_v45  }
  0xd9   :  { %v544_v44 = vpop.permute.xlu0 %543  }
  0xda   :  { %547 = vst.msk [vmem:[#allocation0 + $0x10] sm:$0x3] %vm545_vm6, %v544_v44   ;;  %v576_v47 = vpop.permute.xlu1 %575  }
  0xdb   :  { %579 = vst.msk [vmem:[#allocation0 + $0x10] sm:$0x3] %vm577_vm9, %v576_v47  }
  0xdd   :  { %v566_v46 = vpop.permute.xlu0 %565  }
  0xde   :  { %568 = vst.msk [vmem:[#allocation0] sm:$0x3] %vm567_vm8, %v566_v46   ;;  %v598_v49 = vpop.permute.xlu1 %597  }
  0xdf   :  { %600 = vst.msk [vmem:[#allocation0] sm:$0x3] %vm599_vm11, %v598_v49  }
  0xe1   :  { %v587_v48 = vpop.permute.xlu0 %586  }
  0xe2   :  { %590 = vst.msk [vmem:[#allocation0 + $0x8] sm:$0x3] %vm588_vm10, %v587_v48   ;;  %v619_v51 = vpop.permute.xlu1 %618  }
  0xe3   :  { %622 = vst.msk [vmem:[#allocation0 + $0x8] sm:$0x3] %vm620_vm13, %v619_v51  }
  0xe5   :  { %v608_v50 = vpop.permute.xlu0 %607  }
  0xe6   :  { %611 = vst.msk [vmem:[#allocation0 + $0x10] sm:$0x3] %vm609_vm12, %v608_v50   ;;  %v640_v53 = vpop.permute.xlu1 %639  }
  0xe7   :  { %643 = vst.msk [vmem:[#allocation0 + $0x10] sm:$0x3] %vm641_vm15, %v640_v53  }
  0xe9   :  { %v630_v52 = vpop.permute.xlu0 %629  }
  0xea   :  { %632 = vst.msk [vmem:[#allocation0] sm:$0x3] %vm631_vm14, %v630_v52  }
  0xed   :  { %v651_v54 = vpop.permute.xlu0 %650  }
  0xee   :  { %654 = vst.msk [vmem:[#allocation0 + $0x8] sm:$0x3] %vm652_vm0, %v651_v54   ;;  %v667_v56 = vld [vmem:[#allocation0 + $0x10] sm:$0x3] }
  0xef   :  { %797 = vst [vmem:[%s1370_s1 + $0x4] sm:$0x3] %v667_v56 }
  0xf1   :  { %v658_v55 = vld [vmem:[#allocation0] sm:$0x3] }
  0xf2   :  { %660 = vst [vmem:[%s1370_s1] sm:$0x3] %v658_v55 }
  0xf5   :  { %v662_v57 = vld [vmem:[#allocation0 + $0x8] sm:$0x3] }
  0xf6   :  { %796 = vst [vmem:[%s1370_s1 + $0x2] sm:$0x3] %v662_v57 }

// kernel: squeeze.39
= control target key start
LH: loop header
LB: loop body
LE: loop exit
PB: predicated region body
PF: predicated region fallthrough
CT: control target
= control target key end

     0   :  { %s49_s18 = smov 3  ;;  %s42_s19 = smov 3  ;;  %vm32_vm0 = vcmask 39936   ;;  %vm39_vm1 = vcmask 244936   ;;  %vm46_vm2 = vcmask 203936   ;;  %vm53_vm3 = vcmask 162936   ;;  %s125_s0 = inlined_call_operand.vmem [shape: f32[2,3,2,5], index: 0, kind: input, shape index: {}]   ;;  %s126_s1 = inlined_call_operand.vmem [shape: f32[2,30], index: 1, kind: output, shape index: {}]  }
   0x1   :  { %v79_v0 = vld [vmem:[%s125_s0 + $0xa] sm:$0x3]  ;;  %v82_v1 = vld [vmem:[%s125_s0 + $0x4] sm:$0x3]  ;;  %v80_v2 = vld [vmem:[%s125_s0 + $0x8] sm:$0x3] }
   0x2   :  { %8 = vst [vmem:[#allocation1 + $0x28] sm:$0x3] %v79_v0  ;;  %23 = vst [vmem:[#allocation1 + $0x10] sm:$0x3] %v82_v1  ;;  %v83_v3 = vld [vmem:[%s125_s0 + $0x2] sm:$0x3] }
   0x3   :  { %13 = vst [vmem:[#allocation1 + $0x20] sm:$0x3] %v80_v2  ;;  %27 = vst [vmem:[#allocation1 + $0x8] sm:$0x3] %v83_v3  ;;  %v81_v4 = vld [vmem:[%s125_s0 + $0x6] sm:$0x3] }
   0x4   :  { %v28_v5 = vld [vmem:[%s125_s0] sm:$0x3]  ;;  %18 = vst [vmem:[#allocation1 + $0x18] sm:$0x3] %v81_v4  ;;  %s35_s0 = smov 3  ;;  %s30_s20 = smov 3 }
   0x5   :  { %29 = vst [vmem:[#allocation1] sm:$0x3] %v28_v5  ;;  %s56_s21 = smov 3  ;;  %s89_s22 = smov 25   ;;  %vm60_vm4 = vcmask 121936   ;;  %vm67_vm5 = vcmask 80936  }
   0x6   :  { %s90_s23 = smov 15   ;;  %s63_s24 = smov 3 }
   0x7   :  { %s91_s25 = smov 20   ;;  %s92_s26 = smov 10  }
   0x8   :  { %s93_s27 = smov 5  }
   0x9   :  { %v36_v6 = vld [vmem:[#allocation1 + $0x11] ss:$24 sm:%s35_s0]   ;;  %v43_v8 = vld [vmem:[#allocation1 + $0x10] ss:$24 sm:%s42_s19]  }
   0xa   :  { %37 = vrot.lane.b32.xlu0 %v36_v6, %s89_s22  ;;  %v50_v7 = vld [vmem:[#allocation1 + $0x9] ss:$24 sm:%s49_s18]   ;;  %v57_v10 = vld [vmem:[#allocation1 + $0x8] ss:$24 sm:%s56_s21]  }
   0xb   :  { %51 = vrot.lane.b32.xlu1 %v50_v7, %s90_s23 }
   0xc   :  { %v31_v9 = vld [vmem:[#allocation1] ss:$24 sm:%s30_s20]   ;;  %v64_v11 = vld [vmem:[#allocation1 + $0x1] ss:$24 sm:%s63_s24]  }
   0xd   :  { %33 = vst.msk [vmem:[#allocation0] sm:$0x3] %vm32_vm0, %v31_v9  }
   0xe   :  { %44 = vrot.lane.b32.xlu0 %v43_v8, %s91_s25 }
   0xf   :  { %58 = vrot.lane.b32.xlu1 %v57_v10, %s92_s26 }
  0x12   :  { %65 = vrot.lane.b32.xlu0 %v64_v11, %s93_s27 }
  0x7c   :  { %v38_v12 = vpop.permute.xlu0 %37  }
  0x7d   :  { %40 = vst.msk [vmem:[#allocation0] sm:$0x3] %vm39_vm1, %v38_v12   ;;  %v52_v13 = vpop.permute.xlu1 %51  }
  0x80   :  { %v45_v14 = vpop.permute.xlu0 %44  }
  0x81   :  { %47 = vst.msk [vmem:[#allocation0] sm:$0x3] %vm46_vm2, %v45_v14   ;;  %v59_v15 = vpop.permute.xlu1 %58  }
  0x82   :  { %54 = vst.msk [vmem:[#allocation0] sm:$0x3] %vm53_vm3, %v52_v13  }
  0x83   :  { %61 = vst.msk [vmem:[#allocation0] sm:$0x3] %vm60_vm4, %v59_v15  }
  0x84   :  { %v66_v16 = vpop.permute.xlu0 %65  }
  0x85   :  { %68 = vst.msk [vmem:[#allocation0] sm:$0x3] %vm67_vm5, %v66_v16  }
  0x8c   :  { %v72_v17 = vld [vmem:[#allocation0] sm:$0x3] }
  0x8d   :  { %74 = vst [vmem:[%s126_s1] sm:$0x3] %v72_v17 }

// kernel: tile.14
= control target key start
LH: loop header
LB: loop body
LE: loop exit
PB: predicated region body
PF: predicated region fallthrough
CT: control target
= control target key end

     0   :  { %s58_s0 = inlined_call_operand.vmem [shape: f32[15], index: 0, kind: input, shape index: {}]   ;;  %s59_s1 = inlined_call_operand.vmem [shape: f32[50,15], index: 1, kind: output, shape index: {}]  }
   0x1   :  { %v4_v0 = vld [vmem:[%s58_s0] ss:$0 sm:$0xff] }
   0x2   :  { %5 = vst [vmem:[%s59_s1] sm:$0xff] %v4_v0  ;;  %18 = vst [vmem:[%s59_s1 + $0x8] sm:$0xff] %v4_v0 }
   0x3   :  { %19 = vst [vmem:[%s59_s1 + $0x10] sm:$0xff] %v4_v0  ;;  %20 = vst [vmem:[%s59_s1 + $0x18] sm:$0xff] %v4_v0 }
   0x4   :  { %21 = vst [vmem:[%s59_s1 + $0x20] sm:$0xff] %v4_v0  ;;  %22 = vst [vmem:[%s59_s1 + $0x28] sm:$0xff] %v4_v0 }
   0x5   :  { %23 = vst [vmem:[%s59_s1 + $0x30] sm:$0xff] %v4_v0 }

// kernel: tile.15
= control target key start
LH: loop header
LB: loop body
LE: loop exit
PB: predicated region body
PF: predicated region fallthrough
CT: control target
= control target key end

     0   :  { %vm9_vm0 = vcmask 7168   ;;  %vm37_vm1 = vcmask 64512   ;;  %s522_s14 = smov 127   ;;  %vm23_vm2 = vcmask 15360   ;;  %s523_s19 = smov 120   ;;  %vm50_vm3 = vcmask 72704   ;;  %s764_s0 = inlined_call_operand.vmem [shape: f32[50,15], index: 0, kind: input, shape index: {}]   ;;  %s765_s1 = inlined_call_operand.vmem [shape: f32[1,750], index: 1, kind: output, shape index: {}]  }
   0x1   :  { %v414_v0 = vld [vmem:[%s764_s0 + $0x11] sm:$0x1]   ;;  %v418_v3 = vld [vmem:[%s764_s0 + $0x8] sm:$0x1]   ;;  %v416_v6 = vld [vmem:[%s764_s0 + $0x22] sm:$0x1]  }
   0x2   :  { %v415_v1 = vld [vmem:[%s764_s0 + $0x11] sm:$0x1]   ;;  %v419_v4 = vld [vmem:[%s764_s0 + $0x8] sm:$0x1]   ;;  %v417_v7 = vld [vmem:[%s764_s0 + $0x22] sm:$0x1]  }
   0x3   :  { %v10_v2 = vsel %vm9_vm0, %v415_v1, %v414_v0  ;;  %v38_v5 = vsel %vm37_vm1, %v419_v4, %v418_v3  ;;  %v24_v8 = vsel %vm23_vm2, %v417_v7, %v416_v6  ;;  %v420_v9 = vld [vmem:[%s764_s0 + $0x19] sm:$0x1]   ;;  %v422_v12 = vld [vmem:[%s764_s0 + $0x2a] sm:$0x1]   ;;  %vm64_vm4 = vcmask 80896   ;;  %s524_s28 = smov 126  }
   0x4   :  { %11 = vrot.lane.b32.xlu0 %v10_v2, %s522_s14  ;;  %39 = vrot.lane.b32.xlu1 %v38_v5, %s523_s19  ;;  %v421_v10 = vld [vmem:[%s764_s0 + $0x19] sm:$0x1]   ;;  %v423_v13 = vld [vmem:[%s764_s0 + $0x2a] sm:$0x1]   ;;  %s525_s29 = smov 119   ;;  %s526_s3 = smov 118  }
   0x5   :  { %v51_v11 = vsel %vm50_vm3, %v421_v10, %v420_v9  ;;  %v65_v14 = vsel %vm64_vm4, %v423_v13, %v422_v12  ;;  %v424_v15 = vld [vmem:[%s764_s0 + $0x10] sm:$0x1]   ;;  %s527_s4 = smov 112   ;;  %v425_v16 = vld [vmem:[%s764_s0 + $0x21] sm:$0x1]   ;;  %s528_s9 = smov 111  }
   0x6   :  { %v426_v17 = vld [vmem:[%s764_s0 + $0x7] sm:$0x1]   ;;  %s529_s10 = smov 105   ;;  %v427_v18 = vld [vmem:[%s764_s0 + $0x18] sm:$0x1]   ;;  %s530_s15 = smov 104  }
   0x7   :  { %v428_v19 = vld [vmem:[%s764_s0 + $0x29] sm:$0x1]   ;;  %s531_s16 = smov 103   ;;  %v429_v20 = vld [vmem:[%s764_s0 + $0xf] sm:$0x1]   ;;  %s532_s21 = smov 97  }
   0x8   :  { %25 = vrot.lane.b32.xlu0 %v24_v8, %s524_s28  ;;  %52 = vrot.lane.b32.xlu1 %v51_v11, %s525_s29  ;;  %v430_v21 = vld [vmem:[%s764_s0 + $0x20] sm:$0x1]   ;;  %s533_s22 = smov 96   ;;  %v431_v22 = vld [vmem:[%s764_s0 + $0x31] sm:$0x1]   ;;  %s534_s27 = smov 95  }
   0x9   :  { %v432_v23 = vld [vmem:[%s764_s0 + $0x6] sm:$0x1]   ;;  %s535_s28 = smov 90   ;;  %v433_v24 = vld [vmem:[%s764_s0 + $0x17] sm:$0x1]   ;;  %vm3_vm5 = vcmask 121856  }
   0xa   :  { %v2_v25 = vld [vmem:[%s764_s0] sm:$0x1]   ;;  %v434_v26 = vld [vmem:[%s764_s0 + $0x28] sm:$0x1]   ;;  %s536_s6 = smov 89   ;;  %s537_s7 = smov 88  }
   0xb   :  { %4 = vst.msk [vmem:[#allocation0] sm:$0x1] %vm3_vm5, %v2_v25   ;;  %v435_v27 = vld [vmem:[%s764_s0 + $0xe] sm:$0x1]   ;;  %v436_v28 = vld [vmem:[%s764_s0 + $0x1f] sm:$0x1]  }
   0xc   :  { %66 = vrot.lane.b32.xlu0 %v65_v14, %s526_s3  ;;  %76 = vrot.lane.b32.xlu1 %v424_v15, %s527_s4  ;;  %s538_s12 = smov 82   ;;  %s539_s13 = smov 81   ;;  %v437_v29 = vld [vmem:[%s764_s0 + $0x30] sm:$0x1]   ;;  %v438_v30 = vld [vmem:[%s764_s0 + $0x5] sm:$0x1]  }
   0xd   :  { %s540_s18 = smov 80   ;;  %s541_s19 = smov 75   ;;  %v439_v31 = vld [vmem:[%s764_s0 + $0x16] sm:$0x1]   ;;  %v440_v32 = vld [vmem:[%s764_s0 + $0x27] sm:$0x1]  }
   0xe   :  { %s542_s24 = smov 74   ;;  %s543_s25 = smov 73   ;;  %v441_v33 = vld [vmem:[%s764_s0 + $0xd] sm:$0x1]   ;;  %v442_v34 = vld [vmem:[%s764_s0 + $0x1e] sm:$0x1]  }
   0xf   :  { %s544_s30 = smov 67   ;;  %s545_s2 = smov 66   ;;  %v443_v35 = vld [vmem:[%s764_s0 + $0x2f] sm:$0x1]   ;;  %v444_v36 = vld [vmem:[%s764_s0 + $0x4] sm:$0x1]  }
  0x10   :  { %83 = vrot.lane.b32.xlu0 %v425_v16, %s528_s9  ;;  %90 = vrot.lane.b32.xlu1 %v426_v17, %s529_s10  ;;  %s547_s8 = smov 60   ;;  %v445_v37 = vld [vmem:[%s764_s0 + $0x15] sm:$0x1]   ;;  %v446_v38 = vld [vmem:[%s764_s0 + $0x26] sm:$0x1]   ;;  %s549_s14 = smov 58  }
  0x11   :  { %v447_v39 = vld [vmem:[%s764_s0 + $0xc] sm:$0x1]   ;;  %v448_v40 = vld [vmem:[%s764_s0 + $0x1d] sm:$0x1]   ;;  %s551_s20 = smov 51   ;;  %s553_s26 = smov 45  }
  0x12   :  { %v449_v41 = vld [vmem:[%s764_s0 + $0x2e] sm:$0x1]   ;;  %v450_v42 = vld [vmem:[%s764_s0 + $0x3] sm:$0x1]   ;;  %v451_v43 = vld [vmem:[%s764_s0 + $0x14] sm:$0x1]  }
  0x13   :  { %v452_v44 = vld [vmem:[%s764_s0 + $0x25] sm:$0x1]   ;;  %s555_s3 = smov 43   ;;  %v453_v45 = vld [vmem:[%s764_s0 + $0xb] sm:$0x1]   ;;  %s557_s9 = smov 36  }
  0x14   :  { %96 = vrot.lane.b32.xlu0 %v427_v18, %s530_s15  ;;  %103 = vrot.lane.b32.xlu1 %v428_v19, %s531_s16  ;;  %v454_v46 = vld [vmem:[%s764_s0 + $0x1c] sm:$0x1]   ;;  %v455_v47 = vld [vmem:[%s764_s0 + $0x2d] sm:$0x1]   ;;  %s559_s15 = smov 30   ;;  %s565_s4 = smov 15  }
  0x15   :  { %v456_v48 = vld [vmem:[%s764_s0 + $0x2] sm:$0x1]   ;;  %v457_v49 = vld [vmem:[%s764_s0 + $0x13] sm:$0x1]   ;;  %v458_v50 = vld [vmem:[%s764_s0 + $0x24] sm:$0x1]  }
  0x16   :  { %v459_v51 = vld [vmem:[%s764_s0 + $0xa] sm:$0x1]   ;;  %v460_v52 = vld [vmem:[%s764_s0 + $0x1b] sm:$0x1]   ;;  %v461_v53 = vld [vmem:[%s764_s0 + $0x2c] sm:$0x1]  }
  0x17   :  { %v462_v54 = vld [vmem:[%s764_s0 + $0x1] sm:$0x1]   ;;  %v463_v55 = vld [vmem:[%s764_s0 + $0x12] sm:$0x1]   ;;  %v464_v56 = vld [vmem:[%s764_s0 + $0x23] sm:$0x1]  }
  0x18   :  { %110 = vrot.lane.b32.xlu0 %v429_v20, %s532_s21  ;;  %117 = vrot.lane.b32.xlu1 %v430_v21, %s533_s22  ;;  %s561_s21 = smov 28   ;;  %s567_s10 = smov 13   ;;  %v465_v57 = vld [vmem:[%s764_s0 + $0x9] sm:$0x1]   ;;  %v466_v58 = vld [vmem:[%s764_s0 + $0x1a] sm:$0x1]  }
  0x19   :  { %s569_s16 = smov 6   ;;  %v467_v59 = vld [vmem:[%s764_s0 + $0x2b] sm:$0x1]   ;;  %s570_s0 = smov 5   ;;  %vm13_vm6 = vcmask 113664   ;;  %vm16_vm7 = vcmask 1048568  }
  0x1a   :  { %vm41_vm8 = vcmask 56320   ;;  %vm44_vm9 = vcmask 1048512   ;;  %vm27_vm10 = vcmask 105472   ;;  %vm30_vm11 = vcmask 1048560  }
  0x1b   :  { %vm54_vm12 = vcmask 48128   ;;  %vm57_vm13 = vcmask 1048504   ;;  %vm68_vm14 = vcmask 39936   ;;  %vm71_vm15 = vcmask 1048496  }
  0x1c   :  { %124 = vrot.lane.b32.xlu0 %v431_v22, %s534_s27  ;;  %131 = vrot.lane.b32.xlu1 %v432_v23, %s535_s28  ;;  %s563_s27 = smov 21   ;;  %vm78_vm0 = vcmask 1040256   ;;  %vm85_vm1 = vcmask 1032056   ;;  %vm92_vm2 = vcmask 982856   ;;  %vm98_vm3 = vcmask 974656  }
  0x1d   :  { %vm105_vm4 = vcmask 966456   ;;  %vm112_vm5 = vcmask 917256  }
  0x20   :  { %137 = vrot.lane.b32.xlu0 %v433_v24, %s536_s6  ;;  %144 = vrot.lane.b32.xlu1 %v434_v26, %s537_s7  ;;  %s546_s7 = smov 65  }
  0x24   :  { %151 = vrot.lane.b32.xlu0 %v435_v27, %s538_s12  ;;  %158 = vrot.lane.b32.xlu1 %v436_v28, %s539_s13  ;;  %s548_s13 = smov 59  }
  0x28   :  { %165 = vrot.lane.b32.xlu0 %v437_v29, %s540_s18  ;;  %172 = vrot.lane.b32.xlu1 %v438_v30, %s541_s19  ;;  %s550_s19 = smov 52  }
  0x2c   :  { %178 = vrot.lane.b32.xlu0 %v439_v31, %s542_s24  ;;  %185 = vrot.lane.b32.xlu1 %v440_v32, %s543_s25  ;;  %s552_s25 = smov 50  }
  0x30   :  { %192 = vrot.lane.b32.xlu0 %v441_v33, %s544_s30  ;;  %199 = vrot.lane.b32.xlu1 %v442_v34, %s545_s2  ;;  %s554_s2 = smov 44  }
  0x34   :  { %206 = vrot.lane.b32.xlu0 %v443_v35, %s546_s7  ;;  %213 = vrot.lane.b32.xlu1 %v444_v36, %s547_s8  ;;  %s556_s8 = smov 37  }
  0x38   :  { %219 = vrot.lane.b32.xlu0 %v445_v37, %s548_s13  ;;  %226 = vrot.lane.b32.xlu1 %v446_v38, %s549_s14  ;;  %s558_s14 = smov 35  }
  0x3c   :  { %233 = vrot.lane.b32.xlu0 %v447_v39, %s550_s19  ;;  %240 = vrot.lane.b32.xlu1 %v448_v40, %s551_s20  ;;  %s560_s20 = smov 29  }
  0x40   :  { %247 = vrot.lane.b32.xlu0 %v449_v41, %s552_s25  ;;  %254 = vrot.lane.b32.xlu1 %v450_v42, %s553_s26  ;;  %s562_s26 = smov 22  }
  0x44   :  { %260 = vrot.lane.b32.xlu0 %v451_v43, %s554_s2  ;;  %267 = vrot.lane.b32.xlu1 %v452_v44, %s555_s3  ;;  %s564_s3 = smov 20  }
  0x48   :  { %274 = vrot.lane.b32.xlu0 %v453_v45, %s556_s8  ;;  %281 = vrot.lane.b32.xlu1 %v454_v46, %s557_s9  ;;  %s566_s9 = smov 14  }
  0x4c   :  { %288 = vrot.lane.b32.xlu0 %v455_v47, %s558_s14  ;;  %295 = vrot.lane.b32.xlu1 %v456_v48, %s559_s15  ;;  %s568_s15 = smov 7  }
  0x50   :  { %301 = vrot.lane.b32.xlu0 %v457_v49, %s560_s20  ;;  %308 = vrot.lane.b32.xlu1 %v458_v50, %s561_s21 }
  0x54   :  { %315 = vrot.lane.b32.xlu0 %v459_v51, %s562_s26  ;;  %322 = vrot.lane.b32.xlu1 %v460_v52, %s563_s27 }
  0x58   :  { %329 = vrot.lane.b32.xlu0 %v461_v53, %s564_s3  ;;  %336 = vrot.lane.b32.xlu1 %v462_v54, %s565_s4 }
  0x5c   :  { %342 = vrot.lane.b32.xlu0 %v463_v55, %s566_s9  ;;  %349 = vrot.lane.b32.xlu1 %v464_v56, %s567_s10 }
  0x60   :  { %356 = vrot.lane.b32.xlu0 %v465_v57, %s568_s15  ;;  %363 = vrot.lane.b32.xlu1 %v466_v58, %s569_s16 }
  0x64   :  { %370 = vrot.lane.b32.xlu0 %v467_v59, %s570_s0 }
  0x76   :  { %v12_v60 = vpop.permute.xlu0 %11   ;;  %v40_v61 = vpop.permute.xlu1 %39  }
  0x77   :  { %15 = vst.msk [vmem:[#allocation0 + $0x10] sm:$0x1] %vm13_vm6, %v12_v60   ;;  %vm119_vm6 = vcmask 909056  }
  0x78   :  { %18 = vst.msk [vmem:[#allocation0 + $0x8] sm:$0x1] %vm16_vm7, %v12_v60   ;;  %vm126_vm7 = vcmask 900856  }
  0x79   :  { %43 = vst.msk [vmem:[#allocation0 + $0x8] sm:$0x1] %vm41_vm8, %v40_v61   ;;  %vm133_vm8 = vcmask 859856  }
  0x7a   :  { %45 = vst.msk [vmem:[#allocation0] sm:$0x1] %vm44_vm9, %v40_v61   ;;  %v26_v62 = vpop.permute.xlu0 %25   ;;  %v53_v63 = vpop.permute.xlu1 %52   ;;  %vm139_vm9 = vcmask 851656  }
  0x7b   :  { %29 = vst.msk [vmem:[#allocation0 + $0x20] sm:$0x1] %vm27_vm10, %v26_v62   ;;  %vm146_vm10 = vcmask 843456  }
  0x7c   :  { %32 = vst.msk [vmem:[#allocation0 + $0x18] sm:$0x1] %vm30_vm11, %v26_v62   ;;  %vm153_vm11 = vcmask 794256  }
  0x7d   :  { %56 = vst.msk [vmem:[#allocation0 + $0x18] sm:$0x1] %vm54_vm12, %v53_v63   ;;  %vm160_vm12 = vcmask 786056  }
  0x7e   :  { %59 = vst.msk [vmem:[#allocation0 + $0x10] sm:$0x1] %vm57_vm13, %v53_v63   ;;  %v67_v0 = vpop.permute.xlu0 %66   ;;  %v77_v1 = vpop.permute.xlu1 %76   ;;  %vm167_vm13 = vcmask 777856  }
  0x7f   :  { %70 = vst.msk [vmem:[#allocation0 + $0x28] sm:$0x1] %vm68_vm14, %v67_v0   ;;  %vm174_vm14 = vcmask 736856  }
  0x80   :  { %73 = vst.msk [vmem:[#allocation0 + $0x20] sm:$0x1] %vm71_vm15, %v67_v0   ;;  %vm180_vm15 = vcmask 728656  }
  0x81   :  { %80 = vst.msk [vmem:[#allocation0 + $0x8] sm:$0x1] %vm78_vm0, %v77_v1   ;;  %vm187_vm0 = vcmask 720456  }
  0x82   :  { %v84_v2 = vpop.permute.xlu0 %83   ;;  %v91_v3 = vpop.permute.xlu1 %90  }
  0x83   :  { %87 = vst.msk [vmem:[#allocation0 + $0x18] sm:$0x1] %vm85_vm1, %v84_v2   ;;  %vm194_vm1 = vcmask 671256  }
  0x84   :  { %93 = vst.msk [vmem:[#allocation0] sm:$0x1] %vm92_vm2, %v91_v3   ;;  %vm201_vm2 = vcmask 663056  }
  0x86   :  { %v97_v4 = vpop.permute.xlu0 %96   ;;  %v104_v5 = vpop.permute.xlu1 %103  }
  0x87   :  { %100 = vst.msk [vmem:[#allocation0 + $0x10] sm:$0x1] %vm98_vm3, %v97_v4   ;;  %vm208_vm3 = vcmask 654856  }
  0x88   :  { %107 = vst.msk [vmem:[#allocation0 + $0x20] sm:$0x1] %vm105_vm4, %v104_v5   ;;  %vm215_vm4 = vcmask 613856  }
  0x8a   :  { %v111_v6 = vpop.permute.xlu0 %110   ;;  %v118_v7 = vpop.permute.xlu1 %117  }
  0x8b   :  { %114 = vst.msk [vmem:[#allocation0 + $0x8] sm:$0x1] %vm112_vm5, %v111_v6   ;;  %vm221_vm5 = vcmask 605656  }
  0x8c   :  { %121 = vst.msk [vmem:[#allocation0 + $0x18] sm:$0x1] %vm119_vm6, %v118_v7   ;;  %vm228_vm6 = vcmask 597456  }
  0x8e   :  { %v125_v8 = vpop.permute.xlu0 %124   ;;  %v132_v9 = vpop.permute.xlu1 %131  }
  0x8f   :  { %128 = vst.msk [vmem:[#allocation0 + $0x28] sm:$0x1] %vm126_vm7, %v125_v8   ;;  %vm235_vm7 = vcmask 548256  }
  0x90   :  { %134 = vst.msk [vmem:[#allocation0] sm:$0x1] %vm133_vm8, %v132_v9   ;;  %vm242_vm8 = vcmask 540056  }
  0x92   :  { %v138_v10 = vpop.permute.xlu0 %137   ;;  %v145_v11 = vpop.permute.xlu1 %144  }
  0x93   :  { %141 = vst.msk [vmem:[#allocation0 + $0x10] sm:$0x1] %vm139_vm9, %v138_v10   ;;  %vm249_vm9 = vcmask 531856  }
  0x94   :  { %148 = vst.msk [vmem:[#allocation0 + $0x20] sm:$0x1] %vm146_vm10, %v145_v11   ;;  %vm256_vm10 = vcmask 490856  }
  0x96   :  { %v152_v12 = vpop.permute.xlu0 %151   ;;  %v159_v13 = vpop.permute.xlu1 %158  }
  0x97   :  { %155 = vst.msk [vmem:[#allocation0 + $0x8] sm:$0x1] %vm153_vm11, %v152_v12   ;;  %vm262_vm11 = vcmask 482656  }
  0x98   :  { %162 = vst.msk [vmem:[#allocation0 + $0x18] sm:$0x1] %vm160_vm12, %v159_v13   ;;  %vm269_vm12 = vcmask 474456  }
  0x9a   :  { %v166_v14 = vpop.permute.xlu0 %165   ;;  %v173_v15 = vpop.permute.xlu1 %172  }
  0x9b   :  { %169 = vst.msk [vmem:[#allocation0 + $0x28] sm:$0x1] %vm167_vm13, %v166_v14   ;;  %vm276_vm13 = vcmask 425256  }
  0x9c   :  { %175 = vst.msk [vmem:[#allocation0] sm:$0x1] %vm174_vm14, %v173_v15   ;;  %vm283_vm14 = vcmask 417056  }
  0x9e   :  { %v179_v16 = vpop.permute.xlu0 %178   ;;  %v186_v17 = vpop.permute.xlu1 %185  }
  0x9f   :  { %182 = vst.msk [vmem:[#allocation0 + $0x10] sm:$0x1] %vm180_vm15, %v179_v16   ;;  %vm290_vm15 = vcmask 408856  }
  0xa0   :  { %189 = vst.msk [vmem:[#allocation0 + $0x20] sm:$0x1] %vm187_vm0, %v186_v17   ;;  %vm297_vm0 = vcmask 367856  }
  0xa2   :  { %v193_v18 = vpop.permute.xlu0 %192   ;;  %v200_v19 = vpop.permute.xlu1 %199  }
  0xa3   :  { %196 = vst.msk [vmem:[#allocation0 + $0x8] sm:$0x1] %vm194_vm1, %v193_v18   ;;  %vm303_vm1 = vcmask 359656  }
  0xa4   :  { %203 = vst.msk [vmem:[#allocation0 + $0x18] sm:$0x1] %vm201_vm2, %v200_v19   ;;  %vm310_vm2 = vcmask 351456  }
  0xa6   :  { %v207_v20 = vpop.permute.xlu0 %206   ;;  %v214_v21 = vpop.permute.xlu1 %213  }
  0xa7   :  { %210 = vst.msk [vmem:[#allocation0 + $0x28] sm:$0x1] %vm208_vm3, %v207_v20   ;;  %vm317_vm3 = vcmask 302256  }
  0xa8   :  { %216 = vst.msk [vmem:[#allocation0] sm:$0x1] %vm215_vm4, %v214_v21   ;;  %vm324_vm4 = vcmask 294056  }
  0xaa   :  { %v220_v22 = vpop.permute.xlu0 %219   ;;  %v227_v23 = vpop.permute.xlu1 %226  }
  0xab   :  { %223 = vst.msk [vmem:[#allocation0 + $0x10] sm:$0x1] %vm221_vm5, %v220_v22   ;;  %vm331_vm5 = vcmask 285856  }
  0xac   :  { %230 = vst.msk [vmem:[#allocation0 + $0x20] sm:$0x1] %vm228_vm6, %v227_v23   ;;  %vm338_vm6 = vcmask 244856  }
  0xae   :  { %v234_v24 = vpop.permute.xlu0 %233   ;;  %v241_v25 = vpop.permute.xlu1 %240  }
  0xaf   :  { %237 = vst.msk [vmem:[#allocation0 + $0x8] sm:$0x1] %vm235_vm7, %v234_v24   ;;  %vm344_vm7 = vcmask 236656  }
  0xb0   :  { %244 = vst.msk [vmem:[#allocation0 + $0x18] sm:$0x1] %vm242_vm8, %v241_v25   ;;  %vm351_vm8 = vcmask 228456  }
  0xb2   :  { %v248_v26 = vpop.permute.xlu0 %247   ;;  %v255_v27 = vpop.permute.xlu1 %254  }
  0xb3   :  { %251 = vst.msk [vmem:[#allocation0 + $0x28] sm:$0x1] %vm249_vm9, %v248_v26   ;;  %vm358_vm9 = vcmask 179256  }
  0xb4   :  { %257 = vst.msk [vmem:[#allocation0] sm:$0x1] %vm256_vm10, %v255_v27   ;;  %vm365_vm10 = vcmask 171056  }
  0xb6   :  { %v261_v28 = vpop.permute.xlu0 %260   ;;  %v268_v29 = vpop.permute.xlu1 %267  }
  0xb7   :  { %264 = vst.msk [vmem:[#allocation0 + $0x10] sm:$0x1] %vm262_vm11, %v261_v28   ;;  %vm372_vm11 = vcmask 162856  }
  0xb8   :  { %271 = vst.msk [vmem:[#allocation0 + $0x20] sm:$0x1] %vm269_vm12, %v268_v29  }
  0xba   :  { %v275_v30 = vpop.permute.xlu0 %274   ;;  %v282_v31 = vpop.permute.xlu1 %281  }
  0xbb   :  { %278 = vst.msk [vmem:[#allocation0 + $0x8] sm:$0x1] %vm276_vm13, %v275_v30  }
  0xbc   :  { %285 = vst.msk [vmem:[#allocation0 + $0x18] sm:$0x1] %vm283_vm14, %v282_v31  }
  0xbe   :  { %v289_v32 = vpop.permute.xlu0 %288   ;;  %v296_v33 = vpop.permute.xlu1 %295  }
  0xbf   :  { %292 = vst.msk [vmem:[#allocation0 + $0x28] sm:$0x1] %vm290_vm15, %v289_v32  }
  0xc0   :  { %298 = vst.msk [vmem:[#allocation0] sm:$0x1] %vm297_vm0, %v296_v33  }
  0xc2   :  { %v302_v34 = vpop.permute.xlu0 %301   ;;  %v309_v35 = vpop.permute.xlu1 %308  }
  0xc3   :  { %305 = vst.msk [vmem:[#allocation0 + $0x10] sm:$0x1] %vm303_vm1, %v302_v34  }
  0xc4   :  { %312 = vst.msk [vmem:[#allocation0 + $0x20] sm:$0x1] %vm310_vm2, %v309_v35  }
  0xc6   :  { %v316_v36 = vpop.permute.xlu0 %315   ;;  %v323_v37 = vpop.permute.xlu1 %322  }
  0xc7   :  { %319 = vst.msk [vmem:[#allocation0 + $0x8] sm:$0x1] %vm317_vm3, %v316_v36  }
  0xc8   :  { %326 = vst.msk [vmem:[#allocation0 + $0x18] sm:$0x1] %vm324_vm4, %v323_v37  }
  0xca   :  { %v330_v38 = vpop.permute.xlu0 %329   ;;  %v337_v39 = vpop.permute.xlu1 %336  }
  0xcb   :  { %333 = vst.msk [vmem:[#allocation0 + $0x28] sm:$0x1] %vm331_vm5, %v330_v38  }
  0xcc   :  { %339 = vst.msk [vmem:[#allocation0] sm:$0x1] %vm338_vm6, %v337_v39  }
  0xce   :  { %v343_v40 = vpop.permute.xlu0 %342   ;;  %v350_v41 = vpop.permute.xlu1 %349  }
  0xcf   :  { %346 = vst.msk [vmem:[#allocation0 + $0x10] sm:$0x1] %vm344_vm7, %v343_v40  }
  0xd0   :  { %353 = vst.msk [vmem:[#allocation0 + $0x20] sm:$0x1] %vm351_vm8, %v350_v41  }
  0xd2   :  { %v357_v42 = vpop.permute.xlu0 %356   ;;  %v364_v44 = vpop.permute.xlu1 %363  }
  0xd3   :  { %v378_v43 = vld [vmem:[#allocation0] sm:$0x1]  ;;  %360 = vst.msk [vmem:[#allocation0 + $0x8] sm:$0x1] %vm358_vm9, %v357_v42  }
  0xd4   :  { %380 = vst [vmem:[%s765_s1] sm:$0x1] %v378_v43  ;;  %367 = vst.msk [vmem:[#allocation0 + $0x18] sm:$0x1] %vm365_vm10, %v364_v44  }
  0xd6   :  { %v387_v45 = vld [vmem:[#allocation0 + $0x10] sm:$0x1]  ;;  %v371_v46 = vpop.permute.xlu0 %370  }
  0xd7   :  { %469 = vst [vmem:[%s765_s1 + $0x2] sm:$0x1] %v387_v45  ;;  %v399_v47 = vld [vmem:[#allocation0 + $0x20] sm:$0x1]  ;;  %374 = vst.msk [vmem:[#allocation0 + $0x28] sm:$0x1] %vm372_vm11, %v371_v46  }
  0xd8   :  { %471 = vst [vmem:[%s765_s1 + $0x4] sm:$0x1] %v399_v47 }
  0xda   :  { %v382_v48 = vld [vmem:[#allocation0 + $0x8] sm:$0x1] }
  0xdb   :  { %468 = vst [vmem:[%s765_s1 + $0x1] sm:$0x1] %v382_v48  ;;  %v393_v49 = vld [vmem:[#allocation0 + $0x18] sm:$0x1] }
  0xdc   :  { %470 = vst [vmem:[%s765_s1 + $0x3] sm:$0x1] %v393_v49 }
  0xde   :  { %v405_v50 = vld [vmem:[#allocation0 + $0x28] sm:$0x1] }
  0xdf   :  { %472 = vst [vmem:[%s765_s1 + $0x5] sm:$0x1] %v405_v50 }

// kernel: ddpm_forward.23
= control target key start
LH: loop header
LB: loop body
LE: loop exit
PB: predicated region body
PF: predicated region fallthrough
CT: control target
= control target key end

     0   :  { %s1124_s0 = inlined_call_operand.vmem [shape: f32[2,30], index: 0, kind: input, shape index: {}]   ;;  %s1125_s1 = inlined_call_operand.vmem [shape: f32[2,30], index: 1, kind: input, shape index: {}]   ;;  %s1126_s2 = inlined_call_operand.vmem [shape: f32[2,300], index: 2, kind: input, shape index: {}]   ;;  %s1127_s3 = inlined_call_operand.vmem [shape: f32[2,300], index: 3, kind: input, shape index: {}]   ;;  %s1128_s4 = inlined_call_operand.vmem [shape: f32[2,300], index: 4, kind: input, shape index: {}]   ;;  %s1129_s5 = inlined_call_operand.vmem [shape: f32[2,300], index: 5, kind: input, shape index: {}]   ;;  %s1130_s6 = inlined_call_operand.vmem [shape: f32[2,90], index: 6, kind: input, shape index: {}]   ;;  %s1131_s7 = inlined_call_operand.vmem [shape: f32[2,90], index: 7, kind: input, shape index: {}]   ;;  %s1132_s8 = inlined_call_operand.vmem [shape: f32[2,90], index: 8, kind: input, shape index: {}]   ;;  %s1133_s9 = inlined_call_operand.vmem [shape: f32[2,90], index: 9, kind: input, shape index: {}]   ;;  %s1134_s10 = inlined_call_operand.vmem [shape: f32[2,90], index: 10, kind: input, shape index: {}]   ;;  %s1135_s11 = inlined_call_operand.vmem [shape: f32[2,32], index: 11, kind: input, shape index: {}]   ;;  %s1136_s12 = inlined_call_operand.vmem [shape: f32[2,32], index: 12, kind: input, shape index: {}]   ;;  %s1137_s13 = inlined_call_operand.vmem [shape: f32[12,750], index: 13, kind: input, shape index: {}]   ;;  %s1138_s14 = inlined_call_operand.vmem [shape: f32[12,750], index: 14, kind: input, shape index: {}]   ;;  %s1139_s15 = inlined_call_operand.vmem [shape: f32[12,750], index: 15, kind: input, shape index: {}]   ;;  %s1140_s16 = inlined_call_operand.vmem [shape: f32[12,750], index: 16, kind: input, shape index: {}]   ;;  %s1141_s17 = inlined_call_operand.vmem [shape: f32[12,750], index: 17, kind: input, shape index: {}]   ;;  %s1142_s18 = inlined_call_operand.vmem [shape: f32[12,750], index: 18, kind: input, shape index: {}]   ;;  %s1143_s19 = inlined_call_operand.vmem [shape: f32[1,750], index: 19, kind: input, shape index: {}]   ;;  %s1144_s20 = inlined_call_operand.vmem [shape: f32[11], index: 20, kind: output, shape index: {}]  }
   0x1   :  { %1146 = sst [smem:[#allocation5_spill]] %s1124_s0 }
   0x2   :  { %1147 = sst [smem:[#allocation6_spill]] %s1125_s1 }
   0x3   :  { %1148 = sst [smem:[#allocation7_spill]] %s1126_s2 }
   0x4   :  { %1149 = sst [smem:[#allocation8_spill]] %s1127_s3 }
   0x5   :  { %1150 = sst [smem:[#allocation9_spill]] %s1128_s4 }
   0x6   :  { %v760_v0 = vld [vmem:[%s1130_s6] sm:$0x3]  ;;  %vm79_vm0 = vcmask 238592   ;;  %s1151_s4 = sld [smem:[#allocation5_spill]]  ;;  %vm201_vm1 = vcmask 730112   ;;  %v264_v12 = vld [vmem:[%s1138_s14 + $0x8] sm:$0xff]  ;;  %v110_v13 = vlaneseq }
   0x7   :  { %v196_v1 = vld [vmem:[%s1133_s9] sm:$0x3]  ;;  %v265_v14 = vld [vmem:[%s1138_s14 + $0x10] sm:$0xff]  ;;  %v266_v15 = vld [vmem:[%s1138_s14 + $0x18] sm:$0xff]  ;;  %vm249_vm2 = vcmask 254976   ;;  %vm382_vm3 = vcmask 900096  }
   0x8   :  { %v197_v2 = vld [vmem:[%s1134_s10] sm:$0x3]  ;;  %v276_v20 = vld [vmem:[%s1139_s15 + $0x8] sm:$0xff]  ;;  %v277_v21 = vld [vmem:[%s1139_s15 + $0x10] sm:$0xff]  ;;  %v822_v32 = vshrl.u32 %v110_v13, 7  ;;  %vm385_vm4 = vcmask 1043456  }
   0x9   :  { %v198_v3 = vsub.f32 %v196_v1, %v197_v2  ;;  %v242_v4 = vld [vmem:[%s1136_s12] sm:$0x3]  ;;  %v268_v23 = vld [vmem:[%s1138_s14 + $0x28] sm:$0xff]  ;;  %v278_v24 = vld [vmem:[%s1139_s15 + $0x18] sm:$0xff]  ;;  %v288_v26 = vsub.f32 %v264_v12, %v276_v20  ;;  %v289_v31 = vsub.f32 %v265_v14, %v277_v21  ;;  %s1152_s6 = sld [smem:[#allocation6_spill]]  ;;  %vm396_vm5 = vcmask 896000  }
   0xa   :  { %v246_v5 = vmul.f32 1.442695, %v242_v4  ;;  %v241_v9 = vld [vmem:[%s1135_s11] sm:$0x3]  ;;  %v243_v17 = vadd.f32 1.0, %v242_v4  ;;  %v280_v30 = vld [vmem:[%s1139_s15 + $0x28] sm:$0xff]  ;;  %v290_v37 = vsub.f32 %v266_v15, %v278_v24 }
   0xb   :  { %v214_v7 = vmul.f32 %v198_v3, %v760_v0  ;;  %v263_v11 = vld [vmem:[%s1138_s14] sm:$0xff]  ;;  %v244_v18 = vmul.f32 %v241_v9, %v241_v9  ;;  %v269_v27 = vld [vmem:[%s1138_s14 + $0x30] sm:$0xf]  ;;  %v270_v28 = vld [vmem:[%s1138_s14 + $0x38] sm:$0xf]  ;;  %v292_v44 = vsub.f32 %v268_v23, %v280_v30  ;;  %v338_v52 = vsub.s32 0, %v822_v32 }
   0xc   :  { %v228_v6 = vld [vmem:[%s1151_s4] sm:$0x3]  ;;  %622 = vpow2.f32 %v246_v5  ;;  %v281_v34 = vld [vmem:[%s1139_s15 + $0x30] sm:$0xf]  ;;  %v282_v35 = vld [vmem:[%s1139_s15 + $0x38] sm:$0xf] }
   0xd   :  { %v229_v8 = vsel %vm79_vm0, %v228_v6, 0.0  ;;  %v215_v10 = vmul.f32 %v214_v7, %v198_v3  ;;  %v275_v19 = vld [vmem:[%s1139_s15] sm:$0xff]  ;;  %v245_v36 = vsub.f32 %v243_v17, %v244_v18  ;;  %v300_v39 = vld [vmem:[%s1137_s13 + $0x8] sm:$0xff]  ;;  %v301_v40 = vld [vmem:[%s1137_s13 + $0x10] sm:$0xff]  ;;  %v293_v56 = vsub.f32 %v269_v27, %v281_v34  ;;  %s1153_s30 = sld [smem:[#allocation8_spill]] }
   0xe   :  { %230 = vadd.xlane.f32.xlu1 %v229_v8  ;;  %v267_v22 = vld [vmem:[%s1138_s14 + $0x20] sm:$0xff]  ;;  %v287_v25 = vsub.f32 %v263_v11, %v275_v19  ;;  %v272_v41 = vld [vmem:[%s1138_s14 + $0x48] sm:$0xf]  ;;  %v302_v45 = vld [vmem:[%s1137_s13 + $0x18] sm:$0xff]  ;;  %v312_v47 = vmul.f32 %v300_v39, %v288_v26  ;;  %v313_v51 = vmul.f32 %v301_v40, %v289_v31  ;;  %v294_v57 = vsub.f32 %v270_v28, %v282_v35 }
   0xf   :  { %v216_v16 = vsel %vm201_vm1, %v215_v10, 0.0  ;;  %v279_v29 = vld [vmem:[%s1139_s15 + $0x20] sm:$0xff]  ;;  %v284_v48 = vld [vmem:[%s1139_s15 + $0x48] sm:$0xf]  ;;  %v273_v54 = vld [vmem:[%s1138_s14 + $0x50] sm:$0xf]  ;;  %v314_v2 = vmul.f32 %v302_v45, %v290_v37 }
  0x10   :  { %217 = vadd.xlane.f32.xlu0 %v216_v16  ;;  %v271_v33 = vld [vmem:[%s1138_s14 + $0x40] sm:$0xf]  ;;  %v291_v43 = vsub.f32 %v267_v22, %v279_v29  ;;  %v304_v50 = vld [vmem:[%s1137_s13 + $0x28] sm:$0xff]  ;;  %v274_v55 = vld [vmem:[%s1138_s14 + $0x58] sm:$0xf]  ;;  %v342_v58 = vsub.s32 1, %v822_v32  ;;  %v296_v4 = vsub.f32 %v272_v41, %v284_v48  ;;  %v324_v8 = vmul.f32 %v312_v47, %v288_v26 }
  0x11   :  { %v299_v38 = vld [vmem:[%s1137_s13] sm:$0xff]  ;;  %v346_v59 = vsub.s32 2, %v822_v32  ;;  %v285_v61 = vld [vmem:[%s1139_s15 + $0x50] sm:$0xf]  ;;  %v286_v62 = vld [vmem:[%s1139_s15 + $0x58] sm:$0xf]  ;;  %v316_v7 = vmul.f32 %v304_v50, %v292_v44  ;;  %v325_v12 = vmul.f32 %v313_v51, %v289_v31  ;;  %v326_v21 = vmul.f32 %v314_v2, %v290_v37 }
  0x12   :  { %v283_v42 = vld [vmem:[%s1139_s15 + $0x40] sm:$0xf]  ;;  %v311_v46 = vmul.f32 %v299_v38, %v287_v25  ;;  %v305_v1 = vld [vmem:[%s1137_s13 + $0x30] sm:$0xf]  ;;  %v306_v5 = vld [vmem:[%s1137_s13 + $0x38] sm:$0xf]  ;;  %v297_v14 = vsub.f32 %v273_v54, %v285_v61  ;;  %v298_v15 = vsub.f32 %v274_v55, %v286_v62 }
  0x13   :  { %v303_v49 = vld [vmem:[%s1137_s13 + $0x20] sm:$0xff]  ;;  %v295_v63 = vsub.f32 %v271_v33, %v283_v42  ;;  %v308_v11 = vld [vmem:[%s1137_s13 + $0x48] sm:$0xf]  ;;  %v350_v13 = vsub.s32 3, %v822_v32  ;;  %v317_v16 = vmul.f32 %v305_v1, %v293_v56  ;;  %v318_v20 = vmul.f32 %v306_v5, %v294_v57  ;;  %v309_v28 = vld [vmem:[%s1137_s13 + $0x50] sm:$0xf] }
  0x14   :  { %v323_v3 = vmul.f32 %v311_v46, %v287_v25  ;;  %v315_v6 = vmul.f32 %v303_v49, %v291_v43  ;;  %v307_v10 = vld [vmem:[%s1137_s13 + $0x40] sm:$0xf]  ;;  %v354_v23 = vsub.s32 4, %v822_v32  ;;  %v320_v25 = vmul.f32 %v308_v11, %v296_v4  ;;  %v310_v38 = vld [vmem:[%s1137_s13 + $0x58] sm:$0xf] }
  0x15   :  { %v193_v17 = vld [vmem:[%s1131_s7] sm:$0x3]  ;;  %v319_v24 = vmul.f32 %v307_v10, %v295_v63  ;;  %v328_v27 = vmul.f32 %v316_v7, %v292_v44  ;;  %v329_v34 = vmul.f32 %v317_v16, %v293_v56  ;;  %v358_v37 = vsub.s32 5, %v822_v32 }
  0x16   :  { %v623_v53 = vpop.eup %622  ;;  %v194_v18 = vld [vmem:[%s1132_s8] sm:$0x3]  ;;  %v410_v22 = vadd.f32 %v324_v8, %v323_v3  ;;  %v327_v26 = vmul.f32 %v315_v6, %v291_v43  ;;  %v321_v43 = vmul.f32 %v309_v28, %v297_v14  ;;  %v330_v44 = vmul.f32 %v318_v20, %v294_v57 }
  0x17   :  { %v248_v60 = vsub.f32 %v245_v36, %v623_v53  ;;  %v262_v19 = vld [vmem:[%s1143_s19] sm:$0x3f]  ;;  %v195_v30 = vsub.f32 %v193_v17, %v194_v18  ;;  %v414_v45 = vsel %vm382_vm3, %v328_v27, 0.0  ;;  %v322_v51 = vmul.f32 %v310_v38, %v298_v15 }
  0x18   :  { %v411_v29 = vadd.f32 %v410_v22, %v325_v12  ;;  %v902_v31 = vrot.slane %v262_v19, %v338_v52  ;;  %v904_v33 = vrot.slane %v262_v19, %v342_v58  ;;  %v906_v35 = vrot.slane %v262_v19, %v346_v59  ;;  %v929_v57 = vld [vmem:[%s1152_s6] sm:$0x3] }
  0x19   :  { %v250_v9 = vsel %vm249_vm2, %v248_v60, 0.0  ;;  %v908_v36 = vrot.slane %v262_v19, %v350_v13  ;;  %v199_v40 = vmul.f32 %v195_v30, %v760_v0  ;;  %v918_v46 = vrot.slane %v262_v19, %v358_v37 }
  0x1a   :  { %251 = vadd.xlane.f32.xlu0 %v250_v9  ;;  %v412_v39 = vadd.f32 %v411_v29, %v326_v21  ;;  %v366_v41 = vmul.f32 %v902_v31, %v323_v3  ;;  %v367_v42 = vmul.f32 %v904_v33, %v324_v8  ;;  %v920_v49 = vrot.slane %v262_v19, %v354_v23  ;;  %v940_v8 = vld [vmem:[%s1129_s5] sm:$0x3f] }
  0x1b   :  { %v200_v48 = vmul.f32 %v199_v40, %v195_v30  ;;  %v368_v50 = vmul.f32 %v906_v35, %v325_v12  ;;  %v331_v52 = vmul.f32 %v319_v24, %v295_v63  ;;  %v416_v0 = vsel %vm385_vm4, %v329_v34, 0.0 }
  0x1c   :  { %v413_v47 = vadd.f32 %v412_v39, %v327_v26  ;;  %v369_v55 = vmul.f32 %v908_v36, %v326_v21  ;;  %v378_v56 = vadd.f32 %v367_v42, %v366_v41  ;;  %v332_v58 = vmul.f32 %v320_v25, %v296_v4 }
  0x1d   :  { %v202_v54 = vsel %vm201_vm1, %v200_v48, 0.0  ;;  %v418_v59 = vsel %vm385_vm4, %v330_v44, 0.0  ;;  %v371_v60 = vmul.f32 %v918_v46, %v328_v27  ;;  %v333_v61 = vmul.f32 %v321_v43, %v297_v14 }
  0x1e   :  { %v415_v53 = vadd.f32 %v414_v45, %v413_v47  ;;  %203 = vadd.xlane.f32.xlu1 %v202_v54  ;;  %v370_v63 = vmul.f32 %v920_v49, %v327_v26  ;;  %v379_v1 = vadd.f32 %v378_v56, %v368_v50  ;;  %v420_v2 = vsel %vm385_vm4, %v331_v52, 0.0 }
  0x1f   :  { %v372_v3 = vmul.f32 %v902_v31, %v329_v34  ;;  %v71_v5 = vand.u32 2147483647, %v929_v57  ;;  %v334_v6 = vmul.f32 %v322_v51, %v298_v15  ;;  %v422_v9 = vsel %vm385_vm4, %v332_v58, 0.0  ;;  %v949_v15 = vld [vmem:[%s1153_s30] sm:$0x3f] }
  0x20   :  { %v417_v62 = vadd.f32 %v416_v0, %v415_v53  ;;  %v380_v4 = vadd.f32 %v379_v1, %v369_v55  ;;  %v373_v10 = vmul.f32 %v904_v33, %v330_v44  ;;  %v383_v11 = vsel %vm382_vm3, %v371_v60, 0.0 }
  0x21   :  { %v72_v12 = vsub.f32 0.0, %v71_v5  ;;  %v424_v14 = vsel %vm385_vm4, %v333_v61, 0.0 }
  0x22   :  { %v419_v7 = vadd.f32 %v418_v59, %v417_v62  ;;  %v381_v16 = vadd.f32 %v380_v4, %v370_v63 }
  0x24   :  { %v421_v13 = vadd.f32 %v420_v2, %v419_v7 }
  0x25   :  { %25 = vsyncpa [#allocation3], 0  ;;  %v374_v17 = vmul.f32 %v906_v35, %v331_v52  ;;  %v386_v18 = vsel %vm385_vm4, %v372_v3, 0.0  ;;  %v73_v19 = vmul.f32 1.442695, %v72_v12  ;;  %v440_v21 = vld [vmem:[%s1141_s17] sm:$0xff]  ;;  %v375_v24 = vmul.f32 %v908_v36, %v332_v58 }
  0x26   :  { %v148_v20 = vand.u32 2147483647, %v940_v8  ;;  %v423_v22 = vadd.f32 %v422_v9, %v421_v13  ;;  %v426_v23 = vsel %vm396_vm5, %v334_v6, 0.0  ;;  %v384_v25 = vadd.f32 %v383_v11, %v381_v16  ;;  %v441_v26 = vld [vmem:[%s1141_s17 + $0x8] sm:$0xff]  ;;  %v442_v27 = vld [vmem:[%s1141_s17 + $0x10] sm:$0xff]  ;;  %v452_v28 = vld [vmem:[%s1142_s18] sm:$0xff] }
  0x27   :  { %v388_v29 = vsel %vm385_vm4, %v373_v10, 0.0  ;;  %624 = vpow2.f32 %v73_v19  ;;  %v97_v34 = vand.u32 2147483647, %v949_v15  ;;  %v453_v37 = vld [vmem:[%s1142_s18 + $0x8] sm:$0xff]  ;;  %v454_v38 = vld [vmem:[%s1142_s18 + $0x10] sm:$0xff]  ;;  %v376_v40 = vmul.f32 %v920_v49, %v333_v61  ;;  %v443_v42 = vld [vmem:[%s1141_s17 + $0x18] sm:$0xff] }
  0x28   :  { %v149_v30 = vsub.f32 0.0, %v148_v20  ;;  %v425_v39 = vadd.f32 %v424_v14, %v423_v22  ;;  %v387_v41 = vadd.f32 %v386_v18, %v384_v25  ;;  %v390_v43 = vsel %vm385_vm4, %v374_v17, 0.0  ;;  %v444_v47 = vld [vmem:[%s1141_s17 + $0x20] sm:$0xff]  ;;  %v455_v48 = vld [vmem:[%s1142_s18 + $0x18] sm:$0xff]  ;;  %v445_v0 = vld [vmem:[%s1141_s17 + $0x28] sm:$0xff]  ;;  %s1154_s28 = sld [smem:[#allocation9_spill]] }
  0x29   :  { %v98_v45 = vsub.f32 0.0, %v97_v34  ;;  %v464_v50 = vsub.f32 %v440_v21, %v452_v28  ;;  %v457_v53 = vld [vmem:[%s1142_s18 + $0x28] sm:$0xff]  ;;  %v465_v54 = vsub.f32 %v441_v26, %v453_v37  ;;  %v466_v55 = vsub.f32 %v442_v27, %v454_v38  ;;  %v476_v56 = vld [vmem:[%s1140_s16] sm:$0xff]  ;;  %v478_v63 = vld [vmem:[%s1140_s16 + $0x10] sm:$0xff]  ;;  %s1155_s12 = sld [smem:[#allocation7_spill]]  ;;  %s589_s14 = sshll.u32 %s1144_s20, 4  ;;  %s590_s14 = int_to_ptr.vmem [resolvable:$true] %s589_s14 }
  0x2a   :  { %v150_v44 = vmul.f32 1.442695, %v149_v30  ;;  %v427_v51 = vadd.f32 %v426_v23, %v425_v39  ;;  %v389_v52 = vadd.f32 %v388_v29, %v387_v41  ;;  %v377_v58 = vmul.f32 %v918_v46, %v334_v6  ;;  %v456_v61 = vld [vmem:[%s1142_s18 + $0x20] sm:$0xff]  ;;  %v477_v62 = vld [vmem:[%s1140_s16 + $0x8] sm:$0xff]  ;;  %v446_v2 = vld [vmem:[%s1141_s17 + $0x30] sm:$0xf]  ;;  %p641_p1 = scmp.lt.s32.totalorder %s590_s14, %s590_s14 }
  0x2b   :  { %v392_v59 = vsel %vm385_vm4, %v375_v24, 0.0  ;;  %v99_v60 = vmul.f32 1.442695, %v98_v45  ;;  %v458_v3 = vld [vmem:[%s1142_s18 + $0x30] sm:$0xf]  ;;  %v467_v5 = vsub.f32 %v443_v42, %v455_v48  ;;  %v394_v6 = vsel %vm385_vm4, %v376_v40, 0.0 }
  0x2c   :  { %626 = vpow2.f32 %v150_v44  ;;  %428 = vadd.xlane.f32.xlu0 %v427_v51  ;;  %v391_v1 = vadd.f32 %v390_v43, %v389_v52  ;;  %v469_v7 = vsub.f32 %v445_v0, %v457_v53  ;;  %v479_v4 = vld [vmem:[%s1140_s16 + $0x18] sm:$0xff]  ;;  %v488_v9 = vmul.f32 %v476_v56, %v464_v50  ;;  %v481_v14 = vld [vmem:[%s1140_s16 + $0x28] sm:$0xff]  ;;  %v480_v20 = vld [vmem:[%s1140_s16 + $0x20] sm:$0xff]  ;;  %s636_s3 = scalar_lea.vmem %s590_s14, 16 }
  0x2d   :  { %628 = vpow2.f32 %v99_v60  ;;  %v447_v11 = vld [vmem:[%s1141_s17 + $0x38] sm:$0xf]  ;;  %v468_v13 = vsub.f32 %v444_v47, %v456_v61  ;;  %v489_v16 = vmul.f32 %v477_v62, %v465_v54  ;;  %v490_v17 = vmul.f32 %v478_v63, %v466_v55  ;;  %v448_v22 = vld [vmem:[%s1141_s17 + $0x40] sm:$0xf]  ;;  %v482_v24 = vld [vmem:[%s1140_s16 + $0x30] sm:$0xf]  ;;  %p637_p0 = scmp.ne.s32.totalorder %s590_s14, %s636_s3  ;;  %p642_p2 = scmp.lt.s32.totalorder %s636_s3, %s636_s3 }
  0x2e   :  { %v393_v10 = vadd.f32 %v392_v59, %v391_v1  ;;  %v459_v12 = vld [vmem:[%s1142_s18 + $0x38] sm:$0xf]  ;;  %v397_v18 = vsel %vm396_vm5, %v377_v58, 0.0  ;;  %v470_v19 = vsub.f32 %v446_v2, %v458_v3  ;;  %v460_v23 = vld [vmem:[%s1142_s18 + $0x40] sm:$0xf]  ;;  %v491_v25 = vmul.f32 %v479_v4, %v467_v5 }
  0x2f   :  { %v449_v27 = vld [vmem:[%s1141_s17 + $0x48] sm:$0xf]  ;;  %v471_v29 = vsub.f32 %v447_v11, %v459_v12  ;;  %v493_v30 = vmul.f32 %v481_v14, %v469_v7  ;;  %v500_v34 = vmul.f32 %v488_v9, %v464_v50  ;;  %v501_v37 = vmul.f32 %v489_v16, %v465_v54  ;;  %v483_v40 = vld [vmem:[%s1140_s16 + $0x38] sm:$0xf]  ;;  %v66_v43 = vld [vmem:[%s1151_s4] sm:$0x3]  ;;  %p643_p3 = por %p642_p2, %p641_p1 }
  0x30   :  { %v395_v21 = vadd.f32 %v394_v6, %v393_v10  ;;  %v461_v28 = vld [vmem:[%s1142_s18 + $0x48] sm:$0xf]  ;;  %v492_v41 = vmul.f32 %v480_v20, %v468_v13  ;;  %v502_v42 = vmul.f32 %v490_v17, %v466_v55  ;;  %v68_v44 = vmax.f32 %v929_v57, 0.0  ;;  %v450_v45 = vld [vmem:[%s1141_s17 + $0x50] sm:$0xf] }
  0x31   :  { %v625_v26 = vpop.eup %624  ;;  %v472_v47 = vsub.f32 %v448_v22, %v460_v23  ;;  %v494_v48 = vmul.f32 %v482_v24, %v470_v19  ;;  %v462_v50 = vld [vmem:[%s1142_s18 + $0x50] sm:$0xf]  ;;  %v473_v51 = vsub.f32 %v449_v27, %v461_v28  ;;  %v484_v52 = vld [vmem:[%s1140_s16 + $0x40] sm:$0xf]  ;;  %v503_v0 = vmul.f32 %v491_v25, %v467_v5  ;;  %v485_v61 = vld [vmem:[%s1140_s16 + $0x48] sm:$0xf]  ;;  %p644_p4 = pnand %p643_p3, %p637_p0 }
  0x32   :  { %v398_v38 = vadd.f32 %v397_v18, %v395_v21  ;;  %v75_v39 = vadd.f32 1.0, %v625_v26  ;;  %v495_v54 = vmul.f32 %v483_v40, %v471_v29  ;;  %v505_v55 = vmul.f32 %v493_v30, %v469_v7  ;;  %v143_v5 = vld [vmem:[%s1154_s28] sm:$0x3f]  ;;  %v451_v9 = vld [vmem:[%s1141_s17 + $0x58] sm:$0xf] }
  0x33   :  { %v512_v56 = vmul.f32 %v500_v34, %v902_v31  ;;  %v513_v58 = vmul.f32 %v501_v37, %v904_v33  ;;  %v69_v59 = vmul.f32 %v929_v57, %v66_v43  ;;  %v504_v62 = vmul.f32 %v492_v41, %v468_v13  ;;  %v463_v13 = vld [vmem:[%s1142_s18 + $0x58] sm:$0xf]  ;;  %v486_v14 = vld [vmem:[%s1140_s16 + $0x50] sm:$0xf]  ;;  %v92_v23 = vld [vmem:[%s1155_s12] sm:$0x3f] }
  0x34   :  { %399 = vadd.xlane.f32.xlu1 %v398_v38  ;;  %630 = vlog2.f32 %v75_v39  ;;  %v514_v63 = vmul.f32 %v502_v42, %v906_v35  ;;  %v650_v2 = vmov 1983009808   ;;  %v474_v6 = vsub.f32 %v450_v45, %v462_v50 }
  0x35   :  { %v108_v3 = vunpack.c.l.s4 %v650_v2  ;;  %v496_v7 = vmul.f32 %v484_v52, %v472_v47  ;;  %v506_v4 = vmul.f32 %v494_v48, %v470_v19  ;;  %v515_v10 = vmul.f32 %v503_v0, %v908_v36 }
  0x36   :  { %v627_v53 = vpop.eup %626  ;;  %v524_v11 = vadd.f32 %v513_v58, %v512_v56  ;;  %v145_v12 = vmax.f32 %v940_v8, 0.0  ;;  %v497_v16 = vmul.f32 %v485_v61, %v473_v51  ;;  %v507_v17 = vmul.f32 %v495_v54, %v471_v29 }
  0x37   :  { %v152_v60 = vadd.f32 1.0, %v627_v53  ;;  %v629_v1 = vpop.eup %628  ;;  %v517_v18 = vmul.f32 %v505_v55, %v918_v46  ;;  %v146_v19 = vmul.f32 %v940_v8, %v143_v5  ;;  %v516_v20 = vmul.f32 %v504_v62, %v920_v49  ;;  %v487_v8 = vld [vmem:[%s1140_s16 + $0x58] sm:$0xf] }
  0x38   :  { %v101_v57 = vadd.f32 1.0, %v629_v1  ;;  %v525_v21 = vadd.f32 %v524_v11, %v514_v63  ;;  %v70_v22 = vsub.f32 %v68_v44, %v69_v59  ;;  %v508_v24 = vmul.f32 %v496_v7, %v472_v47 }
  0x39   :  { %632 = vlog2.f32 %v152_v60  ;;  %v518_v25 = vmul.f32 %v506_v4, %v902_v31  ;;  %v553_v26 = vadd.f32 %v501_v37, %v500_v34  ;;  %v109_v27 = vunpack.c.0.s8 %v108_v3 }
  0x3a   :  { %634 = vlog2.f32 %v101_v57  ;;  %v475_v28 = vsub.f32 %v451_v9, %v463_v13  ;;  %v498_v29 = vmul.f32 %v486_v14, %v474_v6  ;;  %v526_v30 = vadd.f32 %v525_v21, %v515_v10 }
  0x3b   :  { %v509_v38 = vmul.f32 %v497_v16, %v473_v51  ;;  %v519_v39 = vmul.f32 %v507_v17, %v904_v33  ;;  %v528_v40 = vsel %vm382_vm3, %v517_v18, 0.0  ;;  %v554_v41 = vadd.f32 %v553_v26, %v502_v42 }
  0x3c   :  { %v147_v44 = vsub.f32 %v145_v12, %v146_v19  ;;  %v94_v45 = vmax.f32 %v949_v15, 0.0  ;;  %v95_v31 = vmul.f32 %v949_v15, %v92_v23  ;;  %v527_v34 = vadd.f32 %v526_v30, %v516_v20 }
  0x3d   :  { %v520_v47 = vmul.f32 %v508_v24, %v906_v35  ;;  %v530_v48 = vsel %vm385_vm4, %v518_v25, 0.0  ;;  %v555_v50 = vadd.f32 %v554_v41, %v503_v0  ;;  %v499_v52 = vmul.f32 %v487_v8, %v475_v28 }
  0x3e   :  { %v631_v43 = vpop.eup %630  ;;  %v510_v51 = vmul.f32 %v498_v29, %v474_v6  ;;  %v529_v53 = vadd.f32 %v528_v40, %v527_v34  ;;  %v557_v33 = vsel %vm382_vm3, %v505_v55, 0.0  ;;  %v521_v42 = vmul.f32 %v509_v38, %v908_v36 }
  0x3f   :  { %v77_v37 = vmul.f32 0.6931472, %v631_v43  ;;  %v532_v56 = vsel %vm385_vm4, %v519_v39, 0.0  ;;  %v556_v58 = vadd.f32 %v555_v50, %v504_v62  ;;  %v112_v15 = vsub.s32 %v109_v27, %v822_v32 }
  0x40   :  { %v96_v60 = vsub.f32 %v94_v45, %v95_v31  ;;  %v531_v61 = vadd.f32 %v530_v48, %v529_v53  ;;  %v559_v35 = vsel %vm385_vm4, %v506_v4, 0.0  ;;  %v534_v1 = vsel %vm385_vm4, %v520_v47, 0.0 }
  0x41   :  { %v78_v54 = vadd.f32 %v77_v37, %v70_v22  ;;  %v558_v2 = vadd.f32 %v557_v33, %v556_v58  ;;  %v511_v3 = vmul.f32 %v499_v52, %v475_v28  ;;  %v522_v36 = vmul.f32 %v510_v51, %v920_v49 }
  0x42   :  { %v533_v5 = vadd.f32 %v532_v56, %v531_v61  ;;  %v561_v62 = vsel %vm385_vm4, %v507_v17, 0.0  ;;  %v536_v7 = vsel %vm385_vm4, %v521_v42, 0.0  ;;  %vm125_vm6 = vcmask 1041408  }
  0x43   :  { %v633_v59 = vpop.eup %632  ;;  %v80_v0 = vsel %vm79_vm0, %v78_v54, 0.0  ;;  %v560_v57 = vadd.f32 %v559_v35, %v558_v2  ;;  %v563_v9 = vsel %vm385_vm4, %v508_v24, 0.0  ;;  %vm129_vm7 = vcmask 353280  }
  0x44   :  { %v154_v63 = vmul.f32 0.6931472, %v633_v59  ;;  %v635_v55 = vpop.eup %634  ;;  %81 = vadd.xlane.f32.xlu0 %v80_v0  ;;  %v535_v4 = vadd.f32 %v534_v1, %v533_v5  ;;  %v523_v14 = vmul.f32 %v511_v3, %v918_v46  ;;  %v538_v16 = vsel %vm385_vm4, %v522_v36, 0.0 }
  0x45   :  { %v103_v32 = vmul.f32 0.6931472, %v635_v55  ;;  %v562_v13 = vadd.f32 %v561_v62, %v560_v57  ;;  %v565_v23 = vsel %vm385_vm4, %v509_v38, 0.0  ;;  %v567_v27 = vsel %vm385_vm4, %v510_v51, 0.0 }
  0x46   :  { %v155_v6 = vadd.f32 %v154_v63, %v147_v44  ;;  %v537_v49 = vadd.f32 %v536_v7, %v535_v4  ;;  %v540_v8 = vsel %vm396_vm5, %v523_v14, 0.0  ;;  %v569_v31 = vsel %vm396_vm5, %v511_v3, 0.0 }
  0x47   :  { %v104_v12 = vadd.f32 %v103_v32, %v96_v60  ;;  %v564_v22 = vadd.f32 %v563_v9, %v562_v13 }
  0x48   :  { %v157_v10 = vcombine.high %v155_v6, %v155_v6  ;;  %v164_v11 = vrot.slane %v155_v6, %v112_v15  ;;  %v539_v30 = vadd.f32 %v538_v16, %v537_v49 }
  0x49   :  { %v106_v20 = vcombine.high %v104_v12, %v104_v12  ;;  %v113_v21 = vrot.slane %v104_v12, %v112_v15  ;;  %v566_v39 = vadd.f32 %v565_v23, %v564_v22 }
  0x4a   :  { %v171_v17 = vrot.slane %v157_v10, %v112_v15  ;;  %v172_v18 = vcombine.high %v164_v11, %v164_v11  ;;  %v176_v19 = vsel %vm125_vm6, %v164_v11, 0.0  ;;  %v541_v45 = vadd.f32 %v540_v8, %v539_v30 }
  0x4b   :  { %v120_v26 = vrot.slane %v106_v20, %v112_v15  ;;  %v121_v28 = vcombine.high %v113_v21, %v113_v21  ;;  %v126_v29 = vsel %vm125_vm6, %v113_v21, 0.0  ;;  %v568_v44 = vadd.f32 %v567_v27, %v566_v39 }
  0x4c   :  { %v177_v24 = vsel %vm125_vm6, %v172_v18, 0.0  ;;  %v179_v25 = vsel %vm129_vm7, %v171_v17, 0.0 }
  0x4d   :  { %v178_v46 = vadd.f32 %v177_v24, %v176_v19  ;;  %v127_v41 = vsel %vm125_vm6, %v121_v28, 0.0  ;;  %v130_v38 = vsel %vm129_vm7, %v120_v26, 0.0  ;;  %v570_v37 = vadd.f32 %v569_v31, %v568_v44 }
  0x4e   :  { %v128_v43 = vadd.f32 %v127_v41, %v126_v29 }
  0x4f   :  { %v180_v40 = vadd.f32 %v179_v25, %v178_v46 }
  0x50   :  { %v131_v34 = vadd.f32 %v130_v38, %v128_v43 }
  0x51   :  { %181 = vadd.xlane.f32.xlu1 %v180_v40 }
  0x52   :  { %132 = vadd.xlane.f32.xlu0 %v131_v34 }
  0x55   :  { %542 = vadd.xlane.f32.xlu1 %v541_v45 }
  0x56   :  { %571 = vadd.xlane.f32.xlu0 %v570_v37 }
  0x9b   :  { %v231_v50 = vpop.xlane.xlu1 %230 }
  0x9c   :  { %v232_v61 = vrot.slane %v231_v50, 4 }
  0x9d   :  { %v218_v47 = vpop.xlane.xlu0 %217 }
  0x9e   :  { %v219_v15 = vrot.slane %v218_v47, 4  ;;  %v233_v5 = vadd.f32 %v232_v61, %v231_v50 }
  0xa0   :  { %v220_v55 = vadd.f32 %v219_v15, %v218_v47  ;;  %v234_v14 = vrot.slane %v233_v5, 2 }
  0xa2   :  { %v221_v10 = vrot.slane %v220_v55, 2  ;;  %v235_v29 = vadd.f32 %v234_v14, %v233_v5 }
  0xa4   :  { %v222_v27 = vadd.f32 %v221_v10, %v220_v55  ;;  %v236_v37 = vrot.slane %v235_v29, 1 }
  0xa6   :  { %v223_v44 = vrot.slane %v222_v27, 1 }
  0xa7   :  { %v252_v48 = vpop.xlane.xlu0 %251 }
  0xa8   :  { %v253_v35 = vrot.slane %v252_v48, 4 }
  0xaa   :  { %v254_v62 = vadd.f32 %v253_v35, %v252_v48 }
  0xab   :  { %v204_v33 = vpop.xlane.xlu1 %203 }
  0xac   :  { %v205_v56 = vrot.slane %v204_v33, 4  ;;  %v255_v16 = vrot.slane %v254_v62, 2 }
  0xae   :  { %v206_v0 = vadd.f32 %v205_v56, %v204_v33  ;;  %v256_v8 = vadd.f32 %v255_v16, %v254_v62 }
  0xb0   :  { %v207_v6 = vrot.slane %v206_v0, 2  ;;  %v257_v47 = vrot.slane %v256_v8, 1 }
  0xb2   :  { %v208_v20 = vadd.f32 %v207_v6, %v206_v0 }
  0xb4   :  { %v209_v30 = vrot.slane %v208_v20, 1 }
  0xb6   :  { %v210_v48 = vadd.f32 %v209_v30, %v208_v20 }
  0xb9   :  { %v429_v52 = vpop.xlane.xlu0 %428 }
  0xba   :  { %v430_v3 = vrot.slane %v429_v52, 4 }
  0xbc   :  { %v431_v11 = vadd.f32 %v430_v3, %v429_v52 }
  0xbe   :  { %v432_v24 = vrot.slane %v431_v11, 2 }
  0xc0   :  { %v433_v45 = vadd.f32 %v432_v24, %v431_v11 }
  0xc1   :  { %v400_v59 = vpop.xlane.xlu1 %399 }
  0xc2   :  { %v401_v1 = vrot.slane %v400_v59, 4 }
  0xc4   :  { %v402_v57 = vadd.f32 %v401_v1, %v400_v59 }
  0xc6   :  { %v403_v21 = vrot.slane %v402_v57, 2 }
  0xc8   :  { %v404_v38 = vadd.f32 %v403_v21, %v402_v57 }
  0xca   :  { %v405_v50 = vrot.slane %v404_v38, 1 }
  0xcc   :  { %v406_v56 = vadd.f32 %v405_v50, %v404_v38 }
  0xd1   :  { %v82_v51 = vpop.xlane.xlu0 %81 }
  0xd2   :  { %v83_v53 = vrot.slane %v82_v51, 4 }
  0xd4   :  { %v84_v54 = vadd.f32 %v83_v53, %v82_v51  ;;  %v224_v51 = vadd.f32 %v223_v44, %v222_v27  ;;  %v434_v53 = vrot.slane %v433_v45, 1 }
  0xd6   :  { %v85_v42 = vrot.slane %v84_v54, 2  ;;  %v435_v59 = vadd.f32 %v434_v53, %v433_v45 }
  0xd8   :  { %v86_v58 = vadd.f32 %v85_v42, %v84_v54  ;;  %v237_v54 = vadd.f32 %v236_v37, %v235_v29  ;;  %v258_v42 = vadd.f32 %v257_v47, %v256_v8 }
  0xda   :  { %v87_v60 = vrot.slane %v86_v58, 1 }
  0xdc   :  { %v88_v63 = vadd.f32 %v87_v60, %v86_v58 }
  0xde   :  { %v182_v2 = vpop.xlane.xlu1 %181  ;;  %598 = vpush %v88_v63 }
  0xdf   :  { %v183_v36 = vrot.slane %v182_v2, 4  ;;  %v133_v7 = vpop.xlane.xlu0 %132 }
  0xe0   :  { %v134_v4 = vrot.slane %v133_v7, 4 }
  0xe1   :  { %v184_v32 = vadd.f32 %v183_v36, %v182_v2 }
  0xe2   :  { %v543_v9 = vpop.xlane.xlu1 %542  ;;  %v135_v49 = vadd.f32 %v134_v4, %v133_v7 }
  0xe3   :  { %v185_v12 = vrot.slane %v184_v32, 2  ;;  %v544_v13 = vrot.slane %v543_v9, 4  ;;  %v572_v18 = vpop.xlane.xlu0 %571 }
  0xe4   :  { %v136_v22 = vrot.slane %v135_v49, 2  ;;  %v573_v23 = vrot.slane %v572_v18, 4 }
  0xe5   :  { %v545_v17 = vadd.f32 %v544_v13, %v543_v9  ;;  %v186_v19 = vadd.f32 %v185_v12, %v184_v32 }
  0xe6   :  { %v574_v46 = vadd.f32 %v573_v23, %v572_v18  ;;  %v137_v28 = vadd.f32 %v136_v22, %v135_v49 }
  0xe7   :  { %v546_v25 = vrot.slane %v545_v17, 2  ;;  %v187_v26 = vrot.slane %v186_v19, 1 }
  0xe8   :  { %v575_v40 = vrot.slane %v574_v46, 2  ;;  %v138_v41 = vrot.slane %v137_v28, 1 }
  0xe9   :  { %v547_v39 = vadd.f32 %v546_v25, %v545_v17  ;;  %v188_v43 = vadd.f32 %v187_v26, %v186_v19 }
  0xea   :  { %v576_v31 = vadd.f32 %v575_v40, %v574_v46  ;;  %v139_v34 = vadd.f32 %v138_v41, %v137_v28 }
  0xeb   :  { %v548_v52 = vrot.slane %v547_v39, 1 }
  0xec   :  { %600 = vpush %v139_v34  ;;  %v577_v33 = vrot.slane %v576_v31, 1 }
  0xed   :  { %602 = vpush %v188_v43  ;;  %v549_v58 = vadd.f32 %v548_v52, %v547_v39 }
  0xee   :  { %604 = vpush %v210_v48  ;;  %v578_v15 = vadd.f32 %v577_v33, %v576_v31 }
  0xef   :  { %606 = vpush %v224_v51 }
  0xf0   :  { %608 = vpush %v237_v54 }
  0xf1   :  { %610 = vpush %v258_v42 }
  0xf2   :  { %612 = vpush %v406_v56 }
  0xf3   :  { %614 = vpush %v435_v59 }
  0xf4   :  { %616 = vpush %v549_v58 }
  0xf5   :  { %618 = vpush %v578_v15 }
 0x10f   :  { %s599_s16 = spop %598 }
 0x110   :  { %91 = sst [smem:[#allocation2]] %s599_s16 }
 0x11d   :  { %s601_s30 = spop %600 }
 0x11e   :  { %142 = sst [smem:[#allocation2 + $0x1]] %s601_s30  ;;  %s603_s21 = spop %602 }
 0x11f   :  { %191 = sst [smem:[#allocation2 + $0x2]] %s603_s21  ;;  %s605_s1 = spop %604 }
 0x120   :  { %213 = sst [smem:[#allocation2 + $0x3]] %s605_s1  ;;  %s607_s15 = spop %606 }
 0x121   :  { %227 = sst [smem:[#allocation2 + $0x4]] %s607_s15  ;;  %s609_s22 = spop %608 }
 0x122   :  { %240 = sst [smem:[#allocation2 + $0x5]] %s609_s22  ;;  %s611_s11 = spop %610 }
 0x123   :  { %261 = sst [smem:[#allocation2 + $0x6]] %s611_s11  ;;  %s613_s23 = spop %612 }
 0x124   :  { %409 = sst [smem:[#allocation2 + $0x7]] %s613_s23  ;;  %s615_s24 = spop %614 }
 0x125   :  { %s437_s2 = ssub.f32 %s615_s24, %s613_s23  ;;  %s617_s25 = spop %616 }
 0x126   :  { %552 = sst [smem:[#allocation2 + $0x9]] %s617_s25  ;;  %s619_s4 = spop %618 }
 0x127   :  { %439 = sst [smem:[#allocation2 + $0x8]] %s437_s2 }
 0x128   :  { %s580_s20 = ssub.f32 %s619_s4, %s617_s25 }
 0x12a   :  { %582 = sst [smem:[#allocation2 + $0xa]] %s580_s20 }
 0x12b   :  { %647 = shalt.err (!%p644_p4)
}
 0x12c   :  { %s651_s26 = smov [#allocation2]  }
 0x12d   :  { %592 = dma.smem_to_vmem %s651_s26, 16, %s590_s14, [#allocation3]  }
 0x12e   :  { %648 = dma.done.wait [#allocation3], 16  }
 0x12f   :  { %649 = vsyncadd [#allocation3], 4294967280 }
 0x130   :  { %596 = sfence }
 0x131   :  { %597 = vsyncpa [#allocation3], 1 }

// kernel: ddpm_forward.22
= control target key start
LH: loop header
LB: loop body
LE: loop exit
PB: predicated region body
PF: predicated region fallthrough
CT: control target
= control target key end

     0   :  { %17 = vsyncpa [#allocation3], 0  ;;  %s25576_s0 = inlined_call_operand.vmem [shape: f32[2,1], index: 0, kind: input, shape index: {}]   ;;  %s25577_s1 = inlined_call_operand.vmem [shape: f32[2,1], index: 1, kind: input, shape index: {}]   ;;  %s25578_s2 = inlined_call_operand.vmem [shape: f32[2,11776], index: 2, kind: input, shape index: {}]   ;;  %s25579_s3 = inlined_call_operand.vmem [shape: f32[2,11776], index: 3, kind: input, shape index: {}]   ;;  %s25580_s4 = inlined_call_operand.vmem [shape: f32[2,128], index: 4, kind: input, shape index: {}]   ;;  %s25581_s5 = inlined_call_operand.vmem [shape: bf16[11776,128], index: 5, kind: input, shape index: {}]   ;;  %s25582_s6 = inlined_call_operand.vmem [shape: bf16[128,128], index: 6, kind: input, shape index: {}]   ;;  %s25583_s7 = inlined_call_operand.vmem [shape: f32[1,128], index: 7, kind: input, shape index: {}]   ;;  %s25584_s8 = inlined_call_operand.hbm [shape: bf16[128,11776], index: 8, kind: input, shape index: {}]   ;;  %s25585_s9 = inlined_call_operand.vmem [shape: f32[1,11776], index: 9, kind: input, shape index: {}]   ;;  %s25586_s10 = inlined_call_operand.vmem [shape: f32[2,11776], index: 10, kind: output, shape index: {0}]   ;;  %s25587_s11 = inlined_call_operand.hbm [shape: f32[1], index: 11, kind: output, shape index: {1}]  }
   0x1   :  { %18 = vsyncpa [#allocation4], 0  ;;  %s21510_s17 = smov [#allocation2]   ;;  %s21474_s21 = scalar_lea.hbm %s25584_s8, 94208 }
   0x2   :  { %s40_s18 = sshll.u32 %s21510_s17, 4  ;;  %p21475_p0 = scmp.ne.s32.totalorder %s25584_s8, %s21474_s21  ;;  %s41_s18 = int_to_ptr.vmem [resolvable:$true] %s40_s18 }
   0x3   :  { %p21478_p1 = scmp.lt.u32.totalorder %s21474_s21, %s25584_s8 }
   0x5   :  { %p21480_p2 = pnand %p21478_p1, %p21475_p0 }
   0x7   :  { %21483 = shalt.err (!%p21480_p2)
}
   0x8   :  { %s21484_s26 = scalar_lea.vmem %s41_s18, 94208  ;;  %p21489_p4 = scmp.lt.s32.totalorder %s41_s18, %s41_s18 }
   0x9   :  { %p21485_p3 = scmp.ne.s32.totalorder %s41_s18, %s21484_s26  ;;  %p21490_p5 = scmp.lt.s32.totalorder %s21484_s26, %s21484_s26 }
   0xb   :  { %p21491_p6 = por %p21490_p5, %p21489_p4 }
   0xd   :  { %p21492_p7 = pnand %p21491_p6, %p21485_p3 }
   0xf   :  { %21495 = shalt.err (!%p21492_p7)
}
  0x10   :  { %s21511_s27 = smov 5888   ;;  %s21512_s28 = smov 368  }
  0x11   :  { %46 = dma.hbm_to_vmem [thread:$0]  %s25584_s8, 94208, %s41_s18, [#allocation3], %s21511_s27, %s21511_s27, %s21512_s28  }
  0x12   :  { %21506 = dma.done.wait [#allocation3], 94208  }
  0x13   :  { %21507 = vsyncadd [#allocation3], 4294873088  ;;  %v25588_v0 = vmov 0   ;;  %v21514_v1 = vmov 0.0   ;;  %vm21515_vm0 = vmmov 0   ;;  %v19580_v3 = vld [vmem:[%s25582_s6] sm:$0xff]   ;;  %v132_v50 = vlaneseq }
  0x14   :  { %19579 = vset.pattern.permute.xlu0 %v25588_v0  ;;  %19549 = vmatprep.subr.bf16.mxu0 %v21514_v1  ;;  %v76_v2 = vld [vmem:[%s25576_s0] sm:$0x3]  ;;  %v19581_v5 = vld [vmem:[%s25582_s6 + $0x8] sm:$0xff]   ;;  %v19582_v6 = vld [vmem:[%s25582_s6 + $0x10] sm:$0xff]   ;;  %v21516_v48 = vmov 1983009808  }
  0x15   :  { %19565 = vmatprep.mubr.msk.bf16.mxu0 %vm21515_vm0, %v21514_v1  ;;  %102 = vperm.xlu0 %19579, %v76_v2   ;;  %v703_v4 = vld [vmem:[%s25577_s1] sm:$0x3]  ;;  %v19583_v8 = vld [vmem:[%s25582_s6 + $0x18] sm:$0xff]   ;;  %v19592_v10 = vld [vmem:[%s25581_s5 + $0x48] sm:$0xff]   ;;  %v130_v49 = vunpack.c.l.s4 %v21516_v48  ;;  %v21729_v53 = vshrl.u32 %v132_v50, 7  ;;  %vm16834_vm1 = vcmask 1041408  }
  0x16   :  { %19550 = vmatpush3.bf16.msra.mxu0 %v19580_v3  ;;  %v19588_v7 = vld [vmem:[%s25581_s5 + $0x40] sm:$0xff]   ;;  %v19594_v12 = vld [vmem:[%s25581_s5 + $0x8] sm:$0xff]   ;;  %v19596_v13 = vld [vmem:[%s25581_s5 + $0x50] sm:$0xff]  }
  0x17   :  { %19551 = vmatprep.subr.bf16.mxu0 %v21514_v1  ;;  %18537 = vmatprep.subr.bf16.mxu1 %v19588_v7  ;;  %v19590_v9 = vld [vmem:[%s25581_s5] sm:$0xff]   ;;  %v19585_v14 = vld [vmem:[%s25582_s6 + $0x28] sm:$0xff]   ;;  %v19598_v15 = vld [vmem:[%s25581_s5 + $0x10] sm:$0xff]   ;;  %v131_v52 = vunpack.c.0.s8 %v130_v49 }
  0x18   :  { %18538 = vmatpush3.bf16.msra.mxu1 %v19590_v9  ;;  %v19584_v11 = vld [vmem:[%s25582_s6 + $0x20] sm:$0xff]   ;;  %v19600_v16 = vld [vmem:[%s25581_s5 + $0x58] sm:$0xff]   ;;  %v19586_v17 = vld [vmem:[%s25582_s6 + $0x30] sm:$0xff]  }
  0x19   :  { %706 = vperm.xlu0 %19579, %v703_v4   ;;  %18539 = vmatprep.subr.bf16.mxu1 %v19592_v10  ;;  %v19602_v18 = vld [vmem:[%s25581_s5 + $0x18] sm:$0xff]   ;;  %v19604_v20 = vld [vmem:[%s25581_s5 + $0x60] sm:$0xff]   ;;  %v19608_v24 = vld [vmem:[%s25581_s5 + $0x68] sm:$0xff]   ;;  %v21741_v58 = vsub.s32 %v131_v52, %v21729_v53 }
  0x1a   :  { %19552 = vmatpush3.bf16.msra.mxu0 %v19581_v5  ;;  %v19587_v19 = vld [vmem:[%s25582_s6 + $0x38] sm:$0xff]   ;;  %v2963_v21 = vld [vmem:[%s25580_s4] sm:$0x3]  ;;  %v19610_v27 = vld [vmem:[%s25581_s5 + $0x28] sm:$0xff]  }
  0x1b   :  { %19553 = vmatprep.subr.bf16.mxu0 %v21514_v1  ;;  %v19606_v22 = vld [vmem:[%s25581_s5 + $0x20] sm:$0xff]   ;;  %v2964_v25 = vpack.c.bf16 %v2963_v21, %v2963_v21  ;;  %v19593_v28 = vld [vmem:[%s25581_s5 + $0xc8] sm:$0xff]   ;;  %v19612_v29 = vld [vmem:[%s25581_s5 + $0x70] sm:$0xff]  }
  0x1c   :  { %18540 = vmatpush3.bf16.msra.mxu1 %v19594_v12  ;;  %v19589_v23 = vld [vmem:[%s25581_s5 + $0xc0] sm:$0xff]   ;;  %v19595_v30 = vld [vmem:[%s25581_s5 + $0x88] sm:$0xff]   ;;  %v19614_v31 = vld [vmem:[%s25581_s5 + $0x30] sm:$0xff]  }
  0x1d   :  { %18541 = vmatprep.subr.bf16.mxu1 %v19596_v13  ;;  %v19591_v26 = vld [vmem:[%s25581_s5 + $0x80] sm:$0xff]   ;;  %v19597_v32 = vld [vmem:[%s25581_s5 + $0xd0] sm:$0xff]   ;;  %v19616_v33 = vld [vmem:[%s25581_s5 + $0x78] sm:$0xff]  }
  0x1e   :  { %19554 = vmatpush3.bf16.msra.mxu0 %v19582_v6  ;;  %v19599_v34 = vld [vmem:[%s25581_s5 + $0x90] sm:$0xff]   ;;  %v19618_v35 = vld [vmem:[%s25581_s5 + $0x38] sm:$0xff]   ;;  %v19622_v37 = vld [vmem:[%s25581_s5 + $0x140] sm:$0xff]  }
  0x1f   :  { %19555 = vmatprep.subr.bf16.mxu0 %v21514_v1  ;;  %v19601_v36 = vld [vmem:[%s25581_s5 + $0xd8] sm:$0xff]   ;;  %v19605_v39 = vld [vmem:[%s25581_s5 + $0xe0] sm:$0xff]   ;;  %v19609_v41 = vld [vmem:[%s25581_s5 + $0xe8] sm:$0xff]  }
  0x20   :  { %18542 = vmatpush3.bf16.msra.mxu1 %v19598_v15  ;;  %v19603_v38 = vld [vmem:[%s25581_s5 + $0x98] sm:$0xff]   ;;  %v19607_v40 = vld [vmem:[%s25581_s5 + $0xa0] sm:$0xff]   ;;  %v19611_v42 = vld [vmem:[%s25581_s5 + $0xa8] sm:$0xff]  }
  0x21   :  { %18543 = vmatprep.subr.bf16.mxu1 %v19600_v16  ;;  %v19613_v43 = vld [vmem:[%s25581_s5 + $0xf0] sm:$0xff]   ;;  %v19617_v45 = vld [vmem:[%s25581_s5 + $0xf8] sm:$0xff]   ;;  %v19623_v47 = vld [vmem:[%s25581_s5 + $0x1c0] sm:$0xff]  }
  0x22   :  { %19556 = vmatpush3.bf16.msra.mxu0 %v19583_v8  ;;  %v19615_v44 = vld [vmem:[%s25581_s5 + $0xb0] sm:$0xff]   ;;  %v19619_v46 = vld [vmem:[%s25581_s5 + $0xb8] sm:$0xff]   ;;  %v53_v51 = vld [vmem:[%s25579_s3] sm:$0xff] }
  0x23   :  { %19557 = vmatprep.subr.bf16.mxu0 %v21514_v1  ;;  %v77_v54 = vld [vmem:[%s25578_s2] sm:$0xff]  ;;  %v54_v55 = vld [vmem:[%s25579_s3 + $0x8] sm:$0xff]  ;;  %v732_v59 = vcombine.high %v53_v51, %v53_v51  ;;  %v19633_v48 = vld [vmem:[%s25581_s5 + $0x1d0] sm:$0xff]  }
  0x24   :  { %18544 = vmatpush3.bf16.msra.mxu1 %v19602_v18  ;;  %v78_v56 = vld [vmem:[%s25578_s2 + $0x8] sm:$0xff]  ;;  %v128_v57 = vcombine.high %v77_v54, %v77_v54  ;;  %v749_v61 = vcombine.high %v54_v55, %v54_v55  ;;  %v135_v62 = vrot.slane %v77_v54, %v21741_v58  ;;  %v21755_v4 = vrot.slane %v54_v55, %v21741_v58  ;;  %v19634_v49 = vld [vmem:[%s25581_s5 + $0x110] sm:$0xff]   ;;  %v19637_v52 = vld [vmem:[%s25581_s5 + $0x1d8] sm:$0xff]  }
  0x25   :  { %18545 = vmatprep.subr.bf16.mxu1 %v19604_v20  ;;  %v145_v60 = vcombine.high %v78_v56, %v78_v56  ;;  %v21749_v2 = vrot.slane %v732_v59, %v21741_v58  ;;  %v21752_v3 = vrot.slane %v78_v56, %v21741_v58  ;;  %v19635_v50 = vld [vmem:[%s25581_s5 + $0x190] sm:$0xff]   ;;  %v19638_v54 = vld [vmem:[%s25581_s5 + $0x118] sm:$0xff]   ;;  %v19640_v56 = vld [vmem:[%s25581_s5 + $0x160] sm:$0xff]  }
  0x26   :  { %19558 = vmatpush3.bf16.msra.mxu0 %v19584_v11  ;;  %v142_v63 = vrot.slane %v128_v57, %v21741_v58  ;;  %v21761_v6 = vrot.slane %v749_v61, %v21741_v58  ;;  %v143_v8 = vcombine.high %v135_v62, %v135_v62  ;;  %v21777_v13 = vcombine.high %v21755_v4, %v21755_v4  ;;  %v19639_v55 = vld [vmem:[%s25581_s5 + $0x198] sm:$0xff]   ;;  %v55_v57 = vld [vmem:[%s25579_s3 + $0x10] sm:$0xff]  ;;  %v19641_v59 = vld [vmem:[%s25581_s5 + $0x1e0] sm:$0xff]  }
  0x27   :  { %19559 = vmatprep.subr.bf16.mxu0 %v21514_v1  ;;  %v21758_v5 = vrot.slane %v145_v60, %v21741_v58  ;;  %v21771_v11 = vcombine.high %v21749_v2, %v21749_v2  ;;  %v160_v12 = vcombine.high %v21752_v3, %v21752_v3  ;;  %v19642_v60 = vld [vmem:[%s25581_s5 + $0x120] sm:$0xff]   ;;  %v79_v61 = vld [vmem:[%s25578_s2 + $0x10] sm:$0xff] }
  0x28   :  { %18546 = vmatpush3.bf16.msra.mxu1 %v19606_v22  ;;  %v144_v9 = vcombine.high %v142_v63, %v142_v63  ;;  %v21783_v15 = vcombine.high %v21761_v6, %v21761_v6 }
  0x29   :  { %18547 = vmatprep.subr.bf16.mxu1 %v19608_v24 }
  0x2a   :  { %19560 = vmatpush3.bf16.msra.mxu0 %v19585_v14  ;;  %v161_v14 = vcombine.high %v21758_v5, %v21758_v5 }
  0x2b   :  { %19561 = vmatprep.subr.bf16.mxu0 %v21514_v1 }
  0x2c   :  { %18548 = vmatpush3.bf16.msra.mxu1 %v19610_v27 }
  0x2d   :  { %18549 = vmatprep.subr.bf16.mxu1 %v19612_v29 }
  0x2e   :  { %19562 = vmatpush3.bf16.msra.mxu0 %v19586_v17 }
  0x2f   :  { %19563 = vmatprep.subr.bf16.mxu0 %v21514_v1  ;;  %v21746_v1 = vrot.slane %v53_v51, %v21741_v58  ;;  %v19636_v51 = vld [vmem:[%s25581_s5 + $0x158] sm:$0xff]  }
  0x30   :  { %18550 = vmatpush3.bf16.msra.mxu1 %v19614_v31 }
  0x31   :  { %18551 = vmatprep.subr.bf16.mxu1 %v19616_v33  ;;  %v21767_v10 = vcombine.high %v21746_v1, %v21746_v1  ;;  %v19624_v33 = vld [vmem:[%s25581_s5 + $0x100] sm:$0xff]  }
  0x32   :  { %19564 = vmatpush3.bf16.msra.mxu0 %v19587_v19 }
  0x33   :  { %18559 = vmatprep.subr.bf16.mxu0 %v19589_v23 }
  0x34   :  { %18552 = vmatpush3.bf16.msra.mxu1 %v19618_v35 }
  0x35   :  { %19566 = vmatmul.mubr.bf16.vlgmr.msra.gmra.mrb[0].mxu0 %v2964_v25  ;;  %18581 = vmatprep.subr.bf16.mxu1 %v19622_v37 }
  0x36   :  { %18560 = vmatpush3.bf16.msra.mxu0 %v19591_v26 }
  0x37   :  { %18561 = vmatprep.subr.bf16.mxu0 %v19593_v28 }
  0x3a   :  { %18562 = vmatpush3.bf16.msra.mxu0 %v19595_v30 }
  0x3b   :  { %18563 = vmatprep.subr.bf16.mxu0 %v19597_v32 }
  0x3e   :  { %18564 = vmatpush3.bf16.msra.mxu0 %v19599_v34 }
  0x3f   :  { %18565 = vmatprep.subr.bf16.mxu0 %v19601_v36 }
  0x42   :  { %18566 = vmatpush3.bf16.msra.mxu0 %v19603_v38 }
  0x43   :  { %18567 = vmatprep.subr.bf16.mxu0 %v19605_v39 }
  0x46   :  { %18568 = vmatpush3.bf16.msra.mxu0 %v19607_v40  ;;  %v19625_v40 = vld [vmem:[%s25581_s5 + $0x180] sm:$0xff]  }
  0x47   :  { %18569 = vmatprep.subr.bf16.mxu0 %v19609_v41  ;;  %v19628_v41 = vld [vmem:[%s25581_s5 + $0x148] sm:$0xff]  }
  0x4a   :  { %18570 = vmatpush3.bf16.msra.mxu0 %v19611_v42  ;;  %v19629_v42 = vld [vmem:[%s25581_s5 + $0x1c8] sm:$0xff]  }
  0x4b   :  { %18571 = vmatprep.subr.bf16.mxu0 %v19613_v43 }
  0x4e   :  { %18572 = vmatpush3.bf16.msra.mxu0 %v19615_v44 }
  0x4f   :  { %18573 = vmatprep.subr.bf16.mxu0 %v19617_v45  ;;  %v19630_v45 = vld [vmem:[%s25581_s5 + $0x108] sm:$0xff]  }
  0x52   :  { %18574 = vmatpush3.bf16.msra.mxu0 %v19619_v46  ;;  %v19631_v46 = vld [vmem:[%s25581_s5 + $0x188] sm:$0xff]  }
  0x53   :  { %18603 = vmatprep.subr.bf16.mxu0 %v19623_v47  ;;  %v19632_v47 = vld [vmem:[%s25581_s5 + $0x150] sm:$0xff]  }
  0x94   :  { %v21763_v7 = vpop.permute.xlu0 %102 }
  0x95   :  { %v612_v17 = vmul.f32 %v143_v8, %v21763_v7  ;;  %v614_v18 = vmul.f32 %v144_v9, %v21763_v7  ;;  %v611_v19 = vmul.f32 %v135_v62, %v21763_v7  ;;  %v613_v20 = vmul.f32 %v142_v63, %v21763_v7  ;;  %v19643_v62 = vld [vmem:[%s25581_s5 + $0x1a0] sm:$0xff]   ;;  %v19644_v8 = vld [vmem:[%s25581_s5 + $0x168] sm:$0xff]  }
  0x96   :  { %v616_v25 = vmul.f32 %v160_v12, %v21763_v7  ;;  %v618_v27 = vmul.f32 %v161_v14, %v21763_v7  ;;  %v766_v63 = vcombine.high %v55_v57, %v55_v57  ;;  %v19645_v9 = vld [vmem:[%s25581_s5 + $0x1e8] sm:$0xff]   ;;  %v162_v12 = vcombine.high %v79_v61, %v79_v61 }
  0x97   :  { %v19646_v14 = vld [vmem:[%s25581_s5 + $0x128] sm:$0xff]  }
  0x98   :  { %v21785_v16 = vpop.permute.xlu0 %706 }
  0x99   :  { %v1216_v21 = vmul.f32 %v21767_v10, %v21785_v16  ;;  %v1218_v22 = vmul.f32 %v21771_v11, %v21785_v16  ;;  %v1215_v23 = vmul.f32 %v21746_v1, %v21785_v16  ;;  %v1217_v24 = vmul.f32 %v21749_v2, %v21785_v16 }
  0x9a   :  { %v1220_v26 = vmul.f32 %v21777_v13, %v21785_v16  ;;  %v1222_v28 = vmul.f32 %v21783_v15, %v21785_v16 }
  0x9b   :  { %v1308_v29 = vadd.f32 %v1216_v21, %v612_v17  ;;  %v1310_v30 = vadd.f32 %v1218_v22, %v614_v18  ;;  %v1307_v31 = vadd.f32 %v1215_v23, %v611_v19  ;;  %v1309_v32 = vadd.f32 %v1217_v24, %v613_v20  ;;  %v19647_v18 = vld [vmem:[%s25581_s5 + $0x1a8] sm:$0xff]   ;;  %v19648_v20 = vld [vmem:[%s25581_s5 + $0x170] sm:$0xff]  }
  0x9c   :  { %v1312_v34 = vadd.f32 %v1220_v26, %v616_v25  ;;  %v1314_v35 = vadd.f32 %v1222_v28, %v618_v27  ;;  %v21875_v17 = vrot.slane %v55_v57, %v21741_v58  ;;  %v21881_v19 = vrot.slane %v766_v63, %v21741_v58  ;;  %v19649_v22 = vld [vmem:[%s25581_s5 + $0x1f0] sm:$0xff]   ;;  %v19652_v28 = vld [vmem:[%s25581_s5 + $0x178] sm:$0xff]  }
  0x9d   :  { %v1400_v36 = vpack.c.bf16 %v1308_v29, %v1308_v29  ;;  %v1402_v37 = vpack.c.bf16 %v1310_v30, %v1310_v30  ;;  %v1399_v38 = vpack.c.bf16 %v1307_v31, %v1307_v31  ;;  %v1401_v39 = vpack.c.bf16 %v1309_v32, %v1309_v32  ;;  %v19650_v24 = vld [vmem:[%s25581_s5 + $0x130] sm:$0xff]   ;;  %v19653_v30 = vld [vmem:[%s25581_s5 + $0x1f8] sm:$0xff]  }
  0x9e   :  { %v1404_v43 = vpack.c.bf16 %v1312_v34, %v1312_v34  ;;  %v1406_v44 = vpack.c.bf16 %v1314_v35, %v1314_v35  ;;  %v21887_v21 = vrot.slane %v79_v61, %v21741_v58  ;;  %v21893_v23 = vrot.slane %v162_v12, %v21741_v58  ;;  %v19651_v26 = vld [vmem:[%s25581_s5 + $0x1b0] sm:$0xff]   ;;  %v19654_v34 = vld [vmem:[%s25581_s5 + $0x138] sm:$0xff]   ;;  %v19674_v12 = vld [vmem:[%s25581_s5 + $0x260] sm:$0xff]  }
  0x9f   :  { %7517 = vmatprep.mubr.bf16.mxu1 %v1400_v36  ;;  %7557 = vmatprep.mubr.bf16.mxu0 %v1402_v37  ;;  %v21900_v25 = vcombine.high %v21875_v17, %v21875_v17  ;;  %v21907_v27 = vcombine.high %v21881_v19, %v21881_v19  ;;  %v1219_v31 = vmul.f32 %v21755_v4, %v21785_v16  ;;  %v19655_v36 = vld [vmem:[%s25581_s5 + $0x1b8] sm:$0xff]   ;;  %v19666_v57 = vld [vmem:[%s25581_s5 + $0x250] sm:$0xff]  }
  0xa0   :  { %7518 = vmatmul.mubr.bf16.vlgmr.msra.gmra.mrb[0].mxu1 %v1399_v38  ;;  %7558 = vmatmul.mubr.bf16.vlgmr.msra.gmra.mrb[4].mxu0 %v1401_v39  ;;  %v177_v29 = vcombine.high %v21887_v21, %v21887_v21  ;;  %v1221_v32 = vmul.f32 %v21761_v6, %v21785_v16  ;;  %v615_v37 = vmul.f32 %v21752_v3, %v21763_v7  ;;  %v19657_v3 = vld [vmem:[%s25581_s5 + $0x2c0] sm:$0xff]   ;;  %v19669_v61 = vld [vmem:[%s25581_s5 + $0x290] sm:$0xff]   ;;  %v19671_v63 = vld [vmem:[%s25581_s5 + $0x2d8] sm:$0xff]  }
  0xa1   :  { %18582 = vmatpush3.bf16.msra.mxu1 %v19624_v33  ;;  %18604 = vmatpush3.bf16.msra.mxu0 %v19625_v40  ;;  %v178_v33 = vcombine.high %v21893_v23, %v21893_v23  ;;  %v1224_v35 = vmul.f32 %v21900_v25, %v21785_v16  ;;  %v617_v38 = vmul.f32 %v21758_v5, %v21763_v7  ;;  %v19656_v40 = vld [vmem:[%s25581_s5 + $0x240] sm:$0xff]  }
  0xa2   :  { %7597 = vmatprep.mubr.bf16.mxu1 %v1404_v43  ;;  %7637 = vmatprep.mubr.bf16.mxu0 %v1406_v44  ;;  %v1226_v39 = vmul.f32 %v21907_v27, %v21785_v16 }
  0xa3   :  { %18583 = vmatprep.subr.bf16.mxu1 %v19628_v41  ;;  %18605 = vmatprep.subr.bf16.mxu0 %v19629_v42  ;;  %v620_v41 = vmul.f32 %v177_v29, %v21763_v7  ;;  %v1311_v42 = vadd.f32 %v1219_v31, %v615_v37  ;;  %v1313_v43 = vadd.f32 %v1221_v32, %v617_v38  ;;  %v19679_v29 = vld [vmem:[%s25581_s5 + $0x2e8] sm:$0xff]   ;;  %v19683_v37 = vld [vmem:[%s25581_s5 + $0x2f0] sm:$0xff]  }
  0xa4   :  { %v622_v5 = vmul.f32 %v178_v33, %v21763_v7  ;;  %v19680_v31 = vld [vmem:[%s25581_s5 + $0x228] sm:$0xff]  }
  0xa5   :  { %18584 = vmatpush3.bf16.msra.mxu1 %v19630_v45  ;;  %18606 = vmatpush3.bf16.msra.mxu0 %v19631_v46  ;;  %v1316_v44 = vadd.f32 %v1224_v35, %v620_v41  ;;  %v19658_v45 = vld [vmem:[%s25581_s5 + $0x200] sm:$0xff]   ;;  %v19681_v33 = vld [vmem:[%s25581_s5 + $0x2a8] sm:$0xff]   ;;  %v19682_v35 = vld [vmem:[%s25581_s5 + $0x270] sm:$0xff]  }
  0xa6   :  { %18585 = vmatprep.subr.bf16.mxu1 %v19632_v47  ;;  %18607 = vmatprep.subr.bf16.mxu0 %v19633_v48  ;;  %v1318_v46 = vadd.f32 %v1226_v39, %v622_v5  ;;  %v19659_v47 = vld [vmem:[%s25581_s5 + $0x280] sm:$0xff]   ;;  %v1403_v48 = vpack.c.bf16 %v1311_v42, %v1311_v42  ;;  %v19684_v39 = vld [vmem:[%s25581_s5 + $0x230] sm:$0xff]  }
  0xa7   :  { %v19685_v41 = vld [vmem:[%s25581_s5 + $0x2b0] sm:$0xff]  }
  0xa9   :  { %18586 = vmatpush3.bf16.msra.mxu1 %v19634_v49  ;;  %18608 = vmatpush3.bf16.msra.mxu0 %v19635_v50  ;;  %v1405_v49 = vpack.c.bf16 %v1313_v43, %v1313_v43  ;;  %v19662_v50 = vld [vmem:[%s25581_s5 + $0x248] sm:$0xff]   ;;  %v19686_v43 = vld [vmem:[%s25581_s5 + $0x278] sm:$0xff]  }
  0xaa   :  { %18587 = vmatprep.subr.bf16.mxu1 %v19636_v51  ;;  %18609 = vmatprep.subr.bf16.mxu0 %v19637_v52  ;;  %v1408_v51 = vpack.c.bf16 %v1316_v44, %v1316_v44  ;;  %v19663_v52 = vld [vmem:[%s25581_s5 + $0x2c8] sm:$0xff]   ;;  %v19687_v44 = vld [vmem:[%s25581_s5 + $0x2f8] sm:$0xff]  }
  0xad   :  { %18588 = vmatpush3.bf16.msra.mxu1 %v19638_v54  ;;  %18610 = vmatpush3.bf16.msra.mxu0 %v19639_v55  ;;  %v1410_v54 = vpack.c.bf16 %v1318_v46, %v1318_v46  ;;  %v19664_v55 = vld [vmem:[%s25581_s5 + $0x208] sm:$0xff]  }
  0xae   :  { %18589 = vmatprep.subr.bf16.mxu1 %v19640_v56  ;;  %18611 = vmatprep.subr.bf16.mxu0 %v19641_v59  ;;  %v19665_v56 = vld [vmem:[%s25581_s5 + $0x288] sm:$0xff]   ;;  %v19667_v59 = vld [vmem:[%s25581_s5 + $0x2d0] sm:$0xff]  }
  0xb1   :  { %18590 = vmatpush3.bf16.msra.mxu1 %v19642_v60  ;;  %18612 = vmatpush3.bf16.msra.mxu0 %v19643_v62  ;;  %v19668_v60 = vld [vmem:[%s25581_s5 + $0x210] sm:$0xff]   ;;  %v19670_v62 = vld [vmem:[%s25581_s5 + $0x258] sm:$0xff]  }
  0xb2   :  { %18591 = vmatprep.subr.bf16.mxu1 %v19644_v8  ;;  %18613 = vmatprep.subr.bf16.mxu0 %v19645_v9  ;;  %v19672_v8 = vld [vmem:[%s25581_s5 + $0x218] sm:$0xff]  }
  0xb3   :  { %v19673_v9 = vld [vmem:[%s25581_s5 + $0x298] sm:$0xff]  }
  0xb5   :  { %18592 = vmatpush3.bf16.msra.mxu1 %v19646_v14  ;;  %18614 = vmatpush3.bf16.msra.mxu0 %v19647_v18  ;;  %v19675_v14 = vld [vmem:[%s25581_s5 + $0x2e0] sm:$0xff]   ;;  %v56_v18 = vld [vmem:[%s25579_s3 + $0x18] sm:$0xff] }
  0xb6   :  { %18593 = vmatprep.subr.bf16.mxu1 %v19648_v20  ;;  %18615 = vmatprep.subr.bf16.mxu0 %v19649_v22  ;;  %v19676_v20 = vld [vmem:[%s25581_s5 + $0x220] sm:$0xff]   ;;  %v80_v22 = vld [vmem:[%s25578_s2 + $0x18] sm:$0xff]  ;;  %v22015_v32 = vrot.slane %v56_v18, %v21741_v58 }
  0xb9   :  { %18594 = vmatpush3.bf16.msra.mxu1 %v19650_v24  ;;  %18616 = vmatpush3.bf16.msra.mxu0 %v19651_v26  ;;  %v19677_v24 = vld [vmem:[%s25581_s5 + $0x2a0] sm:$0xff]   ;;  %v783_v26 = vcombine.high %v56_v18, %v56_v18  ;;  %v19698_v18 = vld [vmem:[%s25581_s5 + $0x308] sm:$0xff]  }
  0xba   :  { %18595 = vmatprep.subr.bf16.mxu1 %v19652_v28  ;;  %18617 = vmatprep.subr.bf16.mxu0 %v19653_v30  ;;  %v19678_v28 = vld [vmem:[%s25581_s5 + $0x268] sm:$0xff]   ;;  %v179_v30 = vcombine.high %v80_v22, %v80_v22 }
  0xbc   :  { %v22033_v38 = vrot.slane %v179_v30, %v21741_v58  ;;  %v19704_v30 = vld [vmem:[%s25581_s5 + $0x358] sm:$0xff]  }
  0xbd   :  { %18596 = vmatpush3.bf16.msra.mxu1 %v19654_v34  ;;  %18618 = vmatpush3.bf16.msra.mxu0 %v19655_v36  ;;  %v22021_v34 = vrot.slane %v783_v26, %v21741_v58  ;;  %v22027_v36 = vrot.slane %v80_v22, %v21741_v58  ;;  %v19699_v22 = vld [vmem:[%s25581_s5 + $0x388] sm:$0xff]   ;;  %v19701_v26 = vld [vmem:[%s25581_s5 + $0x3d0] sm:$0xff]  }
  0xbe   :  { %18625 = vmatprep.subr.bf16.mxu1 %v19656_v40  ;;  %18647 = vmatprep.subr.bf16.mxu0 %v19657_v3  ;;  %v22040_v40 = vcombine.high %v22015_v32, %v22015_v32  ;;  %v1223_v3 = vmul.f32 %v21875_v17, %v21785_v16  ;;  %v195_v46 = vcombine.high %v22033_v38, %v22033_v38 }
  0xbf   :  { %v22047_v42 = vcombine.high %v22021_v34, %v22021_v34  ;;  %v194_v5 = vcombine.high %v22027_v36, %v22027_v36 }
  0xc0   :  { %7598 = vmatmul.mubr.bf16.vlgmr.msra.gmra.mrb[4].mxu1 %v1403_v48  ;;  %7638 = vmatmul.mubr.bf16.vlgmr.msra.gmra.mrb[8].mxu0 %v1405_v49  ;;  %v619_v48 = vmul.f32 %v21887_v21, %v21763_v7  ;;  %v1228_v49 = vmul.f32 %v22040_v40, %v21785_v16  ;;  %v19690_v21 = vld [vmem:[%s25581_s5 + $0x340] sm:$0xff]  }
  0xc1   :  { %18626 = vmatpush3.bf16.msra.mxu1 %v19658_v45  ;;  %7677 = vmatprep.mubr.bf16.mxu1 %v1408_v51  ;;  %v1225_v45 = vmul.f32 %v21881_v19, %v21785_v16  ;;  %v621_v51 = vmul.f32 %v21893_v23, %v21763_v7  ;;  %v626_v23 = vmul.f32 %v195_v46, %v21763_v7  ;;  %v19713_v46 = vld [vmem:[%s25581_s5 + $0x3e8] sm:$0xff]  }
  0xc2   :  { %18648 = vmatpush3.bf16.msra.mxu0 %v19659_v47  ;;  %7717 = vmatprep.mubr.bf16.mxu0 %v1410_v54  ;;  %v19688_v47 = vld [vmem:[%s25581_s5 + $0x238] sm:$0xff]   ;;  %v1315_v54 = vadd.f32 %v1223_v3, %v619_v48  ;;  %v81_v3 = vld [vmem:[%s25578_s2 + $0x20] sm:$0xff]  ;;  %v19714_v48 = vld [vmem:[%s25581_s5 + $0x328] sm:$0xff]  }
  0xc3   :  { %18627 = vmatprep.subr.bf16.mxu1 %v19662_v50  ;;  %18649 = vmatprep.subr.bf16.mxu0 %v19663_v52  ;;  %v19689_v50 = vld [vmem:[%s25581_s5 + $0x2b8] sm:$0xff]   ;;  %v1230_v52 = vmul.f32 %v22047_v42, %v21785_v16 }
  0xc5   :  { %18628 = vmatpush3.bf16.msra.mxu1 %v19664_v55  ;;  %v624_v55 = vmul.f32 %v194_v5, %v21763_v7  ;;  %v19711_v5 = vld [vmem:[%s25581_s5 + $0x3a0] sm:$0xff]  }
  0xc6   :  { %18650 = vmatpush3.bf16.msra.mxu0 %v19665_v56  ;;  %18629 = vmatprep.subr.bf16.mxu1 %v19666_v57  ;;  %v1317_v56 = vadd.f32 %v1225_v45, %v621_v51  ;;  %v19691_v57 = vld [vmem:[%s25581_s5 + $0x3c0] sm:$0xff]   ;;  %v19712_v45 = vld [vmem:[%s25581_s5 + $0x368] sm:$0xff]  }
  0xc7   :  { %18651 = vmatprep.subr.bf16.mxu0 %v19667_v59  ;;  %v19692_v59 = vld [vmem:[%s25581_s5 + $0x300] sm:$0xff]  }
  0xc9   :  { %18630 = vmatpush3.bf16.msra.mxu1 %v19668_v60  ;;  %v1320_v60 = vadd.f32 %v1228_v49, %v624_v55 }
  0xca   :  { %18652 = vmatpush3.bf16.msra.mxu0 %v19669_v61  ;;  %18631 = vmatprep.subr.bf16.mxu1 %v19670_v62  ;;  %v19693_v61 = vld [vmem:[%s25581_s5 + $0x380] sm:$0xff]   ;;  %v1322_v62 = vadd.f32 %v1230_v52, %v626_v23  ;;  %v19716_v52 = vld [vmem:[%s25581_s5 + $0x370] sm:$0xff]  }
  0xcb   :  { %18653 = vmatprep.subr.bf16.mxu0 %v19671_v63  ;;  %v1407_v63 = vpack.c.bf16 %v1315_v54, %v1315_v54  ;;  %v22167_v54 = vrot.slane %v81_v3, %v21741_v58  ;;  %v19719_v23 = vld [vmem:[%s25581_s5 + $0x3b0] sm:$0xff]  }
  0xcd   :  { %18632 = vmatpush3.bf16.msra.mxu1 %v19672_v8  ;;  %v19696_v8 = vld [vmem:[%s25581_s5 + $0x348] sm:$0xff]  }
  0xce   :  { %18654 = vmatpush3.bf16.msra.mxu0 %v19673_v9  ;;  %18633 = vmatprep.subr.bf16.mxu1 %v19674_v12  ;;  %v1409_v9 = vpack.c.bf16 %v1317_v56, %v1317_v56  ;;  %v19697_v12 = vld [vmem:[%s25581_s5 + $0x3c8] sm:$0xff]   ;;  %v19718_v56 = vld [vmem:[%s25581_s5 + $0x330] sm:$0xff]  }
  0xcf   :  { %18655 = vmatprep.subr.bf16.mxu0 %v19675_v14  ;;  %v1412_v14 = vpack.c.bf16 %v1320_v60, %v1320_v60  ;;  %v19720_v60 = vld [vmem:[%s25581_s5 + $0x378] sm:$0xff]  }
  0xd1   :  { %18634 = vmatpush3.bf16.msra.mxu1 %v19676_v20  ;;  %v1414_v20 = vpack.c.bf16 %v1322_v62, %v1322_v62  ;;  %v211_v62 = vcombine.high %v22167_v54, %v22167_v54 }
  0xd2   :  { %18656 = vmatpush3.bf16.msra.mxu0 %v19677_v24  ;;  %18635 = vmatprep.subr.bf16.mxu1 %v19678_v28  ;;  %v19700_v24 = vld [vmem:[%s25581_s5 + $0x350] sm:$0xff]  }
  0xd3   :  { %18657 = vmatprep.subr.bf16.mxu0 %v19679_v29  ;;  %v19702_v28 = vld [vmem:[%s25581_s5 + $0x310] sm:$0xff]  }
  0xd4   :  { %v19703_v29 = vld [vmem:[%s25581_s5 + $0x390] sm:$0xff]  }
  0xd5   :  { %18636 = vmatpush3.bf16.msra.mxu1 %v19680_v31  ;;  %v19705_v31 = vld [vmem:[%s25581_s5 + $0x3d8] sm:$0xff]  }
  0xd6   :  { %18658 = vmatpush3.bf16.msra.mxu0 %v19681_v33  ;;  %18637 = vmatprep.subr.bf16.mxu1 %v19682_v35  ;;  %v19706_v33 = vld [vmem:[%s25581_s5 + $0x318] sm:$0xff]  }
  0xd7   :  { %18659 = vmatprep.subr.bf16.mxu0 %v19683_v37  ;;  %v19707_v35 = vld [vmem:[%s25581_s5 + $0x398] sm:$0xff]   ;;  %v19708_v37 = vld [vmem:[%s25581_s5 + $0x360] sm:$0xff]  }
  0xd9   :  { %18638 = vmatpush3.bf16.msra.mxu1 %v19684_v39  ;;  %v19709_v39 = vld [vmem:[%s25581_s5 + $0x3e0] sm:$0xff]  }
  0xda   :  { %18660 = vmatpush3.bf16.msra.mxu0 %v19685_v41  ;;  %18639 = vmatprep.subr.bf16.mxu1 %v19686_v43  ;;  %v57_v41 = vld [vmem:[%s25579_s3 + $0x20] sm:$0xff] }
  0xdb   :  { %18661 = vmatprep.subr.bf16.mxu0 %v19687_v44  ;;  %v19710_v43 = vld [vmem:[%s25581_s5 + $0x320] sm:$0xff]   ;;  %v800_v44 = vcombine.high %v57_v41, %v57_v41  ;;  %v22155_v49 = vrot.slane %v57_v41, %v21741_v58  ;;  %v19730_v41 = vld [vmem:[%s25581_s5 + $0x448] sm:$0xff]  }
  0xdd   :  { %18640 = vmatpush3.bf16.msra.mxu1 %v19688_v47  ;;  %v196_v47 = vcombine.high %v81_v3, %v81_v3  ;;  %v22161_v51 = vrot.slane %v800_v44, %v21741_v58  ;;  %v19731_v3 = vld [vmem:[%s25581_s5 + $0x4c8] sm:$0xff]  }
  0xde   :  { %18662 = vmatpush3.bf16.msra.mxu0 %v19689_v50  ;;  %18669 = vmatprep.subr.bf16.mxu1 %v19690_v21  ;;  %v19715_v50 = vld [vmem:[%s25581_s5 + $0x3a8] sm:$0xff]   ;;  %v19717_v21 = vld [vmem:[%s25581_s5 + $0x3f0] sm:$0xff]  }
  0xdf   :  { %18691 = vmatprep.subr.bf16.mxu0 %v19691_v57  ;;  %v22173_v55 = vrot.slane %v196_v47, %v21741_v58  ;;  %v22180_v57 = vcombine.high %v22155_v49, %v22155_v49  ;;  %v19732_v44 = vld [vmem:[%s25581_s5 + $0x408] sm:$0xff]   ;;  %v19734_v47 = vld [vmem:[%s25581_s5 + $0x450] sm:$0xff]  }
  0xe0   :  { %7678 = vmatmul.mubr.bf16.vlgmr.msra.gmra.mrb[8].mxu1 %v1407_v63  ;;  %v19721_v63 = vld [vmem:[%s25581_s5 + $0x3f8] sm:$0xff]  }
  0xe1   :  { %7718 = vmatmul.mubr.bf16.vlgmr.msra.gmra.mrb[12].mxu0 %v1409_v9  ;;  %18670 = vmatpush3.bf16.msra.mxu1 %v19692_v59  ;;  %v22187_v59 = vcombine.high %v22161_v51, %v22161_v51  ;;  %v212_v9 = vcombine.high %v22173_v55, %v22173_v55 }
  0xe2   :  { %7757 = vmatprep.mubr.bf16.mxu1 %v1412_v14  ;;  %18692 = vmatpush3.bf16.msra.mxu0 %v19693_v61  ;;  %v1227_v61 = vmul.f32 %v22015_v32, %v21785_v16  ;;  %v623_v14 = vmul.f32 %v22027_v36, %v21763_v7  ;;  %v19724_v36 = vld [vmem:[%s25581_s5 + $0x440] sm:$0xff]  }
  0xe3   :  { %7797 = vmatprep.mubr.bf16.mxu0 %v1414_v20  ;;  %18671 = vmatprep.subr.bf16.mxu1 %v19696_v8  ;;  %v1229_v8 = vmul.f32 %v22021_v34, %v21785_v16  ;;  %v19723_v20 = vld [vmem:[%s25581_s5 + $0x3b8] sm:$0xff]  }
  0xe4   :  { %18693 = vmatprep.subr.bf16.mxu0 %v19697_v12  ;;  %v19722_v12 = vld [vmem:[%s25581_s5 + $0x338] sm:$0xff]  }
  0xe5   :  { %18672 = vmatpush3.bf16.msra.mxu1 %v19698_v18  ;;  %v1232_v18 = vmul.f32 %v22180_v57, %v21785_v16 }
  0xe6   :  { %18694 = vmatpush3.bf16.msra.mxu0 %v19699_v22  ;;  %18673 = vmatprep.subr.bf16.mxu1 %v19700_v24  ;;  %v625_v22 = vmul.f32 %v22033_v38, %v21763_v7  ;;  %v1234_v24 = vmul.f32 %v22187_v59, %v21785_v16  ;;  %v630_v38 = vmul.f32 %v212_v9, %v21763_v7 }
  0xe7   :  { %18695 = vmatprep.subr.bf16.mxu0 %v19701_v26  ;;  %v1319_v26 = vadd.f32 %v1227_v61, %v623_v14  ;;  %v19742_v61 = vld [vmem:[%s25581_s5 + $0x460] sm:$0xff]  }
  0xe9   :  { %18674 = vmatpush3.bf16.msra.mxu1 %v19702_v28  ;;  %v628_v28 = vmul.f32 %v211_v62, %v21763_v7  ;;  %v19743_v62 = vld [vmem:[%s25581_s5 + $0x4e0] sm:$0xff]  }
  0xea   :  { %18696 = vmatpush3.bf16.msra.mxu0 %v19703_v29  ;;  %18675 = vmatprep.subr.bf16.mxu1 %v19704_v30  ;;  %v1321_v29 = vadd.f32 %v1229_v8, %v625_v22  ;;  %v19725_v30 = vld [vmem:[%s25581_s5 + $0x4c0] sm:$0xff]   ;;  %v58_v8 = vld [vmem:[%s25579_s3 + $0x28] sm:$0xff] }
  0xeb   :  { %18697 = vmatprep.subr.bf16.mxu0 %v19705_v31  ;;  %v19726_v31 = vld [vmem:[%s25581_s5 + $0x400] sm:$0xff]  }
  0xec   :  { %v19745_v22 = vld [vmem:[%s25581_s5 + $0x4a0] sm:$0xff]  }
  0xed   :  { %18676 = vmatpush3.bf16.msra.mxu1 %v19706_v33  ;;  %v1324_v33 = vadd.f32 %v1232_v18, %v628_v28  ;;  %v82_v18 = vld [vmem:[%s25578_s2 + $0x28] sm:$0xff] }
  0xee   :  { %18698 = vmatpush3.bf16.msra.mxu0 %v19707_v35  ;;  %18677 = vmatprep.subr.bf16.mxu1 %v19708_v37  ;;  %v19727_v35 = vld [vmem:[%s25581_s5 + $0x480] sm:$0xff]   ;;  %v1326_v37 = vadd.f32 %v1234_v24, %v630_v38  ;;  %v817_v24 = vcombine.high %v58_v8, %v58_v8  ;;  %v213_v28 = vcombine.high %v82_v18, %v82_v18  ;;  %v19749_v38 = vld [vmem:[%s25581_s5 + $0x4a8] sm:$0xff]  }
  0xef   :  { %18699 = vmatprep.subr.bf16.mxu0 %v19709_v39  ;;  %v1411_v39 = vpack.c.bf16 %v1319_v26, %v1319_v26  ;;  %v19746_v26 = vld [vmem:[%s25581_s5 + $0x468] sm:$0xff]  }
  0xf1   :  { %18678 = vmatpush3.bf16.msra.mxu1 %v19710_v43  ;;  %v1413_v43 = vpack.c.bf16 %v1321_v29, %v1321_v29  ;;  %v19748_v29 = vld [vmem:[%s25581_s5 + $0x428] sm:$0xff]  }
  0xf2   :  { %18700 = vmatpush3.bf16.msra.mxu0 %v19711_v5  ;;  %18679 = vmatprep.subr.bf16.mxu1 %v19712_v45  ;;  %v1416_v5 = vpack.c.bf16 %v1324_v33, %v1324_v33  ;;  %v1418_v45 = vpack.c.bf16 %v1326_v37, %v1326_v37  ;;  %v19750_v33 = vld [vmem:[%s25581_s5 + $0x470] sm:$0xff]  }
  0xf3   :  { %18701 = vmatprep.subr.bf16.mxu0 %v19713_v46  ;;  %v19733_v46 = vld [vmem:[%s25581_s5 + $0x488] sm:$0xff]   ;;  %v19751_v37 = vld [vmem:[%s25581_s5 + $0x4f0] sm:$0xff]  }
  0xf5   :  { %18680 = vmatpush3.bf16.msra.mxu1 %v19714_v48  ;;  %v19735_v48 = vld [vmem:[%s25581_s5 + $0x4d0] sm:$0xff]  }
  0xf6   :  { %18702 = vmatpush3.bf16.msra.mxu0 %v19715_v50  ;;  %18681 = vmatprep.subr.bf16.mxu1 %v19716_v52  ;;  %v19736_v50 = vld [vmem:[%s25581_s5 + $0x410] sm:$0xff]  }
  0xf7   :  { %18703 = vmatprep.subr.bf16.mxu0 %v19717_v21  ;;  %v19737_v52 = vld [vmem:[%s25581_s5 + $0x490] sm:$0xff]   ;;  %v19738_v21 = vld [vmem:[%s25581_s5 + $0x458] sm:$0xff]  }
  0xf9   :  { %18682 = vmatpush3.bf16.msra.mxu1 %v19718_v56  ;;  %v19739_v56 = vld [vmem:[%s25581_s5 + $0x4d8] sm:$0xff]  }
  0xfa   :  { %18704 = vmatpush3.bf16.msra.mxu0 %v19719_v23  ;;  %18683 = vmatprep.subr.bf16.mxu1 %v19720_v60  ;;  %v19740_v23 = vld [vmem:[%s25581_s5 + $0x418] sm:$0xff]  }
  0xfb   :  { %18705 = vmatprep.subr.bf16.mxu0 %v19721_v63  ;;  %v19741_v60 = vld [vmem:[%s25581_s5 + $0x498] sm:$0xff]  }
  0xfd   :  { %18684 = vmatpush3.bf16.msra.mxu1 %v19722_v12  ;;  %v19744_v12 = vld [vmem:[%s25581_s5 + $0x420] sm:$0xff]  }
  0xfe   :  { %18706 = vmatpush3.bf16.msra.mxu0 %v19723_v20  ;;  %18713 = vmatprep.subr.bf16.mxu1 %v19724_v36  ;;  %v19747_v36 = vld [vmem:[%s25581_s5 + $0x4e8] sm:$0xff]  }
  0xff   :  { %18735 = vmatprep.subr.bf16.mxu0 %v19725_v30  ;;  %v22297_v30 = vrot.slane %v58_v8, %v21741_v58 }
 0x100   :  { %7758 = vmatmul.mubr.bf16.vlgmr.msra.gmra.mrb[12].mxu1 %v1411_v39  ;;  %v22315_v39 = vrot.slane %v213_v28, %v21741_v58  ;;  %v19765_v28 = vld [vmem:[%s25581_s5 + $0x5c8] sm:$0xff]  }
 0x101   :  { %7798 = vmatmul.mubr.bf16.vlgmr.msra.gmra.mrb[16].mxu0 %v1413_v43  ;;  %18714 = vmatpush3.bf16.msra.mxu1 %v19726_v31  ;;  %v22303_v31 = vrot.slane %v817_v24, %v21741_v58  ;;  %v22322_v43 = vcombine.high %v22297_v30, %v22297_v30 }
 0x102   :  { %7837 = vmatprep.mubr.bf16.mxu1 %v1416_v5  ;;  %18736 = vmatpush3.bf16.msra.mxu0 %v19727_v35  ;;  %v22309_v35 = vrot.slane %v82_v18, %v21741_v58 }
 0x103   :  { %7877 = vmatprep.mubr.bf16.mxu0 %v1418_v45  ;;  %18715 = vmatprep.subr.bf16.mxu1 %v19730_v41  ;;  %v19752_v41 = vld [vmem:[%s25581_s5 + $0x430] sm:$0xff]   ;;  %v22329_v5 = vcombine.high %v22303_v31, %v22303_v31  ;;  %v1231_v45 = vmul.f32 %v22155_v49, %v21785_v16 }
 0x104   :  { %18737 = vmatprep.subr.bf16.mxu0 %v19731_v3  ;;  %v19753_v3 = vld [vmem:[%s25581_s5 + $0x4b0] sm:$0xff]  }
 0x105   :  { %18716 = vmatpush3.bf16.msra.mxu1 %v19732_v44  ;;  %v19754_v44 = vld [vmem:[%s25581_s5 + $0x478] sm:$0xff]  }
 0x106   :  { %18738 = vmatpush3.bf16.msra.mxu0 %v19733_v46  ;;  %18717 = vmatprep.subr.bf16.mxu1 %v19734_v47  ;;  %v228_v46 = vcombine.high %v22309_v35, %v22309_v35  ;;  %v19755_v47 = vld [vmem:[%s25581_s5 + $0x4f8] sm:$0xff]  }
 0x107   :  { %18739 = vmatprep.subr.bf16.mxu0 %v19735_v48  ;;  %v1233_v48 = vmul.f32 %v22161_v51, %v21785_v16 }
 0x108   :  { %v22273_v63 = vpop.f32.mrb[0].mxu0  ;;  %v632_v8 = vmul.f32 %v228_v46, %v21763_v7  ;;  %v19772_v46 = vld [vmem:[%s25581_s5 + $0x558] sm:$0xff]  }
 0x109   :  { %18718 = vmatpush3.bf16.msra.mxu1 %v19736_v50  ;;  %v19567_v9 = vpop.f32.mrb[1].mxu0  ;;  %v229_v50 = vcombine.high %v22315_v39, %v22315_v39 }
 0x10a   :  { %18740 = vmatpush3.bf16.msra.mxu0 %v19737_v52  ;;  %18719 = vmatprep.subr.bf16.mxu1 %v19738_v21  ;;  %v3066_v14 = vpop.f32.mrb[2].mxu0  ;;  %v19756_v52 = vld [vmem:[%s25581_s5 + $0x438] sm:$0xff]   ;;  %v627_v21 = vmul.f32 %v22167_v54, %v21763_v7  ;;  %v19758_v54 = vld [vmem:[%s25581_s5 + $0x540] sm:$0xff]  }
 0x10b   :  { %18741 = vmatprep.subr.bf16.mxu0 %v19739_v56  ;;  %v19568_v20 = vpop.f32.mrb[3].mxu0  ;;  %v1236_v56 = vmul.f32 %v22322_v43, %v21785_v16  ;;  %v19760_v14 = vld [vmem:[%s25581_s5 + $0x500] sm:$0xff]  }
 0x10c   :  { %v19761_v20 = vld [vmem:[%s25581_s5 + $0x580] sm:$0xff]  }
 0x10d   :  { %18720 = vmatpush3.bf16.msra.mxu1 %v19740_v23  ;;  %v19757_v23 = vld [vmem:[%s25581_s5 + $0x4b8] sm:$0xff]   ;;  %v1328_v18 = vadd.f32 %v1236_v56, %v632_v8  ;;  %v59_v56 = vld [vmem:[%s25579_s3 + $0x30] sm:$0xff]  ;;  %v19781_v8 = vld [vmem:[%s25581_s5 + $0x5e8] sm:$0xff]  }
 0x10e   :  { %18742 = vmatpush3.bf16.msra.mxu0 %v19741_v60  ;;  %18721 = vmatprep.subr.bf16.mxu1 %v19742_v61  ;;  %v629_v60 = vmul.f32 %v22173_v55, %v21763_v7  ;;  %v1238_v61 = vmul.f32 %v22329_v5, %v21785_v16  ;;  %v634_v55 = vmul.f32 %v229_v50, %v21763_v7  ;;  %v19775_v50 = vld [vmem:[%s25581_s5 + $0x598] sm:$0xff]  }
 0x10f   :  { %18743 = vmatprep.subr.bf16.mxu0 %v19743_v62  ;;  %v1323_v62 = vadd.f32 %v1231_v45, %v627_v21  ;;  %v19771_v45 = vld [vmem:[%s25581_s5 + $0x590] sm:$0xff]   ;;  %v19777_v21 = vld [vmem:[%s25581_s5 + $0x5e0] sm:$0xff]  }
 0x110   :  { %v1325_v9 = vadd.f32 %v1233_v48, %v629_v60  ;;  %v19774_v48 = vld [vmem:[%s25581_s5 + $0x518] sm:$0xff]   ;;  %v83_v60 = vld [vmem:[%s25578_s2 + $0x30] sm:$0xff] }
 0x111   :  { %18722 = vmatpush3.bf16.msra.mxu1 %v19744_v12  ;;  %v19759_v12 = vld [vmem:[%s25581_s5 + $0x5c0] sm:$0xff]   ;;  %v1415_v24 = vpack.c.bf16 %v1323_v62, %v1323_v62  ;;  %v834_v62 = vcombine.high %v59_v56, %v59_v56 }
 0x112   :  { %18744 = vmatpush3.bf16.msra.mxu0 %v19745_v22  ;;  %18723 = vmatprep.subr.bf16.mxu1 %v19746_v26  ;;  %v1330_v22 = vadd.f32 %v1238_v61, %v634_v55  ;;  %v19764_v26 = vld [vmem:[%s25581_s5 + $0x548] sm:$0xff]   ;;  %v19779_v61 = vld [vmem:[%s25581_s5 + $0x5a0] sm:$0xff]   ;;  %v22437_v55 = vrot.slane %v59_v56, %v21741_v58 }
 0x113   :  { %18745 = vmatprep.subr.bf16.mxu0 %v19747_v36  ;;  %v1417_v36 = vpack.c.bf16 %v1325_v9, %v1325_v9  ;;  %v230_v9 = vcombine.high %v83_v60, %v83_v60 }
 0x115   :  { %18724 = vmatpush3.bf16.msra.mxu1 %v19748_v29  ;;  %v1420_v29 = vpack.c.bf16 %v1328_v18, %v1328_v18  ;;  %v22443_v18 = vrot.slane %v834_v62, %v21741_v58  ;;  %v19794_v62 = vld [vmem:[%s25581_s5 + $0x600] sm:$0xff]  }
 0x116   :  { %18746 = vmatpush3.bf16.msra.mxu0 %v19749_v38  ;;  %18725 = vmatprep.subr.bf16.mxu1 %v19750_v33  ;;  %v19766_v38 = vld [vmem:[%s25581_s5 + $0x508] sm:$0xff]   ;;  %v1422_v33 = vpack.c.bf16 %v1330_v22, %v1330_v22  ;;  %v22449_v22 = vrot.slane %v83_v60, %v21741_v58 }
 0x117   :  { %18747 = vmatprep.subr.bf16.mxu0 %v19751_v37  ;;  %v19767_v37 = vld [vmem:[%s25581_s5 + $0x588] sm:$0xff]  }
 0x119   :  { %18726 = vmatpush3.bf16.msra.mxu1 %v19752_v41  ;;  %v19768_v41 = vld [vmem:[%s25581_s5 + $0x550] sm:$0xff]  }
 0x11a   :  { %18748 = vmatpush3.bf16.msra.mxu0 %v19753_v3  ;;  %18727 = vmatprep.subr.bf16.mxu1 %v19754_v44  ;;  %v19769_v3 = vld [vmem:[%s25581_s5 + $0x5d0] sm:$0xff]  }
 0x11b   :  { %18749 = vmatprep.subr.bf16.mxu0 %v19755_v47  ;;  %v19770_v44 = vld [vmem:[%s25581_s5 + $0x510] sm:$0xff]   ;;  %v19773_v47 = vld [vmem:[%s25581_s5 + $0x5d8] sm:$0xff]  }
 0x11d   :  { %18728 = vmatpush3.bf16.msra.mxu1 %v19756_v52  ;;  %v19776_v52 = vld [vmem:[%s25581_s5 + $0x560] sm:$0xff]  }
 0x11e   :  { %18750 = vmatpush3.bf16.msra.mxu0 %v19757_v23  ;;  %18757 = vmatprep.subr.bf16.mxu1 %v19758_v54  ;;  %v19778_v23 = vld [vmem:[%s25581_s5 + $0x520] sm:$0xff]   ;;  %v19780_v54 = vld [vmem:[%s25581_s5 + $0x568] sm:$0xff]  }
 0x11f   :  { %18779 = vmatprep.subr.bf16.mxu0 %v19759_v12  ;;  %v19782_v12 = vld [vmem:[%s25581_s5 + $0x528] sm:$0xff]  }
 0x120   :  { %7838 = vmatmul.mubr.bf16.vlgmr.msra.gmra.mrb[16].mxu1 %v1415_v24  ;;  %v19785_v24 = vld [vmem:[%s25581_s5 + $0x5f0] sm:$0xff]  }
 0x121   :  { %7878 = vmatmul.mubr.bf16.vlgmr.msra.gmra.mrb[20].mxu0 %v1417_v36  ;;  %18758 = vmatpush3.bf16.msra.mxu1 %v19760_v14  ;;  %v19783_v14 = vld [vmem:[%s25581_s5 + $0x5a8] sm:$0xff]   ;;  %v19786_v36 = vld [vmem:[%s25581_s5 + $0x530] sm:$0xff]  }
 0x122   :  { %7917 = vmatprep.mubr.bf16.mxu1 %v1420_v29  ;;  %18780 = vmatpush3.bf16.msra.mxu0 %v19761_v20  ;;  %v19784_v20 = vld [vmem:[%s25581_s5 + $0x570] sm:$0xff]  }
 0x123   :  { %7957 = vmatprep.mubr.bf16.mxu0 %v1422_v33  ;;  %18759 = vmatprep.subr.bf16.mxu1 %v19764_v26  ;;  %v22455_v26 = vrot.slane %v230_v9, %v21741_v58  ;;  %v19787_v29 = vld [vmem:[%s25581_s5 + $0x5b0] sm:$0xff]   ;;  %v19788_v33 = vld [vmem:[%s25581_s5 + $0x578] sm:$0xff]  }
 0x124   :  { %18781 = vmatprep.subr.bf16.mxu0 %v19765_v28  ;;  %v22462_v28 = vcombine.high %v22437_v55, %v22437_v55 }
 0x125   :  { %18760 = vmatpush3.bf16.msra.mxu1 %v19766_v38  ;;  %v22469_v38 = vcombine.high %v22443_v18, %v22443_v18 }
 0x126   :  { %18782 = vmatpush3.bf16.msra.mxu0 %v19767_v37  ;;  %18761 = vmatprep.subr.bf16.mxu1 %v19768_v41  ;;  %v1235_v37 = vmul.f32 %v22297_v30, %v21785_v16  ;;  %v245_v41 = vcombine.high %v22449_v22, %v22449_v22 }
 0x127   :  { %18783 = vmatprep.subr.bf16.mxu0 %v19769_v3  ;;  %v19789_v3 = vld [vmem:[%s25581_s5 + $0x5f8] sm:$0xff]  }
 0x129   :  { %18762 = vmatpush3.bf16.msra.mxu1 %v19770_v44  ;;  %v1237_v44 = vmul.f32 %v22303_v31, %v21785_v16 }
 0x12a   :  { %18784 = vmatpush3.bf16.msra.mxu0 %v19771_v45  ;;  %18763 = vmatprep.subr.bf16.mxu1 %v19772_v46  ;;  %v246_v45 = vcombine.high %v22455_v26, %v22455_v26  ;;  %v19790_v46 = vld [vmem:[%s25581_s5 + $0x538] sm:$0xff]  }
 0x12b   :  { %18785 = vmatprep.subr.bf16.mxu0 %v19773_v47  ;;  %v631_v47 = vmul.f32 %v22309_v35, %v21763_v7  ;;  %v19792_v35 = vld [vmem:[%s25581_s5 + $0x640] sm:$0xff]  }
 0x12d   :  { %18764 = vmatpush3.bf16.msra.mxu1 %v19774_v48  ;;  %v1240_v48 = vmul.f32 %v22462_v28, %v21785_v16  ;;  %v1327_v56 = vadd.f32 %v1235_v37, %v631_v47  ;;  %v19801_v37 = vld [vmem:[%s25581_s5 + $0x688] sm:$0xff]   ;;  %v19807_v47 = vld [vmem:[%s25581_s5 + $0x6d8] sm:$0xff]  }
 0x12e   :  { %18786 = vmatpush3.bf16.msra.mxu0 %v19775_v50  ;;  %18765 = vmatprep.subr.bf16.mxu1 %v19776_v52  ;;  %v19791_v50 = vld [vmem:[%s25581_s5 + $0x5b8] sm:$0xff]   ;;  %v633_v52 = vmul.f32 %v22315_v39, %v21763_v7  ;;  %v638_v39 = vmul.f32 %v246_v45, %v21763_v7  ;;  %v19805_v45 = vld [vmem:[%s25581_s5 + $0x690] sm:$0xff]  }
 0x12f   :  { %18787 = vmatprep.subr.bf16.mxu0 %v19777_v21  ;;  %v1242_v21 = vmul.f32 %v22469_v38, %v21785_v16 }
 0x130   :  { %v1329_v60 = vadd.f32 %v1237_v44, %v633_v52  ;;  %v19804_v44 = vld [vmem:[%s25581_s5 + $0x610] sm:$0xff]   ;;  %v19810_v52 = vld [vmem:[%s25581_s5 + $0x660] sm:$0xff]  }
 0x131   :  { %18766 = vmatpush3.bf16.msra.mxu1 %v19778_v23  ;;  %v636_v23 = vmul.f32 %v245_v41, %v21763_v7  ;;  %v1334_v9 = vadd.f32 %v1242_v21, %v638_v39  ;;  %v19802_v41 = vld [vmem:[%s25581_s5 + $0x650] sm:$0xff]   ;;  %v19811_v21 = vld [vmem:[%s25581_s5 + $0x6e0] sm:$0xff]   ;;  %v19814_v39 = vld [vmem:[%s25581_s5 + $0x668] sm:$0xff]  }
 0x132   :  { %18788 = vmatpush3.bf16.msra.mxu0 %v19779_v61  ;;  %18767 = vmatprep.subr.bf16.mxu1 %v19780_v54  ;;  %v19793_v61 = vld [vmem:[%s25581_s5 + $0x6c0] sm:$0xff]  }
 0x133   :  { %18789 = vmatprep.subr.bf16.mxu0 %v19781_v8  ;;  %v1332_v54 = vadd.f32 %v1240_v48, %v636_v23  ;;  %v19795_v8 = vld [vmem:[%s25581_s5 + $0x680] sm:$0xff]   ;;  %v19808_v48 = vld [vmem:[%s25581_s5 + $0x618] sm:$0xff]  }
 0x134   :  { %v84_v23 = vld [vmem:[%s25578_s2 + $0x38] sm:$0xff] }
 0x135   :  { %18768 = vmatpush3.bf16.msra.mxu1 %v19782_v12  ;;  %v1419_v12 = vpack.c.bf16 %v1327_v56, %v1327_v56  ;;  %v60_v56 = vld [vmem:[%s25579_s3 + $0x38] sm:$0xff] }
 0x136   :  { %18790 = vmatpush3.bf16.msra.mxu0 %v19783_v14  ;;  %18769 = vmatprep.subr.bf16.mxu1 %v19784_v20  ;;  %v19798_v14 = vld [vmem:[%s25581_s5 + $0x648] sm:$0xff]   ;;  %v1421_v20 = vpack.c.bf16 %v1329_v60, %v1329_v60  ;;  %v19813_v60 = vld [vmem:[%s25581_s5 + $0x6a0] sm:$0xff]  }
 0x137   :  { %18791 = vmatprep.subr.bf16.mxu0 %v19785_v24  ;;  %v19799_v24 = vld [vmem:[%s25581_s5 + $0x6c8] sm:$0xff]  }
 0x139   :  { %18770 = vmatpush3.bf16.msra.mxu1 %v19786_v36  ;;  %v1424_v36 = vpack.c.bf16 %v1332_v54, %v1332_v54  ;;  %v247_v54 = vcombine.high %v84_v23, %v84_v23 }
 0x13a   :  { %18792 = vmatpush3.bf16.msra.mxu0 %v19787_v29  ;;  %18771 = vmatprep.subr.bf16.mxu1 %v19788_v33  ;;  %v19800_v29 = vld [vmem:[%s25581_s5 + $0x608] sm:$0xff]   ;;  %v1426_v33 = vpack.c.bf16 %v1334_v9, %v1334_v9  ;;  %v22577_v9 = vrot.slane %v60_v56, %v21741_v58 }
 0x13b   :  { %18793 = vmatprep.subr.bf16.mxu0 %v19789_v3  ;;  %v19803_v3 = vld [vmem:[%s25581_s5 + $0x6d0] sm:$0xff]  }
 0x13d   :  { %18772 = vmatpush3.bf16.msra.mxu1 %v19790_v46  ;;  %v19806_v46 = vld [vmem:[%s25581_s5 + $0x658] sm:$0xff]  }
 0x13e   :  { %18794 = vmatpush3.bf16.msra.mxu0 %v19791_v50  ;;  %18801 = vmatprep.subr.bf16.mxu1 %v19792_v35  ;;  %v19809_v50 = vld [vmem:[%s25581_s5 + $0x698] sm:$0xff]   ;;  %v19812_v35 = vld [vmem:[%s25581_s5 + $0x620] sm:$0xff]  }
 0x13f   :  { %18823 = vmatprep.subr.bf16.mxu0 %v19793_v61  ;;  %v851_v61 = vcombine.high %v60_v56, %v60_v56 }
 0x140   :  { %7918 = vmatmul.mubr.bf16.vlgmr.msra.gmra.mrb[20].mxu1 %v1419_v12  ;;  %v19817_v12 = vld [vmem:[%s25581_s5 + $0x6a8] sm:$0xff]  }
 0x141   :  { %7958 = vmatmul.mubr.bf16.vlgmr.msra.gmra.mrb[24].mxu0 %v1421_v20  ;;  %18802 = vmatpush3.bf16.msra.mxu1 %v19794_v62  ;;  %v19815_v62 = vld [vmem:[%s25581_s5 + $0x6e8] sm:$0xff]   ;;  %v19818_v20 = vld [vmem:[%s25581_s5 + $0x670] sm:$0xff]  }
 0x142   :  { %7997 = vmatprep.mubr.bf16.mxu1 %v1424_v36  ;;  %18824 = vmatpush3.bf16.msra.mxu0 %v19795_v8  ;;  %v19816_v8 = vld [vmem:[%s25581_s5 + $0x628] sm:$0xff]   ;;  %v19819_v36 = vld [vmem:[%s25581_s5 + $0x6f0] sm:$0xff]  }
 0x143   :  { %8037 = vmatprep.mubr.bf16.mxu0 %v1426_v33  ;;  %18803 = vmatprep.subr.bf16.mxu1 %v19798_v14  ;;  %v22583_v14 = vrot.slane %v851_v61, %v21741_v58  ;;  %v19820_v33 = vld [vmem:[%s25581_s5 + $0x630] sm:$0xff]  }
 0x144   :  { %18825 = vmatprep.subr.bf16.mxu0 %v19799_v24  ;;  %v22589_v24 = vrot.slane %v84_v23, %v21741_v58  ;;  %v637_v23 = vmul.f32 %v22455_v26, %v21763_v7 }
 0x145   :  { %18804 = vmatpush3.bf16.msra.mxu1 %v19800_v29  ;;  %v22595_v29 = vrot.slane %v247_v54, %v21741_v58  ;;  %v19827_v54 = vld [vmem:[%s25581_s5 + $0x7c0] sm:$0xff]  }
 0x146   :  { %18826 = vmatpush3.bf16.msra.mxu0 %v19801_v37  ;;  %18805 = vmatprep.subr.bf16.mxu1 %v19802_v41  ;;  %v22602_v37 = vcombine.high %v22577_v9, %v22577_v9  ;;  %v19821_v41 = vld [vmem:[%s25581_s5 + $0x6b0] sm:$0xff]  }
 0x147   :  { %18827 = vmatprep.subr.bf16.mxu0 %v19803_v3  ;;  %v22609_v3 = vcombine.high %v22583_v14, %v22583_v14 }
 0x148   :  { %v1244_v56 = vmul.f32 %v22602_v37, %v21785_v16 }
 0x149   :  { %18806 = vmatpush3.bf16.msra.mxu1 %v19804_v44  ;;  %25651 = vst [vmem:[#allocation8_spill] sm:$0xff] %v22609_v3  ;;  %v19822_v44 = vld [vmem:[%s25581_s5 + $0x678] sm:$0xff]  }
 0x14a   :  { %18828 = vmatpush3.bf16.msra.mxu0 %v19805_v45  ;;  %18807 = vmatprep.subr.bf16.mxu1 %v19806_v46  ;;  %v1239_v45 = vmul.f32 %v22437_v55, %v21785_v16  ;;  %v262_v46 = vcombine.high %v22589_v24, %v22589_v24 }
 0x14b   :  { %18829 = vmatprep.subr.bf16.mxu0 %v19807_v47  ;;  %v19823_v47 = vld [vmem:[%s25581_s5 + $0x6f8] sm:$0xff]  }
 0x14d   :  { %18808 = vmatpush3.bf16.msra.mxu1 %v19808_v48  ;;  %v1241_v48 = vmul.f32 %v22443_v18, %v21785_v16 }
 0x14e   :  { %18830 = vmatpush3.bf16.msra.mxu0 %v19809_v50  ;;  %18809 = vmatprep.subr.bf16.mxu1 %v19810_v52  ;;  %v263_v50 = vcombine.high %v22595_v29, %v22595_v29  ;;  %v19824_v52 = vld [vmem:[%s25581_s5 + $0x638] sm:$0xff]  }
 0x14f   :  { %18831 = vmatprep.subr.bf16.mxu0 %v19811_v21  ;;  %v635_v21 = vmul.f32 %v22449_v22, %v21763_v7  ;;  %v19826_v22 = vld [vmem:[%s25581_s5 + $0x740] sm:$0xff]  }
 0x150   :  { %v642_v26 = vmul.f32 %v263_v50, %v21763_v7  ;;  %v19835_v50 = vld [vmem:[%s25581_s5 + $0x788] sm:$0xff]  }
 0x151   :  { %18810 = vmatpush3.bf16.msra.mxu1 %v19812_v35  ;;  %v19825_v35 = vld [vmem:[%s25581_s5 + $0x6b8] sm:$0xff]   ;;  %v1331_v61 = vadd.f32 %v1239_v45, %v635_v21  ;;  %v19833_v45 = vld [vmem:[%s25581_s5 + $0x7c8] sm:$0xff]   ;;  %v19837_v21 = vld [vmem:[%s25581_s5 + $0x7d0] sm:$0xff]  }
 0x152   :  { %18832 = vmatpush3.bf16.msra.mxu0 %v19813_v60  ;;  %18811 = vmatprep.subr.bf16.mxu1 %v19814_v39  ;;  %v1246_v60 = vmul.f32 %v22609_v3, %v21785_v16  ;;  %v640_v39 = vmul.f32 %v262_v46, %v21763_v7  ;;  %v19926_v3 = vld [vmem:[%s25581_s5 + $0x938] sm:$0xff]  }
 0x153   :  { %18833 = vmatprep.subr.bf16.mxu0 %v19815_v62  ;;  %v1333_v62 = vadd.f32 %v1241_v48, %v637_v23  ;;  %v19840_v23 = vld [vmem:[%s25581_s5 + $0x758] sm:$0xff]  }
 0x155   :  { %18812 = vmatpush3.bf16.msra.mxu1 %v19816_v8  ;;  %v19828_v8 = vld [vmem:[%s25581_s5 + $0x700] sm:$0xff]  }
 0x156   :  { %18834 = vmatpush3.bf16.msra.mxu0 %v19817_v12  ;;  %18813 = vmatprep.subr.bf16.mxu1 %v19818_v20  ;;  %v1336_v12 = vadd.f32 %v1244_v56, %v640_v39  ;;  %v19829_v20 = vld [vmem:[%s25581_s5 + $0x780] sm:$0xff]   ;;  %v19838_v56 = vld [vmem:[%s25581_s5 + $0x710] sm:$0xff]  }
 0x157   :  { %18835 = vmatprep.subr.bf16.mxu0 %v19819_v36  ;;  %v1338_v36 = vadd.f32 %v1246_v60, %v642_v26  ;;  %v19841_v60 = vld [vmem:[%s25581_s5 + $0x7d8] sm:$0xff]   ;;  %v19844_v39 = vld [vmem:[%s25581_s5 + $0x760] sm:$0xff]  }
 0x158   :  { %v1428_v46 = vpack.c.bf16 %v1336_v12, %v1336_v12  ;;  %v19846_v26 = vld [vmem:[%s25581_s5 + $0x720] sm:$0xff]  }
 0x159   :  { %18814 = vmatpush3.bf16.msra.mxu1 %v19820_v33  ;;  %v1423_v33 = vpack.c.bf16 %v1331_v61, %v1331_v61  ;;  %v1430_v48 = vpack.c.bf16 %v1338_v36, %v1338_v36  ;;  %v19842_v61 = vld [vmem:[%s25581_s5 + $0x718] sm:$0xff]   ;;  %v19847_v12 = vld [vmem:[%s25581_s5 + $0x7a0] sm:$0xff]   ;;  %v19848_v36 = vld [vmem:[%s25581_s5 + $0x768] sm:$0xff]  }
 0x15a   :  { %18836 = vmatpush3.bf16.msra.mxu0 %v19821_v41  ;;  %18815 = vmatprep.subr.bf16.mxu1 %v19822_v44  ;;  %v19832_v41 = vld [vmem:[%s25581_s5 + $0x748] sm:$0xff]   ;;  %v1425_v44 = vpack.c.bf16 %v1333_v62, %v1333_v62  ;;  %v19845_v62 = vld [vmem:[%s25581_s5 + $0x7e0] sm:$0xff]  }
 0x15b   :  { %18837 = vmatprep.subr.bf16.mxu0 %v19823_v47  ;;  %v19834_v47 = vld [vmem:[%s25581_s5 + $0x708] sm:$0xff]  }
 0x15d   :  { %18816 = vmatpush3.bf16.msra.mxu1 %v19824_v52  ;;  %v19836_v52 = vld [vmem:[%s25581_s5 + $0x750] sm:$0xff]  }
 0x15e   :  { %18838 = vmatpush3.bf16.msra.mxu0 %v19825_v35  ;;  %18845 = vmatprep.subr.bf16.mxu1 %v19826_v22  ;;  %v19839_v35 = vld [vmem:[%s25581_s5 + $0x790] sm:$0xff]   ;;  %v19843_v22 = vld [vmem:[%s25581_s5 + $0x798] sm:$0xff]  }
 0x15f   :  { %18867 = vmatprep.subr.bf16.mxu0 %v19827_v54  ;;  %v61_v54 = vld [vmem:[%s25579_s3 + $0x40] sm:$0xff] }
 0x160   :  { %7998 = vmatmul.mubr.bf16.vlgmr.msra.gmra.mrb[24].mxu1 %v1423_v33  ;;  %v19849_v33 = vld [vmem:[%s25581_s5 + $0x7e8] sm:$0xff]  }
 0x161   :  { %8038 = vmatmul.mubr.bf16.vlgmr.msra.gmra.mrb[28].mxu0 %v1425_v44  ;;  %18846 = vmatpush3.bf16.msra.mxu1 %v19828_v8  ;;  %v85_v8 = vld [vmem:[%s25578_s2 + $0x40] sm:$0xff]  ;;  %v19850_v44 = vld [vmem:[%s25581_s5 + $0x728] sm:$0xff]  }
 0x162   :  { %8077 = vmatprep.mubr.bf16.mxu1 %v1428_v46  ;;  %18868 = vmatpush3.bf16.msra.mxu0 %v19829_v20  ;;  %v868_v20 = vcombine.high %v61_v54, %v61_v54  ;;  %v19851_v46 = vld [vmem:[%s25581_s5 + $0x7a8] sm:$0xff]  }
 0x163   :  { %8117 = vmatprep.mubr.bf16.mxu0 %v1430_v48  ;;  %18847 = vmatprep.subr.bf16.mxu1 %v19832_v41  ;;  %v264_v41 = vcombine.high %v85_v8, %v85_v8  ;;  %v19852_v48 = vld [vmem:[%s25581_s5 + $0x770] sm:$0xff]  }
 0x164   :  { %18869 = vmatprep.subr.bf16.mxu0 %v19833_v45  ;;  %v22717_v45 = vrot.slane %v61_v54, %v21741_v58 }
 0x165   :  { %18848 = vmatpush3.bf16.msra.mxu1 %v19834_v47  ;;  %v22723_v47 = vrot.slane %v868_v20, %v21741_v58  ;;  %v19857_v20 = vld [vmem:[%s25581_s5 + $0x7f8] sm:$0xff]  }
 0x166   :  { %18870 = vmatpush3.bf16.msra.mxu0 %v19835_v50  ;;  %18849 = vmatprep.subr.bf16.mxu1 %v19836_v52  ;;  %25652 = vst [vmem:[#allocation9_spill] sm:$0xff] %v22717_v45  ;;  %v22729_v50 = vrot.slane %v85_v8, %v21741_v58 }
 0x167   :  { %18871 = vmatprep.subr.bf16.mxu0 %v19837_v21  ;;  %25653 = vst [vmem:[#allocation10_spill] sm:$0xff] %v22723_v47 }
 0x169   :  { %18850 = vmatpush3.bf16.msra.mxu1 %v19838_v56  ;;  %v19853_v56 = vld [vmem:[%s25581_s5 + $0x7f0] sm:$0xff]  }
 0x16a   :  { %18872 = vmatpush3.bf16.msra.mxu0 %v19839_v35  ;;  %18851 = vmatprep.subr.bf16.mxu1 %v19840_v23  ;;  %v19854_v35 = vld [vmem:[%s25581_s5 + $0x730] sm:$0xff]   ;;  %v22738_v23 = vrot.slane %v264_v41, %v21741_v58 }
 0x16b   :  { %18873 = vmatprep.subr.bf16.mxu0 %v19841_v60 }
 0x16d   :  { %18852 = vmatpush3.bf16.msra.mxu1 %v19842_v61 }
 0x16e   :  { %18874 = vmatpush3.bf16.msra.mxu0 %v19843_v22  ;;  %18853 = vmatprep.subr.bf16.mxu1 %v19844_v39  ;;  %v19855_v22 = vld [vmem:[%s25581_s5 + $0x7b0] sm:$0xff]   ;;  %v22745_v39 = vcombine.high %v22717_v45, %v22717_v45 }
 0x16f   :  { %18875 = vmatprep.subr.bf16.mxu0 %v19845_v62 }
 0x170   :  { %25654 = vst [vmem:[#allocation11_spill] sm:$0xff] %v22745_v39 }
 0x171   :  { %18854 = vmatpush3.bf16.msra.mxu1 %v19846_v26 }
 0x172   :  { %18876 = vmatpush3.bf16.msra.mxu0 %v19847_v12  ;;  %18855 = vmatprep.subr.bf16.mxu1 %v19848_v36  ;;  %v19856_v12 = vld [vmem:[%s25581_s5 + $0x778] sm:$0xff]   ;;  %v22755_v36 = vcombine.high %v22723_v47, %v22723_v47 }
 0x173   :  { %v18553_v52 = vpop.f32.mrb[0].mxu1  ;;  %v18575_v21 = vpop.f32.mrb[4].mxu0  ;;  %18877 = vmatprep.subr.bf16.mxu0 %v19849_v33 }
 0x174   :  { %v18554_v60 = vpop.f32.mrb[1].mxu1  ;;  %v18576_v61 = vpop.f32.mrb[5].mxu0  ;;  %25655 = vst [vmem:[#allocation12_spill] sm:$0xff] %v22755_v36 }
 0x175   :  { %v18555_v62 = vadd.f32 %v18554_v60, %v18553_v52  ;;  %v18577_v54 = vadd.f32 %v18576_v61, %v18575_v21  ;;  %18856 = vmatpush3.bf16.msra.mxu1 %v19850_v44  ;;  %v18556_v26 = vpop.f32.mrb[2].mxu1  ;;  %v18578_v8 = vpop.f32.mrb[6].mxu0  ;;  %v1243_v44 = vmul.f32 %v22577_v9, %v21785_v16  ;;  %v279_v52 = vcombine.high %v22729_v50, %v22729_v50  ;;  %v19858_v60 = vld [vmem:[%s25581_s5 + $0x738] sm:$0xff]  }
 0x176   :  { %18878 = vmatpush3.bf16.msra.mxu0 %v19851_v46  ;;  %v18557_v33 = vpop.f32.mrb[3].mxu1  ;;  %v18579_v41 = vpop.f32.mrb[7].mxu0  ;;  %18857 = vmatprep.subr.bf16.mxu1 %v19852_v48  ;;  %v1245_v61 = vmul.f32 %v22583_v14, %v21785_v16  ;;  %v280_v46 = vcombine.high %v22738_v23, %v22738_v23  ;;  %v19859_v48 = vld [vmem:[%s25581_s5 + $0x7b8] sm:$0xff]   ;;  %v639_v26 = vmul.f32 %v22589_v24, %v21763_v7  ;;  %v19860_v8 = vld [vmem:[%s25581_s5 + $0x840] sm:$0xff]  }
 0x177   :  { %v7520_v21 = vadd.f32 %v18555_v62, %v22273_v63  ;;  %18879 = vmatprep.subr.bf16.mxu0 %v19853_v56  ;;  %v1248_v63 = vmul.f32 %v22745_v39, %v21785_v16  ;;  %v641_v62 = vmul.f32 %v22595_v29, %v21763_v7  ;;  %v1250_v33 = vmul.f32 %v22755_v36, %v21785_v16  ;;  %v19861_v24 = vld [vmem:[%s25581_s5 + $0x8c0] sm:$0xff]   ;;  %v19890_v39 = vld [vmem:[%s25581_s5 + $0x878] sm:$0xff]  }
 0x178   :  { %v1335_v41 = vadd.f32 %v1243_v44, %v639_v26  ;;  %v19862_v29 = vld [vmem:[%s25581_s5 + $0x800] sm:$0xff]   ;;  %v19866_v44 = vld [vmem:[%s25581_s5 + $0x848] sm:$0xff]  }
 0x179   :  { %v22776_v56 = vadd.f32 %v18577_v54, %v7520_v21  ;;  %18858 = vmatpush3.bf16.msra.mxu1 %v19854_v35  ;;  %v644_v54 = vmul.f32 %v279_v52, %v21763_v7  ;;  %v1337_v35 = vadd.f32 %v1245_v61, %v641_v62  ;;  %v646_v21 = vmul.f32 %v280_v46, %v21763_v7  ;;  %v19867_v52 = vld [vmem:[%s25581_s5 + $0x8c8] sm:$0xff]   ;;  %v19871_v62 = vld [vmem:[%s25581_s5 + $0x8d0] sm:$0xff]  }
 0x17a   :  { %18880 = vmatpush3.bf16.msra.mxu0 %v19855_v22  ;;  %18859 = vmatprep.subr.bf16.mxu1 %v19856_v12  ;;  %v19863_v22 = vld [vmem:[%s25581_s5 + $0x880] sm:$0xff]   ;;  %v19868_v46 = vld [vmem:[%s25581_s5 + $0x808] sm:$0xff]  }
 0x17b   :  { %18881 = vmatprep.subr.bf16.mxu0 %v19857_v20  ;;  %v1340_v0 = vadd.f32 %v1248_v63, %v644_v54  ;;  %v1342_v12 = vadd.f32 %v1250_v33, %v646_v21  ;;  %v1427_v20 = vpack.c.bf16 %v1335_v41, %v1335_v41  ;;  %v1429_v61 = vpack.c.bf16 %v1337_v35, %v1337_v35  ;;  %v19869_v26 = vld [vmem:[%s25581_s5 + $0x888] sm:$0xff]   ;;  %v19870_v63 = vld [vmem:[%s25581_s5 + $0x850] sm:$0xff]   ;;  %v19874_v33 = vld [vmem:[%s25581_s5 + $0x858] sm:$0xff]  }
 0x17c   :  { %v19875_v41 = vld [vmem:[%s25581_s5 + $0x8d8] sm:$0xff]   ;;  %v19878_v35 = vld [vmem:[%s25581_s5 + $0x860] sm:$0xff]   ;;  %v62_v21 = vld [vmem:[%s25579_s3 + $0x48] sm:$0xff] }
 0x17d   :  { %18860 = vmatpush3.bf16.msra.mxu1 %v19858_v60  ;;  %v1432_v60 = vpack.c.bf16 %v1340_v0, %v1340_v0  ;;  %v19872_v0 = vld [vmem:[%s25581_s5 + $0x810] sm:$0xff]   ;;  %v19877_v54 = vld [vmem:[%s25581_s5 + $0x898] sm:$0xff]  }
 0x17e   :  { %18882 = vmatpush3.bf16.msra.mxu0 %v19859_v48  ;;  %18889 = vmatprep.subr.bf16.mxu1 %v19860_v8  ;;  %v1434_v48 = vpack.c.bf16 %v1342_v12, %v1342_v12  ;;  %v19873_v8 = vld [vmem:[%s25581_s5 + $0x890] sm:$0xff]   ;;  %v86_v12 = vld [vmem:[%s25578_s2 + $0x48] sm:$0xff] }
 0x17f   :  { %18911 = vmatprep.subr.bf16.mxu0 %v19861_v24  ;;  %v19876_v24 = vld [vmem:[%s25581_s5 + $0x818] sm:$0xff]  }
 0x180   :  { %8078 = vmatmul.mubr.bf16.vlgmr.msra.gmra.mrb[28].mxu1 %v1427_v20  ;;  %v885_v20 = vcombine.high %v62_v21, %v62_v21 }
 0x181   :  { %8118 = vmatmul.mubr.bf16.vlgmr.msra.gmra.mrb[32].mxu0 %v1429_v61  ;;  %18890 = vmatpush3.bf16.msra.mxu1 %v19862_v29  ;;  %v19879_v29 = vld [vmem:[%s25581_s5 + $0x8e0] sm:$0xff]   ;;  %v19883_v61 = vld [vmem:[%s25581_s5 + $0x8e8] sm:$0xff]  }
 0x182   :  { %8157 = vmatprep.mubr.bf16.mxu1 %v1432_v60  ;;  %18912 = vmatpush3.bf16.msra.mxu0 %v19863_v22  ;;  %v19880_v22 = vld [vmem:[%s25581_s5 + $0x820] sm:$0xff]   ;;  %v19884_v60 = vld [vmem:[%s25581_s5 + $0x828] sm:$0xff]  }
 0x183   :  { %8197 = vmatprep.mubr.bf16.mxu0 %v1434_v48  ;;  %18891 = vmatprep.subr.bf16.mxu1 %v19866_v44  ;;  %v19881_v44 = vld [vmem:[%s25581_s5 + $0x8a0] sm:$0xff]   ;;  %v19885_v48 = vld [vmem:[%s25581_s5 + $0x8a8] sm:$0xff]  }
 0x184   :  { %18913 = vmatprep.subr.bf16.mxu0 %v19867_v52  ;;  %v19882_v52 = vld [vmem:[%s25581_s5 + $0x868] sm:$0xff]  }
 0x185   :  { %18892 = vmatpush3.bf16.msra.mxu1 %v19868_v46  ;;  %v281_v46 = vcombine.high %v86_v12, %v86_v12 }
 0x186   :  { %18914 = vmatpush3.bf16.msra.mxu0 %v19869_v26  ;;  %18893 = vmatprep.subr.bf16.mxu1 %v19870_v63  ;;  %v22860_v26 = vrot.slane %v62_v21, %v21741_v58  ;;  %v22866_v63 = vrot.slane %v885_v20, %v21741_v58  ;;  %v19889_v21 = vld [vmem:[%s25581_s5 + $0x8b0] sm:$0xff]  }
 0x187   :  { %18915 = vmatprep.subr.bf16.mxu0 %v19871_v62  ;;  %v19886_v62 = vld [vmem:[%s25581_s5 + $0x870] sm:$0xff]  }
 0x188   :  { %25656 = vst [vmem:[#allocation13_spill] sm:$0xff] %v22860_v26  ;;  %25657 = vst [vmem:[#allocation14_spill] sm:$0xff] %v22866_v63 }
 0x189   :  { %18894 = vmatpush3.bf16.msra.mxu1 %v19872_v0  ;;  %v22872_v0 = vrot.slane %v86_v12, %v21741_v58 }
 0x18a   :  { %18916 = vmatpush3.bf16.msra.mxu0 %v19873_v8  ;;  %18895 = vmatprep.subr.bf16.mxu1 %v19874_v33 }
 0x18b   :  { %18917 = vmatprep.subr.bf16.mxu0 %v19875_v41  ;;  %v19887_v41 = vld [vmem:[%s25581_s5 + $0x8f0] sm:$0xff]  }
 0x18d   :  { %18896 = vmatpush3.bf16.msra.mxu1 %v19876_v24  ;;  %v19888_v24 = vld [vmem:[%s25581_s5 + $0x830] sm:$0xff]  }
 0x18e   :  { %18918 = vmatpush3.bf16.msra.mxu0 %v19877_v54  ;;  %18897 = vmatprep.subr.bf16.mxu1 %v19878_v35  ;;  %v22881_v54 = vrot.slane %v281_v46, %v21741_v58 }
 0x18f   :  { %18919 = vmatprep.subr.bf16.mxu0 %v19879_v29 }
 0x191   :  { %18898 = vmatpush3.bf16.msra.mxu1 %v19880_v22  ;;  %v22888_v22 = vcombine.high %v22860_v26, %v22860_v26 }
 0x192   :  { %18920 = vmatpush3.bf16.msra.mxu0 %v19881_v44  ;;  %18899 = vmatprep.subr.bf16.mxu1 %v19882_v52 }
 0x193   :  { %v18597_v8 = vpop.f32.mrb[4].mxu1  ;;  %v18619_v33 = vpop.f32.mrb[8].mxu0  ;;  %18921 = vmatprep.subr.bf16.mxu0 %v19883_v61  ;;  %25658 = vst [vmem:[#allocation15_spill] sm:$0xff] %v22888_v22  ;;  %v22892_v61 = vcombine.high %v22866_v63, %v22866_v63 }
 0x194   :  { %v18598_v35 = vpop.f32.mrb[5].mxu1  ;;  %v18620_v29 = vpop.f32.mrb[9].mxu0 }
 0x195   :  { %v18599_v12 = vadd.f32 %v18598_v35, %v18597_v8  ;;  %v18621_v44 = vadd.f32 %v18620_v29, %v18619_v33  ;;  %v18600_v20 = vpop.f32.mrb[6].mxu1  ;;  %v18622_v52 = vpop.f32.mrb[10].mxu0  ;;  %18900 = vmatpush3.bf16.msra.mxu1 %v19884_v60  ;;  %25659 = vst [vmem:[#allocation16_spill] sm:$0xff] %v22892_v61  ;;  %v19891_v8 = vld [vmem:[%s25581_s5 + $0x8f8] sm:$0xff]   ;;  %v1247_v33 = vmul.f32 %v22717_v45, %v21785_v16 }
 0x196   :  { %18922 = vmatpush3.bf16.msra.mxu0 %v19885_v48  ;;  %v18601_v46 = vpop.f32.mrb[7].mxu1  ;;  %v18623_v36 = vpop.f32.mrb[11].mxu0  ;;  %18901 = vmatprep.subr.bf16.mxu1 %v19886_v62  ;;  %v296_v60 = vcombine.high %v22872_v0, %v22872_v0  ;;  %v297_v48 = vcombine.high %v22881_v54, %v22881_v54  ;;  %v19892_v62 = vld [vmem:[%s25581_s5 + $0x838] sm:$0xff]   ;;  %v643_v29 = vmul.f32 %v22729_v50, %v21763_v7  ;;  %v19894_v50 = vld [vmem:[%s25581_s5 + $0x940] sm:$0xff]  }
 0x197   :  { %v7600_v35 = vadd.f32 %v18599_v12, %v22776_v56  ;;  %18923 = vmatprep.subr.bf16.mxu0 %v19887_v41  ;;  %v1249_v36 = vmul.f32 %v22723_v47, %v21785_v16  ;;  %v1252_v20 = vmul.f32 %v22888_v22, %v21785_v16  ;;  %v19893_v56 = vld [vmem:[%s25581_s5 + $0x8b8] sm:$0xff]   ;;  %v645_v41 = vmul.f32 %v22738_v23, %v21763_v7 }
 0x198   :  { %v1254_v12 = vmul.f32 %v22892_v61, %v21785_v16  ;;  %v1339_v46 = vadd.f32 %v1247_v33, %v643_v29  ;;  %v650_v23 = vmul.f32 %v297_v48, %v21763_v7  ;;  %v19897_v33 = vld [vmem:[%s25581_s5 + $0x980] sm:$0xff]   ;;  %v19901_v48 = vld [vmem:[%s25581_s5 + $0x9c8] sm:$0xff]  }
 0x199   :  { %v22916_v52 = vadd.f32 %v18621_v44, %v7600_v35  ;;  %18902 = vmatpush3.bf16.msra.mxu1 %v19888_v24  ;;  %v648_v44 = vmul.f32 %v296_v60, %v21763_v7  ;;  %v1341_v24 = vadd.f32 %v1249_v36, %v645_v41  ;;  %v19895_v35 = vld [vmem:[%s25581_s5 + $0x9c0] sm:$0xff]   ;;  %v19900_v60 = vld [vmem:[%s25581_s5 + $0x948] sm:$0xff]  }
 0x19a   :  { %18924 = vmatpush3.bf16.msra.mxu0 %v19889_v21  ;;  %18903 = vmatprep.subr.bf16.mxu1 %v19890_v39  ;;  %v19896_v21 = vld [vmem:[%s25581_s5 + $0x900] sm:$0xff]   ;;  %v1346_v29 = vadd.f32 %v1254_v12, %v650_v23  ;;  %v19903_v41 = vld [vmem:[%s25581_s5 + $0x988] sm:$0xff]   ;;  %v19904_v12 = vld [vmem:[%s25581_s5 + $0x950] sm:$0xff]  }
 0x19b   :  { %18925 = vmatprep.subr.bf16.mxu0 %v19891_v8  ;;  %v1344_v39 = vadd.f32 %v1252_v20, %v648_v44  ;;  %v1431_v8 = vpack.c.bf16 %v1339_v46, %v1339_v46  ;;  %v1433_v36 = vpack.c.bf16 %v1341_v24, %v1341_v24  ;;  %v19902_v20 = vld [vmem:[%s25581_s5 + $0x908] sm:$0xff]   ;;  %v19905_v46 = vld [vmem:[%s25581_s5 + $0x9d0] sm:$0xff]   ;;  %v19908_v24 = vld [vmem:[%s25581_s5 + $0x958] sm:$0xff]  }
 0x19c   :  { %v19907_v44 = vld [vmem:[%s25581_s5 + $0x990] sm:$0xff]   ;;  %v19910_v23 = vld [vmem:[%s25581_s5 + $0x918] sm:$0xff]  }
 0x19d   :  { %18904 = vmatpush3.bf16.msra.mxu1 %v19892_v62  ;;  %v1436_v62 = vpack.c.bf16 %v1344_v39, %v1344_v39  ;;  %v19912_v39 = vld [vmem:[%s25581_s5 + $0x960] sm:$0xff]  }
 0x19e   :  { %18926 = vmatpush3.bf16.msra.mxu0 %v19893_v56  ;;  %18933 = vmatprep.subr.bf16.mxu1 %v19894_v50  ;;  %v1438_v56 = vpack.c.bf16 %v1346_v29, %v1346_v29  ;;  %v19906_v50 = vld [vmem:[%s25581_s5 + $0x910] sm:$0xff]  }
 0x19f   :  { %18955 = vmatprep.subr.bf16.mxu0 %v19895_v35  ;;  %v19909_v35 = vld [vmem:[%s25581_s5 + $0x9d8] sm:$0xff]   ;;  %v63_v29 = vld [vmem:[%s25579_s3 + $0x50] sm:$0xff] }
 0x1a0   :  { %8158 = vmatmul.mubr.bf16.vlgmr.msra.gmra.mrb[32].mxu1 %v1431_v8  ;;  %v19914_v8 = vld [vmem:[%s25581_s5 + $0x920] sm:$0xff]  }
 0x1a1   :  { %8198 = vmatmul.mubr.bf16.vlgmr.msra.gmra.mrb[36].mxu0 %v1433_v36  ;;  %18934 = vmatpush3.bf16.msra.mxu1 %v19896_v21  ;;  %v19911_v21 = vld [vmem:[%s25581_s5 + $0x998] sm:$0xff]   ;;  %v87_v36 = vld [vmem:[%s25578_s2 + $0x50] sm:$0xff] }
 0x1a2   :  { %8237 = vmatprep.mubr.bf16.mxu1 %v1436_v62  ;;  %18956 = vmatpush3.bf16.msra.mxu0 %v19897_v33  ;;  %v19913_v33 = vld [vmem:[%s25581_s5 + $0x9e0] sm:$0xff]   ;;  %v902_v62 = vcombine.high %v63_v29, %v63_v29 }
 0x1a3   :  { %8277 = vmatprep.mubr.bf16.mxu0 %v1438_v56  ;;  %18935 = vmatprep.subr.bf16.mxu1 %v19900_v60  ;;  %v19915_v60 = vld [vmem:[%s25581_s5 + $0x9a0] sm:$0xff]   ;;  %v19918_v56 = vld [vmem:[%s25581_s5 + $0x928] sm:$0xff]  }
 0x1a4   :  { %18957 = vmatprep.subr.bf16.mxu0 %v19901_v48  ;;  %v19916_v48 = vld [vmem:[%s25581_s5 + $0x968] sm:$0xff]  }
 0x1a5   :  { %18936 = vmatpush3.bf16.msra.mxu1 %v19902_v20  ;;  %v19917_v20 = vld [vmem:[%s25581_s5 + $0x9e8] sm:$0xff]  }
 0x1a6   :  { %18958 = vmatpush3.bf16.msra.mxu0 %v19903_v41  ;;  %18937 = vmatprep.subr.bf16.mxu1 %v19904_v12  ;;  %v298_v41 = vcombine.high %v87_v36, %v87_v36  ;;  %v19919_v12 = vld [vmem:[%s25581_s5 + $0x9a8] sm:$0xff]  }
 0x1a7   :  { %18959 = vmatprep.subr.bf16.mxu0 %v19905_v46  ;;  %v23006_v46 = vrot.slane %v63_v29, %v21741_v58 }
 0x1a9   :  { %18938 = vmatpush3.bf16.msra.mxu1 %v19906_v50  ;;  %25660 = vst [vmem:[#allocation17_spill] sm:$0xff] %v23006_v46  ;;  %v19920_v50 = vld [vmem:[%s25581_s5 + $0x970] sm:$0xff]  }
 0x1aa   :  { %18960 = vmatpush3.bf16.msra.mxu0 %v19907_v44  ;;  %18939 = vmatprep.subr.bf16.mxu1 %v19908_v24  ;;  %v23012_v44 = vrot.slane %v902_v62, %v21741_v58  ;;  %v19921_v24 = vld [vmem:[%s25581_s5 + $0x9f0] sm:$0xff]  }
 0x1ab   :  { %18961 = vmatprep.subr.bf16.mxu0 %v19909_v35  ;;  %v23018_v35 = vrot.slane %v87_v36, %v21741_v58 }
 0x1ac   :  { %25661 = vst [vmem:[#allocation18_spill] sm:$0xff] %v23012_v44  ;;  %v23041_v61 = vcombine.high %v23012_v44, %v23012_v44 }
 0x1ad   :  { %18940 = vmatpush3.bf16.msra.mxu1 %v19910_v23 }
 0x1ae   :  { %18962 = vmatpush3.bf16.msra.mxu0 %v19911_v21  ;;  %18941 = vmatprep.subr.bf16.mxu1 %v19912_v39  ;;  %v19922_v21 = vld [vmem:[%s25581_s5 + $0x930] sm:$0xff]   ;;  %v23024_v39 = vrot.slane %v298_v41, %v21741_v58  ;;  %v19925_v41 = vld [vmem:[%s25581_s5 + $0x9f8] sm:$0xff]   ;;  %25663 = vst [vmem:[#allocation20_spill] sm:$0xff] %v23041_v61 }
 0x1af   :  { %18963 = vmatprep.subr.bf16.mxu0 %v19913_v33 }
 0x1b1   :  { %18942 = vmatpush3.bf16.msra.mxu1 %v19914_v8  ;;  %v19923_v8 = vld [vmem:[%s25581_s5 + $0x9b0] sm:$0xff]  }
 0x1b2   :  { %18964 = vmatpush3.bf16.msra.mxu0 %v19915_v60  ;;  %18943 = vmatprep.subr.bf16.mxu1 %v19916_v48  ;;  %v23031_v60 = vcombine.high %v23006_v46, %v23006_v46 }
 0x1b3   :  { %v18641_v23 = vpop.f32.mrb[8].mxu1  ;;  %18965 = vmatprep.subr.bf16.mxu0 %v19917_v20  ;;  %v19924_v20 = vld [vmem:[%s25581_s5 + $0x978] sm:$0xff]  }
 0x1b4   :  { %v18663_v33 = vpop.f32.mrb[12].mxu0  ;;  %v18642_v29 = vpop.f32.mrb[9].mxu1  ;;  %25662 = vst [vmem:[#allocation19_spill] sm:$0xff] %v23031_v60 }
 0x1b5   :  { %v18643_v36 = vadd.f32 %v18642_v29, %v18641_v23  ;;  %v18664_v48 = vpop.f32.mrb[13].mxu0  ;;  %v18644_v62 = vpop.f32.mrb[10].mxu1  ;;  %18944 = vmatpush3.bf16.msra.mxu1 %v19918_v56  ;;  %v1251_v56 = vmul.f32 %v22860_v26, %v21785_v16  ;;  %v313_v23 = vcombine.high %v23018_v35, %v23018_v35 }
 0x1b6   :  { %v18665_v22 = vadd.f32 %v18664_v48, %v18663_v33  ;;  %v18666_v47 = vpop.f32.mrb[14].mxu0  ;;  %18966 = vmatpush3.bf16.msra.mxu0 %v19919_v12  ;;  %v18645_v45 = vpop.f32.mrb[11].mxu1  ;;  %18945 = vmatprep.subr.bf16.mxu1 %v19920_v50  ;;  %v19927_v12 = vld [vmem:[%s25581_s5 + $0x9b8] sm:$0xff]   ;;  %v647_v50 = vmul.f32 %v22872_v0, %v21763_v7  ;;  %v649_v33 = vmul.f32 %v22881_v54, %v21763_v7  ;;  %v19929_v0 = vld [vmem:[%s25581_s5 + $0xac0] sm:$0xff]  }
 0x1b7   :  { %v7680_v29 = vadd.f32 %v18643_v36, %v22916_v52  ;;  %v18667_v62 = vpop.f32.mrb[15].mxu0  ;;  %18967 = vmatprep.subr.bf16.mxu0 %v19921_v24  ;;  %v1253_v47 = vmul.f32 %v22866_v63, %v21785_v16  ;;  %v314_v45 = vcombine.high %v23024_v39, %v23024_v39  ;;  %v1256_v52 = vmul.f32 %v23031_v60, %v21785_v16  ;;  %v19928_v36 = vld [vmem:[%s25581_s5 + $0xa40] sm:$0xff]  }
 0x1b8   :  { %v1258_v48 = vmul.f32 %v23041_v61, %v21785_v16  ;;  %v1343_v62 = vadd.f32 %v1251_v56, %v647_v50  ;;  %v19930_v54 = vld [vmem:[%s25581_s5 + $0xa00] sm:$0xff]   ;;  %v19934_v56 = vld [vmem:[%s25581_s5 + $0xa48] sm:$0xff]   ;;  %v19958_v61 = vld [vmem:[%s25581_s5 + $0xa78] sm:$0xff]  }
 0x1b9   :  { %v23062_v24 = vadd.f32 %v18665_v22, %v7680_v29  ;;  %18946 = vmatpush3.bf16.msra.mxu1 %v19922_v21  ;;  %v652_v22 = vmul.f32 %v313_v23, %v21763_v7  ;;  %v1345_v21 = vadd.f32 %v1253_v47, %v649_v33  ;;  %v654_v29 = vmul.f32 %v314_v45, %v21763_v7  ;;  %v19935_v23 = vld [vmem:[%s25581_s5 + $0xac8] sm:$0xff]   ;;  %v19939_v33 = vld [vmem:[%s25581_s5 + $0xad0] sm:$0xff]  }
 0x1ba   :  { %18968 = vmatpush3.bf16.msra.mxu0 %v19923_v8  ;;  %18947 = vmatprep.subr.bf16.mxu1 %v19924_v20  ;;  %v19931_v8 = vld [vmem:[%s25581_s5 + $0xa80] sm:$0xff]   ;;  %v19936_v45 = vld [vmem:[%s25581_s5 + $0xa08] sm:$0xff]  }
 0x1bb   :  { %18969 = vmatprep.subr.bf16.mxu0 %v19925_v41  ;;  %v1348_v60 = vadd.f32 %v1256_v52, %v652_v22  ;;  %v1350_v20 = vadd.f32 %v1258_v48, %v654_v29  ;;  %v1435_v41 = vpack.c.bf16 %v1343_v62, %v1343_v62  ;;  %v1437_v47 = vpack.c.bf16 %v1345_v21, %v1345_v21  ;;  %v19937_v50 = vld [vmem:[%s25581_s5 + $0xa88] sm:$0xff]   ;;  %v19938_v52 = vld [vmem:[%s25581_s5 + $0xa50] sm:$0xff]   ;;  %v19942_v48 = vld [vmem:[%s25581_s5 + $0xa58] sm:$0xff]  }
 0x1bc   :  { %v19943_v62 = vld [vmem:[%s25581_s5 + $0xad8] sm:$0xff]   ;;  %v19946_v21 = vld [vmem:[%s25581_s5 + $0xa60] sm:$0xff]  }
 0x1bd   :  { %18948 = vmatpush3.bf16.msra.mxu1 %v19926_v3  ;;  %v1440_v3 = vpack.c.bf16 %v1348_v60, %v1348_v60  ;;  %v19940_v60 = vld [vmem:[%s25581_s5 + $0xa10] sm:$0xff]   ;;  %v19945_v22 = vld [vmem:[%s25581_s5 + $0xa98] sm:$0xff]  }
 0x1be   :  { %18970 = vmatpush3.bf16.msra.mxu0 %v19927_v12  ;;  %18977 = vmatprep.subr.bf16.mxu1 %v19928_v36  ;;  %v1442_v12 = vpack.c.bf16 %v1350_v20, %v1350_v20  ;;  %v19941_v36 = vld [vmem:[%s25581_s5 + $0xa90] sm:$0xff]   ;;  %v64_v29 = vld [vmem:[%s25579_s3 + $0x58] sm:$0xff] }
 0x1bf   :  { %18999 = vmatprep.subr.bf16.mxu0 %v19929_v0  ;;  %v19944_v0 = vld [vmem:[%s25581_s5 + $0xa18] sm:$0xff]  }
 0x1c0   :  { %8238 = vmatmul.mubr.bf16.vlgmr.msra.gmra.mrb[36].mxu1 %v1435_v41  ;;  %v88_v20 = vld [vmem:[%s25578_s2 + $0x58] sm:$0xff]  ;;  %v919_v41 = vcombine.high %v64_v29, %v64_v29 }
 0x1c1   :  { %8278 = vmatmul.mubr.bf16.vlgmr.msra.gmra.mrb[40].mxu0 %v1437_v47  ;;  %18978 = vmatpush3.bf16.msra.mxu1 %v19930_v54  ;;  %v19947_v54 = vld [vmem:[%s25581_s5 + $0xae0] sm:$0xff]   ;;  %v19951_v47 = vld [vmem:[%s25581_s5 + $0xae8] sm:$0xff]  }
 0x1c2   :  { %8317 = vmatprep.mubr.bf16.mxu1 %v1440_v3  ;;  %19000 = vmatpush3.bf16.msra.mxu0 %v19931_v8  ;;  %v19948_v8 = vld [vmem:[%s25581_s5 + $0xa20] sm:$0xff]   ;;  %v19952_v3 = vld [vmem:[%s25581_s5 + $0xa28] sm:$0xff]  }
 0x1c3   :  { %8357 = vmatprep.mubr.bf16.mxu0 %v1442_v12  ;;  %18979 = vmatprep.subr.bf16.mxu1 %v19934_v56  ;;  %v19949_v56 = vld [vmem:[%s25581_s5 + $0xaa0] sm:$0xff]   ;;  %v19953_v12 = vld [vmem:[%s25581_s5 + $0xaa8] sm:$0xff]  }
 0x1c4   :  { %19001 = vmatprep.subr.bf16.mxu0 %v19935_v23  ;;  %v19950_v23 = vld [vmem:[%s25581_s5 + $0xa68] sm:$0xff]  }
 0x1c5   :  { %18980 = vmatpush3.bf16.msra.mxu1 %v19936_v45  ;;  %v315_v45 = vcombine.high %v88_v20, %v88_v20 }
 0x1c6   :  { %19002 = vmatpush3.bf16.msra.mxu0 %v19937_v50  ;;  %18981 = vmatprep.subr.bf16.mxu1 %v19938_v52  ;;  %v23146_v50 = vrot.slane %v64_v29, %v21741_v58  ;;  %v23152_v52 = vrot.slane %v919_v41, %v21741_v58 }
 0x1c7   :  { %19003 = vmatprep.subr.bf16.mxu0 %v19939_v33  ;;  %v19954_v33 = vld [vmem:[%s25581_s5 + $0xa70] sm:$0xff]  }
 0x1c8   :  { %25664 = vst [vmem:[#allocation21_spill] sm:$0xff] %v23146_v50  ;;  %25665 = vst [vmem:[#allocation22_spill] sm:$0xff] %v23152_v52  ;;  %v23174_v29 = vcombine.high %v23146_v50, %v23146_v50  ;;  %v23178_v41 = vcombine.high %v23152_v52, %v23152_v52 }
 0x1c9   :  { %18982 = vmatpush3.bf16.msra.mxu1 %v19940_v60  ;;  %v23158_v60 = vrot.slane %v88_v20, %v21741_v58 }
 0x1ca   :  { %19004 = vmatpush3.bf16.msra.mxu0 %v19941_v36  ;;  %18983 = vmatprep.subr.bf16.mxu1 %v19942_v48  ;;  %v19955_v48 = vld [vmem:[%s25581_s5 + $0xaf0] sm:$0xff]   ;;  %25666 = vst [vmem:[#allocation23_spill] sm:$0xff] %v23174_v29  ;;  %25667 = vst [vmem:[#allocation24_spill] sm:$0xff] %v23178_v41 }
 0x1cb   :  { %19005 = vmatprep.subr.bf16.mxu0 %v19943_v62  ;;  %v23164_v62 = vrot.slane %v315_v45, %v21741_v58 }
 0x1cd   :  { %18984 = vmatpush3.bf16.msra.mxu1 %v19944_v0 }
 0x1ce   :  { %19006 = vmatpush3.bf16.msra.mxu0 %v19945_v22  ;;  %18985 = vmatprep.subr.bf16.mxu1 %v19946_v21  ;;  %v19956_v21 = vld [vmem:[%s25581_s5 + $0xa30] sm:$0xff]  }
 0x1cf   :  { %19007 = vmatprep.subr.bf16.mxu0 %v19947_v54  ;;  %v19957_v54 = vld [vmem:[%s25581_s5 + $0xab0] sm:$0xff]  }
 0x1d1   :  { %18986 = vmatpush3.bf16.msra.mxu1 %v19948_v8 }
 0x1d2   :  { %19008 = vmatpush3.bf16.msra.mxu0 %v19949_v56  ;;  %18987 = vmatprep.subr.bf16.mxu1 %v19950_v23 }
 0x1d3   :  { %v18685_v36 = vpop.f32.mrb[12].mxu1  ;;  %19009 = vmatprep.subr.bf16.mxu0 %v19951_v47 }
 0x1d4   :  { %v18707_v0 = vpop.f32.mrb[16].mxu0  ;;  %v18686_v22 = vpop.f32.mrb[13].mxu1 }
 0x1d5   :  { %v18687_v8 = vadd.f32 %v18686_v22, %v18685_v36  ;;  %v18708_v20 = vpop.f32.mrb[17].mxu0  ;;  %v18688_v56 = vpop.f32.mrb[14].mxu1  ;;  %18988 = vmatpush3.bf16.msra.mxu1 %v19952_v3  ;;  %v19959_v36 = vld [vmem:[%s25581_s5 + $0xaf8] sm:$0xff]   ;;  %v1255_v3 = vmul.f32 %v23006_v46, %v21785_v16  ;;  %v330_v22 = vcombine.high %v23158_v60, %v23158_v60 }
 0x1d6   :  { %v18709_v23 = vadd.f32 %v18708_v20, %v18707_v0  ;;  %v18710_v47 = vpop.f32.mrb[18].mxu0  ;;  %19010 = vmatpush3.bf16.msra.mxu0 %v19953_v12  ;;  %v18689_v45 = vpop.f32.mrb[15].mxu1  ;;  %18989 = vmatprep.subr.bf16.mxu1 %v19954_v33  ;;  %v19960_v12 = vld [vmem:[%s25581_s5 + $0xa38] sm:$0xff]   ;;  %v1257_v33 = vmul.f32 %v23012_v44, %v21785_v16  ;;  %v331_v56 = vcombine.high %v23164_v62, %v23164_v62 }
 0x1d7   :  { %v7760_v0 = vadd.f32 %v18687_v8, %v23062_v24  ;;  %v18711_v20 = vpop.f32.mrb[19].mxu0  ;;  %19011 = vmatprep.subr.bf16.mxu0 %v19955_v48  ;;  %v19961_v47 = vld [vmem:[%s25581_s5 + $0xab8] sm:$0xff]   ;;  %v651_v45 = vmul.f32 %v23018_v35, %v21763_v7  ;;  %v1260_v24 = vmul.f32 %v23174_v29, %v21785_v16  ;;  %v653_v8 = vmul.f32 %v23024_v39, %v21763_v7  ;;  %v19963_v35 = vld [vmem:[%s25581_s5 + $0xbc0] sm:$0xff]  }
 0x1d8   :  { %v19962_v20 = vld [vmem:[%s25581_s5 + $0xb40] sm:$0xff]   ;;  %v1262_v44 = vmul.f32 %v23178_v41, %v21785_v16  ;;  %v19992_v41 = vld [vmem:[%s25581_s5 + $0xb78] sm:$0xff]  }
 0x1d9   :  { %v23205_v48 = vadd.f32 %v18709_v23, %v7760_v0  ;;  %18990 = vmatpush3.bf16.msra.mxu1 %v19956_v21  ;;  %v1347_v46 = vadd.f32 %v1255_v3, %v651_v45  ;;  %v656_v23 = vmul.f32 %v330_v22, %v21763_v7  ;;  %v1349_v21 = vadd.f32 %v1257_v33, %v653_v8  ;;  %v19964_v39 = vld [vmem:[%s25581_s5 + $0xb00] sm:$0xff]   ;;  %v19968_v3 = vld [vmem:[%s25581_s5 + $0xb48] sm:$0xff]   ;;  %v19973_v45 = vld [vmem:[%s25581_s5 + $0xbd0] sm:$0xff]  }
 0x1da   :  { %19012 = vmatpush3.bf16.msra.mxu0 %v19957_v54  ;;  %18991 = vmatprep.subr.bf16.mxu1 %v19958_v61  ;;  %v658_v0 = vmul.f32 %v331_v56, %v21763_v7  ;;  %v19965_v61 = vld [vmem:[%s25581_s5 + $0xb80] sm:$0xff]   ;;  %v19969_v22 = vld [vmem:[%s25581_s5 + $0xbc8] sm:$0xff]   ;;  %v19976_v8 = vld [vmem:[%s25581_s5 + $0xb58] sm:$0xff]  }
 0x1db   :  { %19013 = vmatprep.subr.bf16.mxu0 %v19959_v36  ;;  %v1352_v29 = vadd.f32 %v1260_v24, %v656_v23  ;;  %v1439_v36 = vpack.c.bf16 %v1347_v46, %v1347_v46  ;;  %v1441_v33 = vpack.c.bf16 %v1349_v21, %v1349_v21  ;;  %v19970_v56 = vld [vmem:[%s25581_s5 + $0xb08] sm:$0xff]   ;;  %v19975_v24 = vld [vmem:[%s25581_s5 + $0xb90] sm:$0xff]   ;;  %v19979_v23 = vld [vmem:[%s25581_s5 + $0xb98] sm:$0xff]  }
 0x1dc   :  { %v1354_v54 = vadd.f32 %v1262_v44, %v658_v0  ;;  %v19971_v44 = vld [vmem:[%s25581_s5 + $0xb88] sm:$0xff]   ;;  %v19980_v21 = vld [vmem:[%s25581_s5 + $0xb60] sm:$0xff]  }
 0x1dd   :  { %18992 = vmatpush3.bf16.msra.mxu1 %v19960_v12  ;;  %v1444_v12 = vpack.c.bf16 %v1352_v29, %v1352_v29  ;;  %v19974_v29 = vld [vmem:[%s25581_s5 + $0xb10] sm:$0xff]   ;;  %v19981_v0 = vld [vmem:[%s25581_s5 + $0xbe0] sm:$0xff]  }
 0x1de   :  { %19014 = vmatpush3.bf16.msra.mxu0 %v19961_v47  ;;  %19021 = vmatprep.subr.bf16.mxu1 %v19962_v20  ;;  %v1446_v46 = vpack.c.bf16 %v1354_v54, %v1354_v54  ;;  %v19972_v47 = vld [vmem:[%s25581_s5 + $0xb50] sm:$0xff]   ;;  %v19977_v20 = vld [vmem:[%s25581_s5 + $0xbd8] sm:$0xff]   ;;  %v89_v54 = vld [vmem:[%s25578_s2 + $0x60] sm:$0xff] }
 0x1df   :  { %19043 = vmatprep.subr.bf16.mxu0 %v19963_v35  ;;  %v19978_v35 = vld [vmem:[%s25581_s5 + $0xb18] sm:$0xff]  }
 0x1e0   :  { %8318 = vmatmul.mubr.bf16.vlgmr.msra.gmra.mrb[40].mxu1 %v1439_v36 }
 0x1e1   :  { %8358 = vmatmul.mubr.bf16.vlgmr.msra.gmra.mrb[44].mxu0 %v1441_v33  ;;  %19022 = vmatpush3.bf16.msra.mxu1 %v19964_v39  ;;  %v65_v39 = vld [vmem:[%s25579_s3 + $0x60] sm:$0xff]  ;;  %v19985_v33 = vld [vmem:[%s25581_s5 + $0xbe8] sm:$0xff]  }
 0x1e2   :  { %8397 = vmatprep.mubr.bf16.mxu1 %v1444_v12  ;;  %19044 = vmatpush3.bf16.msra.mxu0 %v19965_v61  ;;  %v19982_v61 = vld [vmem:[%s25581_s5 + $0xb20] sm:$0xff]   ;;  %v936_v36 = vcombine.high %v65_v39, %v65_v39  ;;  %v19986_v12 = vld [vmem:[%s25581_s5 + $0xb28] sm:$0xff]  }
 0x1e3   :  { %8437 = vmatprep.mubr.bf16.mxu0 %v1446_v46  ;;  %19023 = vmatprep.subr.bf16.mxu1 %v19968_v3  ;;  %v19983_v3 = vld [vmem:[%s25581_s5 + $0xba0] sm:$0xff]   ;;  %v19987_v46 = vld [vmem:[%s25581_s5 + $0xba8] sm:$0xff]  }
 0x1e4   :  { %19045 = vmatprep.subr.bf16.mxu0 %v19969_v22  ;;  %v19984_v22 = vld [vmem:[%s25581_s5 + $0xb68] sm:$0xff]  }
 0x1e5   :  { %19024 = vmatpush3.bf16.msra.mxu1 %v19970_v56  ;;  %v332_v56 = vcombine.high %v89_v54, %v89_v54 }
 0x1e6   :  { %19046 = vmatpush3.bf16.msra.mxu0 %v19971_v44  ;;  %19025 = vmatprep.subr.bf16.mxu1 %v19972_v47  ;;  %v23289_v44 = vrot.slane %v65_v39, %v21741_v58  ;;  %v23295_v47 = vrot.slane %v936_v36, %v21741_v58  ;;  %v19991_v39 = vld [vmem:[%s25581_s5 + $0xbb0] sm:$0xff]  }
 0x1e7   :  { %19047 = vmatprep.subr.bf16.mxu0 %v19973_v45  ;;  %v19988_v45 = vld [vmem:[%s25581_s5 + $0xb70] sm:$0xff]  }
 0x1e8   :  { %25668 = vst [vmem:[#allocation25_spill] sm:$0xff] %v23289_v44  ;;  %25669 = vst [vmem:[#allocation26_spill] sm:$0xff] %v23295_v47  ;;  %v23321_v36 = vcombine.high %v23295_v47, %v23295_v47 }
 0x1e9   :  { %19026 = vmatpush3.bf16.msra.mxu1 %v19974_v29  ;;  %v23301_v29 = vrot.slane %v89_v54, %v21741_v58 }
 0x1ea   :  { %19048 = vmatpush3.bf16.msra.mxu0 %v19975_v24  ;;  %19027 = vmatprep.subr.bf16.mxu1 %v19976_v8  ;;  %v19989_v8 = vld [vmem:[%s25581_s5 + $0xbf0] sm:$0xff]   ;;  %25671 = vst [vmem:[#allocation28_spill] sm:$0xff] %v23321_v36 }
 0x1eb   :  { %19049 = vmatprep.subr.bf16.mxu0 %v19977_v20  ;;  %v23307_v20 = vrot.slane %v332_v56, %v21741_v58 }
 0x1ed   :  { %19028 = vmatpush3.bf16.msra.mxu1 %v19978_v35 }
 0x1ee   :  { %19050 = vmatpush3.bf16.msra.mxu0 %v19979_v23  ;;  %19029 = vmatprep.subr.bf16.mxu1 %v19980_v21  ;;  %v19990_v21 = vld [vmem:[%s25581_s5 + $0xb30] sm:$0xff]  }
 0x1ef   :  { %19051 = vmatprep.subr.bf16.mxu0 %v19981_v0  ;;  %v23317_v0 = vcombine.high %v23289_v44, %v23289_v44 }
 0x1f1   :  { %19030 = vmatpush3.bf16.msra.mxu1 %v19982_v61  ;;  %25670 = vst [vmem:[#allocation27_spill] sm:$0xff] %v23317_v0 }
 0x1f2   :  { %19052 = vmatpush3.bf16.msra.mxu0 %v19983_v3  ;;  %19031 = vmatprep.subr.bf16.mxu1 %v19984_v22 }
 0x1f3   :  { %v18729_v24 = vpop.f32.mrb[16].mxu1  ;;  %19053 = vmatprep.subr.bf16.mxu0 %v19985_v33 }
 0x1f4   :  { %v18751_v35 = vpop.f32.mrb[20].mxu0  ;;  %v18730_v23 = vpop.f32.mrb[17].mxu1 }
 0x1f5   :  { %v18731_v61 = vadd.f32 %v18730_v23, %v18729_v24  ;;  %v18752_v54 = vpop.f32.mrb[21].mxu0  ;;  %v18732_v3 = vpop.f32.mrb[18].mxu1  ;;  %19032 = vmatpush3.bf16.msra.mxu1 %v19986_v12  ;;  %v19993_v24 = vld [vmem:[%s25581_s5 + $0xbf8] sm:$0xff]   ;;  %v1259_v12 = vmul.f32 %v23146_v50, %v21785_v16  ;;  %v347_v23 = vcombine.high %v23301_v29, %v23301_v29 }
 0x1f6   :  { %v18753_v22 = vadd.f32 %v18752_v54, %v18751_v35  ;;  %v18754_v33 = vpop.f32.mrb[22].mxu0  ;;  %19054 = vmatpush3.bf16.msra.mxu0 %v19987_v46  ;;  %v18733_v56 = vpop.f32.mrb[19].mxu1  ;;  %19033 = vmatprep.subr.bf16.mxu1 %v19988_v45  ;;  %v19994_v46 = vld [vmem:[%s25581_s5 + $0xb38] sm:$0xff]   ;;  %v1261_v45 = vmul.f32 %v23152_v52, %v21785_v16  ;;  %v348_v3 = vcombine.high %v23307_v20, %v23307_v20 }
 0x1f7   :  { %v7840_v35 = vadd.f32 %v18731_v61, %v23205_v48  ;;  %v18755_v54 = vpop.f32.mrb[23].mxu0  ;;  %19055 = vmatprep.subr.bf16.mxu0 %v19989_v8  ;;  %v19995_v33 = vld [vmem:[%s25581_s5 + $0xbb8] sm:$0xff]   ;;  %v655_v56 = vmul.f32 %v23158_v60, %v21763_v7  ;;  %v1264_v48 = vmul.f32 %v23317_v0, %v21785_v16  ;;  %v657_v61 = vmul.f32 %v23164_v62, %v21763_v7  ;;  %v19997_v60 = vld [vmem:[%s25581_s5 + $0xcc0] sm:$0xff]  }
 0x1f8   :  { %v19996_v54 = vld [vmem:[%s25581_s5 + $0xc40] sm:$0xff]   ;;  %v1266_v52 = vmul.f32 %v23321_v36, %v21785_v16  ;;  %v20026_v36 = vld [vmem:[%s25581_s5 + $0xc78] sm:$0xff]  }
 0x1f9   :  { %v23348_v8 = vadd.f32 %v18753_v22, %v7840_v35  ;;  %19034 = vmatpush3.bf16.msra.mxu1 %v19990_v21  ;;  %v1351_v50 = vadd.f32 %v1259_v12, %v655_v56  ;;  %v660_v22 = vmul.f32 %v347_v23, %v21763_v7  ;;  %v1353_v21 = vadd.f32 %v1261_v45, %v657_v61  ;;  %v19998_v62 = vld [vmem:[%s25581_s5 + $0xc00] sm:$0xff]   ;;  %v20002_v12 = vld [vmem:[%s25581_s5 + $0xc48] sm:$0xff]   ;;  %v20007_v56 = vld [vmem:[%s25581_s5 + $0xcd0] sm:$0xff]  }
 0x1fa   :  { %19056 = vmatpush3.bf16.msra.mxu0 %v19991_v39  ;;  %19035 = vmatprep.subr.bf16.mxu1 %v19992_v41  ;;  %v662_v35 = vmul.f32 %v348_v3, %v21763_v7  ;;  %v19999_v41 = vld [vmem:[%s25581_s5 + $0xc80] sm:$0xff]   ;;  %v20003_v23 = vld [vmem:[%s25581_s5 + $0xcc8] sm:$0xff]   ;;  %v20010_v61 = vld [vmem:[%s25581_s5 + $0xc58] sm:$0xff]  }
 0x1fb   :  { %19057 = vmatprep.subr.bf16.mxu0 %v19993_v24  ;;  %v1356_v0 = vadd.f32 %v1264_v48, %v660_v22  ;;  %v1443_v24 = vpack.c.bf16 %v1351_v50, %v1351_v50  ;;  %v1445_v45 = vpack.c.bf16 %v1353_v21, %v1353_v21  ;;  %v20004_v3 = vld [vmem:[%s25581_s5 + $0xc08] sm:$0xff]   ;;  %v20009_v48 = vld [vmem:[%s25581_s5 + $0xc90] sm:$0xff]   ;;  %v20013_v22 = vld [vmem:[%s25581_s5 + $0xc98] sm:$0xff]  }
 0x1fc   :  { %v1358_v39 = vadd.f32 %v1266_v52, %v662_v35  ;;  %v20005_v52 = vld [vmem:[%s25581_s5 + $0xc88] sm:$0xff]   ;;  %v20014_v21 = vld [vmem:[%s25581_s5 + $0xc60] sm:$0xff]  }
 0x1fd   :  { %19036 = vmatpush3.bf16.msra.mxu1 %v19994_v46  ;;  %v1448_v46 = vpack.c.bf16 %v1356_v0, %v1356_v0  ;;  %v20008_v0 = vld [vmem:[%s25581_s5 + $0xc10] sm:$0xff]   ;;  %v20015_v35 = vld [vmem:[%s25581_s5 + $0xce0] sm:$0xff]  }
 0x1fe   :  { %19058 = vmatpush3.bf16.msra.mxu0 %v19995_v33  ;;  %19065 = vmatprep.subr.bf16.mxu1 %v19996_v54  ;;  %v1450_v50 = vpack.c.bf16 %v1358_v39, %v1358_v39  ;;  %v20006_v33 = vld [vmem:[%s25581_s5 + $0xc50] sm:$0xff]   ;;  %v20011_v54 = vld [vmem:[%s25581_s5 + $0xcd8] sm:$0xff]   ;;  %v90_v39 = vld [vmem:[%s25578_s2 + $0x68] sm:$0xff] }
 0x1ff   :  { %19087 = vmatprep.subr.bf16.mxu0 %v19997_v60  ;;  %v20012_v60 = vld [vmem:[%s25581_s5 + $0xc18] sm:$0xff]  }
 0x200   :  { %8398 = vmatmul.mubr.bf16.vlgmr.msra.gmra.mrb[44].mxu1 %v1443_v24 }
 0x201   :  { %8438 = vmatmul.mubr.bf16.vlgmr.msra.gmra.mrb[48].mxu0 %v1445_v45  ;;  %19066 = vmatpush3.bf16.msra.mxu1 %v19998_v62  ;;  %v66_v62 = vld [vmem:[%s25579_s3 + $0x68] sm:$0xff] }
 0x202   :  { %8477 = vmatprep.mubr.bf16.mxu1 %v1448_v46  ;;  %19088 = vmatpush3.bf16.msra.mxu0 %v19999_v41  ;;  %v20016_v41 = vld [vmem:[%s25581_s5 + $0xc20] sm:$0xff]   ;;  %v953_v24 = vcombine.high %v66_v62, %v66_v62  ;;  %v20019_v45 = vld [vmem:[%s25581_s5 + $0xce8] sm:$0xff]  }
 0x203   :  { %8517 = vmatprep.mubr.bf16.mxu0 %v1450_v50  ;;  %19067 = vmatprep.subr.bf16.mxu1 %v20002_v12  ;;  %v20017_v12 = vld [vmem:[%s25581_s5 + $0xca0] sm:$0xff]   ;;  %v20020_v46 = vld [vmem:[%s25581_s5 + $0xc28] sm:$0xff]  }
 0x204   :  { %19089 = vmatprep.subr.bf16.mxu0 %v20003_v23  ;;  %v20018_v23 = vld [vmem:[%s25581_s5 + $0xc68] sm:$0xff]  }
 0x205   :  { %19068 = vmatpush3.bf16.msra.mxu1 %v20004_v3  ;;  %v349_v3 = vcombine.high %v90_v39, %v90_v39  ;;  %v20021_v50 = vld [vmem:[%s25581_s5 + $0xca8] sm:$0xff]  }
 0x206   :  { %19090 = vmatpush3.bf16.msra.mxu0 %v20005_v52  ;;  %19069 = vmatprep.subr.bf16.mxu1 %v20006_v33  ;;  %v23432_v52 = vrot.slane %v66_v62, %v21741_v58  ;;  %v23438_v33 = vrot.slane %v953_v24, %v21741_v58  ;;  %v20025_v62 = vld [vmem:[%s25581_s5 + $0xcb0] sm:$0xff]  }
 0x207   :  { %19091 = vmatprep.subr.bf16.mxu0 %v20007_v56  ;;  %v20022_v56 = vld [vmem:[%s25581_s5 + $0xc70] sm:$0xff]  }
 0x208   :  { %25672 = vst [vmem:[#allocation29_spill] sm:$0xff] %v23432_v52  ;;  %25673 = vst [vmem:[#allocation30_spill] sm:$0xff] %v23438_v33  ;;  %v23464_v24 = vcombine.high %v23438_v33, %v23438_v33 }
 0x209   :  { %19070 = vmatpush3.bf16.msra.mxu1 %v20008_v0  ;;  %v23444_v0 = vrot.slane %v90_v39, %v21741_v58 }
 0x20a   :  { %19092 = vmatpush3.bf16.msra.mxu0 %v20009_v48  ;;  %19071 = vmatprep.subr.bf16.mxu1 %v20010_v61  ;;  %v20023_v61 = vld [vmem:[%s25581_s5 + $0xcf0] sm:$0xff]   ;;  %25675 = vst [vmem:[#allocation32_spill] sm:$0xff] %v23464_v24 }
 0x20b   :  { %19093 = vmatprep.subr.bf16.mxu0 %v20011_v54  ;;  %v23450_v54 = vrot.slane %v349_v3, %v21741_v58 }
 0x20d   :  { %19072 = vmatpush3.bf16.msra.mxu1 %v20012_v60 }
 0x20e   :  { %19094 = vmatpush3.bf16.msra.mxu0 %v20013_v22  ;;  %19073 = vmatprep.subr.bf16.mxu1 %v20014_v21  ;;  %v20024_v21 = vld [vmem:[%s25581_s5 + $0xc30] sm:$0xff]  }
 0x20f   :  { %19095 = vmatprep.subr.bf16.mxu0 %v20015_v35  ;;  %v23460_v35 = vcombine.high %v23432_v52, %v23432_v52 }
 0x211   :  { %19074 = vmatpush3.bf16.msra.mxu1 %v20016_v41  ;;  %25674 = vst [vmem:[#allocation31_spill] sm:$0xff] %v23460_v35 }
 0x212   :  { %19096 = vmatpush3.bf16.msra.mxu0 %v20017_v12  ;;  %19075 = vmatprep.subr.bf16.mxu1 %v20018_v23 }
 0x213   :  { %v18773_v48 = vpop.f32.mrb[20].mxu1  ;;  %19097 = vmatprep.subr.bf16.mxu0 %v20019_v45 }
 0x214   :  { %v18795_v60 = vpop.f32.mrb[24].mxu0  ;;  %v18774_v22 = vpop.f32.mrb[21].mxu1 }
 0x215   :  { %v18775_v41 = vadd.f32 %v18774_v22, %v18773_v48  ;;  %v18796_v39 = vpop.f32.mrb[25].mxu0  ;;  %v18776_v12 = vpop.f32.mrb[22].mxu1  ;;  %19076 = vmatpush3.bf16.msra.mxu1 %v20020_v46  ;;  %v20027_v48 = vld [vmem:[%s25581_s5 + $0xcf8] sm:$0xff]   ;;  %v1263_v46 = vmul.f32 %v23289_v44, %v21785_v16  ;;  %v364_v22 = vcombine.high %v23444_v0, %v23444_v0 }
 0x216   :  { %v18797_v23 = vadd.f32 %v18796_v39, %v18795_v60  ;;  %v18798_v45 = vpop.f32.mrb[26].mxu0  ;;  %19098 = vmatpush3.bf16.msra.mxu0 %v20021_v50  ;;  %v18777_v3 = vpop.f32.mrb[23].mxu1  ;;  %19077 = vmatprep.subr.bf16.mxu1 %v20022_v56  ;;  %v20028_v50 = vld [vmem:[%s25581_s5 + $0xc38] sm:$0xff]   ;;  %v1265_v56 = vmul.f32 %v23295_v47, %v21785_v16  ;;  %v365_v12 = vcombine.high %v23450_v54, %v23450_v54 }
 0x217   :  { %v7920_v60 = vadd.f32 %v18775_v41, %v23348_v8  ;;  %v18799_v39 = vpop.f32.mrb[27].mxu0  ;;  %19099 = vmatprep.subr.bf16.mxu0 %v20023_v61  ;;  %v20029_v45 = vld [vmem:[%s25581_s5 + $0xcb8] sm:$0xff]   ;;  %v659_v3 = vmul.f32 %v23301_v29, %v21763_v7  ;;  %v1268_v8 = vmul.f32 %v23460_v35, %v21785_v16  ;;  %v661_v41 = vmul.f32 %v23307_v20, %v21763_v7  ;;  %v20031_v29 = vld [vmem:[%s25581_s5 + $0xdc0] sm:$0xff]  }
 0x218   :  { %v20030_v39 = vld [vmem:[%s25581_s5 + $0xd40] sm:$0xff]   ;;  %v1270_v47 = vmul.f32 %v23464_v24, %v21785_v16  ;;  %v20060_v24 = vld [vmem:[%s25581_s5 + $0xd78] sm:$0xff]  }
 0x219   :  { %v23491_v61 = vadd.f32 %v18797_v23, %v7920_v60  ;;  %19078 = vmatpush3.bf16.msra.mxu1 %v20024_v21  ;;  %v1355_v44 = vadd.f32 %v1263_v46, %v659_v3  ;;  %v664_v23 = vmul.f32 %v364_v22, %v21763_v7  ;;  %v1357_v21 = vadd.f32 %v1265_v56, %v661_v41  ;;  %v20032_v20 = vld [vmem:[%s25581_s5 + $0xd00] sm:$0xff]   ;;  %v20036_v46 = vld [vmem:[%s25581_s5 + $0xd48] sm:$0xff]   ;;  %v20041_v3 = vld [vmem:[%s25581_s5 + $0xdd0] sm:$0xff]  }
 0x21a   :  { %19100 = vmatpush3.bf16.msra.mxu0 %v20025_v62  ;;  %19079 = vmatprep.subr.bf16.mxu1 %v20026_v36  ;;  %v666_v60 = vmul.f32 %v365_v12, %v21763_v7  ;;  %v20033_v36 = vld [vmem:[%s25581_s5 + $0xd80] sm:$0xff]   ;;  %v20037_v22 = vld [vmem:[%s25581_s5 + $0xdc8] sm:$0xff]   ;;  %v20044_v41 = vld [vmem:[%s25581_s5 + $0xd58] sm:$0xff]  }
 0x21b   :  { %19101 = vmatprep.subr.bf16.mxu0 %v20027_v48  ;;  %v1360_v35 = vadd.f32 %v1268_v8, %v664_v23  ;;  %v1447_v48 = vpack.c.bf16 %v1355_v44, %v1355_v44  ;;  %v1449_v56 = vpack.c.bf16 %v1357_v21, %v1357_v21  ;;  %v20038_v12 = vld [vmem:[%s25581_s5 + $0xd08] sm:$0xff]   ;;  %v20043_v8 = vld [vmem:[%s25581_s5 + $0xd90] sm:$0xff]   ;;  %v20047_v23 = vld [vmem:[%s25581_s5 + $0xd98] sm:$0xff]  }
 0x21c   :  { %v1362_v62 = vadd.f32 %v1270_v47, %v666_v60  ;;  %v20039_v47 = vld [vmem:[%s25581_s5 + $0xd88] sm:$0xff]   ;;  %v20048_v21 = vld [vmem:[%s25581_s5 + $0xd60] sm:$0xff]  }
 0x21d   :  { %19080 = vmatpush3.bf16.msra.mxu1 %v20028_v50  ;;  %v1452_v50 = vpack.c.bf16 %v1360_v35, %v1360_v35  ;;  %v20042_v35 = vld [vmem:[%s25581_s5 + $0xd10] sm:$0xff]   ;;  %v20049_v60 = vld [vmem:[%s25581_s5 + $0xde0] sm:$0xff]  }
 0x21e   :  { %19102 = vmatpush3.bf16.msra.mxu0 %v20029_v45  ;;  %19109 = vmatprep.subr.bf16.mxu1 %v20030_v39  ;;  %v1454_v44 = vpack.c.bf16 %v1362_v62, %v1362_v62  ;;  %v20040_v45 = vld [vmem:[%s25581_s5 + $0xd50] sm:$0xff]   ;;  %v20045_v39 = vld [vmem:[%s25581_s5 + $0xdd8] sm:$0xff]   ;;  %v20050_v62 = vld [vmem:[%s25581_s5 + $0xd20] sm:$0xff]  }
 0x21f   :  { %19131 = vmatprep.subr.bf16.mxu0 %v20031_v29  ;;  %v20046_v29 = vld [vmem:[%s25581_s5 + $0xd18] sm:$0xff]  }
 0x220   :  { %8478 = vmatmul.mubr.bf16.vlgmr.msra.gmra.mrb[48].mxu1 %v1447_v48 }
 0x221   :  { %8518 = vmatmul.mubr.bf16.vlgmr.msra.gmra.mrb[52].mxu0 %v1449_v56  ;;  %19110 = vmatpush3.bf16.msra.mxu1 %v20032_v20  ;;  %v67_v20 = vld [vmem:[%s25579_s3 + $0x70] sm:$0xff]  ;;  %v20053_v56 = vld [vmem:[%s25581_s5 + $0xde8] sm:$0xff]  }
 0x222   :  { %8557 = vmatprep.mubr.bf16.mxu1 %v1452_v50  ;;  %19132 = vmatpush3.bf16.msra.mxu0 %v20033_v36  ;;  %v91_v36 = vld [vmem:[%s25578_s2 + $0x70] sm:$0xff]  ;;  %v970_v48 = vcombine.high %v67_v20, %v67_v20  ;;  %v20054_v50 = vld [vmem:[%s25581_s5 + $0xd28] sm:$0xff]  }
 0x223   :  { %8597 = vmatprep.mubr.bf16.mxu0 %v1454_v44  ;;  %19111 = vmatprep.subr.bf16.mxu1 %v20036_v46  ;;  %v20051_v46 = vld [vmem:[%s25581_s5 + $0xda0] sm:$0xff]   ;;  %v20055_v44 = vld [vmem:[%s25581_s5 + $0xda8] sm:$0xff]  }
 0x224   :  { %19133 = vmatprep.subr.bf16.mxu0 %v20037_v22  ;;  %v20052_v22 = vld [vmem:[%s25581_s5 + $0xd68] sm:$0xff]  }
 0x225   :  { %19112 = vmatpush3.bf16.msra.mxu1 %v20038_v12  ;;  %v366_v12 = vcombine.high %v91_v36, %v91_v36 }
 0x226   :  { %19134 = vmatpush3.bf16.msra.mxu0 %v20039_v47  ;;  %19113 = vmatprep.subr.bf16.mxu1 %v20040_v45  ;;  %v23575_v47 = vrot.slane %v67_v20, %v21741_v58  ;;  %v23581_v45 = vrot.slane %v970_v48, %v21741_v58  ;;  %v20059_v20 = vld [vmem:[%s25581_s5 + $0xdb0] sm:$0xff]  }
 0x227   :  { %19135 = vmatprep.subr.bf16.mxu0 %v20041_v3  ;;  %v20056_v3 = vld [vmem:[%s25581_s5 + $0xd70] sm:$0xff]  }
 0x228   :  { %25676 = vst [vmem:[#allocation33_spill] sm:$0xff] %v23575_v47  ;;  %25677 = vst [vmem:[#allocation34_spill] sm:$0xff] %v23581_v45  ;;  %v23607_v48 = vcombine.high %v23581_v45, %v23581_v45 }
 0x229   :  { %19114 = vmatpush3.bf16.msra.mxu1 %v20042_v35  ;;  %v23587_v35 = vrot.slane %v91_v36, %v21741_v58 }
 0x22a   :  { %19136 = vmatpush3.bf16.msra.mxu0 %v20043_v8  ;;  %19115 = vmatprep.subr.bf16.mxu1 %v20044_v41  ;;  %v20057_v41 = vld [vmem:[%s25581_s5 + $0xdf0] sm:$0xff]   ;;  %25679 = vst [vmem:[#allocation36_spill] sm:$0xff] %v23607_v48 }
 0x22b   :  { %19137 = vmatprep.subr.bf16.mxu0 %v20045_v39  ;;  %v23593_v39 = vrot.slane %v366_v12, %v21741_v58 }
 0x22d   :  { %19116 = vmatpush3.bf16.msra.mxu1 %v20046_v29 }
 0x22e   :  { %19138 = vmatpush3.bf16.msra.mxu0 %v20047_v23  ;;  %19117 = vmatprep.subr.bf16.mxu1 %v20048_v21  ;;  %v20058_v21 = vld [vmem:[%s25581_s5 + $0xd30] sm:$0xff]  }
 0x22f   :  { %19139 = vmatprep.subr.bf16.mxu0 %v20049_v60  ;;  %v23603_v60 = vcombine.high %v23575_v47, %v23575_v47 }
 0x231   :  { %19118 = vmatpush3.bf16.msra.mxu1 %v20050_v62  ;;  %25678 = vst [vmem:[#allocation35_spill] sm:$0xff] %v23603_v60 }
 0x232   :  { %19140 = vmatpush3.bf16.msra.mxu0 %v20051_v46  ;;  %19119 = vmatprep.subr.bf16.mxu1 %v20052_v22 }
 0x233   :  { %v18817_v8 = vpop.f32.mrb[24].mxu1  ;;  %19141 = vmatprep.subr.bf16.mxu0 %v20053_v56 }
 0x234   :  { %v18839_v29 = vpop.f32.mrb[28].mxu0  ;;  %v18818_v23 = vpop.f32.mrb[25].mxu1 }
 0x235   :  { %v18819_v36 = vadd.f32 %v18818_v23, %v18817_v8  ;;  %v18840_v62 = vpop.f32.mrb[29].mxu0  ;;  %v18820_v46 = vpop.f32.mrb[26].mxu1  ;;  %19120 = vmatpush3.bf16.msra.mxu1 %v20054_v50  ;;  %v20061_v8 = vld [vmem:[%s25581_s5 + $0xdf8] sm:$0xff]   ;;  %v1267_v50 = vmul.f32 %v23432_v52, %v21785_v16  ;;  %v381_v23 = vcombine.high %v23587_v35, %v23587_v35 }
 0x236   :  { %v18841_v22 = vadd.f32 %v18840_v62, %v18839_v29  ;;  %v18842_v56 = vpop.f32.mrb[30].mxu0  ;;  %19142 = vmatpush3.bf16.msra.mxu0 %v20055_v44  ;;  %v18821_v12 = vpop.f32.mrb[27].mxu1  ;;  %19121 = vmatprep.subr.bf16.mxu1 %v20056_v3  ;;  %v20062_v44 = vld [vmem:[%s25581_s5 + $0xd38] sm:$0xff]   ;;  %v1269_v3 = vmul.f32 %v23438_v33, %v21785_v16  ;;  %v382_v46 = vcombine.high %v23593_v39, %v23593_v39 }
 0x237   :  { %v8000_v29 = vadd.f32 %v18819_v36, %v23491_v61  ;;  %v18843_v62 = vpop.f32.mrb[31].mxu0  ;;  %19143 = vmatprep.subr.bf16.mxu0 %v20057_v41  ;;  %v20063_v56 = vld [vmem:[%s25581_s5 + $0xdb8] sm:$0xff]   ;;  %v663_v12 = vmul.f32 %v23444_v0, %v21763_v7  ;;  %v1272_v61 = vmul.f32 %v23603_v60, %v21785_v16  ;;  %v665_v36 = vmul.f32 %v23450_v54, %v21763_v7  ;;  %v20065_v0 = vld [vmem:[%s25581_s5 + $0xec0] sm:$0xff]  }
 0x238   :  { %v20064_v62 = vld [vmem:[%s25581_s5 + $0xe40] sm:$0xff]   ;;  %v1274_v33 = vmul.f32 %v23607_v48, %v21785_v16  ;;  %v20094_v48 = vld [vmem:[%s25581_s5 + $0xe78] sm:$0xff]  }
 0x239   :  { %v23634_v41 = vadd.f32 %v18841_v22, %v8000_v29  ;;  %19122 = vmatpush3.bf16.msra.mxu1 %v20058_v21  ;;  %v1359_v52 = vadd.f32 %v1267_v50, %v663_v12  ;;  %v668_v22 = vmul.f32 %v381_v23, %v21763_v7  ;;  %v1361_v21 = vadd.f32 %v1269_v3, %v665_v36  ;;  %v20066_v54 = vld [vmem:[%s25581_s5 + $0xe00] sm:$0xff]   ;;  %v20070_v50 = vld [vmem:[%s25581_s5 + $0xe48] sm:$0xff]   ;;  %v20075_v12 = vld [vmem:[%s25581_s5 + $0xed0] sm:$0xff]  }
 0x23a   :  { %19144 = vmatpush3.bf16.msra.mxu0 %v20059_v20  ;;  %19123 = vmatprep.subr.bf16.mxu1 %v20060_v24  ;;  %v670_v29 = vmul.f32 %v382_v46, %v21763_v7  ;;  %v20067_v24 = vld [vmem:[%s25581_s5 + $0xe80] sm:$0xff]   ;;  %v20071_v23 = vld [vmem:[%s25581_s5 + $0xec8] sm:$0xff]   ;;  %v20078_v36 = vld [vmem:[%s25581_s5 + $0xe58] sm:$0xff]  }
 0x23b   :  { %19145 = vmatprep.subr.bf16.mxu0 %v20061_v8  ;;  %v1364_v60 = vadd.f32 %v1272_v61, %v668_v22  ;;  %v1451_v8 = vpack.c.bf16 %v1359_v52, %v1359_v52  ;;  %v1453_v3 = vpack.c.bf16 %v1361_v21, %v1361_v21  ;;  %v20072_v46 = vld [vmem:[%s25581_s5 + $0xe08] sm:$0xff]   ;;  %v20077_v61 = vld [vmem:[%s25581_s5 + $0xe90] sm:$0xff]   ;;  %v20081_v22 = vld [vmem:[%s25581_s5 + $0xe98] sm:$0xff]  }
 0x23c   :  { %v1366_v20 = vadd.f32 %v1274_v33, %v670_v29  ;;  %v20073_v33 = vld [vmem:[%s25581_s5 + $0xe88] sm:$0xff]   ;;  %v20082_v21 = vld [vmem:[%s25581_s5 + $0xe60] sm:$0xff]  }
 0x23d   :  { %19124 = vmatpush3.bf16.msra.mxu1 %v20062_v44  ;;  %v1456_v44 = vpack.c.bf16 %v1364_v60, %v1364_v60  ;;  %v20076_v60 = vld [vmem:[%s25581_s5 + $0xe10] sm:$0xff]   ;;  %v20083_v29 = vld [vmem:[%s25581_s5 + $0xee0] sm:$0xff]  }
 0x23e   :  { %19146 = vmatpush3.bf16.msra.mxu0 %v20063_v56  ;;  %19153 = vmatprep.subr.bf16.mxu1 %v20064_v62  ;;  %v1458_v52 = vpack.c.bf16 %v1366_v20, %v1366_v20  ;;  %v20074_v56 = vld [vmem:[%s25581_s5 + $0xe50] sm:$0xff]   ;;  %v20079_v62 = vld [vmem:[%s25581_s5 + $0xed8] sm:$0xff]   ;;  %v20084_v20 = vld [vmem:[%s25581_s5 + $0xe20] sm:$0xff]  }
 0x23f   :  { %19175 = vmatprep.subr.bf16.mxu0 %v20065_v0  ;;  %v20080_v0 = vld [vmem:[%s25581_s5 + $0xe18] sm:$0xff]  }
 0x240   :  { %8558 = vmatmul.mubr.bf16.vlgmr.msra.gmra.mrb[52].mxu1 %v1451_v8  ;;  %v20085_v8 = vld [vmem:[%s25581_s5 + $0xea0] sm:$0xff]  }
 0x241   :  { %8598 = vmatmul.mubr.bf16.vlgmr.msra.gmra.mrb[56].mxu0 %v1453_v3  ;;  %19154 = vmatpush3.bf16.msra.mxu1 %v20066_v54  ;;  %v68_v54 = vld [vmem:[%s25579_s3 + $0x78] sm:$0xff]  ;;  %v20087_v3 = vld [vmem:[%s25581_s5 + $0xee8] sm:$0xff]  }
 0x242   :  { %8637 = vmatprep.mubr.bf16.mxu1 %v1456_v44  ;;  %19176 = vmatpush3.bf16.msra.mxu0 %v20067_v24  ;;  %v92_v24 = vld [vmem:[%s25578_s2 + $0x78] sm:$0xff]  ;;  %v20088_v44 = vld [vmem:[%s25581_s5 + $0xe28] sm:$0xff]  }
 0x243   :  { %8677 = vmatprep.mubr.bf16.mxu0 %v1458_v52  ;;  %19155 = vmatprep.subr.bf16.mxu1 %v20070_v50  ;;  %v987_v50 = vcombine.high %v68_v54, %v68_v54  ;;  %v20089_v52 = vld [vmem:[%s25581_s5 + $0xea8] sm:$0xff]  }
 0x244   :  { %19177 = vmatprep.subr.bf16.mxu0 %v20071_v23  ;;  %v20086_v23 = vld [vmem:[%s25581_s5 + $0xe68] sm:$0xff]  }
 0x245   :  { %19156 = vmatpush3.bf16.msra.mxu1 %v20072_v46  ;;  %v383_v46 = vcombine.high %v92_v24, %v92_v24 }
 0x246   :  { %19178 = vmatpush3.bf16.msra.mxu0 %v20073_v33  ;;  %19157 = vmatprep.subr.bf16.mxu1 %v20074_v56  ;;  %v23718_v33 = vrot.slane %v68_v54, %v21741_v58  ;;  %v23724_v56 = vrot.slane %v987_v50, %v21741_v58  ;;  %v20093_v54 = vld [vmem:[%s25581_s5 + $0xeb0] sm:$0xff]  }
 0x247   :  { %19179 = vmatprep.subr.bf16.mxu0 %v20075_v12  ;;  %v20090_v12 = vld [vmem:[%s25581_s5 + $0xe70] sm:$0xff]  }
 0x248   :  { %25680 = vst [vmem:[#allocation37_spill] sm:$0xff] %v23718_v33  ;;  %25681 = vst [vmem:[#allocation38_spill] sm:$0xff] %v23724_v56 }
 0x249   :  { %19158 = vmatpush3.bf16.msra.mxu1 %v20076_v60  ;;  %v23730_v60 = vrot.slane %v92_v24, %v21741_v58 }
 0x24a   :  { %19180 = vmatpush3.bf16.msra.mxu0 %v20077_v61  ;;  %19159 = vmatprep.subr.bf16.mxu1 %v20078_v36  ;;  %v20091_v36 = vld [vmem:[%s25581_s5 + $0xef0] sm:$0xff]  }
 0x24b   :  { %19181 = vmatprep.subr.bf16.mxu0 %v20079_v62  ;;  %v23736_v62 = vrot.slane %v383_v46, %v21741_v58 }
 0x24d   :  { %19160 = vmatpush3.bf16.msra.mxu1 %v20080_v0 }
 0x24e   :  { %19182 = vmatpush3.bf16.msra.mxu0 %v20081_v22  ;;  %19161 = vmatprep.subr.bf16.mxu1 %v20082_v21  ;;  %v20092_v21 = vld [vmem:[%s25581_s5 + $0xe30] sm:$0xff]  }
 0x24f   :  { %19183 = vmatprep.subr.bf16.mxu0 %v20083_v29  ;;  %v23746_v29 = vcombine.high %v23718_v33, %v23718_v33 }
 0x251   :  { %19162 = vmatpush3.bf16.msra.mxu1 %v20084_v20  ;;  %25682 = vst [vmem:[#allocation39_spill] sm:$0xff] %v23746_v29 }
 0x252   :  { %19184 = vmatpush3.bf16.msra.mxu0 %v20085_v8  ;;  %19163 = vmatprep.subr.bf16.mxu1 %v20086_v23  ;;  %v23750_v8 = vcombine.high %v23724_v56, %v23724_v56 }
 0x253   :  { %v18861_v61 = vpop.f32.mrb[28].mxu1  ;;  %19185 = vmatprep.subr.bf16.mxu0 %v20087_v3 }
 0x254   :  { %v18883_v0 = vpop.f32.mrb[32].mxu0  ;;  %v18862_v22 = vpop.f32.mrb[29].mxu1  ;;  %25683 = vst [vmem:[#allocation40_spill] sm:$0xff] %v23750_v8 }
 0x255   :  { %v18863_v24 = vadd.f32 %v18862_v22, %v18861_v61  ;;  %v18884_v20 = vpop.f32.mrb[33].mxu0  ;;  %v18864_v50 = vpop.f32.mrb[30].mxu1  ;;  %19164 = vmatpush3.bf16.msra.mxu1 %v20088_v44  ;;  %v20095_v61 = vld [vmem:[%s25581_s5 + $0xef8] sm:$0xff]   ;;  %v1271_v44 = vmul.f32 %v23575_v47, %v21785_v16  ;;  %v398_v22 = vcombine.high %v23730_v60, %v23730_v60 }
 0x256   :  { %v18885_v23 = vadd.f32 %v18884_v20, %v18883_v0  ;;  %v18886_v3 = vpop.f32.mrb[34].mxu0  ;;  %19186 = vmatpush3.bf16.msra.mxu0 %v20089_v52  ;;  %v18865_v46 = vpop.f32.mrb[31].mxu1  ;;  %19165 = vmatprep.subr.bf16.mxu1 %v20090_v12  ;;  %v20096_v52 = vld [vmem:[%s25581_s5 + $0xe38] sm:$0xff]   ;;  %v1273_v12 = vmul.f32 %v23581_v45, %v21785_v16  ;;  %v399_v50 = vcombine.high %v23736_v62, %v23736_v62 }
 0x257   :  { %v8080_v0 = vadd.f32 %v18863_v24, %v23634_v41  ;;  %v18887_v20 = vpop.f32.mrb[35].mxu0  ;;  %19187 = vmatprep.subr.bf16.mxu0 %v20091_v36  ;;  %v20097_v3 = vld [vmem:[%s25581_s5 + $0xeb8] sm:$0xff]   ;;  %v667_v46 = vmul.f32 %v23587_v35, %v21763_v7  ;;  %v1276_v41 = vmul.f32 %v23746_v29, %v21785_v16  ;;  %v669_v24 = vmul.f32 %v23593_v39, %v21763_v7  ;;  %v20099_v35 = vld [vmem:[%s25581_s5 + $0xfc0] sm:$0xff]  }
 0x258   :  { %v20098_v20 = vld [vmem:[%s25581_s5 + $0xf40] sm:$0xff]   ;;  %v1278_v45 = vmul.f32 %v23750_v8, %v21785_v16  ;;  %v20128_v8 = vld [vmem:[%s25581_s5 + $0xf78] sm:$0xff]  }
 0x259   :  { %v23777_v36 = vadd.f32 %v18885_v23, %v8080_v0  ;;  %19166 = vmatpush3.bf16.msra.mxu1 %v20092_v21  ;;  %v1363_v47 = vadd.f32 %v1271_v44, %v667_v46  ;;  %v672_v23 = vmul.f32 %v398_v22, %v21763_v7  ;;  %v1365_v21 = vadd.f32 %v1273_v12, %v669_v24  ;;  %v20100_v39 = vld [vmem:[%s25581_s5 + $0xf00] sm:$0xff]   ;;  %v20104_v44 = vld [vmem:[%s25581_s5 + $0xf48] sm:$0xff]   ;;  %v20109_v46 = vld [vmem:[%s25581_s5 + $0xfd0] sm:$0xff]  }
 0x25a   :  { %19188 = vmatpush3.bf16.msra.mxu0 %v20093_v54  ;;  %19167 = vmatprep.subr.bf16.mxu1 %v20094_v48  ;;  %v674_v0 = vmul.f32 %v399_v50, %v21763_v7  ;;  %v20101_v48 = vld [vmem:[%s25581_s5 + $0xf80] sm:$0xff]   ;;  %v20105_v22 = vld [vmem:[%s25581_s5 + $0xfc8] sm:$0xff]   ;;  %v20112_v24 = vld [vmem:[%s25581_s5 + $0xf58] sm:$0xff]  }
 0x25b   :  { %19189 = vmatprep.subr.bf16.mxu0 %v20095_v61  ;;  %v1368_v29 = vadd.f32 %v1276_v41, %v672_v23  ;;  %v1455_v61 = vpack.c.bf16 %v1363_v47, %v1363_v47  ;;  %v1457_v12 = vpack.c.bf16 %v1365_v21, %v1365_v21  ;;  %v20106_v50 = vld [vmem:[%s25581_s5 + $0xf08] sm:$0xff]   ;;  %v20111_v41 = vld [vmem:[%s25581_s5 + $0xf90] sm:$0xff]   ;;  %v20115_v23 = vld [vmem:[%s25581_s5 + $0xf98] sm:$0xff]  }
 0x25c   :  { %v1370_v54 = vadd.f32 %v1278_v45, %v674_v0  ;;  %v20107_v45 = vld [vmem:[%s25581_s5 + $0xf88] sm:$0xff]   ;;  %v20116_v21 = vld [vmem:[%s25581_s5 + $0xf60] sm:$0xff]  }
 0x25d   :  { %19168 = vmatpush3.bf16.msra.mxu1 %v20096_v52  ;;  %v1460_v52 = vpack.c.bf16 %v1368_v29, %v1368_v29  ;;  %v20110_v29 = vld [vmem:[%s25581_s5 + $0xf10] sm:$0xff]   ;;  %v69_v0 = vld [vmem:[%s25579_s3 + $0x80] sm:$0xff] }
 0x25e   :  { %19190 = vmatpush3.bf16.msra.mxu0 %v20097_v3  ;;  %19197 = vmatprep.subr.bf16.mxu1 %v20098_v20  ;;  %v1462_v47 = vpack.c.bf16 %v1370_v54, %v1370_v54  ;;  %v20108_v3 = vld [vmem:[%s25581_s5 + $0xf50] sm:$0xff]   ;;  %v20113_v20 = vld [vmem:[%s25581_s5 + $0xfd8] sm:$0xff]   ;;  %v93_v54 = vld [vmem:[%s25578_s2 + $0x80] sm:$0xff] }
 0x25f   :  { %19219 = vmatprep.subr.bf16.mxu0 %v20099_v35  ;;  %v20114_v35 = vld [vmem:[%s25581_s5 + $0xf18] sm:$0xff]  }
 0x260   :  { %8638 = vmatmul.mubr.bf16.vlgmr.msra.gmra.mrb[56].mxu1 %v1455_v61  ;;  %v1004_v61 = vcombine.high %v69_v0, %v69_v0 }
 0x261   :  { %8678 = vmatmul.mubr.bf16.vlgmr.msra.gmra.mrb[60].mxu0 %v1457_v12  ;;  %19198 = vmatpush3.bf16.msra.mxu1 %v20100_v39  ;;  %v20117_v39 = vld [vmem:[%s25581_s5 + $0xfe0] sm:$0xff]   ;;  %v20121_v12 = vld [vmem:[%s25581_s5 + $0xfe8] sm:$0xff]  }
 0x262   :  { %8717 = vmatprep.mubr.bf16.mxu1 %v1460_v52  ;;  %19220 = vmatpush3.bf16.msra.mxu0 %v20101_v48  ;;  %v20118_v48 = vld [vmem:[%s25581_s5 + $0xf20] sm:$0xff]   ;;  %v20122_v52 = vld [vmem:[%s25581_s5 + $0xf28] sm:$0xff]  }
 0x263   :  { %8757 = vmatprep.mubr.bf16.mxu0 %v1462_v47  ;;  %19199 = vmatprep.subr.bf16.mxu1 %v20104_v44  ;;  %v20119_v44 = vld [vmem:[%s25581_s5 + $0xfa0] sm:$0xff]   ;;  %v20123_v47 = vld [vmem:[%s25581_s5 + $0xfa8] sm:$0xff]  }
 0x264   :  { %19221 = vmatprep.subr.bf16.mxu0 %v20105_v22  ;;  %v20120_v22 = vld [vmem:[%s25581_s5 + $0xf68] sm:$0xff]  }
 0x265   :  { %19200 = vmatpush3.bf16.msra.mxu1 %v20106_v50  ;;  %v400_v50 = vcombine.high %v93_v54, %v93_v54 }
 0x266   :  { %19222 = vmatpush3.bf16.msra.mxu0 %v20107_v45  ;;  %19201 = vmatprep.subr.bf16.mxu1 %v20108_v3  ;;  %v23861_v45 = vrot.slane %v69_v0, %v21741_v58  ;;  %v23867_v3 = vrot.slane %v1004_v61, %v21741_v58 }
 0x267   :  { %19223 = vmatprep.subr.bf16.mxu0 %v20109_v46  ;;  %v20124_v46 = vld [vmem:[%s25581_s5 + $0xf70] sm:$0xff]  }
 0x268   :  { %25684 = vst [vmem:[#allocation41_spill] sm:$0xff] %v23861_v45  ;;  %25685 = vst [vmem:[#allocation42_spill] sm:$0xff] %v23867_v3  ;;  %v23889_v0 = vcombine.high %v23861_v45, %v23861_v45  ;;  %v23893_v61 = vcombine.high %v23867_v3, %v23867_v3 }
 0x269   :  { %19202 = vmatpush3.bf16.msra.mxu1 %v20110_v29  ;;  %v23873_v29 = vrot.slane %v93_v54, %v21741_v58 }
 0x26a   :  { %19224 = vmatpush3.bf16.msra.mxu0 %v20111_v41  ;;  %19203 = vmatprep.subr.bf16.mxu1 %v20112_v24  ;;  %v20125_v24 = vld [vmem:[%s25581_s5 + $0xff0] sm:$0xff]   ;;  %25686 = vst [vmem:[#allocation43_spill] sm:$0xff] %v23889_v0  ;;  %25687 = vst [vmem:[#allocation44_spill] sm:$0xff] %v23893_v61 }
 0x26b   :  { %19225 = vmatprep.subr.bf16.mxu0 %v20113_v20  ;;  %v23879_v20 = vrot.slane %v400_v50, %v21741_v58 }
 0x26d   :  { %19204 = vmatpush3.bf16.msra.mxu1 %v20114_v35 }
 0x26e   :  { %19226 = vmatpush3.bf16.msra.mxu0 %v20115_v23  ;;  %19205 = vmatprep.subr.bf16.mxu1 %v20116_v21  ;;  %v20126_v21 = vld [vmem:[%s25581_s5 + $0xf30] sm:$0xff]  }
 0x26f   :  { %19227 = vmatprep.subr.bf16.mxu0 %v20117_v39  ;;  %v20127_v39 = vld [vmem:[%s25581_s5 + $0xfb0] sm:$0xff]  }
 0x271   :  { %19206 = vmatpush3.bf16.msra.mxu1 %v20118_v48 }
 0x272   :  { %19228 = vmatpush3.bf16.msra.mxu0 %v20119_v44  ;;  %19207 = vmatprep.subr.bf16.mxu1 %v20120_v22 }
 0x273   :  { %v18905_v41 = vpop.f32.mrb[32].mxu1  ;;  %19229 = vmatprep.subr.bf16.mxu0 %v20121_v12 }
 0x274   :  { %v18927_v35 = vpop.f32.mrb[36].mxu0  ;;  %v18906_v23 = vpop.f32.mrb[33].mxu1 }
 0x275   :  { %v18907_v48 = vadd.f32 %v18906_v23, %v18905_v41  ;;  %v18928_v54 = vpop.f32.mrb[37].mxu0  ;;  %v18908_v44 = vpop.f32.mrb[34].mxu1  ;;  %19208 = vmatpush3.bf16.msra.mxu1 %v20122_v52  ;;  %v20129_v41 = vld [vmem:[%s25581_s5 + $0xff8] sm:$0xff]   ;;  %v1275_v52 = vmul.f32 %v23718_v33, %v21785_v16  ;;  %v415_v23 = vcombine.high %v23873_v29, %v23873_v29 }
 0x276   :  { %v18929_v22 = vadd.f32 %v18928_v54, %v18927_v35  ;;  %v18930_v12 = vpop.f32.mrb[38].mxu0  ;;  %19230 = vmatpush3.bf16.msra.mxu0 %v20123_v47  ;;  %v18909_v50 = vpop.f32.mrb[35].mxu1  ;;  %19209 = vmatprep.subr.bf16.mxu1 %v20124_v46  ;;  %v20130_v47 = vld [vmem:[%s25581_s5 + $0xf38] sm:$0xff]   ;;  %v1277_v46 = vmul.f32 %v23724_v56, %v21785_v16  ;;  %v416_v44 = vcombine.high %v23879_v20, %v23879_v20 }
 0x277   :  { %v8160_v35 = vadd.f32 %v18907_v48, %v23777_v36  ;;  %v18931_v54 = vpop.f32.mrb[39].mxu0  ;;  %19231 = vmatprep.subr.bf16.mxu0 %v20125_v24  ;;  %v20131_v12 = vld [vmem:[%s25581_s5 + $0xfb8] sm:$0xff]   ;;  %v671_v50 = vmul.f32 %v23730_v60, %v21763_v7  ;;  %v1280_v36 = vmul.f32 %v23889_v0, %v21785_v16  ;;  %v673_v48 = vmul.f32 %v23736_v62, %v21763_v7  ;;  %v20133_v60 = vld [vmem:[%s25581_s5 + $0x10c0] sm:$0xff]  }
 0x278   :  { %v20132_v54 = vld [vmem:[%s25581_s5 + $0x1040] sm:$0xff]   ;;  %v1282_v56 = vmul.f32 %v23893_v61, %v21785_v16  ;;  %v20162_v61 = vld [vmem:[%s25581_s5 + $0x1078] sm:$0xff]  }
 0x279   :  { %v23920_v24 = vadd.f32 %v18929_v22, %v8160_v35  ;;  %19210 = vmatpush3.bf16.msra.mxu1 %v20126_v21  ;;  %v1367_v33 = vadd.f32 %v1275_v52, %v671_v50  ;;  %v676_v22 = vmul.f32 %v415_v23, %v21763_v7  ;;  %v1369_v21 = vadd.f32 %v1277_v46, %v673_v48  ;;  %v20134_v62 = vld [vmem:[%s25581_s5 + $0x1000] sm:$0xff]   ;;  %v20138_v52 = vld [vmem:[%s25581_s5 + $0x1048] sm:$0xff]   ;;  %v20143_v50 = vld [vmem:[%s25581_s5 + $0x10d0] sm:$0xff]  }
 0x27a   :  { %19232 = vmatpush3.bf16.msra.mxu0 %v20127_v39  ;;  %19211 = vmatprep.subr.bf16.mxu1 %v20128_v8  ;;  %v678_v35 = vmul.f32 %v416_v44, %v21763_v7  ;;  %v20135_v8 = vld [vmem:[%s25581_s5 + $0x1080] sm:$0xff]   ;;  %v20139_v23 = vld [vmem:[%s25581_s5 + $0x10c8] sm:$0xff]   ;;  %v20146_v48 = vld [vmem:[%s25581_s5 + $0x1058] sm:$0xff]  }
 0x27b   :  { %19233 = vmatprep.subr.bf16.mxu0 %v20129_v41  ;;  %v1372_v0 = vadd.f32 %v1280_v36, %v676_v22  ;;  %v1459_v41 = vpack.c.bf16 %v1367_v33, %v1367_v33  ;;  %v1461_v46 = vpack.c.bf16 %v1369_v21, %v1369_v21  ;;  %v20140_v44 = vld [vmem:[%s25581_s5 + $0x1008] sm:$0xff]   ;;  %v20145_v36 = vld [vmem:[%s25581_s5 + $0x1090] sm:$0xff]   ;;  %v20149_v22 = vld [vmem:[%s25581_s5 + $0x1098] sm:$0xff]  }
 0x27c   :  { %v1374_v39 = vadd.f32 %v1282_v56, %v678_v35  ;;  %v20141_v56 = vld [vmem:[%s25581_s5 + $0x1088] sm:$0xff]   ;;  %v20150_v21 = vld [vmem:[%s25581_s5 + $0x1060] sm:$0xff]  }
 0x27d   :  { %19212 = vmatpush3.bf16.msra.mxu1 %v20130_v47  ;;  %v1464_v47 = vpack.c.bf16 %v1372_v0, %v1372_v0  ;;  %v20144_v0 = vld [vmem:[%s25581_s5 + $0x1010] sm:$0xff]   ;;  %v70_v35 = vld [vmem:[%s25579_s3 + $0x88] sm:$0xff] }
 0x27e   :  { %19234 = vmatpush3.bf16.msra.mxu0 %v20131_v12  ;;  %19241 = vmatprep.subr.bf16.mxu1 %v20132_v54  ;;  %v1466_v33 = vpack.c.bf16 %v1374_v39, %v1374_v39  ;;  %v20142_v12 = vld [vmem:[%s25581_s5 + $0x1050] sm:$0xff]   ;;  %v20147_v54 = vld [vmem:[%s25581_s5 + $0x10d8] sm:$0xff]   ;;  %v94_v39 = vld [vmem:[%s25578_s2 + $0x88] sm:$0xff] }
 0x27f   :  { %19263 = vmatprep.subr.bf16.mxu0 %v20133_v60  ;;  %v20148_v60 = vld [vmem:[%s25581_s5 + $0x1018] sm:$0xff]  }
 0x280   :  { %8718 = vmatmul.mubr.bf16.vlgmr.msra.gmra.mrb[60].mxu1 %v1459_v41  ;;  %v1021_v41 = vcombine.high %v70_v35, %v70_v35 }
 0x281   :  { %8758 = vmatmul.mubr.bf16.vlgmr.msra.gmra.mrb[64].mxu0 %v1461_v46  ;;  %19242 = vmatpush3.bf16.msra.mxu1 %v20134_v62  ;;  %v20151_v62 = vld [vmem:[%s25581_s5 + $0x10e0] sm:$0xff]   ;;  %v20155_v46 = vld [vmem:[%s25581_s5 + $0x10e8] sm:$0xff]  }
 0x282   :  { %8797 = vmatprep.mubr.bf16.mxu1 %v1464_v47  ;;  %19264 = vmatpush3.bf16.msra.mxu0 %v20135_v8  ;;  %v20152_v8 = vld [vmem:[%s25581_s5 + $0x1020] sm:$0xff]   ;;  %v20156_v47 = vld [vmem:[%s25581_s5 + $0x1028] sm:$0xff]  }
 0x283   :  { %8837 = vmatprep.mubr.bf16.mxu0 %v1466_v33  ;;  %19243 = vmatprep.subr.bf16.mxu1 %v20138_v52  ;;  %v20153_v52 = vld [vmem:[%s25581_s5 + $0x10a0] sm:$0xff]   ;;  %v20157_v33 = vld [vmem:[%s25581_s5 + $0x10a8] sm:$0xff]  }
 0x284   :  { %19265 = vmatprep.subr.bf16.mxu0 %v20139_v23  ;;  %v20154_v23 = vld [vmem:[%s25581_s5 + $0x1068] sm:$0xff]  }
 0x285   :  { %19244 = vmatpush3.bf16.msra.mxu1 %v20140_v44  ;;  %v417_v44 = vcombine.high %v94_v39, %v94_v39 }
 0x286   :  { %19266 = vmatpush3.bf16.msra.mxu0 %v20141_v56  ;;  %19245 = vmatprep.subr.bf16.mxu1 %v20142_v12  ;;  %v24004_v56 = vrot.slane %v70_v35, %v21741_v58  ;;  %v24010_v12 = vrot.slane %v1021_v41, %v21741_v58 }
 0x287   :  { %19267 = vmatprep.subr.bf16.mxu0 %v20143_v50  ;;  %v20158_v50 = vld [vmem:[%s25581_s5 + $0x1070] sm:$0xff]  }
 0x288   :  { %25688 = vst [vmem:[#allocation45_spill] sm:$0xff] %v24004_v56  ;;  %25689 = vst [vmem:[#allocation46_spill] sm:$0xff] %v24010_v12  ;;  %v24032_v35 = vcombine.high %v24004_v56, %v24004_v56  ;;  %v24036_v41 = vcombine.high %v24010_v12, %v24010_v12 }
 0x289   :  { %19246 = vmatpush3.bf16.msra.mxu1 %v20144_v0  ;;  %v24016_v0 = vrot.slane %v94_v39, %v21741_v58 }
 0x28a   :  { %19268 = vmatpush3.bf16.msra.mxu0 %v20145_v36  ;;  %19247 = vmatprep.subr.bf16.mxu1 %v20146_v48  ;;  %v20159_v48 = vld [vmem:[%s25581_s5 + $0x10f0] sm:$0xff]   ;;  %25690 = vst [vmem:[#allocation47_spill] sm:$0xff] %v24032_v35  ;;  %25691 = vst [vmem:[#allocation48_spill] sm:$0xff] %v24036_v41 }
 0x28b   :  { %19269 = vmatprep.subr.bf16.mxu0 %v20147_v54  ;;  %v24022_v54 = vrot.slane %v417_v44, %v21741_v58 }
 0x28d   :  { %19248 = vmatpush3.bf16.msra.mxu1 %v20148_v60 }
 0x28e   :  { %19270 = vmatpush3.bf16.msra.mxu0 %v20149_v22  ;;  %19249 = vmatprep.subr.bf16.mxu1 %v20150_v21  ;;  %v20160_v21 = vld [vmem:[%s25581_s5 + $0x1030] sm:$0xff]  }
 0x28f   :  { %19271 = vmatprep.subr.bf16.mxu0 %v20151_v62  ;;  %v20161_v62 = vld [vmem:[%s25581_s5 + $0x10b0] sm:$0xff]  }
 0x291   :  { %19250 = vmatpush3.bf16.msra.mxu1 %v20152_v8 }
 0x292   :  { %19272 = vmatpush3.bf16.msra.mxu0 %v20153_v52  ;;  %19251 = vmatprep.subr.bf16.mxu1 %v20154_v23 }
 0x293   :  { %v18949_v36 = vpop.f32.mrb[36].mxu1  ;;  %19273 = vmatprep.subr.bf16.mxu0 %v20155_v46 }
 0x294   :  { %v18971_v60 = vpop.f32.mrb[40].mxu0  ;;  %v18950_v22 = vpop.f32.mrb[37].mxu1 }
 0x295   :  { %v18951_v8 = vadd.f32 %v18950_v22, %v18949_v36  ;;  %v18972_v39 = vpop.f32.mrb[41].mxu0  ;;  %v18952_v52 = vpop.f32.mrb[38].mxu1  ;;  %19252 = vmatpush3.bf16.msra.mxu1 %v20156_v47  ;;  %v20163_v36 = vld [vmem:[%s25581_s5 + $0x10f8] sm:$0xff]   ;;  %v1279_v47 = vmul.f32 %v23861_v45, %v21785_v16  ;;  %v432_v22 = vcombine.high %v24016_v0, %v24016_v0 }
 0x296   :  { %v18973_v23 = vadd.f32 %v18972_v39, %v18971_v60  ;;  %v18974_v46 = vpop.f32.mrb[42].mxu0  ;;  %19274 = vmatpush3.bf16.msra.mxu0 %v20157_v33  ;;  %v18953_v44 = vpop.f32.mrb[39].mxu1  ;;  %19253 = vmatprep.subr.bf16.mxu1 %v20158_v50  ;;  %v20164_v33 = vld [vmem:[%s25581_s5 + $0x1038] sm:$0xff]   ;;  %v1281_v50 = vmul.f32 %v23867_v3, %v21785_v16  ;;  %v433_v52 = vcombine.high %v24022_v54, %v24022_v54 }
 0x297   :  { %v8240_v60 = vadd.f32 %v18951_v8, %v23920_v24  ;;  %v18975_v39 = vpop.f32.mrb[43].mxu0  ;;  %19275 = vmatprep.subr.bf16.mxu0 %v20159_v48  ;;  %v20165_v46 = vld [vmem:[%s25581_s5 + $0x10b8] sm:$0xff]   ;;  %v675_v44 = vmul.f32 %v23873_v29, %v21763_v7  ;;  %v1284_v24 = vmul.f32 %v24032_v35, %v21785_v16  ;;  %v677_v8 = vmul.f32 %v23879_v20, %v21763_v7  ;;  %v20167_v29 = vld [vmem:[%s25581_s5 + $0x11c0] sm:$0xff]  }
 0x298   :  { %v20166_v39 = vld [vmem:[%s25581_s5 + $0x1140] sm:$0xff]   ;;  %v1286_v3 = vmul.f32 %v24036_v41, %v21785_v16  ;;  %v20196_v41 = vld [vmem:[%s25581_s5 + $0x1178] sm:$0xff]  }
 0x299   :  { %v24063_v48 = vadd.f32 %v18973_v23, %v8240_v60  ;;  %19254 = vmatpush3.bf16.msra.mxu1 %v20160_v21  ;;  %v1371_v45 = vadd.f32 %v1279_v47, %v675_v44  ;;  %v680_v23 = vmul.f32 %v432_v22, %v21763_v7  ;;  %v1373_v21 = vadd.f32 %v1281_v50, %v677_v8  ;;  %v20168_v20 = vld [vmem:[%s25581_s5 + $0x1100] sm:$0xff]   ;;  %v20172_v47 = vld [vmem:[%s25581_s5 + $0x1148] sm:$0xff]   ;;  %v20177_v44 = vld [vmem:[%s25581_s5 + $0x11d0] sm:$0xff]  }
 0x29a   :  { %19276 = vmatpush3.bf16.msra.mxu0 %v20161_v62  ;;  %19255 = vmatprep.subr.bf16.mxu1 %v20162_v61  ;;  %v682_v60 = vmul.f32 %v433_v52, %v21763_v7  ;;  %v20169_v61 = vld [vmem:[%s25581_s5 + $0x1180] sm:$0xff]   ;;  %v20173_v22 = vld [vmem:[%s25581_s5 + $0x11c8] sm:$0xff]   ;;  %v20180_v8 = vld [vmem:[%s25581_s5 + $0x1158] sm:$0xff]  }
 0x29b   :  { %19277 = vmatprep.subr.bf16.mxu0 %v20163_v36  ;;  %v1376_v35 = vadd.f32 %v1284_v24, %v680_v23  ;;  %v1463_v36 = vpack.c.bf16 %v1371_v45, %v1371_v45  ;;  %v1465_v50 = vpack.c.bf16 %v1373_v21, %v1373_v21  ;;  %v20174_v52 = vld [vmem:[%s25581_s5 + $0x1108] sm:$0xff]   ;;  %v20179_v24 = vld [vmem:[%s25581_s5 + $0x1190] sm:$0xff]   ;;  %v20183_v23 = vld [vmem:[%s25581_s5 + $0x1198] sm:$0xff]  }
 0x29c   :  { %v1378_v62 = vadd.f32 %v1286_v3, %v682_v60  ;;  %v20175_v3 = vld [vmem:[%s25581_s5 + $0x1188] sm:$0xff]   ;;  %v20184_v21 = vld [vmem:[%s25581_s5 + $0x1160] sm:$0xff]   ;;  %v71_v60 = vld [vmem:[%s25579_s3 + $0x90] sm:$0xff] }
 0x29d   :  { %19256 = vmatpush3.bf16.msra.mxu1 %v20164_v33  ;;  %v1468_v33 = vpack.c.bf16 %v1376_v35, %v1376_v35  ;;  %v20178_v35 = vld [vmem:[%s25581_s5 + $0x1110] sm:$0xff]  }
 0x29e   :  { %19278 = vmatpush3.bf16.msra.mxu0 %v20165_v46  ;;  %19285 = vmatprep.subr.bf16.mxu1 %v20166_v39  ;;  %v1470_v45 = vpack.c.bf16 %v1378_v62, %v1378_v62  ;;  %v20176_v46 = vld [vmem:[%s25581_s5 + $0x1150] sm:$0xff]   ;;  %v20181_v39 = vld [vmem:[%s25581_s5 + $0x11d8] sm:$0xff]  }
 0x29f   :  { %19307 = vmatprep.subr.bf16.mxu0 %v20167_v29  ;;  %v20182_v29 = vld [vmem:[%s25581_s5 + $0x1118] sm:$0xff]   ;;  %v95_v62 = vld [vmem:[%s25578_s2 + $0x90] sm:$0xff] }
 0x2a0   :  { %8798 = vmatmul.mubr.bf16.vlgmr.msra.gmra.mrb[64].mxu1 %v1463_v36  ;;  %v1038_v36 = vcombine.high %v71_v60, %v71_v60 }
 0x2a1   :  { %8838 = vmatmul.mubr.bf16.vlgmr.msra.gmra.mrb[68].mxu0 %v1465_v50  ;;  %19286 = vmatpush3.bf16.msra.mxu1 %v20168_v20  ;;  %v20185_v20 = vld [vmem:[%s25581_s5 + $0x11e0] sm:$0xff]   ;;  %v20189_v50 = vld [vmem:[%s25581_s5 + $0x11e8] sm:$0xff]  }
 0x2a2   :  { %8877 = vmatprep.mubr.bf16.mxu1 %v1468_v33  ;;  %19308 = vmatpush3.bf16.msra.mxu0 %v20169_v61  ;;  %v20186_v61 = vld [vmem:[%s25581_s5 + $0x1120] sm:$0xff]   ;;  %v24144_v33 = vrot.slane %v71_v60, %v21741_v58 }
 0x2a3   :  { %8917 = vmatprep.mubr.bf16.mxu0 %v1470_v45  ;;  %19287 = vmatprep.subr.bf16.mxu1 %v20172_v47  ;;  %v20187_v47 = vld [vmem:[%s25581_s5 + $0x11a0] sm:$0xff]   ;;  %v20191_v45 = vld [vmem:[%s25581_s5 + $0x11a8] sm:$0xff]  }
 0x2a4   :  { %19309 = vmatprep.subr.bf16.mxu0 %v20173_v22  ;;  %v20188_v22 = vld [vmem:[%s25581_s5 + $0x1168] sm:$0xff]   ;;  %25692 = vst [vmem:[#allocation49_spill] sm:$0xff] %v24144_v33  ;;  %v24175_v60 = vcombine.high %v24144_v33, %v24144_v33 }
 0x2a5   :  { %19288 = vmatpush3.bf16.msra.mxu1 %v20174_v52  ;;  %v434_v52 = vcombine.high %v95_v62, %v95_v62 }
 0x2a6   :  { %19310 = vmatpush3.bf16.msra.mxu0 %v20175_v3  ;;  %19289 = vmatprep.subr.bf16.mxu1 %v20176_v46  ;;  %v20190_v3 = vld [vmem:[%s25581_s5 + $0x1128] sm:$0xff]   ;;  %v24153_v46 = vrot.slane %v1038_v36, %v21741_v58  ;;  %25694 = vst [vmem:[#allocation51_spill] sm:$0xff] %v24175_v60 }
 0x2a7   :  { %19311 = vmatprep.subr.bf16.mxu0 %v20177_v44  ;;  %v20192_v44 = vld [vmem:[%s25581_s5 + $0x1170] sm:$0xff]  }
 0x2a8   :  { %25693 = vst [vmem:[#allocation50_spill] sm:$0xff] %v24153_v46  ;;  %v24179_v36 = vcombine.high %v24153_v46, %v24153_v46 }
 0x2a9   :  { %19290 = vmatpush3.bf16.msra.mxu1 %v20178_v35  ;;  %v24159_v35 = vrot.slane %v95_v62, %v21741_v58 }
 0x2aa   :  { %19312 = vmatpush3.bf16.msra.mxu0 %v20179_v24  ;;  %19291 = vmatprep.subr.bf16.mxu1 %v20180_v8  ;;  %v20193_v8 = vld [vmem:[%s25581_s5 + $0x11f0] sm:$0xff]   ;;  %25695 = vst [vmem:[#allocation52_spill] sm:$0xff] %v24179_v36 }
 0x2ab   :  { %19313 = vmatprep.subr.bf16.mxu0 %v20181_v39  ;;  %v24165_v39 = vrot.slane %v434_v52, %v21741_v58 }
 0x2ad   :  { %19292 = vmatpush3.bf16.msra.mxu1 %v20182_v29 }
 0x2ae   :  { %19314 = vmatpush3.bf16.msra.mxu0 %v20183_v23  ;;  %19293 = vmatprep.subr.bf16.mxu1 %v20184_v21  ;;  %v20194_v21 = vld [vmem:[%s25581_s5 + $0x1130] sm:$0xff]  }
 0x2af   :  { %19315 = vmatprep.subr.bf16.mxu0 %v20185_v20  ;;  %v20195_v20 = vld [vmem:[%s25581_s5 + $0x11b0] sm:$0xff]  }
 0x2b1   :  { %19294 = vmatpush3.bf16.msra.mxu1 %v20186_v61 }
 0x2b2   :  { %19316 = vmatpush3.bf16.msra.mxu0 %v20187_v47  ;;  %19295 = vmatprep.subr.bf16.mxu1 %v20188_v22 }
 0x2b3   :  { %v18993_v24 = vpop.f32.mrb[40].mxu1  ;;  %19317 = vmatprep.subr.bf16.mxu0 %v20189_v50 }
 0x2b4   :  { %v19015_v29 = vpop.f32.mrb[44].mxu0  ;;  %v18994_v23 = vpop.f32.mrb[41].mxu1 }
 0x2b5   :  { %v18995_v61 = vadd.f32 %v18994_v23, %v18993_v24  ;;  %v19016_v62 = vpop.f32.mrb[45].mxu0  ;;  %v18996_v47 = vpop.f32.mrb[42].mxu1  ;;  %19296 = vmatpush3.bf16.msra.mxu1 %v20190_v3  ;;  %v20197_v24 = vld [vmem:[%s25581_s5 + $0x11f8] sm:$0xff]   ;;  %v1283_v3 = vmul.f32 %v24004_v56, %v21785_v16  ;;  %v449_v23 = vcombine.high %v24159_v35, %v24159_v35 }
 0x2b6   :  { %v19017_v22 = vadd.f32 %v19016_v62, %v19015_v29  ;;  %v19018_v50 = vpop.f32.mrb[46].mxu0  ;;  %19318 = vmatpush3.bf16.msra.mxu0 %v20191_v45  ;;  %v18997_v52 = vpop.f32.mrb[43].mxu1  ;;  %19297 = vmatprep.subr.bf16.mxu1 %v20192_v44  ;;  %v20198_v45 = vld [vmem:[%s25581_s5 + $0x1138] sm:$0xff]   ;;  %v1285_v44 = vmul.f32 %v24010_v12, %v21785_v16  ;;  %v450_v47 = vcombine.high %v24165_v39, %v24165_v39 }
 0x2b7   :  { %v8320_v29 = vadd.f32 %v18995_v61, %v24063_v48  ;;  %v19019_v62 = vpop.f32.mrb[47].mxu0  ;;  %19319 = vmatprep.subr.bf16.mxu0 %v20193_v8  ;;  %v20199_v50 = vld [vmem:[%s25581_s5 + $0x11b8] sm:$0xff]   ;;  %v679_v52 = vmul.f32 %v24016_v0, %v21763_v7  ;;  %v1288_v48 = vmul.f32 %v24175_v60, %v21785_v16  ;;  %v681_v61 = vmul.f32 %v24022_v54, %v21763_v7  ;;  %v20201_v0 = vld [vmem:[%s25581_s5 + $0x12c0] sm:$0xff]  }
 0x2b8   :  { %v20200_v62 = vld [vmem:[%s25581_s5 + $0x1240] sm:$0xff]   ;;  %v1290_v12 = vmul.f32 %v24179_v36, %v21785_v16  ;;  %v20230_v36 = vld [vmem:[%s25581_s5 + $0x1278] sm:$0xff]  }
 0x2b9   :  { %v24206_v8 = vadd.f32 %v19017_v22, %v8320_v29  ;;  %19298 = vmatpush3.bf16.msra.mxu1 %v20194_v21  ;;  %v1375_v56 = vadd.f32 %v1283_v3, %v679_v52  ;;  %v684_v22 = vmul.f32 %v449_v23, %v21763_v7  ;;  %v1377_v21 = vadd.f32 %v1285_v44, %v681_v61  ;;  %v20202_v54 = vld [vmem:[%s25581_s5 + $0x1200] sm:$0xff]   ;;  %v20206_v3 = vld [vmem:[%s25581_s5 + $0x1248] sm:$0xff]   ;;  %v20211_v52 = vld [vmem:[%s25581_s5 + $0x12d0] sm:$0xff]  }
 0x2ba   :  { %19320 = vmatpush3.bf16.msra.mxu0 %v20195_v20  ;;  %19299 = vmatprep.subr.bf16.mxu1 %v20196_v41  ;;  %v686_v29 = vmul.f32 %v450_v47, %v21763_v7  ;;  %v20203_v41 = vld [vmem:[%s25581_s5 + $0x1280] sm:$0xff]   ;;  %v20207_v23 = vld [vmem:[%s25581_s5 + $0x12c8] sm:$0xff]   ;;  %v20214_v61 = vld [vmem:[%s25581_s5 + $0x1258] sm:$0xff]  }
 0x2bb   :  { %19321 = vmatprep.subr.bf16.mxu0 %v20197_v24  ;;  %v1380_v60 = vadd.f32 %v1288_v48, %v684_v22  ;;  %v1467_v24 = vpack.c.bf16 %v1375_v56, %v1375_v56  ;;  %v1469_v44 = vpack.c.bf16 %v1377_v21, %v1377_v21  ;;  %v20208_v47 = vld [vmem:[%s25581_s5 + $0x1208] sm:$0xff]   ;;  %v20213_v48 = vld [vmem:[%s25581_s5 + $0x1290] sm:$0xff]   ;;  %v20217_v22 = vld [vmem:[%s25581_s5 + $0x1298] sm:$0xff]  }
 0x2bc   :  { %v1382_v20 = vadd.f32 %v1290_v12, %v686_v29  ;;  %v20209_v12 = vld [vmem:[%s25581_s5 + $0x1288] sm:$0xff]   ;;  %v20218_v21 = vld [vmem:[%s25581_s5 + $0x1260] sm:$0xff]   ;;  %v72_v29 = vld [vmem:[%s25579_s3 + $0x98] sm:$0xff] }
 0x2bd   :  { %19300 = vmatpush3.bf16.msra.mxu1 %v20198_v45  ;;  %v1472_v45 = vpack.c.bf16 %v1380_v60, %v1380_v60  ;;  %v20212_v60 = vld [vmem:[%s25581_s5 + $0x1210] sm:$0xff]  }
 0x2be   :  { %19322 = vmatpush3.bf16.msra.mxu0 %v20199_v50  ;;  %19329 = vmatprep.subr.bf16.mxu1 %v20200_v62  ;;  %v1474_v56 = vpack.c.bf16 %v1382_v20, %v1382_v20  ;;  %v20210_v50 = vld [vmem:[%s25581_s5 + $0x1250] sm:$0xff]   ;;  %v20215_v62 = vld [vmem:[%s25581_s5 + $0x12d8] sm:$0xff]  }
 0x2bf   :  { %19351 = vmatprep.subr.bf16.mxu0 %v20201_v0  ;;  %v20216_v0 = vld [vmem:[%s25581_s5 + $0x1218] sm:$0xff]  }
 0x2c0   :  { %8878 = vmatmul.mubr.bf16.vlgmr.msra.gmra.mrb[68].mxu1 %v1467_v24  ;;  %v96_v20 = vld [vmem:[%s25578_s2 + $0x98] sm:$0xff]  ;;  %v1055_v24 = vcombine.high %v72_v29, %v72_v29 }
 0x2c1   :  { %8918 = vmatmul.mubr.bf16.vlgmr.msra.gmra.mrb[72].mxu0 %v1469_v44  ;;  %19330 = vmatpush3.bf16.msra.mxu1 %v20202_v54  ;;  %v20219_v54 = vld [vmem:[%s25581_s5 + $0x12e0] sm:$0xff]   ;;  %v20223_v44 = vld [vmem:[%s25581_s5 + $0x12e8] sm:$0xff]  }
 0x2c2   :  { %8957 = vmatprep.mubr.bf16.mxu1 %v1472_v45  ;;  %19352 = vmatpush3.bf16.msra.mxu0 %v20203_v41  ;;  %v20220_v41 = vld [vmem:[%s25581_s5 + $0x1220] sm:$0xff]   ;;  %v24287_v45 = vrot.slane %v72_v29, %v21741_v58 }
 0x2c3   :  { %8997 = vmatprep.mubr.bf16.mxu0 %v1474_v56  ;;  %19331 = vmatprep.subr.bf16.mxu1 %v20206_v3  ;;  %v20221_v3 = vld [vmem:[%s25581_s5 + $0x12a0] sm:$0xff]   ;;  %v24293_v56 = vrot.slane %v1055_v24, %v21741_v58 }
 0x2c4   :  { %19353 = vmatprep.subr.bf16.mxu0 %v20207_v23  ;;  %v20222_v23 = vld [vmem:[%s25581_s5 + $0x1268] sm:$0xff]   ;;  %25696 = vst [vmem:[#allocation53_spill] sm:$0xff] %v24287_v45  ;;  %v24318_v29 = vcombine.high %v24287_v45, %v24287_v45 }
 0x2c5   :  { %19332 = vmatpush3.bf16.msra.mxu1 %v20208_v47  ;;  %v451_v47 = vcombine.high %v96_v20, %v96_v20  ;;  %25697 = vst [vmem:[#allocation54_spill] sm:$0xff] %v24293_v56  ;;  %v24322_v24 = vcombine.high %v24293_v56, %v24293_v56 }
 0x2c6   :  { %19354 = vmatpush3.bf16.msra.mxu0 %v20209_v12  ;;  %19333 = vmatprep.subr.bf16.mxu1 %v20210_v50  ;;  %v20224_v12 = vld [vmem:[%s25581_s5 + $0x1228] sm:$0xff]   ;;  %25698 = vst [vmem:[#allocation55_spill] sm:$0xff] %v24318_v29 }
 0x2c7   :  { %19355 = vmatprep.subr.bf16.mxu0 %v20211_v52  ;;  %v20225_v50 = vld [vmem:[%s25581_s5 + $0x12a8] sm:$0xff]   ;;  %v20226_v52 = vld [vmem:[%s25581_s5 + $0x1270] sm:$0xff]   ;;  %25699 = vst [vmem:[#allocation56_spill] sm:$0xff] %v24322_v24 }
 0x2c9   :  { %19334 = vmatpush3.bf16.msra.mxu1 %v20212_v60  ;;  %v24302_v60 = vrot.slane %v96_v20, %v21741_v58 }
 0x2ca   :  { %19356 = vmatpush3.bf16.msra.mxu0 %v20213_v48  ;;  %19335 = vmatprep.subr.bf16.mxu1 %v20214_v61  ;;  %v20227_v61 = vld [vmem:[%s25581_s5 + $0x12f0] sm:$0xff]  }
 0x2cb   :  { %19357 = vmatprep.subr.bf16.mxu0 %v20215_v62  ;;  %v24308_v62 = vrot.slane %v451_v47, %v21741_v58 }
 0x2cd   :  { %19336 = vmatpush3.bf16.msra.mxu1 %v20216_v0 }
 0x2ce   :  { %19358 = vmatpush3.bf16.msra.mxu0 %v20217_v22  ;;  %19337 = vmatprep.subr.bf16.mxu1 %v20218_v21  ;;  %v20228_v21 = vld [vmem:[%s25581_s5 + $0x1230] sm:$0xff]  }
 0x2cf   :  { %19359 = vmatprep.subr.bf16.mxu0 %v20219_v54  ;;  %v20229_v54 = vld [vmem:[%s25581_s5 + $0x12b0] sm:$0xff]  }
 0x2d1   :  { %19338 = vmatpush3.bf16.msra.mxu1 %v20220_v41 }
 0x2d2   :  { %19360 = vmatpush3.bf16.msra.mxu0 %v20221_v3  ;;  %19339 = vmatprep.subr.bf16.mxu1 %v20222_v23 }
 0x2d3   :  { %v19037_v48 = vpop.f32.mrb[44].mxu1  ;;  %19361 = vmatprep.subr.bf16.mxu0 %v20223_v44 }
 0x2d4   :  { %v19059_v0 = vpop.f32.mrb[48].mxu0  ;;  %v19038_v22 = vpop.f32.mrb[45].mxu1 }
 0x2d5   :  { %v19039_v41 = vadd.f32 %v19038_v22, %v19037_v48  ;;  %v19060_v20 = vpop.f32.mrb[49].mxu0  ;;  %v19040_v3 = vpop.f32.mrb[46].mxu1  ;;  %19340 = vmatpush3.bf16.msra.mxu1 %v20224_v12  ;;  %v20231_v48 = vld [vmem:[%s25581_s5 + $0x12f8] sm:$0xff]   ;;  %v1287_v12 = vmul.f32 %v24144_v33, %v21785_v16  ;;  %v466_v22 = vcombine.high %v24302_v60, %v24302_v60 }
 0x2d6   :  { %v19061_v23 = vadd.f32 %v19060_v20, %v19059_v0  ;;  %v19062_v44 = vpop.f32.mrb[50].mxu0  ;;  %19362 = vmatpush3.bf16.msra.mxu0 %v20225_v50  ;;  %v19041_v47 = vpop.f32.mrb[47].mxu1  ;;  %19341 = vmatprep.subr.bf16.mxu1 %v20226_v52  ;;  %v20232_v50 = vld [vmem:[%s25581_s5 + $0x1238] sm:$0xff]   ;;  %v1289_v52 = vmul.f32 %v24153_v46, %v21785_v16  ;;  %v467_v3 = vcombine.high %v24308_v62, %v24308_v62 }
 0x2d7   :  { %v8400_v0 = vadd.f32 %v19039_v41, %v24206_v8  ;;  %v19063_v20 = vpop.f32.mrb[51].mxu0  ;;  %19363 = vmatprep.subr.bf16.mxu0 %v20227_v61  ;;  %v20233_v44 = vld [vmem:[%s25581_s5 + $0x12b8] sm:$0xff]   ;;  %v683_v47 = vmul.f32 %v24159_v35, %v21763_v7  ;;  %v1292_v8 = vmul.f32 %v24318_v29, %v21785_v16  ;;  %v685_v41 = vmul.f32 %v24165_v39, %v21763_v7  ;;  %v20235_v35 = vld [vmem:[%s25581_s5 + $0x13c0] sm:$0xff]  }
 0x2d8   :  { %v20234_v20 = vld [vmem:[%s25581_s5 + $0x1340] sm:$0xff]   ;;  %v1294_v46 = vmul.f32 %v24322_v24, %v21785_v16  ;;  %v20264_v24 = vld [vmem:[%s25581_s5 + $0x1378] sm:$0xff]  }
 0x2d9   :  { %v24349_v61 = vadd.f32 %v19061_v23, %v8400_v0  ;;  %19342 = vmatpush3.bf16.msra.mxu1 %v20228_v21  ;;  %v1379_v33 = vadd.f32 %v1287_v12, %v683_v47  ;;  %v688_v23 = vmul.f32 %v466_v22, %v21763_v7  ;;  %v1381_v21 = vadd.f32 %v1289_v52, %v685_v41  ;;  %v20236_v39 = vld [vmem:[%s25581_s5 + $0x1300] sm:$0xff]   ;;  %v20240_v12 = vld [vmem:[%s25581_s5 + $0x1348] sm:$0xff]   ;;  %v20245_v47 = vld [vmem:[%s25581_s5 + $0x13d0] sm:$0xff]  }
 0x2da   :  { %19364 = vmatpush3.bf16.msra.mxu0 %v20229_v54  ;;  %19343 = vmatprep.subr.bf16.mxu1 %v20230_v36  ;;  %v690_v0 = vmul.f32 %v467_v3, %v21763_v7  ;;  %v20237_v36 = vld [vmem:[%s25581_s5 + $0x1380] sm:$0xff]   ;;  %v20241_v22 = vld [vmem:[%s25581_s5 + $0x13c8] sm:$0xff]   ;;  %v20248_v41 = vld [vmem:[%s25581_s5 + $0x1358] sm:$0xff]  }
 0x2db   :  { %19365 = vmatprep.subr.bf16.mxu0 %v20231_v48  ;;  %v1384_v29 = vadd.f32 %v1292_v8, %v688_v23  ;;  %v1471_v48 = vpack.c.bf16 %v1379_v33, %v1379_v33  ;;  %v1473_v52 = vpack.c.bf16 %v1381_v21, %v1381_v21  ;;  %v20242_v3 = vld [vmem:[%s25581_s5 + $0x1308] sm:$0xff]   ;;  %v20247_v8 = vld [vmem:[%s25581_s5 + $0x1390] sm:$0xff]   ;;  %v20251_v23 = vld [vmem:[%s25581_s5 + $0x1398] sm:$0xff]  }
 0x2dc   :  { %v1386_v54 = vadd.f32 %v1294_v46, %v690_v0  ;;  %v20243_v46 = vld [vmem:[%s25581_s5 + $0x1388] sm:$0xff]   ;;  %v20252_v21 = vld [vmem:[%s25581_s5 + $0x1360] sm:$0xff]  }
 0x2dd   :  { %19344 = vmatpush3.bf16.msra.mxu1 %v20232_v50  ;;  %v1476_v50 = vpack.c.bf16 %v1384_v29, %v1384_v29  ;;  %v20246_v29 = vld [vmem:[%s25581_s5 + $0x1310] sm:$0xff]   ;;  %v73_v0 = vld [vmem:[%s25579_s3 + $0xa0] sm:$0xff] }
 0x2de   :  { %19366 = vmatpush3.bf16.msra.mxu0 %v20233_v44  ;;  %19373 = vmatprep.subr.bf16.mxu1 %v20234_v20  ;;  %v1478_v33 = vpack.c.bf16 %v1386_v54, %v1386_v54  ;;  %v20244_v44 = vld [vmem:[%s25581_s5 + $0x1350] sm:$0xff]   ;;  %v20249_v20 = vld [vmem:[%s25581_s5 + $0x13d8] sm:$0xff]   ;;  %v97_v54 = vld [vmem:[%s25578_s2 + $0xa0] sm:$0xff] }
 0x2df   :  { %19395 = vmatprep.subr.bf16.mxu0 %v20235_v35  ;;  %v20250_v35 = vld [vmem:[%s25581_s5 + $0x1318] sm:$0xff]  }
 0x2e0   :  { %8958 = vmatmul.mubr.bf16.vlgmr.msra.gmra.mrb[72].mxu1 %v1471_v48  ;;  %v1072_v48 = vcombine.high %v73_v0, %v73_v0 }
 0x2e1   :  { %8998 = vmatmul.mubr.bf16.vlgmr.msra.gmra.mrb[76].mxu0 %v1473_v52  ;;  %19374 = vmatpush3.bf16.msra.mxu1 %v20236_v39  ;;  %v20253_v39 = vld [vmem:[%s25581_s5 + $0x13e0] sm:$0xff]   ;;  %v20257_v52 = vld [vmem:[%s25581_s5 + $0x13e8] sm:$0xff]  }
 0x2e2   :  { %9037 = vmatprep.mubr.bf16.mxu1 %v1476_v50  ;;  %19396 = vmatpush3.bf16.msra.mxu0 %v20237_v36  ;;  %v20254_v36 = vld [vmem:[%s25581_s5 + $0x1320] sm:$0xff]   ;;  %v20258_v50 = vld [vmem:[%s25581_s5 + $0x1328] sm:$0xff]  }
 0x2e3   :  { %9077 = vmatprep.mubr.bf16.mxu0 %v1478_v33  ;;  %19375 = vmatprep.subr.bf16.mxu1 %v20240_v12  ;;  %v20255_v12 = vld [vmem:[%s25581_s5 + $0x13a0] sm:$0xff]   ;;  %v20259_v33 = vld [vmem:[%s25581_s5 + $0x13a8] sm:$0xff]  }
 0x2e4   :  { %19397 = vmatprep.subr.bf16.mxu0 %v20241_v22  ;;  %v20256_v22 = vld [vmem:[%s25581_s5 + $0x1368] sm:$0xff]  }
 0x2e5   :  { %19376 = vmatpush3.bf16.msra.mxu1 %v20242_v3  ;;  %v468_v3 = vcombine.high %v97_v54, %v97_v54 }
 0x2e6   :  { %19398 = vmatpush3.bf16.msra.mxu0 %v20243_v46  ;;  %19377 = vmatprep.subr.bf16.mxu1 %v20244_v44  ;;  %v24433_v46 = vrot.slane %v73_v0, %v21741_v58  ;;  %v24439_v44 = vrot.slane %v1072_v48, %v21741_v58 }
 0x2e7   :  { %19399 = vmatprep.subr.bf16.mxu0 %v20245_v47  ;;  %v20260_v47 = vld [vmem:[%s25581_s5 + $0x1370] sm:$0xff]  }
 0x2e8   :  { %25700 = vst [vmem:[#allocation57_spill] sm:$0xff] %v24433_v46  ;;  %25701 = vst [vmem:[#allocation58_spill] sm:$0xff] %v24439_v44  ;;  %v24461_v0 = vcombine.high %v24433_v46, %v24433_v46  ;;  %v24465_v48 = vcombine.high %v24439_v44, %v24439_v44  ;;  %v1295_v26 = vmul.f32 %v24433_v46, %v21785_v16 }
 0x2e9   :  { %19378 = vmatpush3.bf16.msra.mxu1 %v20246_v29  ;;  %v24445_v29 = vrot.slane %v97_v54, %v21741_v58 }
 0x2ea   :  { %19400 = vmatpush3.bf16.msra.mxu0 %v20247_v8  ;;  %19379 = vmatprep.subr.bf16.mxu1 %v20248_v41  ;;  %v20261_v41 = vld [vmem:[%s25581_s5 + $0x13f0] sm:$0xff]   ;;  %25702 = vst [vmem:[#allocation59_spill] sm:$0xff] %v24461_v0  ;;  %25703 = vst [vmem:[#allocation60_spill] sm:$0xff] %v24465_v48 }
 0x2eb   :  { %19401 = vmatprep.subr.bf16.mxu0 %v20249_v20  ;;  %v24451_v20 = vrot.slane %v468_v3, %v21741_v58 }
 0x2ed   :  { %19380 = vmatpush3.bf16.msra.mxu1 %v20250_v35 }
 0x2ee   :  { %19402 = vmatpush3.bf16.msra.mxu0 %v20251_v23  ;;  %19381 = vmatprep.subr.bf16.mxu1 %v20252_v21  ;;  %v20262_v21 = vld [vmem:[%s25581_s5 + $0x1330] sm:$0xff]  }
 0x2ef   :  { %19403 = vmatprep.subr.bf16.mxu0 %v20253_v39  ;;  %v20263_v39 = vld [vmem:[%s25581_s5 + $0x13b0] sm:$0xff]  }
 0x2f1   :  { %19382 = vmatpush3.bf16.msra.mxu1 %v20254_v36 }
 0x2f2   :  { %19404 = vmatpush3.bf16.msra.mxu0 %v20255_v12  ;;  %19383 = vmatprep.subr.bf16.mxu1 %v20256_v22 }
 0x2f3   :  { %v19081_v8 = vpop.f32.mrb[48].mxu1  ;;  %19405 = vmatprep.subr.bf16.mxu0 %v20257_v52 }
 0x2f4   :  { %v19103_v35 = vpop.f32.mrb[52].mxu0  ;;  %v19082_v23 = vpop.f32.mrb[49].mxu1 }
 0x2f5   :  { %v19083_v36 = vadd.f32 %v19082_v23, %v19081_v8  ;;  %v19104_v54 = vpop.f32.mrb[53].mxu0  ;;  %v19084_v12 = vpop.f32.mrb[50].mxu1  ;;  %19384 = vmatpush3.bf16.msra.mxu1 %v20258_v50  ;;  %v20265_v8 = vld [vmem:[%s25581_s5 + $0x13f8] sm:$0xff]   ;;  %v1291_v50 = vmul.f32 %v24287_v45, %v21785_v16  ;;  %v483_v23 = vcombine.high %v24445_v29, %v24445_v29 }
 0x2f6   :  { %v19105_v22 = vadd.f32 %v19104_v54, %v19103_v35  ;;  %v19106_v52 = vpop.f32.mrb[54].mxu0  ;;  %19406 = vmatpush3.bf16.msra.mxu0 %v20259_v33  ;;  %v19085_v3 = vpop.f32.mrb[51].mxu1  ;;  %19385 = vmatprep.subr.bf16.mxu1 %v20260_v47  ;;  %v20266_v33 = vld [vmem:[%s25581_s5 + $0x1338] sm:$0xff]   ;;  %v1293_v47 = vmul.f32 %v24293_v56, %v21785_v16  ;;  %v484_v12 = vcombine.high %v24451_v20, %v24451_v20 }
 0x2f7   :  { %v8480_v35 = vadd.f32 %v19083_v36, %v24349_v61  ;;  %v19107_v54 = vpop.f32.mrb[55].mxu0  ;;  %19407 = vmatprep.subr.bf16.mxu0 %v20261_v41  ;;  %v20267_v52 = vld [vmem:[%s25581_s5 + $0x13b8] sm:$0xff]   ;;  %v687_v3 = vmul.f32 %v24302_v60, %v21763_v7  ;;  %v1296_v61 = vmul.f32 %v24461_v0, %v21785_v16  ;;  %v689_v36 = vmul.f32 %v24308_v62, %v21763_v7  ;;  %v20269_v60 = vld [vmem:[%s25581_s5 + $0x14c0] sm:$0xff]  }
 0x2f8   :  { %v20268_v54 = vld [vmem:[%s25581_s5 + $0x1440] sm:$0xff]   ;;  %v1298_v56 = vmul.f32 %v24465_v48, %v21785_v16 }
 0x2f9   :  { %v24492_v41 = vadd.f32 %v19105_v22, %v8480_v35  ;;  %19386 = vmatpush3.bf16.msra.mxu1 %v20262_v21  ;;  %v1383_v45 = vadd.f32 %v1291_v50, %v687_v3  ;;  %v692_v22 = vmul.f32 %v483_v23, %v21763_v7  ;;  %v1385_v21 = vadd.f32 %v1293_v47, %v689_v36  ;;  %v20270_v62 = vld [vmem:[%s25581_s5 + $0x1400] sm:$0xff]   ;;  %v20274_v50 = vld [vmem:[%s25581_s5 + $0x1448] sm:$0xff]   ;;  %v20279_v3 = vld [vmem:[%s25581_s5 + $0x14d0] sm:$0xff]  }
 0x2fa   :  { %19408 = vmatpush3.bf16.msra.mxu0 %v20263_v39  ;;  %19387 = vmatprep.subr.bf16.mxu1 %v20264_v24  ;;  %v694_v35 = vmul.f32 %v484_v12, %v21763_v7  ;;  %v20271_v24 = vld [vmem:[%s25581_s5 + $0x1480] sm:$0xff]   ;;  %v20275_v23 = vld [vmem:[%s25581_s5 + $0x14c8] sm:$0xff]   ;;  %v20282_v36 = vld [vmem:[%s25581_s5 + $0x1458] sm:$0xff]  }
 0x2fb   :  { %19409 = vmatprep.subr.bf16.mxu0 %v20265_v8  ;;  %v1388_v0 = vadd.f32 %v1296_v61, %v692_v22  ;;  %v1475_v8 = vpack.c.bf16 %v1383_v45, %v1383_v45  ;;  %v1477_v47 = vpack.c.bf16 %v1385_v21, %v1385_v21  ;;  %v20276_v12 = vld [vmem:[%s25581_s5 + $0x1408] sm:$0xff]   ;;  %v20281_v61 = vld [vmem:[%s25581_s5 + $0x1490] sm:$0xff]   ;;  %v20285_v22 = vld [vmem:[%s25581_s5 + $0x1498] sm:$0xff]  }
 0x2fc   :  { %v1390_v39 = vadd.f32 %v1298_v56, %v694_v35  ;;  %v20277_v56 = vld [vmem:[%s25581_s5 + $0x1488] sm:$0xff]   ;;  %v20286_v21 = vld [vmem:[%s25581_s5 + $0x1460] sm:$0xff]  }
 0x2fd   :  { %19388 = vmatpush3.bf16.msra.mxu1 %v20266_v33  ;;  %v1480_v33 = vpack.c.bf16 %v1388_v0, %v1388_v0  ;;  %v20280_v0 = vld [vmem:[%s25581_s5 + $0x1410] sm:$0xff]   ;;  %v74_v35 = vld [vmem:[%s25579_s3 + $0xa8] sm:$0xff] }
 0x2fe   :  { %19410 = vmatpush3.bf16.msra.mxu0 %v20267_v52  ;;  %19417 = vmatprep.subr.bf16.mxu1 %v20268_v54  ;;  %v1482_v45 = vpack.c.bf16 %v1390_v39, %v1390_v39  ;;  %v20278_v52 = vld [vmem:[%s25581_s5 + $0x1450] sm:$0xff]   ;;  %v20283_v54 = vld [vmem:[%s25581_s5 + $0x14d8] sm:$0xff]   ;;  %v20289_v39 = vld [vmem:[%s25581_s5 + $0x14a0] sm:$0xff]  }
 0x2ff   :  { %19439 = vmatprep.subr.bf16.mxu0 %v20269_v60  ;;  %v20284_v60 = vld [vmem:[%s25581_s5 + $0x1418] sm:$0xff]  }
 0x300   :  { %9038 = vmatmul.mubr.bf16.vlgmr.msra.gmra.mrb[76].mxu1 %v1475_v8  ;;  %v20290_v8 = vld [vmem:[%s25581_s5 + $0x1468] sm:$0xff]  }
 0x301   :  { %9078 = vmatmul.mubr.bf16.vlgmr.msra.gmra.mrb[80].mxu0 %v1477_v47  ;;  %19418 = vmatpush3.bf16.msra.mxu1 %v20270_v62  ;;  %v20287_v62 = vld [vmem:[%s25581_s5 + $0x14e0] sm:$0xff]   ;;  %v20291_v47 = vld [vmem:[%s25581_s5 + $0x14e8] sm:$0xff]  }
 0x302   :  { %9117 = vmatprep.mubr.bf16.mxu1 %v1480_v33  ;;  %19440 = vmatpush3.bf16.msra.mxu0 %v20271_v24  ;;  %v20288_v24 = vld [vmem:[%s25581_s5 + $0x1420] sm:$0xff]  }
 0x303   :  { %9157 = vmatprep.mubr.bf16.mxu0 %v1482_v45  ;;  %19419 = vmatprep.subr.bf16.mxu1 %v20274_v50  ;;  %v98_v50 = vld [vmem:[%s25578_s2 + $0xa8] sm:$0xff]  ;;  %v20294_v45 = vld [vmem:[%s25581_s5 + $0x1470] sm:$0xff]  }
 0x304   :  { %19441 = vmatprep.subr.bf16.mxu0 %v20275_v23  ;;  %v1089_v23 = vcombine.high %v74_v35, %v74_v35  ;;  %v485_v33 = vcombine.high %v98_v50, %v98_v50 }
 0x305   :  { %19420 = vmatpush3.bf16.msra.mxu1 %v20276_v12  ;;  %v20292_v12 = vld [vmem:[%s25581_s5 + $0x1428] sm:$0xff]  }
 0x306   :  { %19442 = vmatpush3.bf16.msra.mxu0 %v20277_v56  ;;  %19421 = vmatprep.subr.bf16.mxu1 %v20278_v52  ;;  %v20293_v56 = vld [vmem:[%s25581_s5 + $0x14a8] sm:$0xff]   ;;  %v24582_v52 = vrot.slane %v74_v35, %v21741_v58  ;;  %v20298_v35 = vld [vmem:[%s25581_s5 + $0x1478] sm:$0xff]  }
 0x307   :  { %19443 = vmatprep.subr.bf16.mxu0 %v20279_v3  ;;  %v20295_v3 = vld [vmem:[%s25581_s5 + $0x14f0] sm:$0xff]  }
 0x308   :  { %25704 = vst [vmem:[#allocation61_spill] sm:$0xff] %v24582_v52  ;;  %v1299_v46 = vmul.f32 %v24582_v52, %v21785_v16 }
 0x309   :  { %19422 = vmatpush3.bf16.msra.mxu1 %v20280_v0  ;;  %v24588_v0 = vrot.slane %v1089_v23, %v21741_v58  ;;  %v20299_v23 = vld [vmem:[%s25581_s5 + $0x14f8] sm:$0xff]  }
 0x30a   :  { %19444 = vmatpush3.bf16.msra.mxu0 %v20281_v61  ;;  %19423 = vmatprep.subr.bf16.mxu1 %v20282_v36  ;;  %v24591_v61 = vrot.slane %v98_v50, %v21741_v58 }
 0x30b   :  { %19445 = vmatprep.subr.bf16.mxu0 %v20283_v54  ;;  %25705 = vst [vmem:[#allocation62_spill] sm:$0xff] %v24588_v0  ;;  %v20296_v54 = vld [vmem:[%s25581_s5 + $0x1430] sm:$0xff]  }
 0x30d   :  { %19424 = vmatpush3.bf16.msra.mxu1 %v20284_v60  ;;  %v24597_v60 = vrot.slane %v485_v33, %v21741_v58 }
 0x30e   :  { %19446 = vmatpush3.bf16.msra.mxu0 %v20285_v22  ;;  %19425 = vmatprep.subr.bf16.mxu1 %v20286_v21 }
 0x30f   :  { %19447 = vmatprep.subr.bf16.mxu0 %v20287_v62  ;;  %v20297_v62 = vld [vmem:[%s25581_s5 + $0x14b0] sm:$0xff]  }
 0x311   :  { %19426 = vmatpush3.bf16.msra.mxu1 %v20288_v24  ;;  %v24607_v24 = vcombine.high %v24582_v52, %v24582_v52  ;;  %v20745_v52 = vld [vmem:[#allocation2 + $0x11b8] ss:$368 sps:$4 sm:$0xff]  }
 0x312   :  { %19448 = vmatpush3.bf16.msra.mxu0 %v20289_v39  ;;  %19427 = vmatprep.subr.bf16.mxu1 %v20290_v8 }
 0x313   :  { %v19125_v36 = vpop.f32.mrb[52].mxu1  ;;  %19449 = vmatprep.subr.bf16.mxu0 %v20291_v47  ;;  %25706 = vst [vmem:[#allocation63_spill] sm:$0xff] %v24607_v24  ;;  %v24614_v47 = vcombine.high %v24588_v0, %v24588_v0 }
 0x314   :  { %v19147_v22 = vpop.f32.mrb[56].mxu0  ;;  %v19126_v21 = vpop.f32.mrb[53].mxu1 }
 0x315   :  { %v19127_v39 = vadd.f32 %v19126_v21, %v19125_v36  ;;  %v19148_v50 = vpop.f32.mrb[57].mxu0  ;;  %v19128_v8 = vpop.f32.mrb[54].mxu1  ;;  %19428 = vmatpush3.bf16.msra.mxu1 %v20292_v12  ;;  %25707 = vst [vmem:[#allocation64_spill] sm:$0xff] %v24614_v47  ;;  %v500_v36 = vcombine.high %v24591_v61, %v24591_v61 }
 0x316   :  { %v19149_v33 = vadd.f32 %v19148_v50, %v19147_v22  ;;  %v19150_v48 = vpop.f32.mrb[58].mxu0  ;;  %19450 = vmatpush3.bf16.msra.mxu0 %v20293_v56  ;;  %v19129_v63 = vpop.f32.mrb[55].mxu1  ;;  %19429 = vmatprep.subr.bf16.mxu1 %v20294_v45  ;;  %v20300_v8 = vld [vmem:[%s25581_s5 + $0x1438] sm:$0xff]   ;;  %v691_v45 = vmul.f32 %v24445_v29, %v21763_v7  ;;  %v20303_v50 = vld [vmem:[%s25581_s5 + $0x15c0] sm:$0xff]   ;;  %v1302_v29 = vmul.f32 %v24614_v47, %v21785_v16 }
 0x317   :  { %v8560_v12 = vadd.f32 %v19127_v39, %v24492_v41  ;;  %v19151_v21 = vpop.f32.mrb[59].mxu0  ;;  %19451 = vmatprep.subr.bf16.mxu0 %v20295_v3  ;;  %v1297_v48 = vmul.f32 %v24439_v44, %v21785_v16  ;;  %v501_v63 = vcombine.high %v24597_v60, %v24597_v60  ;;  %v20301_v56 = vld [vmem:[%s25581_s5 + $0x14b8] sm:$0xff]   ;;  %v20302_v41 = vld [vmem:[%s25581_s5 + $0x1540] sm:$0xff]   ;;  %v1300_v3 = vmul.f32 %v24607_v24, %v21785_v16 }
 0x318   :  { %v693_v39 = vmul.f32 %v24451_v20, %v21763_v7  ;;  %v1387_v21 = vadd.f32 %v1295_v26, %v691_v45  ;;  %v696_v44 = vmul.f32 %v500_v36, %v21763_v7  ;;  %v20308_v26 = vld [vmem:[%s25581_s5 + $0x1548] sm:$0xff]   ;;  %v20315_v45 = vld [vmem:[%s25581_s5 + $0x1590] sm:$0xff]  }
 0x319   :  { %v24638_v22 = vadd.f32 %v19149_v33, %v8560_v12  ;;  %19430 = vmatpush3.bf16.msra.mxu1 %v20296_v54  ;;  %v20304_v54 = vld [vmem:[%s25581_s5 + $0x1500] sm:$0xff]   ;;  %v698_v20 = vmul.f32 %v501_v63, %v21763_v7 }
 0x31a   :  { %19452 = vmatpush3.bf16.msra.mxu0 %v20297_v62  ;;  %19431 = vmatprep.subr.bf16.mxu1 %v20298_v35  ;;  %v1389_v24 = vadd.f32 %v1297_v48, %v693_v39  ;;  %v1392_v33 = vadd.f32 %v1300_v3, %v696_v44  ;;  %v20305_v12 = vld [vmem:[%s25581_s5 + $0x1580] sm:$0xff]   ;;  %v1479_v62 = vpack.c.bf16 %v1387_v21, %v1387_v21  ;;  %v20309_v35 = vld [vmem:[%s25581_s5 + $0x15c8] sm:$0xff]   ;;  %v20312_v48 = vld [vmem:[%s25581_s5 + $0x1550] sm:$0xff]  }
 0x31b   :  { %19453 = vmatprep.subr.bf16.mxu0 %v20299_v23  ;;  %v1394_v47 = vadd.f32 %v1302_v29, %v698_v20  ;;  %v20310_v44 = vld [vmem:[%s25581_s5 + $0x1508] sm:$0xff]   ;;  %v20318_v3 = vld [vmem:[%s25581_s5 + $0x1518] sm:$0xff]   ;;  %v75_v29 = vld [vmem:[%s25579_s3 + $0xb0] sm:$0xff] }
 0x31c   :  { %v1481_v23 = vpack.c.bf16 %v1389_v24, %v1389_v24  ;;  %v1484_v36 = vpack.c.bf16 %v1392_v33, %v1392_v33  ;;  %v20313_v24 = vld [vmem:[%s25581_s5 + $0x15d0] sm:$0xff]   ;;  %v20319_v39 = vld [vmem:[%s25581_s5 + $0x1598] sm:$0xff]   ;;  %v20321_v21 = vld [vmem:[%s25581_s5 + $0x15e0] sm:$0xff]  }
 0x31d   :  { %19432 = vmatpush3.bf16.msra.mxu1 %v20300_v8  ;;  %v20311_v8 = vld [vmem:[%s25581_s5 + $0x1588] sm:$0xff]   ;;  %v1486_v63 = vpack.c.bf16 %v1394_v47, %v1394_v47  ;;  %v20316_v47 = vld [vmem:[%s25581_s5 + $0x1558] sm:$0xff]   ;;  %v20322_v20 = vld [vmem:[%s25581_s5 + $0x1520] sm:$0xff]  }
 0x31e   :  { %19454 = vmatpush3.bf16.msra.mxu0 %v20301_v56  ;;  %19461 = vmatprep.subr.bf16.mxu1 %v20302_v41  ;;  %v20314_v56 = vld [vmem:[%s25581_s5 + $0x1510] sm:$0xff]   ;;  %v20317_v41 = vld [vmem:[%s25581_s5 + $0x15d8] sm:$0xff]   ;;  %v20323_v33 = vld [vmem:[%s25581_s5 + $0x15a0] sm:$0xff]  }
 0x31f   :  { %19483 = vmatprep.subr.bf16.mxu0 %v20303_v50  ;;  %v20320_v50 = vld [vmem:[%s25581_s5 + $0x1560] sm:$0xff]  }
 0x320   :  { %9118 = vmatmul.mubr.bf16.vlgmr.msra.gmra.mrb[80].mxu1 %v1479_v62  ;;  %v1106_v62 = vcombine.high %v75_v29, %v75_v29 }
 0x321   :  { %9158 = vmatmul.mubr.bf16.vlgmr.msra.gmra.mrb[84].mxu0 %v1481_v23  ;;  %19462 = vmatpush3.bf16.msra.mxu1 %v20304_v54  ;;  %v99_v54 = vld [vmem:[%s25578_s2 + $0xb0] sm:$0xff] }
 0x322   :  { %9197 = vmatprep.mubr.bf16.mxu1 %v1484_v36  ;;  %19484 = vmatpush3.bf16.msra.mxu0 %v20305_v12  ;;  %v20324_v12 = vld [vmem:[%s25581_s5 + $0x1568] sm:$0xff]   ;;  %v502_v23 = vcombine.high %v99_v54, %v99_v54  ;;  %v20328_v36 = vld [vmem:[%s25581_s5 + $0x1570] sm:$0xff]  }
 0x323   :  { %9237 = vmatprep.mubr.bf16.mxu0 %v1486_v63  ;;  %19463 = vmatprep.subr.bf16.mxu1 %v20308_v26  ;;  %v20325_v26 = vld [vmem:[%s25581_s5 + $0x15e8] sm:$0xff]   ;;  %v24731_v63 = vrot.slane %v1106_v62, %v21741_v58 }
 0x324   :  { %19485 = vmatprep.subr.bf16.mxu0 %v20309_v35  ;;  %v20326_v35 = vld [vmem:[%s25581_s5 + $0x1528] sm:$0xff]  }
 0x325   :  { %19464 = vmatpush3.bf16.msra.mxu1 %v20310_v44  ;;  %v20327_v44 = vld [vmem:[%s25581_s5 + $0x15a8] sm:$0xff]   ;;  %25709 = vst [vmem:[#allocation66_spill] sm:$0xff] %v24731_v63 }
 0x326   :  { %19486 = vmatpush3.bf16.msra.mxu0 %v20311_v8  ;;  %19465 = vmatprep.subr.bf16.mxu1 %v20312_v48  ;;  %v24725_v8 = vrot.slane %v75_v29, %v21741_v58  ;;  %v20329_v48 = vld [vmem:[%s25581_s5 + $0x15f0] sm:$0xff]  }
 0x327   :  { %19487 = vmatprep.subr.bf16.mxu0 %v20313_v24  ;;  %v24734_v24 = vrot.slane %v99_v54, %v21741_v58 }
 0x328   :  { %25708 = vst [vmem:[#allocation65_spill] sm:$0xff] %v24725_v8  ;;  %v24750_v29 = vcombine.high %v24725_v8, %v24725_v8 }
 0x329   :  { %19466 = vmatpush3.bf16.msra.mxu1 %v20314_v56 }
 0x32a   :  { %19488 = vmatpush3.bf16.msra.mxu0 %v20315_v45  ;;  %19467 = vmatprep.subr.bf16.mxu1 %v20316_v47  ;;  %v20330_v45 = vld [vmem:[%s25581_s5 + $0x1530] sm:$0xff]   ;;  %v24740_v47 = vrot.slane %v502_v23, %v21741_v58  ;;  %25710 = vst [vmem:[#allocation67_spill] sm:$0xff] %v24750_v29 }
 0x32b   :  { %19489 = vmatprep.subr.bf16.mxu0 %v20317_v41 }
 0x32d   :  { %19468 = vmatpush3.bf16.msra.mxu1 %v20318_v3 }
 0x32e   :  { %19490 = vmatpush3.bf16.msra.mxu0 %v20319_v39  ;;  %19469 = vmatprep.subr.bf16.mxu1 %v20320_v50  ;;  %v20331_v39 = vld [vmem:[%s25581_s5 + $0x15b0] sm:$0xff]   ;;  %v20332_v50 = vld [vmem:[%s25581_s5 + $0x1578] sm:$0xff]  }
 0x32f   :  { %19491 = vmatprep.subr.bf16.mxu0 %v20321_v21 }
 0x331   :  { %19470 = vmatpush3.bf16.msra.mxu1 %v20322_v20 }
 0x332   :  { %19492 = vmatpush3.bf16.msra.mxu0 %v20323_v33  ;;  %19471 = vmatprep.subr.bf16.mxu1 %v20324_v12  ;;  %v20333_v33 = vld [vmem:[%s25581_s5 + $0x15f8] sm:$0xff]   ;;  %v24757_v12 = vcombine.high %v24731_v63, %v24731_v63 }
 0x333   :  { %v19169_v56 = vpop.f32.mrb[56].mxu1  ;;  %19493 = vmatprep.subr.bf16.mxu0 %v20325_v26 }
 0x334   :  { %v19191_v41 = vpop.f32.mrb[60].mxu0  ;;  %v19170_v3 = vpop.f32.mrb[57].mxu1  ;;  %25711 = vst [vmem:[#allocation68_spill] sm:$0xff] %v24757_v12 }
 0x335   :  { %v19171_v21 = vadd.f32 %v19170_v3, %v19169_v56  ;;  %v19192_v54 = vpop.f32.mrb[61].mxu0  ;;  %v19172_v20 = vpop.f32.mrb[58].mxu1  ;;  %19472 = vmatpush3.bf16.msra.mxu1 %v20326_v35  ;;  %v517_v56 = vcombine.high %v24734_v24, %v24734_v24 }
 0x336   :  { %v19193_v26 = vadd.f32 %v19192_v54, %v19191_v41  ;;  %v19194_v62 = vpop.f32.mrb[62].mxu0  ;;  %19494 = vmatpush3.bf16.msra.mxu0 %v20327_v44  ;;  %v19173_v23 = vpop.f32.mrb[59].mxu1  ;;  %19473 = vmatprep.subr.bf16.mxu1 %v20328_v36  ;;  %v20334_v20 = vld [vmem:[%s25581_s5 + $0x1538] sm:$0xff]   ;;  %v1301_v41 = vmul.f32 %v24588_v0, %v21785_v16  ;;  %v518_v44 = vcombine.high %v24740_v47, %v24740_v47 }
 0x337   :  { %v8640_v35 = vadd.f32 %v19171_v21, %v24638_v22  ;;  %v19195_v3 = vpop.f32.mrb[63].mxu0  ;;  %19495 = vmatprep.subr.bf16.mxu0 %v20329_v48  ;;  %v20335_v36 = vld [vmem:[%s25581_s5 + $0x15b8] sm:$0xff]   ;;  %v695_v54 = vmul.f32 %v24591_v61, %v21763_v7  ;;  %v20336_v22 = vld [vmem:[%s25581_s5 + $0x1640] sm:$0xff]   ;;  %v1304_v48 = vmul.f32 %v24750_v29, %v21785_v16  ;;  %v697_v62 = vmul.f32 %v24597_v60, %v21763_v7 }
 0x338   :  { %v20337_v23 = vld [vmem:[%s25581_s5 + $0x16c0] sm:$0xff]   ;;  %v1306_v61 = vmul.f32 %v24757_v12, %v21785_v16  ;;  %v700_v0 = vmul.f32 %v517_v56, %v21763_v7  ;;  %v702_v60 = vmul.f32 %v518_v44, %v21763_v7 }
 0x339   :  { %v24781_v21 = vadd.f32 %v19193_v26, %v8640_v35  ;;  %19474 = vmatpush3.bf16.msra.mxu1 %v20330_v45  ;;  %v1391_v3 = vadd.f32 %v1299_v46, %v695_v54  ;;  %v1393_v29 = vadd.f32 %v1301_v41, %v697_v62  ;;  %v20338_v45 = vld [vmem:[%s25581_s5 + $0x1600] sm:$0xff]   ;;  %v20342_v46 = vld [vmem:[%s25581_s5 + $0x1648] sm:$0xff]   ;;  %v20346_v41 = vld [vmem:[%s25581_s5 + $0x1650] sm:$0xff]  }
 0x33a   :  { %19496 = vmatpush3.bf16.msra.mxu0 %v20331_v39  ;;  %19475 = vmatprep.subr.bf16.mxu1 %v20332_v50  ;;  %v1396_v26 = vadd.f32 %v1304_v48, %v700_v0  ;;  %v20339_v35 = vld [vmem:[%s25581_s5 + $0x1680] sm:$0xff]   ;;  %v1398_v12 = vadd.f32 %v1306_v61, %v702_v60  ;;  %v20343_v50 = vld [vmem:[%s25581_s5 + $0x16c8] sm:$0xff]   ;;  %v20349_v54 = vld [vmem:[%s25581_s5 + $0x1690] sm:$0xff]  }
 0x33b   :  { %19497 = vmatprep.subr.bf16.mxu0 %v20333_v33  ;;  %v1483_v39 = vpack.c.bf16 %v1391_v3, %v1391_v3  ;;  %v1485_v33 = vpack.c.bf16 %v1393_v29, %v1393_v29  ;;  %v20344_v0 = vld [vmem:[%s25581_s5 + $0x1608] sm:$0xff]   ;;  %v20347_v29 = vld [vmem:[%s25581_s5 + $0x16d0] sm:$0xff]   ;;  %v20352_v48 = vld [vmem:[%s25581_s5 + $0x1618] sm:$0xff]  }
 0x33c   :  { %v1488_v56 = vpack.c.bf16 %v1396_v26, %v1396_v26  ;;  %v1490_v44 = vpack.c.bf16 %v1398_v12, %v1398_v12  ;;  %v20350_v12 = vld [vmem:[%s25581_s5 + $0x1658] sm:$0xff]   ;;  %v20355_v61 = vld [vmem:[%s25581_s5 + $0x16e0] sm:$0xff]   ;;  %v20358_v60 = vld [vmem:[%s25581_s5 + $0x1668] sm:$0xff]  }
 0x33d   :  { %19476 = vmatpush3.bf16.msra.mxu1 %v20334_v20  ;;  %v20345_v20 = vld [vmem:[%s25581_s5 + $0x1688] sm:$0xff]   ;;  %v20353_v62 = vld [vmem:[%s25581_s5 + $0x1698] sm:$0xff]   ;;  %v20356_v3 = vld [vmem:[%s25581_s5 + $0x1620] sm:$0xff]  }
 0x33e   :  { %19498 = vmatpush3.bf16.msra.mxu0 %v20335_v36  ;;  %19505 = vmatprep.subr.bf16.mxu1 %v20336_v22  ;;  %v20348_v36 = vld [vmem:[%s25581_s5 + $0x1610] sm:$0xff]   ;;  %v20351_v22 = vld [vmem:[%s25581_s5 + $0x16d8] sm:$0xff]   ;;  %v20359_v26 = vld [vmem:[%s25581_s5 + $0x16e8] sm:$0xff]  }
 0x33f   :  { %19527 = vmatprep.subr.bf16.mxu0 %v20337_v23  ;;  %v20354_v23 = vld [vmem:[%s25581_s5 + $0x1660] sm:$0xff]  }
 0x340   :  { %9198 = vmatmul.mubr.bf16.vlgmr.msra.gmra.mrb[84].mxu1 %v1483_v39  ;;  %v20362_v39 = vld [vmem:[%s25581_s5 + $0x1670] sm:$0xff]  }
 0x341   :  { %9238 = vmatmul.mubr.bf16.vlgmr.msra.gmra.mrb[88].mxu0 %v1485_v33  ;;  %19506 = vmatpush3.bf16.msra.mxu1 %v20338_v45  ;;  %v20357_v45 = vld [vmem:[%s25581_s5 + $0x16a0] sm:$0xff]  }
 0x342   :  { %9277 = vmatprep.mubr.bf16.mxu1 %v1488_v56  ;;  %19528 = vmatpush3.bf16.msra.mxu0 %v20339_v35  ;;  %v20360_v35 = vld [vmem:[%s25581_s5 + $0x1628] sm:$0xff]  }
 0x343   :  { %9317 = vmatprep.mubr.bf16.mxu0 %v1490_v44  ;;  %19507 = vmatprep.subr.bf16.mxu1 %v20342_v46  ;;  %v20361_v46 = vld [vmem:[%s25581_s5 + $0x16a8] sm:$0xff]   ;;  %v20366_v44 = vld [vmem:[%s25581_s5 + $0x1678] sm:$0xff]  }
 0x344   :  { %19529 = vmatprep.subr.bf16.mxu0 %v20343_v50  ;;  %v20363_v50 = vld [vmem:[%s25581_s5 + $0x16f0] sm:$0xff]  }
 0x345   :  { %19508 = vmatpush3.bf16.msra.mxu1 %v20344_v0  ;;  %v20364_v0 = vld [vmem:[%s25581_s5 + $0x1630] sm:$0xff]  }
 0x346   :  { %19530 = vmatpush3.bf16.msra.mxu0 %v20345_v20  ;;  %19509 = vmatprep.subr.bf16.mxu1 %v20346_v41  ;;  %v20365_v41 = vld [vmem:[%s25581_s5 + $0x16b0] sm:$0xff]  }
 0x347   :  { %19531 = vmatprep.subr.bf16.mxu0 %v20347_v29 }
 0x349   :  { %19510 = vmatpush3.bf16.msra.mxu1 %v20348_v36 }
 0x34a   :  { %19532 = vmatpush3.bf16.msra.mxu0 %v20349_v54  ;;  %19511 = vmatprep.subr.bf16.mxu1 %v20350_v12  ;;  %v20367_v12 = vld [vmem:[%s25581_s5 + $0x16f8] sm:$0xff]  }
 0x34b   :  { %19533 = vmatprep.subr.bf16.mxu0 %v20351_v22 }
 0x34d   :  { %19512 = vmatpush3.bf16.msra.mxu1 %v20352_v48 }
 0x34e   :  { %19534 = vmatpush3.bf16.msra.mxu0 %v20353_v62  ;;  %19513 = vmatprep.subr.bf16.mxu1 %v20354_v23  ;;  %v1303_v23 = vmul.f32 %v24725_v8, %v21785_v16 }
 0x34f   :  { %19535 = vmatprep.subr.bf16.mxu0 %v20355_v61 }
 0x351   :  { %19514 = vmatpush3.bf16.msra.mxu1 %v20356_v3 }
 0x352   :  { %19536 = vmatpush3.bf16.msra.mxu0 %v20357_v45  ;;  %19515 = vmatprep.subr.bf16.mxu1 %v20358_v60  ;;  %v20368_v45 = vld [vmem:[%s25581_s5 + $0x1638] sm:$0xff]   ;;  %v1305_v60 = vmul.f32 %v24731_v63, %v21785_v16 }
 0x353   :  { %v19213_v33 = vpop.f32.mrb[60].mxu1  ;;  %19537 = vmatprep.subr.bf16.mxu0 %v20359_v26  ;;  %v20369_v26 = vld [vmem:[%s25581_s5 + $0x16b8] sm:$0xff]  }
 0x354   :  { %v19235_v56 = vpop.f32.mrb[64].mxu0  ;;  %v19214_v20 = vpop.f32.mrb[61].mxu1 }
 0x355   :  { %v19215_v29 = vadd.f32 %v19214_v20, %v19213_v33  ;;  %v19236_v36 = vpop.f32.mrb[65].mxu0  ;;  %v19216_v54 = vpop.f32.mrb[62].mxu1  ;;  %19516 = vmatpush3.bf16.msra.mxu1 %v20360_v35  ;;  %v699_v35 = vmul.f32 %v24734_v24, %v21763_v7 }
 0x356   :  { %v19237_v22 = vadd.f32 %v19236_v36, %v19235_v56  ;;  %v19238_v48 = vpop.f32.mrb[66].mxu0  ;;  %19538 = vmatpush3.bf16.msra.mxu0 %v20361_v46  ;;  %v19217_v62 = vpop.f32.mrb[63].mxu1  ;;  %19517 = vmatprep.subr.bf16.mxu1 %v20362_v39  ;;  %v25712_v56 = vmov 0  }
 0x357   :  { %v8720_v61 = vadd.f32 %v19215_v29, %v24781_v21  ;;  %v19239_v3 = vpop.f32.mrb[67].mxu0  ;;  %19539 = vmatprep.subr.bf16.mxu0 %v20363_v50  ;;  %v701_v21 = vmul.f32 %v24740_v47, %v21763_v7  ;;  %v1395_v39 = vadd.f32 %v1303_v23, %v699_v35 }
 0x359   :  { %v8760_v46 = vadd.f32 %v19237_v22, %v8720_v61  ;;  %19518 = vmatpush3.bf16.msra.mxu1 %v20364_v0  ;;  %v1397_v50 = vadd.f32 %v1305_v60, %v701_v21  ;;  %v1487_v16 = vpack.c.bf16 %v1395_v39, %v1395_v39 }
 0x35a   :  { %19540 = vmatpush3.bf16.msra.mxu0 %v20365_v41  ;;  %19519 = vmatprep.subr.bf16.mxu1 %v20366_v44 }
 0x35b   :  { %19541 = vmatprep.subr.bf16.mxu0 %v20367_v12  ;;  %v1489_v33 = vpack.c.bf16 %v1397_v50, %v1397_v50 }
 0x35d   :  { %19520 = vmatpush3.bf16.msra.mxu1 %v20368_v45 }
 0x35e   :  { %19542 = vmatpush3.bf16.msra.mxu0 %v20369_v26 }
 0x360   :  { %9278 = vmatmul.mubr.bf16.vlgmr.msra.gmra.mrb[88].mxu1 %v1487_v16  ;;  %v20370_v16 = vld [vmem:[#allocation2] ss:$368 sps:$4 sm:$0xff]  }
 0x361   :  { %9318 = vmatmul.mubr.bf16.vlgmr.msra.gmra.mrb[92].mxu0 %v1489_v33  ;;  %14267 = vmatprep.mubr.bf16.mxu1 %v25712_v56  ;;  %v20372_v33 = vld [vmem:[#allocation2 + $0x4] ss:$368 sps:$4 sm:$0xff]  }
 0x362   :  { %14308 = vmatprep.mubr.bf16.mxu0 %v25712_v56  ;;  %14235 = vmatprep.subr.bf16.mxu1 %v20372_v33 }
 0x363   :  { %14236 = vmatpush1.bf16.msra.mxu1 %v20370_v16 }
 0x373   :  { %v19257_v24 = vpop.f32.mrb[64].mxu1 }
 0x374   :  { %v19279_v0 = vpop.f32.mrb[68].mxu0  ;;  %v19258_v20 = vpop.f32.mrb[65].mxu1 }
 0x375   :  { %v19259_v29 = vadd.f32 %v19258_v20, %v19257_v24  ;;  %v19280_v7 = vpop.f32.mrb[69].mxu0  ;;  %v19260_v47 = vpop.f32.mrb[66].mxu1  ;;  %v20373_v24 = vld [vmem:[#allocation2 + $0x8] ss:$368 sps:$4 sm:$0xff]   ;;  %v20378_v20 = vld [vmem:[#allocation2 + $0x2e4] ss:$368 sps:$4 sm:$0xff]  }
 0x376   :  { %v19281_v41 = vadd.f32 %v19280_v7, %v19279_v0  ;;  %v19282_v44 = vpop.f32.mrb[70].mxu0  ;;  %v19261_v36 = vpop.f32.mrb[67].mxu1  ;;  %v20375_v0 = vld [vmem:[#allocation2 + $0xc] ss:$368 sps:$4 sm:$0xff]   ;;  %14237 = vmatprep.subr.bf16.mxu1 %v20378_v20  ;;  %v20379_v7 = vld [vmem:[#allocation2 + $0x2e8] ss:$368 sps:$4 sm:$0xff]  }
 0x377   :  { %v8800_v54 = vadd.f32 %v19259_v29, %v8760_v46  ;;  %v19283_v12 = vpop.f32.mrb[71].mxu0  ;;  %v20381_v46 = vld [vmem:[#allocation2 + $0x2ec] ss:$368 sps:$4 sm:$0xff]   ;;  %14276 = vmatprep.subr.bf16.mxu0 %v20375_v0  ;;  %v20376_v29 = vld [vmem:[#allocation2 + $0x2e0] ss:$368 sps:$4 sm:$0xff]  }
 0x378   :  { %14277 = vmatpush1.bf16.msra.mxu0 %v20373_v24  ;;  %v20384_v47 = vld [vmem:[#allocation2 + $0x5c4] ss:$368 sps:$4 sm:$0xff]   ;;  %v20387_v44 = vld [vmem:[#allocation2 + $0x5cc] ss:$368 sps:$4 sm:$0xff]   ;;  %v20385_v36 = vld [vmem:[#allocation2 + $0x5c8] ss:$368 sps:$4 sm:$0xff]   ;;  %14238 = vmatpush1.bf16.msra.mxu1 %v20376_v29 }
 0x379   :  { %v8840_v22 = vadd.f32 %v19281_v41, %v8800_v54  ;;  %14278 = vmatprep.subr.bf16.mxu0 %v20381_v46  ;;  %v20382_v41 = vld [vmem:[#allocation2 + $0x5c0] ss:$368 sps:$4 sm:$0xff]   ;;  %v20390_v54 = vld [vmem:[#allocation2 + $0x8a4] ss:$368 sps:$4 sm:$0xff]   ;;  %v20393_v12 = vld [vmem:[#allocation2 + $0x8ac] ss:$368 sps:$4 sm:$0xff]   ;;  %14239 = vmatprep.subr.bf16.mxu1 %v20384_v47 }
 0x37a   :  { %v20400_v29 = vld [vmem:[#allocation2 + $0xe60] ss:$368 sps:$4 sm:$0xff]   ;;  %v20403_v47 = vld [vmem:[#allocation2 + $0xe68] ss:$368 sps:$4 sm:$0xff]  }
 0x37c   :  { %14279 = vmatpush1.bf16.msra.mxu0 %v20379_v7  ;;  %14240 = vmatpush1.bf16.msra.mxu1 %v20382_v41  ;;  %v20402_v7 = vld [vmem:[#allocation2 + $0xe64] ss:$368 sps:$4 sm:$0xff]   ;;  %v20405_v41 = vld [vmem:[#allocation2 + $0xe6c] ss:$368 sps:$4 sm:$0xff]  }
 0x37d   :  { %14280 = vmatprep.subr.bf16.mxu0 %v20387_v44  ;;  %14241 = vmatprep.subr.bf16.mxu1 %v20390_v54  ;;  %v20408_v44 = vld [vmem:[#allocation2 + $0x1144] ss:$368 sps:$4 sm:$0xff]   ;;  %v20406_v54 = vld [vmem:[#allocation2 + $0x1140] ss:$368 sps:$4 sm:$0xff]  }
 0x380   :  { %14281 = vmatpush1.bf16.msra.mxu0 %v20385_v36  ;;  %v20411_v36 = vld [vmem:[#allocation2 + $0x114c] ss:$368 sps:$4 sm:$0xff]  }
 0x381   :  { %14282 = vmatprep.subr.bf16.mxu0 %v20393_v12  ;;  %v20409_v12 = vld [vmem:[#allocation2 + $0x1148] ss:$368 sps:$4 sm:$0xff]  }
 0x393   :  { %v19301_v48 = vpop.f32.mrb[68].mxu1 }
 0x394   :  { %v19323_v62 = vpop.f32.mrb[72].mxu0  ;;  %v19302_v23 = vpop.f32.mrb[69].mxu1 }
 0x395   :  { %v19303_v61 = vadd.f32 %v19302_v23, %v19301_v48  ;;  %v19324_v3 = vpop.f32.mrb[73].mxu0  ;;  %v19304_v45 = vpop.f32.mrb[70].mxu1  ;;  %v20391_v48 = vld [vmem:[#allocation2 + $0x8a8] ss:$368 sps:$4 sm:$0xff]   ;;  %v20399_v23 = vld [vmem:[#allocation2 + $0xb8c] ss:$368 sps:$4 sm:$0xff]  }
 0x396   :  { %v19325_v60 = vadd.f32 %v19324_v3, %v19323_v62  ;;  %v19326_v26 = vpop.f32.mrb[74].mxu0  ;;  %v19305_v35 = vpop.f32.mrb[71].mxu1  ;;  %v20396_v62 = vld [vmem:[#allocation2 + $0xb84] ss:$368 sps:$4 sm:$0xff]   ;;  %v20397_v3 = vld [vmem:[#allocation2 + $0xb88] ss:$368 sps:$4 sm:$0xff]   ;;  %14283 = vmatpush1.bf16.msra.mxu0 %v20391_v48 }
 0x397   :  { %v8880_v21 = vadd.f32 %v19303_v61, %v8840_v22  ;;  %v19327_v39 = vpop.f32.mrb[75].mxu0  ;;  %v20388_v22 = vld [vmem:[#allocation2 + $0x8a0] ss:$368 sps:$4 sm:$0xff]   ;;  %14284 = vmatprep.subr.bf16.mxu0 %v20399_v23  ;;  %v20417_v48 = vld [vmem:[#allocation2 + $0x142c] ss:$368 sps:$4 sm:$0xff]  }
 0x398   :  { %v20394_v61 = vld [vmem:[#allocation2 + $0xb80] ss:$368 sps:$4 sm:$0xff]   ;;  %14242 = vmatpush1.bf16.msra.mxu1 %v20388_v22  ;;  %v20414_v22 = vld [vmem:[#allocation2 + $0x1424] ss:$368 sps:$4 sm:$0xff]  }
 0x399   :  { %v8920_v50 = vadd.f32 %v19325_v60, %v8880_v21  ;;  %14243 = vmatprep.subr.bf16.mxu1 %v20396_v62  ;;  %v20415_v62 = vld [vmem:[#allocation2 + $0x1428] ss:$368 sps:$4 sm:$0xff]   ;;  %v20420_v23 = vld [vmem:[#allocation2 + $0x14] ss:$368 sps:$4 sm:$0xff]  }
 0x39a   :  { %14285 = vmatpush1.bf16.msra.mxu0 %v20397_v3 }
 0x39b   :  { %14286 = vmatprep.subr.bf16.mxu0 %v20405_v41 }
 0x39c   :  { %14244 = vmatpush1.bf16.msra.mxu1 %v20394_v61  ;;  %v20423_v61 = vld [vmem:[#allocation2 + $0x1c] ss:$368 sps:$4 sm:$0xff]  }
 0x39d   :  { %14245 = vmatprep.subr.bf16.mxu1 %v20402_v7 }
 0x39e   :  { %14287 = vmatpush1.bf16.msra.mxu0 %v20403_v47 }
 0x39f   :  { %14288 = vmatprep.subr.bf16.mxu0 %v20411_v36 }
 0x3a0   :  { %14246 = vmatpush1.bf16.msra.mxu1 %v20400_v29 }
 0x3a1   :  { %14247 = vmatprep.subr.bf16.mxu1 %v20408_v44 }
 0x3a2   :  { %14289 = vmatpush1.bf16.msra.mxu0 %v20409_v12 }
 0x3a3   :  { %14290 = vmatprep.subr.bf16.mxu0 %v20417_v48 }
 0x3a4   :  { %14248 = vmatpush1.bf16.msra.mxu1 %v20406_v54 }
 0x3a5   :  { %14249 = vmatprep.subr.bf16.mxu1 %v20414_v22 }
 0x3a6   :  { %14291 = vmatpush1.bf16.msra.mxu0 %v20415_v62 }
 0x3a7   :  { %14358 = vmatprep.subr.bf16.mxu0 %v20423_v61 }
 0x3b3   :  { %v19345_v45 = vpop.f32.mrb[72].mxu1 }
 0x3b4   :  { %v19367_v60 = vpop.f32.mrb[76].mxu0  ;;  %v19346_v26 = vpop.f32.mrb[73].mxu1 }
 0x3b5   :  { %v19347_v35 = vadd.f32 %v19346_v26, %v19345_v45  ;;  %v19368_v21 = vpop.f32.mrb[77].mxu0  ;;  %v19348_v39 = vpop.f32.mrb[74].mxu1 }
 0x3b6   :  { %v19369_v16 = vadd.f32 %v19368_v21, %v19367_v60  ;;  %v19370_v33 = vpop.f32.mrb[78].mxu0  ;;  %v19349_v24 = vpop.f32.mrb[75].mxu1 }
 0x3b7   :  { %v8960_v0 = vadd.f32 %v19347_v35, %v8920_v50  ;;  %v19371_v20 = vpop.f32.mrb[79].mxu0  ;;  %v20412_v50 = vld [vmem:[#allocation2 + $0x1420] ss:$368 sps:$4 sm:$0xff]  }
 0x3b8   :  { %14250 = vmatpush1.bf16.msra.mxu1 %v20412_v50 }
 0x3b9   :  { %v9000_v46 = vadd.f32 %v19369_v16, %v8960_v0  ;;  %14317 = vmatprep.subr.bf16.mxu1 %v20420_v23 }
 0x3d3   :  { %v19389_v3 = vpop.f32.mrb[76].mxu1 }
 0x3d4   :  { %v19411_v45 = vpop.f32.mrb[80].mxu0  ;;  %v19390_v60 = vpop.f32.mrb[77].mxu1 }
 0x3d5   :  { %v19391_v26 = vadd.f32 %v19390_v60, %v19389_v3  ;;  %v19412_v35 = vpop.f32.mrb[81].mxu0  ;;  %v19392_v21 = vpop.f32.mrb[78].mxu1 }
 0x3d6   :  { %v19413_v39 = vadd.f32 %v19412_v35, %v19411_v45  ;;  %v19414_v16 = vpop.f32.mrb[82].mxu0  ;;  %v19393_v33 = vpop.f32.mrb[79].mxu1 }
 0x3d7   :  { %v9040_v24 = vadd.f32 %v19391_v26, %v9000_v46  ;;  %v19415_v0 = vpop.f32.mrb[83].mxu0 }
 0x3d9   :  { %v9080_v20 = vadd.f32 %v19413_v39, %v9040_v24 }
 0x3f3   :  { %v19433_v29 = vpop.f32.mrb[80].mxu1 }
 0x3f4   :  { %v19455_v7 = vpop.f32.mrb[84].mxu0  ;;  %v19434_v47 = vpop.f32.mrb[81].mxu1 }
 0x3f5   :  { %v19435_v41 = vadd.f32 %v19434_v47, %v19433_v29  ;;  %v19456_v44 = vpop.f32.mrb[85].mxu0  ;;  %v19436_v36 = vpop.f32.mrb[82].mxu1 }
 0x3f6   :  { %v19457_v54 = vadd.f32 %v19456_v44, %v19455_v7  ;;  %v19458_v12 = vpop.f32.mrb[86].mxu0  ;;  %v19437_v22 = vpop.f32.mrb[83].mxu1 }
 0x3f7   :  { %v9120_v48 = vadd.f32 %v19435_v41, %v9080_v20  ;;  %v19459_v50 = vpop.f32.mrb[87].mxu0  ;;  %v17791_v12 = vld [vmem:[%s25583_s7] ss:$0 sm:$0xff] }
 0x3f9   :  { %v9160_v62 = vadd.f32 %v19457_v54, %v9120_v48 }
 0x413   :  { %v19477_v23 = vpop.f32.mrb[84].mxu1 }
 0x414   :  { %v19499_v61 = vpop.f32.mrb[88].mxu0  ;;  %v19478_v3 = vpop.f32.mrb[85].mxu1 }
 0x415   :  { %v19479_v45 = vadd.f32 %v19478_v3, %v19477_v23  ;;  %v19500_v60 = vpop.f32.mrb[89].mxu0  ;;  %v19480_v46 = vpop.f32.mrb[86].mxu1  ;;  %v20418_v23 = vld [vmem:[#allocation2 + $0x10] ss:$368 sps:$4 sm:$0xff]  }
 0x416   :  { %v19501_v26 = vadd.f32 %v19500_v60, %v19499_v61  ;;  %v19502_v35 = vpop.f32.mrb[90].mxu0  ;;  %v19481_v21 = vpop.f32.mrb[87].mxu1  ;;  %v20421_v61 = vld [vmem:[#allocation2 + $0x18] ss:$368 sps:$4 sm:$0xff]   ;;  %v20429_v60 = vld [vmem:[#allocation2 + $0x2fc] ss:$368 sps:$4 sm:$0xff]  }
 0x417   :  { %v9200_v39 = vadd.f32 %v19479_v45, %v9160_v62  ;;  %v19503_v16 = vpop.f32.mrb[91].mxu0  ;;  %v20426_v45 = vld [vmem:[#allocation2 + $0x2f4] ss:$368 sps:$4 sm:$0xff]   ;;  %v20424_v46 = vld [vmem:[#allocation2 + $0x2f0] ss:$368 sps:$4 sm:$0xff]  }
 0x418   :  { %v20432_v35 = vld [vmem:[#allocation2 + $0x5d4] ss:$368 sps:$4 sm:$0xff]   ;;  %v20435_v21 = vld [vmem:[#allocation2 + $0x5dc] ss:$368 sps:$4 sm:$0xff]   ;;  %v20433_v16 = vld [vmem:[#allocation2 + $0x5d8] ss:$368 sps:$4 sm:$0xff]  }
 0x419   :  { %v9240_v33 = vadd.f32 %v19501_v26, %v9200_v39  ;;  %v20427_v26 = vld [vmem:[#allocation2 + $0x2f8] ss:$368 sps:$4 sm:$0xff]   ;;  %v20430_v39 = vld [vmem:[#allocation2 + $0x5d0] ss:$368 sps:$4 sm:$0xff]  }
 0x433   :  { %v19521_v24 = vpop.f32.mrb[88].mxu1 }
 0x434   :  { %v19543_v0 = vpop.f32.mrb[92].mxu0  ;;  %v19522_v29 = vpop.f32.mrb[89].mxu1 }
 0x435   :  { %v19523_v7 = vadd.f32 %v19522_v29, %v19521_v24  ;;  %v19544_v47 = vpop.f32.mrb[93].mxu0  ;;  %v19524_v20 = vpop.f32.mrb[90].mxu1  ;;  %v20441_v24 = vld [vmem:[#allocation2 + $0x8bc] ss:$368 sps:$4 sm:$0xff]   ;;  %v20439_v29 = vld [vmem:[#allocation2 + $0x8b8] ss:$368 sps:$4 sm:$0xff]  }
 0x436   :  { %v19545_v41 = vadd.f32 %v19544_v47, %v19543_v0  ;;  %v19546_v44 = vpop.f32.mrb[94].mxu0  ;;  %v19525_v36 = vpop.f32.mrb[91].mxu1  ;;  %v20436_v0 = vld [vmem:[#allocation2 + $0x8b0] ss:$368 sps:$4 sm:$0xff]   ;;  %v20447_v47 = vld [vmem:[#allocation2 + $0xb9c] ss:$368 sps:$4 sm:$0xff]  }
 0x437   :  { %v9280_v54 = vadd.f32 %v19523_v7, %v9240_v33  ;;  %v19547_v22 = vpop.f32.mrb[95].mxu0  ;;  %v20438_v33 = vld [vmem:[#allocation2 + $0x8b4] ss:$368 sps:$4 sm:$0xff]   ;;  %v20442_v20 = vld [vmem:[#allocation2 + $0xb90] ss:$368 sps:$4 sm:$0xff]  }
 0x438   :  { %v20444_v7 = vld [vmem:[#allocation2 + $0xb94] ss:$368 sps:$4 sm:$0xff]   ;;  %v20453_v36 = vld [vmem:[#allocation2 + $0xe7c] ss:$368 sps:$4 sm:$0xff]  }
 0x439   :  { %v9320_v48 = vadd.f32 %v19545_v41, %v9280_v54  ;;  %v20445_v41 = vld [vmem:[#allocation2 + $0xb98] ss:$368 sps:$4 sm:$0xff]   ;;  %v20450_v44 = vld [vmem:[#allocation2 + $0xe74] ss:$368 sps:$4 sm:$0xff]   ;;  %v20448_v54 = vld [vmem:[#allocation2 + $0xe70] ss:$368 sps:$4 sm:$0xff]  }
 0x43a   :  { %v20456_v22 = vld [vmem:[#allocation2 + $0x1154] ss:$368 sps:$4 sm:$0xff]  }
 0x43b   :  { %v9332_v50 = vadd.f32 %v17791_v12, %v9320_v48  ;;  %v20451_v12 = vld [vmem:[#allocation2 + $0xe78] ss:$368 sps:$4 sm:$0xff]   ;;  %v20459_v48 = vld [vmem:[#allocation2 + $0x115c] ss:$368 sps:$4 sm:$0xff]  }
 0x43d   :  { %v9333_v62 = vmax.f32 %v9332_v50, 0.0  ;;  %v20454_v50 = vld [vmem:[#allocation2 + $0x1150] ss:$368 sps:$4 sm:$0xff]  }
 0x43f   :  { %v24896_v3 = vpack.c.bf16 %v9333_v62, %v9333_v62  ;;  %v20457_v62 = vld [vmem:[#allocation2 + $0x1158] ss:$368 sps:$4 sm:$0xff]  }
 0x441   :  { %14268 = vmatmul.mubr.bf16.vlgmr.msra.gmra.mrb[92].mxu1 %v24896_v3  ;;  %14309 = vmatmul.mubr.bf16.vlgmr.msra.gmra.mrb[96].mxu0 %v24896_v3 }
 0x442   :  { %14318 = vmatpush1.bf16.msra.mxu1 %v20418_v23  ;;  %14359 = vmatpush1.bf16.msra.mxu0 %v20421_v61  ;;  %v20462_v23 = vld [vmem:[#allocation2 + $0x1434] ss:$368 sps:$4 sm:$0xff]   ;;  %v20465_v61 = vld [vmem:[#allocation2 + $0x143c] ss:$368 sps:$4 sm:$0xff]  }
 0x443   :  { %14319 = vmatprep.subr.bf16.mxu1 %v20426_v45  ;;  %14360 = vmatprep.subr.bf16.mxu0 %v20429_v60  ;;  %v20460_v45 = vld [vmem:[#allocation2 + $0x1430] ss:$368 sps:$4 sm:$0xff]   ;;  %v20463_v60 = vld [vmem:[#allocation2 + $0x1438] ss:$368 sps:$4 sm:$0xff]  }
 0x444   :  { %14349 = vmatprep.mubr.bf16.mxu1 %v25712_v56  ;;  %14390 = vmatprep.mubr.bf16.mxu0 %v25712_v56 }
 0x446   :  { %14320 = vmatpush1.bf16.msra.mxu1 %v20424_v46  ;;  %14361 = vmatpush1.bf16.msra.mxu0 %v20427_v26  ;;  %v20468_v46 = vld [vmem:[#allocation2 + $0x24] ss:$368 sps:$4 sm:$0xff]   ;;  %v20471_v26 = vld [vmem:[#allocation2 + $0x2c] ss:$368 sps:$4 sm:$0xff]  }
 0x447   :  { %14321 = vmatprep.subr.bf16.mxu1 %v20432_v35  ;;  %14362 = vmatprep.subr.bf16.mxu0 %v20435_v21  ;;  %v20466_v35 = vld [vmem:[#allocation2 + $0x20] ss:$368 sps:$4 sm:$0xff]   ;;  %v20469_v21 = vld [vmem:[#allocation2 + $0x28] ss:$368 sps:$4 sm:$0xff]  }
 0x44a   :  { %14322 = vmatpush1.bf16.msra.mxu1 %v20430_v39  ;;  %14363 = vmatpush1.bf16.msra.mxu0 %v20433_v16  ;;  %v20474_v39 = vld [vmem:[#allocation2 + $0x304] ss:$368 sps:$4 sm:$0xff]   ;;  %v20477_v16 = vld [vmem:[#allocation2 + $0x30c] ss:$368 sps:$4 sm:$0xff]  }
 0x44b   :  { %14323 = vmatprep.subr.bf16.mxu1 %v20438_v33  ;;  %14364 = vmatprep.subr.bf16.mxu0 %v20441_v24  ;;  %v20472_v33 = vld [vmem:[#allocation2 + $0x300] ss:$368 sps:$4 sm:$0xff]   ;;  %v20475_v24 = vld [vmem:[#allocation2 + $0x308] ss:$368 sps:$4 sm:$0xff]  }
 0x44e   :  { %14324 = vmatpush1.bf16.msra.mxu1 %v20436_v0  ;;  %14365 = vmatpush1.bf16.msra.mxu0 %v20439_v29  ;;  %v20480_v0 = vld [vmem:[#allocation2 + $0x5e4] ss:$368 sps:$4 sm:$0xff]   ;;  %v20483_v29 = vld [vmem:[#allocation2 + $0x5ec] ss:$368 sps:$4 sm:$0xff]  }
 0x44f   :  { %14325 = vmatprep.subr.bf16.mxu1 %v20444_v7  ;;  %14366 = vmatprep.subr.bf16.mxu0 %v20447_v47  ;;  %v20478_v7 = vld [vmem:[#allocation2 + $0x5e0] ss:$368 sps:$4 sm:$0xff]   ;;  %v20481_v47 = vld [vmem:[#allocation2 + $0x5e8] ss:$368 sps:$4 sm:$0xff]  }
 0x452   :  { %14326 = vmatpush1.bf16.msra.mxu1 %v20442_v20  ;;  %14367 = vmatpush1.bf16.msra.mxu0 %v20445_v41  ;;  %v20486_v20 = vld [vmem:[#allocation2 + $0x8c4] ss:$368 sps:$4 sm:$0xff]   ;;  %v20489_v41 = vld [vmem:[#allocation2 + $0x8cc] ss:$368 sps:$4 sm:$0xff]  }
 0x453   :  { %14327 = vmatprep.subr.bf16.mxu1 %v20450_v44  ;;  %14368 = vmatprep.subr.bf16.mxu0 %v20453_v36  ;;  %v20484_v44 = vld [vmem:[#allocation2 + $0x8c0] ss:$368 sps:$4 sm:$0xff]   ;;  %v20487_v36 = vld [vmem:[#allocation2 + $0x8c8] ss:$368 sps:$4 sm:$0xff]  }
 0x456   :  { %14328 = vmatpush1.bf16.msra.mxu1 %v20448_v54  ;;  %14369 = vmatpush1.bf16.msra.mxu0 %v20451_v12  ;;  %v20492_v54 = vld [vmem:[#allocation2 + $0xba4] ss:$368 sps:$4 sm:$0xff]   ;;  %v20495_v12 = vld [vmem:[#allocation2 + $0xbac] ss:$368 sps:$4 sm:$0xff]  }
 0x457   :  { %14329 = vmatprep.subr.bf16.mxu1 %v20456_v22  ;;  %14370 = vmatprep.subr.bf16.mxu0 %v20459_v48  ;;  %v20490_v22 = vld [vmem:[#allocation2 + $0xba0] ss:$368 sps:$4 sm:$0xff]   ;;  %v20493_v48 = vld [vmem:[#allocation2 + $0xba8] ss:$368 sps:$4 sm:$0xff]  }
 0x45a   :  { %14330 = vmatpush1.bf16.msra.mxu1 %v20454_v50  ;;  %14371 = vmatpush1.bf16.msra.mxu0 %v20457_v62  ;;  %v20498_v50 = vld [vmem:[#allocation2 + $0xe84] ss:$368 sps:$4 sm:$0xff]   ;;  %v20501_v62 = vld [vmem:[#allocation2 + $0xe8c] ss:$368 sps:$4 sm:$0xff]  }
 0x45b   :  { %14331 = vmatprep.subr.bf16.mxu1 %v20462_v23  ;;  %14372 = vmatprep.subr.bf16.mxu0 %v20465_v61  ;;  %v20496_v23 = vld [vmem:[#allocation2 + $0xe80] ss:$368 sps:$4 sm:$0xff]   ;;  %v20499_v61 = vld [vmem:[#allocation2 + $0xe88] ss:$368 sps:$4 sm:$0xff]  }
 0x45e   :  { %14332 = vmatpush1.bf16.msra.mxu1 %v20460_v45  ;;  %14373 = vmatpush1.bf16.msra.mxu0 %v20463_v60  ;;  %v20504_v45 = vld [vmem:[#allocation2 + $0x1164] ss:$368 sps:$4 sm:$0xff]   ;;  %v20507_v60 = vld [vmem:[#allocation2 + $0x116c] ss:$368 sps:$4 sm:$0xff]  }
 0x45f   :  { %14399 = vmatprep.subr.bf16.mxu1 %v20468_v46  ;;  %14440 = vmatprep.subr.bf16.mxu0 %v20471_v26  ;;  %v20502_v46 = vld [vmem:[#allocation2 + $0x1160] ss:$368 sps:$4 sm:$0xff]   ;;  %v20505_v26 = vld [vmem:[#allocation2 + $0x1168] ss:$368 sps:$4 sm:$0xff]  }
 0x461   :  { %14350 = vmatmul.mubr.bf16.vlgmr.msra.gmra.mrb[96].mxu1 %v24896_v3  ;;  %14391 = vmatmul.mubr.bf16.vlgmr.msra.gmra.mrb[100].mxu0 %v24896_v3 }
 0x462   :  { %14400 = vmatpush1.bf16.msra.mxu1 %v20466_v35  ;;  %14441 = vmatpush1.bf16.msra.mxu0 %v20469_v21  ;;  %v20510_v35 = vld [vmem:[#allocation2 + $0x1444] ss:$368 sps:$4 sm:$0xff]   ;;  %v20513_v21 = vld [vmem:[#allocation2 + $0x144c] ss:$368 sps:$4 sm:$0xff]  }
 0x463   :  { %14401 = vmatprep.subr.bf16.mxu1 %v20474_v39  ;;  %14442 = vmatprep.subr.bf16.mxu0 %v20477_v16  ;;  %v20508_v39 = vld [vmem:[#allocation2 + $0x1440] ss:$368 sps:$4 sm:$0xff]   ;;  %v20511_v16 = vld [vmem:[#allocation2 + $0x1448] ss:$368 sps:$4 sm:$0xff]  }
 0x464   :  { %14431 = vmatprep.mubr.bf16.mxu1 %v25712_v56  ;;  %14472 = vmatprep.mubr.bf16.mxu0 %v25712_v56 }
 0x466   :  { %14402 = vmatpush1.bf16.msra.mxu1 %v20472_v33  ;;  %14443 = vmatpush1.bf16.msra.mxu0 %v20475_v24  ;;  %v20516_v33 = vld [vmem:[#allocation2 + $0x34] ss:$368 sps:$4 sm:$0xff]   ;;  %v20519_v24 = vld [vmem:[#allocation2 + $0x3c] ss:$368 sps:$4 sm:$0xff]  }
 0x467   :  { %14403 = vmatprep.subr.bf16.mxu1 %v20480_v0  ;;  %14444 = vmatprep.subr.bf16.mxu0 %v20483_v29  ;;  %v20514_v0 = vld [vmem:[#allocation2 + $0x30] ss:$368 sps:$4 sm:$0xff]   ;;  %v20517_v29 = vld [vmem:[#allocation2 + $0x38] ss:$368 sps:$4 sm:$0xff]  }
 0x46a   :  { %14404 = vmatpush1.bf16.msra.mxu1 %v20478_v7  ;;  %14445 = vmatpush1.bf16.msra.mxu0 %v20481_v47  ;;  %v20522_v7 = vld [vmem:[#allocation2 + $0x314] ss:$368 sps:$4 sm:$0xff]   ;;  %v20525_v47 = vld [vmem:[#allocation2 + $0x31c] ss:$368 sps:$4 sm:$0xff]  }
 0x46b   :  { %14405 = vmatprep.subr.bf16.mxu1 %v20486_v20  ;;  %14446 = vmatprep.subr.bf16.mxu0 %v20489_v41  ;;  %v20520_v20 = vld [vmem:[#allocation2 + $0x310] ss:$368 sps:$4 sm:$0xff]   ;;  %v20523_v41 = vld [vmem:[#allocation2 + $0x318] ss:$368 sps:$4 sm:$0xff]  }
 0x46e   :  { %14406 = vmatpush1.bf16.msra.mxu1 %v20484_v44  ;;  %14447 = vmatpush1.bf16.msra.mxu0 %v20487_v36  ;;  %v20528_v44 = vld [vmem:[#allocation2 + $0x5f4] ss:$368 sps:$4 sm:$0xff]   ;;  %v20531_v36 = vld [vmem:[#allocation2 + $0x5fc] ss:$368 sps:$4 sm:$0xff]  }
 0x46f   :  { %14407 = vmatprep.subr.bf16.mxu1 %v20492_v54  ;;  %14448 = vmatprep.subr.bf16.mxu0 %v20495_v12  ;;  %v20526_v54 = vld [vmem:[#allocation2 + $0x5f0] ss:$368 sps:$4 sm:$0xff]   ;;  %v20529_v12 = vld [vmem:[#allocation2 + $0x5f8] ss:$368 sps:$4 sm:$0xff]  }
 0x472   :  { %14408 = vmatpush1.bf16.msra.mxu1 %v20490_v22  ;;  %14449 = vmatpush1.bf16.msra.mxu0 %v20493_v48  ;;  %v20534_v22 = vld [vmem:[#allocation2 + $0x8d4] ss:$368 sps:$4 sm:$0xff]   ;;  %v20537_v48 = vld [vmem:[#allocation2 + $0x8dc] ss:$368 sps:$4 sm:$0xff]  }
 0x473   :  { %14409 = vmatprep.subr.bf16.mxu1 %v20498_v50  ;;  %14450 = vmatprep.subr.bf16.mxu0 %v20501_v62  ;;  %v20532_v50 = vld [vmem:[#allocation2 + $0x8d0] ss:$368 sps:$4 sm:$0xff]   ;;  %v20535_v62 = vld [vmem:[#allocation2 + $0x8d8] ss:$368 sps:$4 sm:$0xff]  }
 0x476   :  { %14410 = vmatpush1.bf16.msra.mxu1 %v20496_v23  ;;  %14451 = vmatpush1.bf16.msra.mxu0 %v20499_v61  ;;  %v20540_v23 = vld [vmem:[#allocation2 + $0xbb4] ss:$368 sps:$4 sm:$0xff]   ;;  %v20543_v61 = vld [vmem:[#allocation2 + $0xbbc] ss:$368 sps:$4 sm:$0xff]  }
 0x477   :  { %14411 = vmatprep.subr.bf16.mxu1 %v20504_v45  ;;  %14452 = vmatprep.subr.bf16.mxu0 %v20507_v60  ;;  %v20538_v45 = vld [vmem:[#allocation2 + $0xbb0] ss:$368 sps:$4 sm:$0xff]   ;;  %v20541_v60 = vld [vmem:[#allocation2 + $0xbb8] ss:$368 sps:$4 sm:$0xff]  }
 0x47a   :  { %14412 = vmatpush1.bf16.msra.mxu1 %v20502_v46  ;;  %14453 = vmatpush1.bf16.msra.mxu0 %v20505_v26  ;;  %v20546_v46 = vld [vmem:[#allocation2 + $0xe94] ss:$368 sps:$4 sm:$0xff]   ;;  %v20549_v26 = vld [vmem:[#allocation2 + $0xe9c] ss:$368 sps:$4 sm:$0xff]  }
 0x47b   :  { %14413 = vmatprep.subr.bf16.mxu1 %v20510_v35  ;;  %14454 = vmatprep.subr.bf16.mxu0 %v20513_v21  ;;  %v20544_v35 = vld [vmem:[#allocation2 + $0xe90] ss:$368 sps:$4 sm:$0xff]   ;;  %v20547_v21 = vld [vmem:[#allocation2 + $0xe98] ss:$368 sps:$4 sm:$0xff]  }
 0x47e   :  { %14414 = vmatpush1.bf16.msra.mxu1 %v20508_v39  ;;  %14455 = vmatpush1.bf16.msra.mxu0 %v20511_v16  ;;  %v20552_v39 = vld [vmem:[#allocation2 + $0x1174] ss:$368 sps:$4 sm:$0xff]   ;;  %v20555_v16 = vld [vmem:[#allocation2 + $0x117c] ss:$368 sps:$4 sm:$0xff]  }
 0x47f   :  { %14481 = vmatprep.subr.bf16.mxu1 %v20516_v33  ;;  %14522 = vmatprep.subr.bf16.mxu0 %v20519_v24  ;;  %v20550_v33 = vld [vmem:[#allocation2 + $0x1170] ss:$368 sps:$4 sm:$0xff]   ;;  %v20553_v24 = vld [vmem:[#allocation2 + $0x1178] ss:$368 sps:$4 sm:$0xff]  }
 0x481   :  { %14432 = vmatmul.mubr.bf16.vlgmr.msra.gmra.mrb[100].mxu1 %v24896_v3  ;;  %14473 = vmatmul.mubr.bf16.vlgmr.msra.gmra.mrb[104].mxu0 %v24896_v3 }
 0x482   :  { %14482 = vmatpush1.bf16.msra.mxu1 %v20514_v0  ;;  %14523 = vmatpush1.bf16.msra.mxu0 %v20517_v29  ;;  %v20558_v0 = vld [vmem:[#allocation2 + $0x1454] ss:$368 sps:$4 sm:$0xff]   ;;  %v20561_v29 = vld [vmem:[#allocation2 + $0x145c] ss:$368 sps:$4 sm:$0xff]  }
 0x483   :  { %14483 = vmatprep.subr.bf16.mxu1 %v20522_v7  ;;  %14524 = vmatprep.subr.bf16.mxu0 %v20525_v47  ;;  %v20556_v7 = vld [vmem:[#allocation2 + $0x1450] ss:$368 sps:$4 sm:$0xff]   ;;  %v20559_v47 = vld [vmem:[#allocation2 + $0x1458] ss:$368 sps:$4 sm:$0xff]  }
 0x484   :  { %14513 = vmatprep.mubr.bf16.mxu1 %v25712_v56  ;;  %14554 = vmatprep.mubr.bf16.mxu0 %v25712_v56 }
 0x486   :  { %14484 = vmatpush1.bf16.msra.mxu1 %v20520_v20  ;;  %14525 = vmatpush1.bf16.msra.mxu0 %v20523_v41  ;;  %v20564_v20 = vld [vmem:[#allocation2 + $0x44] ss:$368 sps:$4 sm:$0xff]   ;;  %v20567_v41 = vld [vmem:[#allocation2 + $0x4c] ss:$368 sps:$4 sm:$0xff]  }
 0x487   :  { %14485 = vmatprep.subr.bf16.mxu1 %v20528_v44  ;;  %14526 = vmatprep.subr.bf16.mxu0 %v20531_v36  ;;  %v20562_v44 = vld [vmem:[#allocation2 + $0x40] ss:$368 sps:$4 sm:$0xff]   ;;  %v20565_v36 = vld [vmem:[#allocation2 + $0x48] ss:$368 sps:$4 sm:$0xff]  }
 0x48a   :  { %14486 = vmatpush1.bf16.msra.mxu1 %v20526_v54  ;;  %14527 = vmatpush1.bf16.msra.mxu0 %v20529_v12  ;;  %v20570_v54 = vld [vmem:[#allocation2 + $0x324] ss:$368 sps:$4 sm:$0xff]   ;;  %v20573_v12 = vld [vmem:[#allocation2 + $0x32c] ss:$368 sps:$4 sm:$0xff]  }
 0x48b   :  { %14487 = vmatprep.subr.bf16.mxu1 %v20534_v22  ;;  %14528 = vmatprep.subr.bf16.mxu0 %v20537_v48  ;;  %v20568_v22 = vld [vmem:[#allocation2 + $0x320] ss:$368 sps:$4 sm:$0xff]   ;;  %v20571_v48 = vld [vmem:[#allocation2 + $0x328] ss:$368 sps:$4 sm:$0xff]  }
 0x48e   :  { %14488 = vmatpush1.bf16.msra.mxu1 %v20532_v50  ;;  %14529 = vmatpush1.bf16.msra.mxu0 %v20535_v62  ;;  %v20576_v50 = vld [vmem:[#allocation2 + $0x604] ss:$368 sps:$4 sm:$0xff]   ;;  %v20579_v62 = vld [vmem:[#allocation2 + $0x60c] ss:$368 sps:$4 sm:$0xff]  }
 0x48f   :  { %14489 = vmatprep.subr.bf16.mxu1 %v20540_v23  ;;  %14530 = vmatprep.subr.bf16.mxu0 %v20543_v61  ;;  %v20574_v23 = vld [vmem:[#allocation2 + $0x600] ss:$368 sps:$4 sm:$0xff]   ;;  %v20577_v61 = vld [vmem:[#allocation2 + $0x608] ss:$368 sps:$4 sm:$0xff]  }
 0x492   :  { %14490 = vmatpush1.bf16.msra.mxu1 %v20538_v45  ;;  %14531 = vmatpush1.bf16.msra.mxu0 %v20541_v60  ;;  %v20582_v45 = vld [vmem:[#allocation2 + $0x8e4] ss:$368 sps:$4 sm:$0xff]   ;;  %v20585_v60 = vld [vmem:[#allocation2 + $0x8ec] ss:$368 sps:$4 sm:$0xff]  }
 0x493   :  { %14491 = vmatprep.subr.bf16.mxu1 %v20546_v46  ;;  %14532 = vmatprep.subr.bf16.mxu0 %v20549_v26  ;;  %v20580_v46 = vld [vmem:[#allocation2 + $0x8e0] ss:$368 sps:$4 sm:$0xff]   ;;  %v20583_v26 = vld [vmem:[#allocation2 + $0x8e8] ss:$368 sps:$4 sm:$0xff]  }
 0x496   :  { %14492 = vmatpush1.bf16.msra.mxu1 %v20544_v35  ;;  %14533 = vmatpush1.bf16.msra.mxu0 %v20547_v21  ;;  %v20588_v35 = vld [vmem:[#allocation2 + $0xbc4] ss:$368 sps:$4 sm:$0xff]   ;;  %v20591_v21 = vld [vmem:[#allocation2 + $0xbcc] ss:$368 sps:$4 sm:$0xff]  }
 0x497   :  { %14493 = vmatprep.subr.bf16.mxu1 %v20552_v39  ;;  %14534 = vmatprep.subr.bf16.mxu0 %v20555_v16  ;;  %v20586_v39 = vld [vmem:[#allocation2 + $0xbc0] ss:$368 sps:$4 sm:$0xff]   ;;  %v20589_v16 = vld [vmem:[#allocation2 + $0xbc8] ss:$368 sps:$4 sm:$0xff]  }
 0x49a   :  { %14494 = vmatpush1.bf16.msra.mxu1 %v20550_v33  ;;  %14535 = vmatpush1.bf16.msra.mxu0 %v20553_v24  ;;  %v20594_v33 = vld [vmem:[#allocation2 + $0xea4] ss:$368 sps:$4 sm:$0xff]   ;;  %v20597_v24 = vld [vmem:[#allocation2 + $0xeac] ss:$368 sps:$4 sm:$0xff]  }
 0x49b   :  { %14495 = vmatprep.subr.bf16.mxu1 %v20558_v0  ;;  %14536 = vmatprep.subr.bf16.mxu0 %v20561_v29  ;;  %v20592_v0 = vld [vmem:[#allocation2 + $0xea0] ss:$368 sps:$4 sm:$0xff]   ;;  %v20595_v29 = vld [vmem:[#allocation2 + $0xea8] ss:$368 sps:$4 sm:$0xff]  }
 0x49e   :  { %14496 = vmatpush1.bf16.msra.mxu1 %v20556_v7  ;;  %14537 = vmatpush1.bf16.msra.mxu0 %v20559_v47  ;;  %v20600_v7 = vld [vmem:[#allocation2 + $0x1184] ss:$368 sps:$4 sm:$0xff]   ;;  %v20603_v47 = vld [vmem:[#allocation2 + $0x118c] ss:$368 sps:$4 sm:$0xff]  }
 0x49f   :  { %14563 = vmatprep.subr.bf16.mxu1 %v20564_v20  ;;  %14604 = vmatprep.subr.bf16.mxu0 %v20567_v41  ;;  %v20598_v20 = vld [vmem:[#allocation2 + $0x1180] ss:$368 sps:$4 sm:$0xff]   ;;  %v20601_v41 = vld [vmem:[#allocation2 + $0x1188] ss:$368 sps:$4 sm:$0xff]  }
 0x4a1   :  { %14514 = vmatmul.mubr.bf16.vlgmr.msra.gmra.mrb[104].mxu1 %v24896_v3  ;;  %14555 = vmatmul.mubr.bf16.vlgmr.msra.gmra.mrb[108].mxu0 %v24896_v3 }
 0x4a2   :  { %14564 = vmatpush1.bf16.msra.mxu1 %v20562_v44  ;;  %14605 = vmatpush1.bf16.msra.mxu0 %v20565_v36  ;;  %v20606_v44 = vld [vmem:[#allocation2 + $0x1464] ss:$368 sps:$4 sm:$0xff]   ;;  %v20609_v36 = vld [vmem:[#allocation2 + $0x146c] ss:$368 sps:$4 sm:$0xff]  }
 0x4a3   :  { %14565 = vmatprep.subr.bf16.mxu1 %v20570_v54  ;;  %14606 = vmatprep.subr.bf16.mxu0 %v20573_v12  ;;  %v20604_v54 = vld [vmem:[#allocation2 + $0x1460] ss:$368 sps:$4 sm:$0xff]   ;;  %v20607_v12 = vld [vmem:[#allocation2 + $0x1468] ss:$368 sps:$4 sm:$0xff]  }
 0x4a4   :  { %14595 = vmatprep.mubr.bf16.mxu1 %v25712_v56  ;;  %14636 = vmatprep.mubr.bf16.mxu0 %v25712_v56 }
 0x4a6   :  { %14566 = vmatpush1.bf16.msra.mxu1 %v20568_v22  ;;  %14607 = vmatpush1.bf16.msra.mxu0 %v20571_v48  ;;  %v20612_v22 = vld [vmem:[#allocation2 + $0x54] ss:$368 sps:$4 sm:$0xff]   ;;  %v20615_v48 = vld [vmem:[#allocation2 + $0x5c] ss:$368 sps:$4 sm:$0xff]  }
 0x4a7   :  { %14567 = vmatprep.subr.bf16.mxu1 %v20576_v50  ;;  %14608 = vmatprep.subr.bf16.mxu0 %v20579_v62  ;;  %v20610_v50 = vld [vmem:[#allocation2 + $0x50] ss:$368 sps:$4 sm:$0xff]   ;;  %v20613_v62 = vld [vmem:[#allocation2 + $0x58] ss:$368 sps:$4 sm:$0xff]  }
 0x4aa   :  { %14568 = vmatpush1.bf16.msra.mxu1 %v20574_v23  ;;  %14609 = vmatpush1.bf16.msra.mxu0 %v20577_v61  ;;  %v20618_v23 = vld [vmem:[#allocation2 + $0x334] ss:$368 sps:$4 sm:$0xff]   ;;  %v20621_v61 = vld [vmem:[#allocation2 + $0x33c] ss:$368 sps:$4 sm:$0xff]  }
 0x4ab   :  { %14569 = vmatprep.subr.bf16.mxu1 %v20582_v45  ;;  %14610 = vmatprep.subr.bf16.mxu0 %v20585_v60  ;;  %v20616_v45 = vld [vmem:[#allocation2 + $0x330] ss:$368 sps:$4 sm:$0xff]   ;;  %v20619_v60 = vld [vmem:[#allocation2 + $0x338] ss:$368 sps:$4 sm:$0xff]  }
 0x4ae   :  { %14570 = vmatpush1.bf16.msra.mxu1 %v20580_v46  ;;  %14611 = vmatpush1.bf16.msra.mxu0 %v20583_v26  ;;  %v20624_v46 = vld [vmem:[#allocation2 + $0x614] ss:$368 sps:$4 sm:$0xff]   ;;  %v20627_v26 = vld [vmem:[#allocation2 + $0x61c] ss:$368 sps:$4 sm:$0xff]  }
 0x4af   :  { %14571 = vmatprep.subr.bf16.mxu1 %v20588_v35  ;;  %14612 = vmatprep.subr.bf16.mxu0 %v20591_v21  ;;  %v20622_v35 = vld [vmem:[#allocation2 + $0x610] ss:$368 sps:$4 sm:$0xff]   ;;  %v20625_v21 = vld [vmem:[#allocation2 + $0x618] ss:$368 sps:$4 sm:$0xff]  }
 0x4b2   :  { %14572 = vmatpush1.bf16.msra.mxu1 %v20586_v39  ;;  %14613 = vmatpush1.bf16.msra.mxu0 %v20589_v16  ;;  %v20630_v39 = vld [vmem:[#allocation2 + $0x8f4] ss:$368 sps:$4 sm:$0xff]   ;;  %v20633_v16 = vld [vmem:[#allocation2 + $0x8fc] ss:$368 sps:$4 sm:$0xff]  }
 0x4b3   :  { %14573 = vmatprep.subr.bf16.mxu1 %v20594_v33  ;;  %14614 = vmatprep.subr.bf16.mxu0 %v20597_v24  ;;  %v20628_v33 = vld [vmem:[#allocation2 + $0x8f0] ss:$368 sps:$4 sm:$0xff]   ;;  %v20631_v24 = vld [vmem:[#allocation2 + $0x8f8] ss:$368 sps:$4 sm:$0xff]  }
 0x4b6   :  { %14574 = vmatpush1.bf16.msra.mxu1 %v20592_v0  ;;  %14615 = vmatpush1.bf16.msra.mxu0 %v20595_v29  ;;  %v20636_v0 = vld [vmem:[#allocation2 + $0xbd4] ss:$368 sps:$4 sm:$0xff]   ;;  %v20639_v29 = vld [vmem:[#allocation2 + $0xbdc] ss:$368 sps:$4 sm:$0xff]  }
 0x4b7   :  { %14575 = vmatprep.subr.bf16.mxu1 %v20600_v7  ;;  %14616 = vmatprep.subr.bf16.mxu0 %v20603_v47  ;;  %v20634_v7 = vld [vmem:[#allocation2 + $0xbd0] ss:$368 sps:$4 sm:$0xff]   ;;  %v20637_v47 = vld [vmem:[#allocation2 + $0xbd8] ss:$368 sps:$4 sm:$0xff]  }
 0x4ba   :  { %14576 = vmatpush1.bf16.msra.mxu1 %v20598_v20  ;;  %14617 = vmatpush1.bf16.msra.mxu0 %v20601_v41  ;;  %v20642_v20 = vld [vmem:[#allocation2 + $0xeb4] ss:$368 sps:$4 sm:$0xff]   ;;  %v20645_v41 = vld [vmem:[#allocation2 + $0xebc] ss:$368 sps:$4 sm:$0xff]  }
 0x4bb   :  { %14577 = vmatprep.subr.bf16.mxu1 %v20606_v44  ;;  %14618 = vmatprep.subr.bf16.mxu0 %v20609_v36  ;;  %v20640_v44 = vld [vmem:[#allocation2 + $0xeb0] ss:$368 sps:$4 sm:$0xff]   ;;  %v20643_v36 = vld [vmem:[#allocation2 + $0xeb8] ss:$368 sps:$4 sm:$0xff]  }
 0x4be   :  { %14578 = vmatpush1.bf16.msra.mxu1 %v20604_v54  ;;  %14619 = vmatpush1.bf16.msra.mxu0 %v20607_v12  ;;  %v20648_v54 = vld [vmem:[#allocation2 + $0x1194] ss:$368 sps:$4 sm:$0xff]   ;;  %v20651_v12 = vld [vmem:[#allocation2 + $0x119c] ss:$368 sps:$4 sm:$0xff]  }
 0x4bf   :  { %14645 = vmatprep.subr.bf16.mxu1 %v20612_v22  ;;  %14686 = vmatprep.subr.bf16.mxu0 %v20615_v48  ;;  %v20646_v22 = vld [vmem:[#allocation2 + $0x1190] ss:$368 sps:$4 sm:$0xff]   ;;  %v20649_v48 = vld [vmem:[#allocation2 + $0x1198] ss:$368 sps:$4 sm:$0xff]  }
 0x4c1   :  { %14596 = vmatmul.mubr.bf16.vlgmr.msra.gmra.mrb[108].mxu1 %v24896_v3  ;;  %14637 = vmatmul.mubr.bf16.vlgmr.msra.gmra.mrb[112].mxu0 %v24896_v3 }
 0x4c2   :  { %14646 = vmatpush1.bf16.msra.mxu1 %v20610_v50  ;;  %14687 = vmatpush1.bf16.msra.mxu0 %v20613_v62  ;;  %v20654_v50 = vld [vmem:[#allocation2 + $0x1474] ss:$368 sps:$4 sm:$0xff]   ;;  %v20657_v62 = vld [vmem:[#allocation2 + $0x147c] ss:$368 sps:$4 sm:$0xff]  }
 0x4c3   :  { %14647 = vmatprep.subr.bf16.mxu1 %v20618_v23  ;;  %14688 = vmatprep.subr.bf16.mxu0 %v20621_v61  ;;  %v20652_v23 = vld [vmem:[#allocation2 + $0x1470] ss:$368 sps:$4 sm:$0xff]   ;;  %v20655_v61 = vld [vmem:[#allocation2 + $0x1478] ss:$368 sps:$4 sm:$0xff]  }
 0x4c4   :  { %14677 = vmatprep.mubr.bf16.mxu1 %v25712_v56  ;;  %14718 = vmatprep.mubr.bf16.mxu0 %v25712_v56 }
 0x4c6   :  { %14648 = vmatpush1.bf16.msra.mxu1 %v20616_v45  ;;  %14689 = vmatpush1.bf16.msra.mxu0 %v20619_v60  ;;  %v20660_v45 = vld [vmem:[#allocation2 + $0x64] ss:$368 sps:$4 sm:$0xff]   ;;  %v20663_v60 = vld [vmem:[#allocation2 + $0x6c] ss:$368 sps:$4 sm:$0xff]  }
 0x4c7   :  { %14649 = vmatprep.subr.bf16.mxu1 %v20624_v46  ;;  %14690 = vmatprep.subr.bf16.mxu0 %v20627_v26  ;;  %v20658_v46 = vld [vmem:[#allocation2 + $0x60] ss:$368 sps:$4 sm:$0xff]   ;;  %v20661_v26 = vld [vmem:[#allocation2 + $0x68] ss:$368 sps:$4 sm:$0xff]  }
 0x4ca   :  { %14650 = vmatpush1.bf16.msra.mxu1 %v20622_v35  ;;  %14691 = vmatpush1.bf16.msra.mxu0 %v20625_v21  ;;  %v20666_v35 = vld [vmem:[#allocation2 + $0x344] ss:$368 sps:$4 sm:$0xff]   ;;  %v20669_v21 = vld [vmem:[#allocation2 + $0x34c] ss:$368 sps:$4 sm:$0xff]  }
 0x4cb   :  { %14651 = vmatprep.subr.bf16.mxu1 %v20630_v39  ;;  %14692 = vmatprep.subr.bf16.mxu0 %v20633_v16  ;;  %v20664_v39 = vld [vmem:[#allocation2 + $0x340] ss:$368 sps:$4 sm:$0xff]   ;;  %v20667_v16 = vld [vmem:[#allocation2 + $0x348] ss:$368 sps:$4 sm:$0xff]  }
 0x4ce   :  { %14652 = vmatpush1.bf16.msra.mxu1 %v20628_v33  ;;  %14693 = vmatpush1.bf16.msra.mxu0 %v20631_v24  ;;  %v20672_v33 = vld [vmem:[#allocation2 + $0x624] ss:$368 sps:$4 sm:$0xff]   ;;  %v20675_v24 = vld [vmem:[#allocation2 + $0x62c] ss:$368 sps:$4 sm:$0xff]  }
 0x4cf   :  { %14653 = vmatprep.subr.bf16.mxu1 %v20636_v0  ;;  %14694 = vmatprep.subr.bf16.mxu0 %v20639_v29  ;;  %v20670_v0 = vld [vmem:[#allocation2 + $0x620] ss:$368 sps:$4 sm:$0xff]   ;;  %v20673_v29 = vld [vmem:[#allocation2 + $0x628] ss:$368 sps:$4 sm:$0xff]  }
 0x4d2   :  { %14654 = vmatpush1.bf16.msra.mxu1 %v20634_v7  ;;  %14695 = vmatpush1.bf16.msra.mxu0 %v20637_v47  ;;  %v20678_v7 = vld [vmem:[#allocation2 + $0x904] ss:$368 sps:$4 sm:$0xff]   ;;  %v20681_v47 = vld [vmem:[#allocation2 + $0x90c] ss:$368 sps:$4 sm:$0xff]  }
 0x4d3   :  { %14655 = vmatprep.subr.bf16.mxu1 %v20642_v20  ;;  %14696 = vmatprep.subr.bf16.mxu0 %v20645_v41  ;;  %v20676_v20 = vld [vmem:[#allocation2 + $0x900] ss:$368 sps:$4 sm:$0xff]   ;;  %v20679_v41 = vld [vmem:[#allocation2 + $0x908] ss:$368 sps:$4 sm:$0xff]  }
 0x4d6   :  { %14656 = vmatpush1.bf16.msra.mxu1 %v20640_v44  ;;  %14697 = vmatpush1.bf16.msra.mxu0 %v20643_v36  ;;  %v20684_v44 = vld [vmem:[#allocation2 + $0xbe4] ss:$368 sps:$4 sm:$0xff]   ;;  %v20687_v36 = vld [vmem:[#allocation2 + $0xbec] ss:$368 sps:$4 sm:$0xff]  }
 0x4d7   :  { %14657 = vmatprep.subr.bf16.mxu1 %v20648_v54  ;;  %14698 = vmatprep.subr.bf16.mxu0 %v20651_v12  ;;  %v20682_v54 = vld [vmem:[#allocation2 + $0xbe0] ss:$368 sps:$4 sm:$0xff]   ;;  %v20685_v12 = vld [vmem:[#allocation2 + $0xbe8] ss:$368 sps:$4 sm:$0xff]  }
 0x4da   :  { %14658 = vmatpush1.bf16.msra.mxu1 %v20646_v22  ;;  %14699 = vmatpush1.bf16.msra.mxu0 %v20649_v48  ;;  %v20690_v22 = vld [vmem:[#allocation2 + $0xec4] ss:$368 sps:$4 sm:$0xff]   ;;  %v20693_v48 = vld [vmem:[#allocation2 + $0xecc] ss:$368 sps:$4 sm:$0xff]  }
 0x4db   :  { %14659 = vmatprep.subr.bf16.mxu1 %v20654_v50  ;;  %14700 = vmatprep.subr.bf16.mxu0 %v20657_v62  ;;  %v20688_v50 = vld [vmem:[#allocation2 + $0xec0] ss:$368 sps:$4 sm:$0xff]   ;;  %v20691_v62 = vld [vmem:[#allocation2 + $0xec8] ss:$368 sps:$4 sm:$0xff]  }
 0x4de   :  { %14660 = vmatpush1.bf16.msra.mxu1 %v20652_v23  ;;  %14701 = vmatpush1.bf16.msra.mxu0 %v20655_v61  ;;  %v20696_v23 = vld [vmem:[#allocation2 + $0x11a4] ss:$368 sps:$4 sm:$0xff]   ;;  %v20699_v61 = vld [vmem:[#allocation2 + $0x11ac] ss:$368 sps:$4 sm:$0xff]  }
 0x4df   :  { %14727 = vmatprep.subr.bf16.mxu1 %v20660_v45  ;;  %14768 = vmatprep.subr.bf16.mxu0 %v20663_v60  ;;  %v20694_v45 = vld [vmem:[#allocation2 + $0x11a0] ss:$368 sps:$4 sm:$0xff]   ;;  %v20697_v60 = vld [vmem:[#allocation2 + $0x11a8] ss:$368 sps:$4 sm:$0xff]  }
 0x4e1   :  { %14678 = vmatmul.mubr.bf16.vlgmr.msra.gmra.mrb[112].mxu1 %v24896_v3  ;;  %14719 = vmatmul.mubr.bf16.vlgmr.msra.gmra.mrb[116].mxu0 %v24896_v3 }
 0x4e2   :  { %14728 = vmatpush1.bf16.msra.mxu1 %v20658_v46  ;;  %14769 = vmatpush1.bf16.msra.mxu0 %v20661_v26  ;;  %v20702_v46 = vld [vmem:[#allocation2 + $0x1484] ss:$368 sps:$4 sm:$0xff]   ;;  %v20705_v26 = vld [vmem:[#allocation2 + $0x148c] ss:$368 sps:$4 sm:$0xff]  }
 0x4e3   :  { %14729 = vmatprep.subr.bf16.mxu1 %v20666_v35  ;;  %14770 = vmatprep.subr.bf16.mxu0 %v20669_v21  ;;  %v20700_v35 = vld [vmem:[#allocation2 + $0x1480] ss:$368 sps:$4 sm:$0xff]   ;;  %v20703_v21 = vld [vmem:[#allocation2 + $0x1488] ss:$368 sps:$4 sm:$0xff]  }
 0x4e4   :  { %14759 = vmatprep.mubr.bf16.mxu1 %v25712_v56  ;;  %14800 = vmatprep.mubr.bf16.mxu0 %v25712_v56 }
 0x4e6   :  { %14730 = vmatpush1.bf16.msra.mxu1 %v20664_v39  ;;  %14771 = vmatpush1.bf16.msra.mxu0 %v20667_v16  ;;  %v20708_v39 = vld [vmem:[#allocation2 + $0x74] ss:$368 sps:$4 sm:$0xff]   ;;  %v20711_v16 = vld [vmem:[#allocation2 + $0x7c] ss:$368 sps:$4 sm:$0xff]  }
 0x4e7   :  { %14731 = vmatprep.subr.bf16.mxu1 %v20672_v33  ;;  %14772 = vmatprep.subr.bf16.mxu0 %v20675_v24  ;;  %v20706_v33 = vld [vmem:[#allocation2 + $0x70] ss:$368 sps:$4 sm:$0xff]   ;;  %v20709_v24 = vld [vmem:[#allocation2 + $0x78] ss:$368 sps:$4 sm:$0xff]  }
 0x4ea   :  { %14732 = vmatpush1.bf16.msra.mxu1 %v20670_v0  ;;  %14773 = vmatpush1.bf16.msra.mxu0 %v20673_v29  ;;  %v20714_v0 = vld [vmem:[#allocation2 + $0x354] ss:$368 sps:$4 sm:$0xff]   ;;  %v20717_v29 = vld [vmem:[#allocation2 + $0x35c] ss:$368 sps:$4 sm:$0xff]  }
 0x4eb   :  { %14733 = vmatprep.subr.bf16.mxu1 %v20678_v7  ;;  %14774 = vmatprep.subr.bf16.mxu0 %v20681_v47  ;;  %v20712_v7 = vld [vmem:[#allocation2 + $0x350] ss:$368 sps:$4 sm:$0xff]   ;;  %v20715_v47 = vld [vmem:[#allocation2 + $0x358] ss:$368 sps:$4 sm:$0xff]  }
 0x4ee   :  { %14734 = vmatpush1.bf16.msra.mxu1 %v20676_v20  ;;  %14775 = vmatpush1.bf16.msra.mxu0 %v20679_v41  ;;  %v20720_v20 = vld [vmem:[#allocation2 + $0x634] ss:$368 sps:$4 sm:$0xff]   ;;  %v20723_v41 = vld [vmem:[#allocation2 + $0x63c] ss:$368 sps:$4 sm:$0xff]  }
 0x4ef   :  { %14735 = vmatprep.subr.bf16.mxu1 %v20684_v44  ;;  %14776 = vmatprep.subr.bf16.mxu0 %v20687_v36  ;;  %v20718_v44 = vld [vmem:[#allocation2 + $0x630] ss:$368 sps:$4 sm:$0xff]   ;;  %v20721_v36 = vld [vmem:[#allocation2 + $0x638] ss:$368 sps:$4 sm:$0xff]  }
 0x4f2   :  { %14736 = vmatpush1.bf16.msra.mxu1 %v20682_v54  ;;  %14777 = vmatpush1.bf16.msra.mxu0 %v20685_v12  ;;  %v20726_v54 = vld [vmem:[#allocation2 + $0x914] ss:$368 sps:$4 sm:$0xff]   ;;  %v20729_v12 = vld [vmem:[#allocation2 + $0x91c] ss:$368 sps:$4 sm:$0xff]  }
 0x4f3   :  { %14737 = vmatprep.subr.bf16.mxu1 %v20690_v22  ;;  %14778 = vmatprep.subr.bf16.mxu0 %v20693_v48  ;;  %v20724_v22 = vld [vmem:[#allocation2 + $0x910] ss:$368 sps:$4 sm:$0xff]   ;;  %v20727_v48 = vld [vmem:[#allocation2 + $0x918] ss:$368 sps:$4 sm:$0xff]  }
 0x4f6   :  { %14738 = vmatpush1.bf16.msra.mxu1 %v20688_v50  ;;  %14779 = vmatpush1.bf16.msra.mxu0 %v20691_v62  ;;  %v20732_v50 = vld [vmem:[#allocation2 + $0xbf4] ss:$368 sps:$4 sm:$0xff]   ;;  %v20735_v62 = vld [vmem:[#allocation2 + $0xbfc] ss:$368 sps:$4 sm:$0xff]  }
 0x4f7   :  { %14739 = vmatprep.subr.bf16.mxu1 %v20696_v23  ;;  %14780 = vmatprep.subr.bf16.mxu0 %v20699_v61  ;;  %v20730_v23 = vld [vmem:[#allocation2 + $0xbf0] ss:$368 sps:$4 sm:$0xff]   ;;  %v24927_v61 = vsub.s32 0, %v21729_v53 }
 0x4fa   :  { %14740 = vmatpush1.bf16.msra.mxu1 %v20694_v45  ;;  %14781 = vmatpush1.bf16.msra.mxu0 %v20697_v60  ;;  %v24930_v45 = vsub.s32 2, %v21729_v53  ;;  %v20733_v60 = vld [vmem:[#allocation2 + $0xbf8] ss:$368 sps:$4 sm:$0xff]  }
 0x4fb   :  { %14741 = vmatprep.subr.bf16.mxu1 %v20702_v46  ;;  %14782 = vmatprep.subr.bf16.mxu0 %v20705_v26  ;;  %v24935_v46 = vld [vmem:[%s25585_s9] sm:$0xff]  ;;  %v24938_v26 = vsub.s32 1, %v21729_v53 }
 0x4fe   :  { %14742 = vmatpush1.bf16.msra.mxu1 %v20700_v35  ;;  %14783 = vmatpush1.bf16.msra.mxu0 %v20703_v21  ;;  %v24941_v35 = vsub.s32 3, %v21729_v53  ;;  %v20738_v21 = vld [vmem:[#allocation2 + $0xed4] ss:$368 sps:$4 sm:$0xff]  }
 0x4ff   :  { %14809 = vmatprep.subr.bf16.mxu1 %v20708_v39  ;;  %14850 = vmatprep.subr.bf16.mxu0 %v20711_v16  ;;  %v20741_v39 = vld [vmem:[#allocation2 + $0xedc] ss:$368 sps:$4 sm:$0xff]   ;;  %v10098_v16 = vrot.slane %v24935_v46, %v24927_v61 }
 0x501   :  { %14760 = vmatmul.mubr.bf16.vlgmr.msra.gmra.mrb[116].mxu1 %v24896_v3  ;;  %14801 = vmatmul.mubr.bf16.vlgmr.msra.gmra.mrb[120].mxu0 %v24896_v3 }
 0x502   :  { %14810 = vmatpush1.bf16.msra.mxu1 %v20706_v33  ;;  %14851 = vmatpush1.bf16.msra.mxu0 %v20709_v24  ;;  %v10106_v33 = vrot.slane %v24935_v46, %v24930_v45  ;;  %v20736_v24 = vld [vmem:[#allocation2 + $0xed0] ss:$368 sps:$4 sm:$0xff]  }
 0x503   :  { %14811 = vmatprep.subr.bf16.mxu1 %v20714_v0  ;;  %14852 = vmatprep.subr.bf16.mxu0 %v20717_v29  ;;  %v20739_v0 = vld [vmem:[#allocation2 + $0xed8] ss:$368 sps:$4 sm:$0xff]   ;;  %v10102_v29 = vrot.slane %v24935_v46, %v24938_v26 }
 0x504   :  { %14841 = vmatprep.mubr.bf16.mxu1 %v25712_v56  ;;  %14882 = vmatprep.mubr.bf16.mxu0 %v25712_v56 }
 0x506   :  { %14812 = vmatpush1.bf16.msra.mxu1 %v20712_v7  ;;  %14853 = vmatpush1.bf16.msra.mxu0 %v20715_v47  ;;  %v10110_v7 = vrot.slane %v24935_v46, %v24941_v35  ;;  %v20744_v47 = vld [vmem:[#allocation2 + $0x11b4] ss:$368 sps:$4 sm:$0xff]  }
 0x507   :  { %14813 = vmatprep.subr.bf16.mxu1 %v20720_v20  ;;  %14854 = vmatprep.subr.bf16.mxu0 %v20723_v41  ;;  %v20747_v20 = vld [vmem:[#allocation2 + $0x11bc] ss:$368 sps:$4 sm:$0xff]  }
 0x50a   :  { %14814 = vmatpush1.bf16.msra.mxu1 %v20718_v44  ;;  %14855 = vmatpush1.bf16.msra.mxu0 %v20721_v36 }
 0x50b   :  { %14815 = vmatprep.subr.bf16.mxu1 %v20726_v54  ;;  %14856 = vmatprep.subr.bf16.mxu0 %v20729_v12 }
 0x50e   :  { %14816 = vmatpush1.bf16.msra.mxu1 %v20724_v22  ;;  %14857 = vmatpush1.bf16.msra.mxu0 %v20727_v48 }
 0x50f   :  { %14817 = vmatprep.subr.bf16.mxu1 %v20732_v50  ;;  %14858 = vmatprep.subr.bf16.mxu0 %v20735_v62 }
 0x512   :  { %14818 = vmatpush1.bf16.msra.mxu1 %v20730_v23  ;;  %14859 = vmatpush1.bf16.msra.mxu0 %v20733_v60  ;;  %v20742_v60 = vld [vmem:[#allocation2 + $0x11b0] ss:$368 sps:$4 sm:$0xff]  }
 0x513   :  { %14819 = vmatprep.subr.bf16.mxu1 %v20738_v21  ;;  %14860 = vmatprep.subr.bf16.mxu0 %v20741_v39 }
 0x514   :  { %v14269_v41 = vpop.f32.mrb[92].mxu1  ;;  %v14310_v44 = vpop.f32.mrb[96].mxu0 }
 0x515   :  { %v14270_v36 = vadd.f32 %v14269_v41, %v10098_v16  ;;  %v14311_v54 = vadd.f32 %v14310_v44, %v10106_v33  ;;  %v14271_v12 = vpop.f32.mrb[93].mxu1  ;;  %v14312_v22 = vpop.f32.mrb[97].mxu0  ;;  %v20750_v16 = vld [vmem:[#allocation2 + $0x1494] ss:$368 sps:$4 sm:$0xff]  }
 0x516   :  { %v14272_v48 = vadd.f32 %v14271_v12, %v10102_v29  ;;  %v14313_v50 = vadd.f32 %v14312_v22, %v10110_v7  ;;  %14820 = vmatpush1.bf16.msra.mxu1 %v20736_v24  ;;  %14861 = vmatpush1.bf16.msra.mxu0 %v20739_v0  ;;  %v14273_v62 = vpop.f32.mrb[94].mxu1  ;;  %v14314_v23 = vpop.f32.mrb[98].mxu0  ;;  %v20753_v0 = vld [vmem:[#allocation2 + $0x149c] ss:$368 sps:$4 sm:$0xff]  }
 0x517   :  { %v16650_v63 = vsub.f32 %v14270_v36, %v21746_v1  ;;  %v16652_v21 = vsub.f32 %v14311_v54, %v21749_v2  ;;  %v14274_v39 = vpop.f32.mrb[95].mxu1  ;;  %v14315_v8 = vpop.f32.mrb[99].mxu0  ;;  %14821 = vmatprep.subr.bf16.mxu1 %v20744_v47  ;;  %14862 = vmatprep.subr.bf16.mxu0 %v20747_v20  ;;  %v20751_v20 = vld [vmem:[#allocation2 + $0x1498] ss:$368 sps:$4 sm:$0xff]   ;;  %v20762_v23 = vld [vmem:[#allocation2 + $0x364] ss:$368 sps:$4 sm:$0xff]  }
 0x518   :  { %v16213_v33 = vcombine.low %v14270_v36, %v14272_v48  ;;  %v16651_v41 = vsub.f32 %v14272_v48, %v21767_v10  ;;  %v16214_v29 = vcombine.low %v14311_v54, %v14313_v50  ;;  %v16653_v24 = vsub.f32 %v14313_v50, %v21771_v11  ;;  %v20748_v8 = vld [vmem:[#allocation2 + $0x1490] ss:$368 sps:$4 sm:$0xff]   ;;  %v20756_v36 = vld [vmem:[#allocation2 + $0x84] ss:$368 sps:$4 sm:$0xff]  }
 0x519   :  { %v16742_v7 = vmul.f32 %v16650_v63, %v16650_v63  ;;  %v16744_v44 = vmul.f32 %v16652_v21, %v16652_v21  ;;  %v20759_v63 = vld [vmem:[#allocation2 + $0x8c] ss:$368 sps:$4 sm:$0xff]   ;;  %v20754_v50 = vld [vmem:[#allocation2 + $0x80] ss:$368 sps:$4 sm:$0xff]  }
 0x51a   :  { %v16221_v12 = vrot.slane %v16213_v33, %v21741_v58  ;;  %v16743_v1 = vmul.f32 %v16651_v41, %v16651_v41  ;;  %v16228_v2 = vrot.slane %v16214_v29, %v21741_v58  ;;  %14822 = vmatpush1.bf16.msra.mxu1 %v20742_v60  ;;  %14863 = vmatpush1.bf16.msra.mxu0 %v20745_v52  ;;  %v20757_v52 = vld [vmem:[#allocation2 + $0x88] ss:$368 sps:$4 sm:$0xff]   ;;  %v20765_v21 = vld [vmem:[#allocation2 + $0x36c] ss:$368 sps:$4 sm:$0xff]   ;;  %v20768_v41 = vld [vmem:[#allocation2 + $0x644] ss:$368 sps:$4 sm:$0xff]  }
 0x51b   :  { %v16835_v47 = vsel %vm16834_vm1, %v16742_v7, 0.0  ;;  %14823 = vmatprep.subr.bf16.mxu1 %v20750_v16  ;;  %v16745_v11 = vmul.f32 %v16653_v24, %v16653_v24  ;;  %14864 = vmatprep.subr.bf16.mxu0 %v20753_v0  ;;  %v16838_v48 = vsel %vm16834_vm1, %v16744_v44, 0.0  ;;  %v20760_v16 = vld [vmem:[#allocation2 + $0x360] ss:$368 sps:$4 sm:$0xff]   ;;  %v20763_v33 = vld [vmem:[#allocation2 + $0x368] ss:$368 sps:$4 sm:$0xff]  }
 0x51c   :  { %v16836_v10 = vsel %vm16834_vm1, %v16743_v1, 0.0  ;;  %v16229_v54 = vcombine.low %v16221_v12, %v16228_v2  ;;  %v20771_v29 = vld [vmem:[#allocation2 + $0x64c] ss:$368 sps:$4 sm:$0xff]   ;;  %v20766_v24 = vld [vmem:[#allocation2 + $0x640] ss:$368 sps:$4 sm:$0xff]  }
 0x51d   :  { %v16837_v22 = vadd.f32 %v16836_v10, %v16835_v47  ;;  %v16840_v60 = vsel %vm16834_vm1, %v16745_v11, 0.0  ;;  %v20769_v0 = vld [vmem:[#allocation2 + $0x648] ss:$368 sps:$4 sm:$0xff]   ;;  %v20774_v7 = vld [vmem:[#allocation2 + $0x924] ss:$368 sps:$4 sm:$0xff]   ;;  %v24971_v47 = vsub.s32 4, %v21729_v53 }
 0x51e   :  { %16627 = vst [vmem:[%s25586_s10] sm:$0xff] %v16229_v54  ;;  %14824 = vmatpush1.bf16.msra.mxu1 %v20748_v8  ;;  %14865 = vmatpush1.bf16.msra.mxu0 %v20751_v20  ;;  %v20777_v44 = vld [vmem:[#allocation2 + $0x92c] ss:$368 sps:$4 sm:$0xff]   ;;  %v20772_v12 = vld [vmem:[#allocation2 + $0x920] ss:$368 sps:$4 sm:$0xff]   ;;  %v20775_v1 = vld [vmem:[#allocation2 + $0x928] ss:$368 sps:$4 sm:$0xff]  }
 0x51f   :  { %v16839_v62 = vadd.f32 %v16838_v48, %v16837_v22  ;;  %14891 = vmatprep.subr.bf16.mxu1 %v20756_v36  ;;  %14932 = vmatprep.subr.bf16.mxu0 %v20759_v63  ;;  %v20780_v2 = vld [vmem:[#allocation2 + $0xc04] ss:$368 sps:$4 sm:$0xff]   ;;  %v20783_v8 = vld [vmem:[#allocation2 + $0xc0c] ss:$368 sps:$4 sm:$0xff]   ;;  %v24974_v20 = vsub.s32 6, %v21729_v53  ;;  %v24977_v10 = vsub.s32 5, %v21729_v53  ;;  %v10114_v48 = vrot.slane %v24935_v46, %v24971_v47 }
 0x520   :  { %v20778_v36 = vld [vmem:[#allocation2 + $0xc00] ss:$368 sps:$4 sm:$0xff]   ;;  %v24980_v54 = vsub.s32 7, %v21729_v53  ;;  %v20781_v11 = vld [vmem:[#allocation2 + $0xc08] ss:$368 sps:$4 sm:$0xff]  }
 0x521   :  { %v24964_v39 = vadd.f32 %v16840_v60, %v16839_v62  ;;  %14842 = vmatmul.mubr.bf16.vlgmr.msra.gmra.mrb[120].mxu1 %v24896_v3  ;;  %14883 = vmatmul.mubr.bf16.vlgmr.msra.gmra.mrb[124].mxu0 %v24896_v3  ;;  %v20786_v63 = vld [vmem:[#allocation2 + $0xee4] ss:$368 sps:$4 sm:$0xff]   ;;  %v20789_v22 = vld [vmem:[#allocation2 + $0xeec] ss:$368 sps:$4 sm:$0xff]   ;;  %v10118_v62 = vrot.slane %v24935_v46, %v24977_v10 }
 0x522   :  { %14892 = vmatpush1.bf16.msra.mxu1 %v20754_v50  ;;  %14933 = vmatpush1.bf16.msra.mxu0 %v20757_v52  ;;  %v10122_v50 = vrot.slane %v24935_v46, %v24974_v20  ;;  %v10126_v53 = vrot.slane %v24935_v46, %v24980_v54  ;;  %v20784_v52 = vld [vmem:[#allocation2 + $0xee0] ss:$368 sps:$4 sm:$0xff]   ;;  %v20792_v60 = vld [vmem:[#allocation2 + $0x11c4] ss:$368 sps:$4 sm:$0xff]  }
 0x523   :  { %14893 = vmatprep.subr.bf16.mxu1 %v20762_v23  ;;  %14934 = vmatprep.subr.bf16.mxu0 %v20765_v21  ;;  %v20787_v23 = vld [vmem:[#allocation2 + $0xee8] ss:$368 sps:$4 sm:$0xff]  }
 0x524   :  { %14923 = vmatprep.mubr.bf16.mxu1 %v25712_v56  ;;  %14964 = vmatprep.mubr.bf16.mxu0 %v25712_v56 }
 0x526   :  { %14894 = vmatpush1.bf16.msra.mxu1 %v20760_v16  ;;  %14935 = vmatpush1.bf16.msra.mxu0 %v20763_v33  ;;  %v20795_v33 = vld [vmem:[#allocation2 + $0x11cc] ss:$368 sps:$4 sm:$0xff]  }
 0x527   :  { %14895 = vmatprep.subr.bf16.mxu1 %v20768_v41  ;;  %14936 = vmatprep.subr.bf16.mxu0 %v20771_v29 }
 0x52a   :  { %14896 = vmatpush1.bf16.msra.mxu1 %v20766_v24  ;;  %14937 = vmatpush1.bf16.msra.mxu0 %v20769_v0 }
 0x52b   :  { %14897 = vmatprep.subr.bf16.mxu1 %v20774_v7  ;;  %14938 = vmatprep.subr.bf16.mxu0 %v20777_v44 }
 0x52e   :  { %14898 = vmatpush1.bf16.msra.mxu1 %v20772_v12  ;;  %14939 = vmatpush1.bf16.msra.mxu0 %v20775_v1 }
 0x52f   :  { %14899 = vmatprep.subr.bf16.mxu1 %v20780_v2  ;;  %14940 = vmatprep.subr.bf16.mxu0 %v20783_v8  ;;  %v20790_v2 = vld [vmem:[#allocation2 + $0x11c0] ss:$368 sps:$4 sm:$0xff]  }
 0x532   :  { %14900 = vmatpush1.bf16.msra.mxu1 %v20778_v36  ;;  %14941 = vmatpush1.bf16.msra.mxu0 %v20781_v11 }
 0x533   :  { %14901 = vmatprep.subr.bf16.mxu1 %v20786_v63  ;;  %14942 = vmatprep.subr.bf16.mxu0 %v20789_v22  ;;  %v20793_v63 = vld [vmem:[#allocation2 + $0x11c8] ss:$368 sps:$4 sm:$0xff]   ;;  %v20798_v22 = vld [vmem:[#allocation2 + $0x14a4] ss:$368 sps:$4 sm:$0xff]  }
 0x534   :  { %v14351_v21 = vpop.f32.mrb[96].mxu1  ;;  %v14392_v16 = vpop.f32.mrb[100].mxu0 }
 0x535   :  { %v14352_v41 = vadd.f32 %v14351_v21, %v10114_v48  ;;  %v14393_v29 = vadd.f32 %v14392_v16, %v10122_v50  ;;  %v14353_v24 = vpop.f32.mrb[97].mxu1  ;;  %v14394_v0 = vpop.f32.mrb[101].mxu0 }
 0x536   :  { %v14354_v7 = vadd.f32 %v14353_v24, %v10118_v62  ;;  %v14395_v44 = vadd.f32 %v14394_v0, %v10126_v53  ;;  %v14355_v12 = vpop.f32.mrb[98].mxu1  ;;  %v14396_v1 = vpop.f32.mrb[102].mxu0  ;;  %14902 = vmatpush1.bf16.msra.mxu1 %v20784_v52  ;;  %14943 = vmatpush1.bf16.msra.mxu0 %v20787_v23  ;;  %v20801_v62 = vld [vmem:[#allocation2 + $0x14ac] ss:$368 sps:$4 sm:$0xff]   ;;  %v20796_v23 = vld [vmem:[#allocation2 + $0x14a0] ss:$368 sps:$4 sm:$0xff]  }
 0x537   :  { %v16654_v46 = vsub.f32 %v14352_v41, %v21755_v4  ;;  %v16656_v8 = vsub.f32 %v14393_v29, %v21761_v6  ;;  %v14356_v36 = vpop.f32.mrb[99].mxu1  ;;  %v14397_v11 = vpop.f32.mrb[103].mxu0  ;;  %14903 = vmatprep.subr.bf16.mxu1 %v20792_v60  ;;  %14944 = vmatprep.subr.bf16.mxu0 %v20795_v33  ;;  %v20802_v12 = vld [vmem:[#allocation2 + $0x90] ss:$368 sps:$4 sm:$0xff]  }
 0x538   :  { %v16230_v48 = vcombine.low %v14352_v41, %v14354_v7  ;;  %v16655_v50 = vsub.f32 %v14354_v7, %v21777_v13  ;;  %v16231_v21 = vcombine.low %v14393_v29, %v14395_v44  ;;  %v16657_v52 = vsub.f32 %v14395_v44, %v21783_v15  ;;  %v20799_v41 = vld [vmem:[#allocation2 + $0x14a8] ss:$368 sps:$4 sm:$0xff]   ;;  %v20804_v13 = vld [vmem:[#allocation2 + $0x94] ss:$368 sps:$4 sm:$0xff]   ;;  %v20807_v15 = vld [vmem:[#allocation2 + $0x9c] ss:$368 sps:$4 sm:$0xff]  }
 0x539   :  { %v16746_v53 = vmul.f32 %v16654_v46, %v16654_v46  ;;  %v16748_v24 = vmul.f32 %v16656_v8, %v16656_v8  ;;  %v20810_v46 = vld [vmem:[#allocation2 + $0x374] ss:$368 sps:$4 sm:$0xff]   ;;  %v20813_v8 = vld [vmem:[#allocation2 + $0x37c] ss:$368 sps:$4 sm:$0xff]  }
 0x53a   :  { %v16238_v16 = vrot.slane %v16230_v48, %v21741_v58  ;;  %v16747_v4 = vmul.f32 %v16655_v50, %v16655_v50  ;;  %v16245_v6 = vrot.slane %v16231_v21, %v21741_v58  ;;  %14904 = vmatpush1.bf16.msra.mxu1 %v20790_v2  ;;  %14945 = vmatpush1.bf16.msra.mxu0 %v20793_v63  ;;  %v20805_v2 = vld [vmem:[#allocation2 + $0x98] ss:$368 sps:$4 sm:$0xff]   ;;  %v20808_v63 = vld [vmem:[#allocation2 + $0x370] ss:$368 sps:$4 sm:$0xff]   ;;  %v20816_v48 = vld [vmem:[#allocation2 + $0x654] ss:$368 sps:$4 sm:$0xff]  }
 0x53b   :  { %v16842_v60 = vsel %vm16834_vm1, %v16746_v53, 0.0  ;;  %14905 = vmatprep.subr.bf16.mxu1 %v20798_v22  ;;  %14946 = vmatprep.subr.bf16.mxu0 %v20801_v62  ;;  %v16749_v7 = vmul.f32 %v16657_v52, %v16657_v52  ;;  %v16846_v1 = vsel %vm16834_vm1, %v16748_v24, 0.0  ;;  %v20811_v22 = vld [vmem:[#allocation2 + $0x378] ss:$368 sps:$4 sm:$0xff]   ;;  %v20819_v50 = vld [vmem:[#allocation2 + $0x65c] ss:$368 sps:$4 sm:$0xff]  }
 0x53c   :  { %v16843_v33 = vadd.f32 %v16842_v60, %v24964_v39  ;;  %v16844_v29 = vsel %vm16834_vm1, %v16747_v4, 0.0  ;;  %v16246_v0 = vcombine.low %v16238_v16, %v16245_v6  ;;  %v20814_v21 = vld [vmem:[#allocation2 + $0x650] ss:$368 sps:$4 sm:$0xff]   ;;  %v20817_v62 = vld [vmem:[#allocation2 + $0x658] ss:$368 sps:$4 sm:$0xff]  }
 0x53d   :  { %v16848_v36 = vsel %vm16834_vm1, %v16749_v7, 0.0  ;;  %v20822_v53 = vld [vmem:[#allocation2 + $0x934] ss:$368 sps:$4 sm:$0xff]   ;;  %v20825_v52 = vld [vmem:[#allocation2 + $0x93c] ss:$368 sps:$4 sm:$0xff]  }
 0x53e   :  { %v16845_v44 = vadd.f32 %v16844_v29, %v16843_v33  ;;  %16628 = vst [vmem:[%s25586_s10 + $0x8] sm:$0xff] %v16246_v0  ;;  %14906 = vmatpush1.bf16.msra.mxu1 %v20796_v23  ;;  %14947 = vmatpush1.bf16.msra.mxu0 %v20799_v41  ;;  %v20820_v16 = vld [vmem:[#allocation2 + $0x930] ss:$368 sps:$4 sm:$0xff]   ;;  %v20823_v4 = vld [vmem:[#allocation2 + $0x938] ss:$368 sps:$4 sm:$0xff]  }
 0x53f   :  { %14973 = vmatprep.subr.bf16.mxu1 %v20804_v13  ;;  %15014 = vmatprep.subr.bf16.mxu0 %v20807_v15  ;;  %v20828_v6 = vld [vmem:[#allocation2 + $0xc14] ss:$368 sps:$4 sm:$0xff]   ;;  %v20831_v23 = vld [vmem:[#allocation2 + $0xc1c] ss:$368 sps:$4 sm:$0xff]   ;;  %v20826_v60 = vld [vmem:[#allocation2 + $0xc10] ss:$368 sps:$4 sm:$0xff]  }
 0x540   :  { %v16847_v39 = vadd.f32 %v16846_v1, %v16845_v44  ;;  %v25013_v24 = vld [vmem:[%s25585_s9 + $0x8] sm:$0xff]  ;;  %v20834_v13 = vld [vmem:[#allocation2 + $0xef4] ss:$368 sps:$4 sm:$0xff]   ;;  %v20832_v44 = vld [vmem:[#allocation2 + $0xef0] ss:$368 sps:$4 sm:$0xff]  }
 0x541   :  { %14924 = vmatmul.mubr.bf16.vlgmr.msra.gmra.mrb[124].mxu1 %v24896_v3  ;;  %14965 = vmatmul.mubr.bf16.vlgmr.msra.gmra.mrb[128].mxu0 %v24896_v3  ;;  %v20829_v41 = vld [vmem:[#allocation2 + $0xc18] ss:$368 sps:$4 sm:$0xff]   ;;  %v20837_v33 = vld [vmem:[#allocation2 + $0xefc] ss:$368 sps:$4 sm:$0xff]   ;;  %v10130_v29 = vrot.slane %v25013_v24, %v24927_v61  ;;  %v10138_v0 = vrot.slane %v25013_v24, %v24930_v45  ;;  %v10134_v15 = vrot.slane %v25013_v24, %v24938_v26  ;;  %v20840_v1 = vld [vmem:[#allocation2 + $0x11d4] ss:$368 sps:$4 sm:$0xff]  }
 0x542   :  { %v25005_v11 = vadd.f32 %v16848_v36, %v16847_v39  ;;  %14974 = vmatpush1.bf16.msra.mxu1 %v20802_v12  ;;  %15015 = vmatpush1.bf16.msra.mxu0 %v20805_v2  ;;  %v10142_v7 = vrot.slane %v25013_v24, %v24941_v35  ;;  %v20835_v12 = vld [vmem:[#allocation2 + $0xef8] ss:$368 sps:$4 sm:$0xff]   ;;  %v20843_v39 = vld [vmem:[#allocation2 + $0x11dc] ss:$368 sps:$4 sm:$0xff]  }
 0x543   :  { %14975 = vmatprep.subr.bf16.mxu1 %v20810_v46  ;;  %15016 = vmatprep.subr.bf16.mxu0 %v20813_v8 }
 0x544   :  { %15005 = vmatprep.mubr.bf16.mxu1 %v25712_v56  ;;  %15046 = vmatprep.mubr.bf16.mxu0 %v25712_v56 }
 0x546   :  { %14976 = vmatpush1.bf16.msra.mxu1 %v20808_v63  ;;  %15017 = vmatpush1.bf16.msra.mxu0 %v20811_v22 }
 0x547   :  { %14977 = vmatprep.subr.bf16.mxu1 %v20816_v48  ;;  %15018 = vmatprep.subr.bf16.mxu0 %v20819_v50 }
 0x54a   :  { %14978 = vmatpush1.bf16.msra.mxu1 %v20814_v21  ;;  %15019 = vmatpush1.bf16.msra.mxu0 %v20817_v62 }
 0x54b   :  { %14979 = vmatprep.subr.bf16.mxu1 %v20822_v53  ;;  %15020 = vmatprep.subr.bf16.mxu0 %v20825_v52  ;;  %v20838_v53 = vld [vmem:[#allocation2 + $0x11d0] ss:$368 sps:$4 sm:$0xff]  }
 0x54e   :  { %14980 = vmatpush1.bf16.msra.mxu1 %v20820_v16  ;;  %15021 = vmatpush1.bf16.msra.mxu0 %v20823_v4 }
 0x54f   :  { %14981 = vmatprep.subr.bf16.mxu1 %v20828_v6  ;;  %15022 = vmatprep.subr.bf16.mxu0 %v20831_v23  ;;  %v20841_v23 = vld [vmem:[#allocation2 + $0x11d8] ss:$368 sps:$4 sm:$0xff]  }
 0x552   :  { %14982 = vmatpush1.bf16.msra.mxu1 %v20826_v60  ;;  %15023 = vmatpush1.bf16.msra.mxu0 %v20829_v41  ;;  %v20846_v60 = vld [vmem:[#allocation2 + $0x14b4] ss:$368 sps:$4 sm:$0xff]  }
 0x553   :  { %14983 = vmatprep.subr.bf16.mxu1 %v20834_v13  ;;  %15024 = vmatprep.subr.bf16.mxu0 %v20837_v33 }
 0x554   :  { %v14433_v2 = vpop.f32.mrb[100].mxu1  ;;  %v14474_v46 = vpop.f32.mrb[104].mxu0 }
 0x555   :  { %v14434_v8 = vadd.f32 %v14433_v2, %v10130_v29  ;;  %v14475_v36 = vadd.f32 %v14474_v46, %v10138_v0  ;;  %v14435_v63 = vpop.f32.mrb[101].mxu1  ;;  %v14476_v22 = vpop.f32.mrb[105].mxu0  ;;  %v20849_v29 = vld [vmem:[#allocation2 + $0x14bc] ss:$368 sps:$4 sm:$0xff]   ;;  %v20847_v2 = vld [vmem:[#allocation2 + $0x14b8] ss:$368 sps:$4 sm:$0xff]  }
 0x556   :  { %v14436_v48 = vadd.f32 %v14435_v63, %v10134_v15  ;;  %v14477_v50 = vadd.f32 %v14476_v22, %v10142_v7  ;;  %v14437_v21 = vpop.f32.mrb[102].mxu1  ;;  %v14478_v62 = vpop.f32.mrb[106].mxu0  ;;  %14984 = vmatpush1.bf16.msra.mxu1 %v20832_v44  ;;  %15025 = vmatpush1.bf16.msra.mxu0 %v20835_v12  ;;  %v20844_v44 = vld [vmem:[#allocation2 + $0x14b0] ss:$368 sps:$4 sm:$0xff]  }
 0x557   :  { %v16658_v52 = vsub.f32 %v14434_v8, %v21875_v17  ;;  %v16660_v16 = vsub.f32 %v14475_v36, %v21881_v19  ;;  %v14438_v4 = vpop.f32.mrb[103].mxu1  ;;  %v14479_v6 = vpop.f32.mrb[107].mxu0  ;;  %14985 = vmatprep.subr.bf16.mxu1 %v20840_v1  ;;  %15026 = vmatprep.subr.bf16.mxu0 %v20843_v39  ;;  %v20850_v22 = vld [vmem:[#allocation2 + $0xa0] ss:$368 sps:$4 sm:$0xff]   ;;  %v20858_v21 = vld [vmem:[#allocation2 + $0x384] ss:$368 sps:$4 sm:$0xff]  }
 0x558   :  { %v16247_v41 = vcombine.low %v14434_v8, %v14436_v48  ;;  %v16659_v13 = vsub.f32 %v14436_v48, %v21900_v25  ;;  %v16248_v33 = vcombine.low %v14475_v36, %v14477_v50  ;;  %v16661_v15 = vsub.f32 %v14477_v50, %v21907_v27  ;;  %v20852_v25 = vld [vmem:[#allocation2 + $0xa4] ss:$368 sps:$4 sm:$0xff]   ;;  %v20855_v27 = vld [vmem:[#allocation2 + $0xac] ss:$368 sps:$4 sm:$0xff]   ;;  %v20853_v50 = vld [vmem:[#allocation2 + $0xa8] ss:$368 sps:$4 sm:$0xff]  }
 0x559   :  { %v16750_v0 = vmul.f32 %v16658_v52, %v16658_v52  ;;  %v16752_v1 = vmul.f32 %v16660_v16, %v16660_v16  ;;  %v20861_v62 = vld [vmem:[#allocation2 + $0x38c] ss:$368 sps:$4 sm:$0xff]   ;;  %v20856_v16 = vld [vmem:[#allocation2 + $0x380] ss:$368 sps:$4 sm:$0xff]   ;;  %v20859_v4 = vld [vmem:[#allocation2 + $0x388] ss:$368 sps:$4 sm:$0xff]  }
 0x55a   :  { %v16255_v7 = vrot.slane %v16247_v41, %v21741_v58  ;;  %v16751_v17 = vmul.f32 %v16659_v13, %v16659_v13  ;;  %v16262_v19 = vrot.slane %v16248_v33, %v21741_v58  ;;  %14986 = vmatpush1.bf16.msra.mxu1 %v20838_v53  ;;  %15027 = vmatpush1.bf16.msra.mxu0 %v20841_v23  ;;  %v20864_v6 = vld [vmem:[#allocation2 + $0x664] ss:$368 sps:$4 sm:$0xff]   ;;  %v20867_v23 = vld [vmem:[#allocation2 + $0x66c] ss:$368 sps:$4 sm:$0xff]   ;;  %v20865_v41 = vld [vmem:[#allocation2 + $0x668] ss:$368 sps:$4 sm:$0xff]  }
 0x55b   :  { %v16850_v12 = vsel %vm16834_vm1, %v16750_v0, 0.0  ;;  %14987 = vmatprep.subr.bf16.mxu1 %v20846_v60  ;;  %15028 = vmatprep.subr.bf16.mxu0 %v20849_v29  ;;  %v16753_v36 = vmul.f32 %v16661_v15, %v16661_v15  ;;  %v16854_v48 = vsel %vm16834_vm1, %v16752_v1, 0.0  ;;  %v20862_v60 = vld [vmem:[#allocation2 + $0x660] ss:$368 sps:$4 sm:$0xff]   ;;  %v20870_v13 = vld [vmem:[#allocation2 + $0x944] ss:$368 sps:$4 sm:$0xff]   ;;  %v10146_v1 = vrot.slane %v25013_v24, %v24971_v47 }
 0x55c   :  { %v16851_v46 = vadd.f32 %v16850_v12, %v25005_v11  ;;  %v16852_v39 = vsel %vm16834_vm1, %v16751_v17, 0.0  ;;  %v16263_v8 = vcombine.low %v16255_v7, %v16262_v19  ;;  %v20873_v33 = vld [vmem:[#allocation2 + $0x94c] ss:$368 sps:$4 sm:$0xff]   ;;  %v20868_v29 = vld [vmem:[#allocation2 + $0x940] ss:$368 sps:$4 sm:$0xff]  }
 0x55d   :  { %v16856_v53 = vsel %vm16834_vm1, %v16753_v36, 0.0  ;;  %v20871_v0 = vld [vmem:[#allocation2 + $0x948] ss:$368 sps:$4 sm:$0xff]   ;;  %v20876_v15 = vld [vmem:[#allocation2 + $0xc24] ss:$368 sps:$4 sm:$0xff]  }
 0x55e   :  { %v16853_v63 = vadd.f32 %v16852_v39, %v16851_v46  ;;  %16629 = vst [vmem:[%s25586_s10 + $0x10] sm:$0xff] %v16263_v8  ;;  %14988 = vmatpush1.bf16.msra.mxu1 %v20844_v44  ;;  %15029 = vmatpush1.bf16.msra.mxu0 %v20847_v2  ;;  %v20879_v7 = vld [vmem:[#allocation2 + $0xc2c] ss:$368 sps:$4 sm:$0xff]   ;;  %v20874_v17 = vld [vmem:[#allocation2 + $0xc20] ss:$368 sps:$4 sm:$0xff]   ;;  %v10154_v2 = vrot.slane %v25013_v24, %v24974_v20 }
 0x55f   :  { %15055 = vmatprep.subr.bf16.mxu1 %v20852_v25  ;;  %15096 = vmatprep.subr.bf16.mxu0 %v20855_v27  ;;  %v20877_v19 = vld [vmem:[#allocation2 + $0xc28] ss:$368 sps:$4 sm:$0xff]   ;;  %v20882_v44 = vld [vmem:[#allocation2 + $0xf04] ss:$368 sps:$4 sm:$0xff]   ;;  %v20885_v12 = vld [vmem:[#allocation2 + $0xf0c] ss:$368 sps:$4 sm:$0xff]   ;;  %v10150_v25 = vrot.slane %v25013_v24, %v24977_v10  ;;  %v10158_v46 = vrot.slane %v25013_v24, %v24980_v54 }
 0x560   :  { %v16855_v11 = vadd.f32 %v16854_v48, %v16853_v63  ;;  %v20880_v39 = vld [vmem:[#allocation2 + $0xf00] ss:$368 sps:$4 sm:$0xff]   ;;  %v20883_v8 = vld [vmem:[#allocation2 + $0xf08] ss:$368 sps:$4 sm:$0xff]   ;;  %v20888_v27 = vld [vmem:[#allocation2 + $0x11e4] ss:$368 sps:$4 sm:$0xff]  }
 0x561   :  { %15006 = vmatmul.mubr.bf16.vlgmr.msra.gmra.mrb[128].mxu1 %v24896_v3  ;;  %15047 = vmatmul.mubr.bf16.vlgmr.msra.gmra.mrb[132].mxu0 %v24896_v3 }
 0x562   :  { %v25038_v52 = vadd.f32 %v16856_v53, %v16855_v11  ;;  %15056 = vmatpush1.bf16.msra.mxu1 %v20850_v22  ;;  %15097 = vmatpush1.bf16.msra.mxu0 %v20853_v50  ;;  %v20891_v22 = vld [vmem:[#allocation2 + $0x11ec] ss:$368 sps:$4 sm:$0xff]  }
 0x563   :  { %15057 = vmatprep.subr.bf16.mxu1 %v20858_v21  ;;  %15098 = vmatprep.subr.bf16.mxu0 %v20861_v62 }
 0x564   :  { %15087 = vmatprep.mubr.bf16.mxu1 %v25712_v56  ;;  %15128 = vmatprep.mubr.bf16.mxu0 %v25712_v56 }
 0x566   :  { %15058 = vmatpush1.bf16.msra.mxu1 %v20856_v16  ;;  %15099 = vmatpush1.bf16.msra.mxu0 %v20859_v4 }
 0x567   :  { %15059 = vmatprep.subr.bf16.mxu1 %v20864_v6  ;;  %15100 = vmatprep.subr.bf16.mxu0 %v20867_v23  ;;  %v20886_v6 = vld [vmem:[#allocation2 + $0x11e0] ss:$368 sps:$4 sm:$0xff]  }
 0x56a   :  { %15060 = vmatpush1.bf16.msra.mxu1 %v20862_v60  ;;  %15101 = vmatpush1.bf16.msra.mxu0 %v20865_v41 }
 0x56b   :  { %15061 = vmatprep.subr.bf16.mxu1 %v20870_v13  ;;  %15102 = vmatprep.subr.bf16.mxu0 %v20873_v33  ;;  %v20889_v13 = vld [vmem:[#allocation2 + $0x11e8] ss:$368 sps:$4 sm:$0xff]   ;;  %v20894_v33 = vld [vmem:[#allocation2 + $0x14c4] ss:$368 sps:$4 sm:$0xff]  }
 0x56e   :  { %15062 = vmatpush1.bf16.msra.mxu1 %v20868_v29  ;;  %15103 = vmatpush1.bf16.msra.mxu0 %v20871_v0 }
 0x56f   :  { %15063 = vmatprep.subr.bf16.mxu1 %v20876_v15  ;;  %15104 = vmatprep.subr.bf16.mxu0 %v20879_v7  ;;  %v20897_v7 = vld [vmem:[#allocation2 + $0x14cc] ss:$368 sps:$4 sm:$0xff]  }
 0x572   :  { %15064 = vmatpush1.bf16.msra.mxu1 %v20874_v17  ;;  %15105 = vmatpush1.bf16.msra.mxu0 %v20877_v19 }
 0x573   :  { %15065 = vmatprep.subr.bf16.mxu1 %v20882_v44  ;;  %15106 = vmatprep.subr.bf16.mxu0 %v20885_v12  ;;  %v20892_v12 = vld [vmem:[#allocation2 + $0x14c0] ss:$368 sps:$4 sm:$0xff]  }
 0x574   :  { %v14515_v36 = vpop.f32.mrb[104].mxu1  ;;  %v14556_v63 = vpop.f32.mrb[108].mxu0 }
 0x575   :  { %v14516_v48 = vadd.f32 %v14515_v36, %v10146_v1  ;;  %v14557_v50 = vadd.f32 %v14556_v63, %v10154_v2  ;;  %v14517_v21 = vpop.f32.mrb[105].mxu1  ;;  %v14558_v11 = vpop.f32.mrb[109].mxu0  ;;  %v20898_v63 = vld [vmem:[#allocation2 + $0xb0] ss:$368 sps:$4 sm:$0xff]  }
 0x576   :  { %v14518_v62 = vadd.f32 %v14517_v21, %v10150_v25  ;;  %v14559_v53 = vadd.f32 %v14558_v11, %v10158_v46  ;;  %v14519_v16 = vpop.f32.mrb[106].mxu1  ;;  %v14560_v4 = vpop.f32.mrb[110].mxu0  ;;  %15066 = vmatpush1.bf16.msra.mxu1 %v20880_v39  ;;  %15107 = vmatpush1.bf16.msra.mxu0 %v20883_v8  ;;  %v20895_v25 = vld [vmem:[#allocation2 + $0x14c8] ss:$368 sps:$4 sm:$0xff]   ;;  %v20909_v21 = vld [vmem:[#allocation2 + $0x39c] ss:$368 sps:$4 sm:$0xff]  }
 0x577   :  { %v16662_v24 = vsub.f32 %v14516_v48, %v22015_v32  ;;  %v16664_v23 = vsub.f32 %v14557_v50, %v22021_v34  ;;  %v14520_v60 = vpop.f32.mrb[107].mxu1  ;;  %v14561_v41 = vpop.f32.mrb[111].mxu0  ;;  %15067 = vmatprep.subr.bf16.mxu1 %v20888_v27  ;;  %15108 = vmatprep.subr.bf16.mxu0 %v20891_v22  ;;  %v20907_v16 = vld [vmem:[#allocation2 + $0x398] ss:$368 sps:$4 sm:$0xff]   ;;  %v20912_v4 = vld [vmem:[#allocation2 + $0x674] ss:$368 sps:$4 sm:$0xff]  }
 0x578   :  { %v16264_v29 = vcombine.low %v14516_v48, %v14518_v62  ;;  %v16663_v0 = vsub.f32 %v14518_v62, %v22040_v40  ;;  %v16265_v15 = vcombine.low %v14557_v50, %v14559_v53  ;;  %v16665_v19 = vsub.f32 %v14559_v53, %v22047_v42  ;;  %v20900_v40 = vld [vmem:[#allocation2 + $0xb4] ss:$368 sps:$4 sm:$0xff]   ;;  %v20903_v42 = vld [vmem:[#allocation2 + $0xbc] ss:$368 sps:$4 sm:$0xff]   ;;  %v20901_v48 = vld [vmem:[#allocation2 + $0xb8] ss:$368 sps:$4 sm:$0xff]  }
 0x579   :  { %v16754_v17 = vmul.f32 %v16662_v24, %v16662_v24  ;;  %v16756_v2 = vmul.f32 %v16664_v23, %v16664_v23  ;;  %v20906_v50 = vld [vmem:[#allocation2 + $0x394] ss:$368 sps:$4 sm:$0xff]   ;;  %v20904_v53 = vld [vmem:[#allocation2 + $0x390] ss:$368 sps:$4 sm:$0xff]   ;;  %v20913_v23 = vld [vmem:[#allocation2 + $0x678] ss:$368 sps:$4 sm:$0xff]  }
 0x57a   :  { %v16272_v44 = vrot.slane %v16264_v29, %v21741_v58  ;;  %v16755_v32 = vmul.f32 %v16663_v0, %v16663_v0  ;;  %v16279_v34 = vrot.slane %v16265_v15, %v21741_v58  ;;  %15068 = vmatpush1.bf16.msra.mxu1 %v20886_v6  ;;  %15109 = vmatpush1.bf16.msra.mxu0 %v20889_v13  ;;  %v20915_v6 = vld [vmem:[#allocation2 + $0x67c] ss:$368 sps:$4 sm:$0xff]   ;;  %v20910_v24 = vld [vmem:[#allocation2 + $0x670] ss:$368 sps:$4 sm:$0xff]   ;;  %v20918_v60 = vld [vmem:[#allocation2 + $0x954] ss:$368 sps:$4 sm:$0xff]  }
 0x57b   :  { %v16858_v1 = vsel %vm16834_vm1, %v16754_v17, 0.0  ;;  %15069 = vmatprep.subr.bf16.mxu1 %v20894_v33  ;;  %15110 = vmatprep.subr.bf16.mxu0 %v20897_v7  ;;  %v16757_v27 = vmul.f32 %v16665_v19, %v16665_v19  ;;  %v16862_v22 = vsel %vm16834_vm1, %v16756_v2, 0.0  ;;  %v20921_v41 = vld [vmem:[#allocation2 + $0x95c] ss:$368 sps:$4 sm:$0xff]   ;;  %v20916_v13 = vld [vmem:[#allocation2 + $0x950] ss:$368 sps:$4 sm:$0xff]  }
 0x57c   :  { %v16859_v46 = vadd.f32 %v16858_v1, %v25038_v52  ;;  %v16860_v39 = vsel %vm16834_vm1, %v16755_v32, 0.0  ;;  %v16280_v8 = vcombine.low %v16272_v44, %v16279_v34  ;;  %v20919_v33 = vld [vmem:[#allocation2 + $0x958] ss:$368 sps:$4 sm:$0xff]   ;;  %v20924_v29 = vld [vmem:[#allocation2 + $0xc34] ss:$368 sps:$4 sm:$0xff]  }
 0x57d   :  { %v16864_v11 = vsel %vm16834_vm1, %v16757_v27, 0.0  ;;  %v20927_v0 = vld [vmem:[#allocation2 + $0xc3c] ss:$368 sps:$4 sm:$0xff]   ;;  %v20922_v15 = vld [vmem:[#allocation2 + $0xc30] ss:$368 sps:$4 sm:$0xff]  }
 0x57e   :  { %v16861_v36 = vadd.f32 %v16860_v39, %v16859_v46  ;;  %16630 = vst [vmem:[%s25586_s10 + $0x18] sm:$0xff] %v16280_v8  ;;  %15070 = vmatpush1.bf16.msra.mxu1 %v20892_v12  ;;  %15111 = vmatpush1.bf16.msra.mxu0 %v20895_v25  ;;  %v25074_v7 = vld [vmem:[%s25585_s9 + $0x10] sm:$0xff]  ;;  %v20925_v17 = vld [vmem:[#allocation2 + $0xc38] ss:$368 sps:$4 sm:$0xff]   ;;  %v20933_v44 = vld [vmem:[#allocation2 + $0xf1c] ss:$368 sps:$4 sm:$0xff]  }
 0x57f   :  { %15137 = vmatprep.subr.bf16.mxu1 %v20900_v40  ;;  %15178 = vmatprep.subr.bf16.mxu0 %v20903_v42  ;;  %v20930_v19 = vld [vmem:[#allocation2 + $0xf14] ss:$368 sps:$4 sm:$0xff]   ;;  %v10162_v32 = vrot.slane %v25074_v7, %v24927_v61  ;;  %v10170_v34 = vrot.slane %v25074_v7, %v24930_v45  ;;  %v10166_v12 = vrot.slane %v25074_v7, %v24938_v26  ;;  %v20928_v2 = vld [vmem:[#allocation2 + $0xf10] ss:$368 sps:$4 sm:$0xff]   ;;  %v20931_v25 = vld [vmem:[#allocation2 + $0xf18] ss:$368 sps:$4 sm:$0xff]  }
 0x580   :  { %v16863_v52 = vadd.f32 %v16862_v22, %v16861_v36  ;;  %v10174_v1 = vrot.slane %v25074_v7, %v24941_v35  ;;  %v20936_v40 = vld [vmem:[#allocation2 + $0x11f4] ss:$368 sps:$4 sm:$0xff]   ;;  %v20939_v8 = vld [vmem:[#allocation2 + $0x11fc] ss:$368 sps:$4 sm:$0xff]  }
 0x581   :  { %15088 = vmatmul.mubr.bf16.vlgmr.msra.gmra.mrb[132].mxu1 %v24896_v3  ;;  %15129 = vmatmul.mubr.bf16.vlgmr.msra.gmra.mrb[136].mxu0 %v24896_v3 }
 0x582   :  { %v25066_v62 = vadd.f32 %v16864_v11, %v16863_v52  ;;  %15138 = vmatpush1.bf16.msra.mxu1 %v20898_v63  ;;  %15179 = vmatpush1.bf16.msra.mxu0 %v20901_v48 }
 0x583   :  { %15139 = vmatprep.subr.bf16.mxu1 %v20906_v50  ;;  %15180 = vmatprep.subr.bf16.mxu0 %v20909_v21  ;;  %v20934_v21 = vld [vmem:[#allocation2 + $0x11f0] ss:$368 sps:$4 sm:$0xff]  }
 0x584   :  { %15169 = vmatprep.mubr.bf16.mxu1 %v25712_v56  ;;  %15210 = vmatprep.mubr.bf16.mxu0 %v25712_v56 }
 0x586   :  { %15140 = vmatpush1.bf16.msra.mxu1 %v20904_v53  ;;  %15181 = vmatpush1.bf16.msra.mxu0 %v20907_v16 }
 0x587   :  { %15141 = vmatprep.subr.bf16.mxu1 %v20912_v4  ;;  %15182 = vmatprep.subr.bf16.mxu0 %v20915_v6  ;;  %v20937_v6 = vld [vmem:[#allocation2 + $0x11f8] ss:$368 sps:$4 sm:$0xff]  }
 0x58a   :  { %15142 = vmatpush1.bf16.msra.mxu1 %v20910_v24  ;;  %15183 = vmatpush1.bf16.msra.mxu0 %v20913_v23  ;;  %v20942_v24 = vld [vmem:[#allocation2 + $0x14d4] ss:$368 sps:$4 sm:$0xff]  }
 0x58b   :  { %15143 = vmatprep.subr.bf16.mxu1 %v20918_v60  ;;  %15184 = vmatprep.subr.bf16.mxu0 %v20921_v41 }
 0x58e   :  { %15144 = vmatpush1.bf16.msra.mxu1 %v20916_v13  ;;  %15185 = vmatpush1.bf16.msra.mxu0 %v20919_v33  ;;  %v20945_v13 = vld [vmem:[#allocation2 + $0x14dc] ss:$368 sps:$4 sm:$0xff]  }
 0x58f   :  { %15145 = vmatprep.subr.bf16.mxu1 %v20924_v29  ;;  %15186 = vmatprep.subr.bf16.mxu0 %v20927_v0 }
 0x592   :  { %15146 = vmatpush1.bf16.msra.mxu1 %v20922_v15  ;;  %15187 = vmatpush1.bf16.msra.mxu0 %v20925_v17  ;;  %v20940_v15 = vld [vmem:[#allocation2 + $0x14d0] ss:$368 sps:$4 sm:$0xff]  }
 0x593   :  { %15147 = vmatprep.subr.bf16.mxu1 %v20930_v19  ;;  %15188 = vmatprep.subr.bf16.mxu0 %v20933_v44  ;;  %v20943_v44 = vld [vmem:[#allocation2 + $0x14d8] ss:$368 sps:$4 sm:$0xff]  }
 0x594   :  { %v14597_v46 = vpop.f32.mrb[108].mxu1  ;;  %v14638_v39 = vpop.f32.mrb[112].mxu0 }
 0x595   :  { %v14598_v42 = vadd.f32 %v14597_v46, %v10162_v32  ;;  %v14639_v27 = vadd.f32 %v14638_v39, %v10170_v34  ;;  %v14599_v36 = vpop.f32.mrb[109].mxu1  ;;  %v14640_v63 = vpop.f32.mrb[113].mxu0  ;;  %v20949_v46 = vld [vmem:[#allocation2 + $0xc8] ss:$368 sps:$4 sm:$0xff]   ;;  %v20954_v39 = vld [vmem:[#allocation2 + $0x3a4] ss:$368 sps:$4 sm:$0xff]  }
 0x596   :  { %v14600_v22 = vadd.f32 %v14599_v36, %v10166_v12  ;;  %v14641_v48 = vadd.f32 %v14640_v63, %v10174_v1  ;;  %v14601_v50 = vpop.f32.mrb[110].mxu1  ;;  %v14642_v52 = vpop.f32.mrb[114].mxu0  ;;  %15148 = vmatpush1.bf16.msra.mxu1 %v20928_v2  ;;  %15189 = vmatpush1.bf16.msra.mxu0 %v20931_v25  ;;  %v20946_v25 = vld [vmem:[#allocation2 + $0xc0] ss:$368 sps:$4 sm:$0xff]   ;;  %v20955_v63 = vld [vmem:[#allocation2 + $0x3a8] ss:$368 sps:$4 sm:$0xff]  }
 0x597   :  { %v16666_v11 = vsub.f32 %v14598_v42, %v22155_v49  ;;  %v16668_v53 = vsub.f32 %v14639_v27, %v22161_v51  ;;  %v14602_v16 = vpop.f32.mrb[111].mxu1  ;;  %v14643_v4 = vpop.f32.mrb[115].mxu0  ;;  %15149 = vmatprep.subr.bf16.mxu1 %v20936_v40  ;;  %15190 = vmatprep.subr.bf16.mxu0 %v20939_v8  ;;  %v20957_v8 = vld [vmem:[#allocation2 + $0x3ac] ss:$368 sps:$4 sm:$0xff]   ;;  %v20952_v36 = vld [vmem:[#allocation2 + $0x3a0] ss:$368 sps:$4 sm:$0xff]  }
 0x598   :  { %v16281_v23 = vcombine.low %v14598_v42, %v14600_v22  ;;  %v16667_v60 = vsub.f32 %v14600_v22, %v22180_v57  ;;  %v16282_v41 = vcombine.low %v14639_v27, %v14641_v48  ;;  %v16669_v29 = vsub.f32 %v14641_v48, %v22187_v59  ;;  %v20948_v57 = vld [vmem:[#allocation2 + $0xc4] ss:$368 sps:$4 sm:$0xff]   ;;  %v20951_v59 = vld [vmem:[#allocation2 + $0xcc] ss:$368 sps:$4 sm:$0xff]   ;;  %v20958_v50 = vld [vmem:[#allocation2 + $0x680] ss:$368 sps:$4 sm:$0xff]  }
 0x599   :  { %v16758_v33 = vmul.f32 %v16666_v11, %v16666_v11  ;;  %v16760_v19 = vmul.f32 %v16668_v53, %v16668_v53  ;;  %v20960_v22 = vld [vmem:[#allocation2 + $0x684] ss:$368 sps:$4 sm:$0xff]   ;;  %v20963_v48 = vld [vmem:[#allocation2 + $0x68c] ss:$368 sps:$4 sm:$0xff]   ;;  %v20961_v52 = vld [vmem:[#allocation2 + $0x688] ss:$368 sps:$4 sm:$0xff]  }
 0x59a   :  { %v16289_v0 = vrot.slane %v16281_v23, %v21741_v58  ;;  %v16759_v49 = vmul.f32 %v16667_v60, %v16667_v60  ;;  %v16296_v51 = vrot.slane %v16282_v41, %v21741_v58  ;;  %15150 = vmatpush1.bf16.msra.mxu1 %v20934_v21  ;;  %15191 = vmatpush1.bf16.msra.mxu0 %v20937_v6  ;;  %v20966_v21 = vld [vmem:[#allocation2 + $0x964] ss:$368 sps:$4 sm:$0xff]   ;;  %v20969_v11 = vld [vmem:[#allocation2 + $0x96c] ss:$368 sps:$4 sm:$0xff]   ;;  %v20964_v53 = vld [vmem:[#allocation2 + $0x960] ss:$368 sps:$4 sm:$0xff]  }
 0x59b   :  { %v16866_v17 = vsel %vm16834_vm1, %v16758_v33, 0.0  ;;  %15151 = vmatprep.subr.bf16.mxu1 %v20942_v24  ;;  %15192 = vmatprep.subr.bf16.mxu0 %v20945_v13  ;;  %v16761_v1 = vmul.f32 %v16669_v29, %v16669_v29  ;;  %v16870_v40 = vsel %vm16834_vm1, %v16760_v19, 0.0  ;;  %v20967_v16 = vld [vmem:[#allocation2 + $0x968] ss:$368 sps:$4 sm:$0xff]   ;;  %v20972_v4 = vld [vmem:[#allocation2 + $0xc44] ss:$368 sps:$4 sm:$0xff]   ;;  %v10178_v13 = vrot.slane %v25074_v7, %v24971_v47 }
 0x59c   :  { %v16867_v32 = vadd.f32 %v16866_v17, %v25066_v62  ;;  %v16868_v34 = vsel %vm16834_vm1, %v16759_v49, 0.0  ;;  %v16297_v12 = vcombine.low %v16289_v0, %v16296_v51  ;;  %v20975_v6 = vld [vmem:[#allocation2 + $0xc4c] ss:$368 sps:$4 sm:$0xff]   ;;  %v20970_v24 = vld [vmem:[#allocation2 + $0xc40] ss:$368 sps:$4 sm:$0xff]   ;;  %v10186_v33 = vrot.slane %v25074_v7, %v24974_v20 }
 0x59d   :  { %v16872_v42 = vsel %vm16834_vm1, %v16761_v1, 0.0  ;;  %v20973_v23 = vld [vmem:[#allocation2 + $0xc48] ss:$368 sps:$4 sm:$0xff]   ;;  %v20978_v60 = vld [vmem:[#allocation2 + $0xf24] ss:$368 sps:$4 sm:$0xff]   ;;  %v10182_v29 = vrot.slane %v25074_v7, %v24977_v10  ;;  %v10190_v0 = vrot.slane %v25074_v7, %v24980_v54 }
 0x59e   :  { %v16869_v2 = vadd.f32 %v16868_v34, %v16867_v32  ;;  %16631 = vst [vmem:[%s25586_s10 + $0x20] sm:$0xff] %v16297_v12  ;;  %15152 = vmatpush1.bf16.msra.mxu1 %v20940_v15  ;;  %15193 = vmatpush1.bf16.msra.mxu0 %v20943_v44  ;;  %v20981_v41 = vld [vmem:[#allocation2 + $0xf2c] ss:$368 sps:$4 sm:$0xff]   ;;  %v20976_v49 = vld [vmem:[#allocation2 + $0xf20] ss:$368 sps:$4 sm:$0xff]  }
 0x59f   :  { %15219 = vmatprep.subr.bf16.mxu1 %v20948_v57  ;;  %15260 = vmatprep.subr.bf16.mxu0 %v20951_v59  ;;  %v20979_v51 = vld [vmem:[#allocation2 + $0xf28] ss:$368 sps:$4 sm:$0xff]   ;;  %v20984_v15 = vld [vmem:[#allocation2 + $0x1204] ss:$368 sps:$4 sm:$0xff]   ;;  %v20987_v44 = vld [vmem:[#allocation2 + $0x120c] ss:$368 sps:$4 sm:$0xff]  }
 0x5a0   :  { %v16871_v62 = vadd.f32 %v16870_v40, %v16869_v2  ;;  %v20982_v40 = vld [vmem:[#allocation2 + $0x1200] ss:$368 sps:$4 sm:$0xff]  }
 0x5a1   :  { %15170 = vmatmul.mubr.bf16.vlgmr.msra.gmra.mrb[136].mxu1 %v24896_v3  ;;  %15211 = vmatmul.mubr.bf16.vlgmr.msra.gmra.mrb[140].mxu0 %v24896_v3 }
 0x5a2   :  { %v25099_v27 = vadd.f32 %v16872_v42, %v16871_v62  ;;  %15220 = vmatpush1.bf16.msra.mxu1 %v20946_v25  ;;  %15261 = vmatpush1.bf16.msra.mxu0 %v20949_v46  ;;  %v20990_v42 = vld [vmem:[#allocation2 + $0x14e4] ss:$368 sps:$4 sm:$0xff]  }
 0x5a3   :  { %15221 = vmatprep.subr.bf16.mxu1 %v20954_v39  ;;  %15262 = vmatprep.subr.bf16.mxu0 %v20957_v8  ;;  %v20985_v8 = vld [vmem:[#allocation2 + $0x1208] ss:$368 sps:$4 sm:$0xff]  }
 0x5a4   :  { %15251 = vmatprep.mubr.bf16.mxu1 %v25712_v56  ;;  %15292 = vmatprep.mubr.bf16.mxu0 %v25712_v56 }
 0x5a6   :  { %15222 = vmatpush1.bf16.msra.mxu1 %v20952_v36  ;;  %15263 = vmatpush1.bf16.msra.mxu0 %v20955_v63 }
 0x5a7   :  { %15223 = vmatprep.subr.bf16.mxu1 %v20960_v22  ;;  %15264 = vmatprep.subr.bf16.mxu0 %v20963_v48  ;;  %v20993_v48 = vld [vmem:[#allocation2 + $0x14ec] ss:$368 sps:$4 sm:$0xff]  }
 0x5aa   :  { %15224 = vmatpush1.bf16.msra.mxu1 %v20958_v50  ;;  %15265 = vmatpush1.bf16.msra.mxu0 %v20961_v52 }
 0x5ab   :  { %15225 = vmatprep.subr.bf16.mxu1 %v20966_v21  ;;  %15266 = vmatprep.subr.bf16.mxu0 %v20969_v11  ;;  %v20988_v11 = vld [vmem:[#allocation2 + $0x14e0] ss:$368 sps:$4 sm:$0xff]  }
 0x5ae   :  { %15226 = vmatpush1.bf16.msra.mxu1 %v20964_v53  ;;  %15267 = vmatpush1.bf16.msra.mxu0 %v20967_v16 }
 0x5af   :  { %15227 = vmatprep.subr.bf16.mxu1 %v20972_v4  ;;  %15268 = vmatprep.subr.bf16.mxu0 %v20975_v6  ;;  %v20991_v4 = vld [vmem:[#allocation2 + $0x14e8] ss:$368 sps:$4 sm:$0xff]  }
 0x5b2   :  { %15228 = vmatpush1.bf16.msra.mxu1 %v20970_v24  ;;  %15269 = vmatpush1.bf16.msra.mxu0 %v20973_v23 }
 0x5b3   :  { %15229 = vmatprep.subr.bf16.mxu1 %v20978_v60  ;;  %15270 = vmatprep.subr.bf16.mxu0 %v20981_v41 }
 0x5b4   :  { %v14679_v17 = vpop.f32.mrb[112].mxu1  ;;  %v14720_v19 = vpop.f32.mrb[116].mxu0 }
 0x5b5   :  { %v14680_v57 = vadd.f32 %v14679_v17, %v10178_v13  ;;  %v14721_v32 = vadd.f32 %v14720_v19, %v10186_v33  ;;  %v14681_v34 = vpop.f32.mrb[113].mxu1  ;;  %v14722_v12 = vpop.f32.mrb[117].mxu0  ;;  %v20994_v13 = vld [vmem:[#allocation2 + $0xd0] ss:$368 sps:$4 sm:$0xff]   ;;  %v21003_v19 = vld [vmem:[#allocation2 + $0x3b8] ss:$368 sps:$4 sm:$0xff]  }
 0x5b6   :  { %v14682_v59 = vadd.f32 %v14681_v34, %v10182_v29  ;;  %v14723_v1 = vadd.f32 %v14722_v12, %v10190_v0  ;;  %v14683_v2 = vpop.f32.mrb[114].mxu1  ;;  %v14724_v25 = vpop.f32.mrb[118].mxu0  ;;  %15230 = vmatpush1.bf16.msra.mxu1 %v20976_v49  ;;  %15271 = vmatpush1.bf16.msra.mxu0 %v20979_v51  ;;  %v20997_v29 = vld [vmem:[#allocation2 + $0xd8] ss:$368 sps:$4 sm:$0xff]   ;;  %v21002_v0 = vld [vmem:[#allocation2 + $0x3b4] ss:$368 sps:$4 sm:$0xff]  }
 0x5b7   :  { %v16670_v7 = vsub.f32 %v14680_v57, %v22297_v30  ;;  %v16672_v46 = vsub.f32 %v14721_v32, %v22303_v31  ;;  %v14684_v39 = vpop.f32.mrb[115].mxu1  ;;  %v14725_v62 = vpop.f32.mrb[119].mxu0  ;;  %15231 = vmatprep.subr.bf16.mxu1 %v20984_v15  ;;  %15272 = vmatprep.subr.bf16.mxu0 %v20987_v44  ;;  %v21005_v49 = vld [vmem:[#allocation2 + $0x3bc] ss:$368 sps:$4 sm:$0xff]   ;;  %v21000_v17 = vld [vmem:[#allocation2 + $0x3b0] ss:$368 sps:$4 sm:$0xff]  }
 0x5b8   :  { %v16298_v36 = vcombine.low %v14680_v57, %v14682_v59  ;;  %v16671_v63 = vsub.f32 %v14682_v59, %v22322_v43  ;;  %v16299_v22 = vcombine.low %v14721_v32, %v14723_v1  ;;  %v16673_v52 = vsub.f32 %v14723_v1, %v22329_v5  ;;  %v20996_v43 = vld [vmem:[#allocation2 + $0xd4] ss:$368 sps:$4 sm:$0xff]   ;;  %v20999_v5 = vld [vmem:[#allocation2 + $0xdc] ss:$368 sps:$4 sm:$0xff]   ;;  %v21006_v32 = vld [vmem:[#allocation2 + $0x690] ss:$368 sps:$4 sm:$0xff]  }
 0x5b9   :  { %v16762_v50 = vmul.f32 %v16670_v7, %v16670_v7  ;;  %v16764_v16 = vmul.f32 %v16672_v46, %v16672_v46  ;;  %v21008_v44 = vld [vmem:[#allocation2 + $0x694] ss:$368 sps:$4 sm:$0xff]   ;;  %v21011_v57 = vld [vmem:[#allocation2 + $0x69c] ss:$368 sps:$4 sm:$0xff]   ;;  %v21009_v34 = vld [vmem:[#allocation2 + $0x698] ss:$368 sps:$4 sm:$0xff]  }
 0x5ba   :  { %v16306_v21 = vrot.slane %v16298_v36, %v21741_v58  ;;  %v16763_v30 = vmul.f32 %v16671_v63, %v16671_v63  ;;  %v16313_v31 = vrot.slane %v16299_v22, %v21741_v58  ;;  %15232 = vmatpush1.bf16.msra.mxu1 %v20982_v40  ;;  %15273 = vmatpush1.bf16.msra.mxu0 %v20985_v8  ;;  %v21014_v12 = vld [vmem:[#allocation2 + $0x974] ss:$368 sps:$4 sm:$0xff]   ;;  %v21017_v59 = vld [vmem:[#allocation2 + $0x97c] ss:$368 sps:$4 sm:$0xff]   ;;  %v21012_v1 = vld [vmem:[#allocation2 + $0x970] ss:$368 sps:$4 sm:$0xff]  }
 0x5bb   :  { %v16874_v53 = vsel %vm16834_vm1, %v16762_v50, 0.0  ;;  %15233 = vmatprep.subr.bf16.mxu1 %v20990_v42  ;;  %15274 = vmatprep.subr.bf16.mxu0 %v20993_v48  ;;  %v16765_v60 = vmul.f32 %v16673_v52, %v16673_v52  ;;  %v16878_v33 = vsel %vm16834_vm1, %v16764_v16, 0.0  ;;  %v21015_v2 = vld [vmem:[#allocation2 + $0x978] ss:$368 sps:$4 sm:$0xff]   ;;  %v21020_v25 = vld [vmem:[#allocation2 + $0xc54] ss:$368 sps:$4 sm:$0xff]  }
 0x5bc   :  { %v16875_v6 = vadd.f32 %v16874_v53, %v25099_v27  ;;  %v16876_v24 = vsel %vm16834_vm1, %v16763_v30, 0.0  ;;  %v16314_v23 = vcombine.low %v16306_v21, %v16313_v31  ;;  %v21023_v40 = vld [vmem:[#allocation2 + $0xc5c] ss:$368 sps:$4 sm:$0xff]   ;;  %v21018_v7 = vld [vmem:[#allocation2 + $0xc50] ss:$368 sps:$4 sm:$0xff]  }
 0x5bd   :  { %v16880_v51 = vsel %vm16834_vm1, %v16765_v60, 0.0  ;;  %v25135_v46 = vld [vmem:[%s25585_s9 + $0x18] sm:$0xff]  ;;  %v21026_v62 = vld [vmem:[#allocation2 + $0xf34] ss:$368 sps:$4 sm:$0xff]   ;;  %v21024_v48 = vld [vmem:[#allocation2 + $0xf30] ss:$368 sps:$4 sm:$0xff]  }
 0x5be   :  { %v16877_v41 = vadd.f32 %v16876_v24, %v16875_v6  ;;  %16632 = vst [vmem:[%s25586_s10 + $0x28] sm:$0xff] %v16314_v23  ;;  %15234 = vmatpush1.bf16.msra.mxu1 %v20988_v11  ;;  %15275 = vmatpush1.bf16.msra.mxu0 %v20991_v4  ;;  %v21021_v39 = vld [vmem:[#allocation2 + $0xc58] ss:$368 sps:$4 sm:$0xff]   ;;  %v21029_v8 = vld [vmem:[#allocation2 + $0xf3c] ss:$368 sps:$4 sm:$0xff]   ;;  %v10194_v42 = vrot.slane %v25135_v46, %v24927_v61 }
 0x5bf   :  { %15301 = vmatprep.subr.bf16.mxu1 %v20996_v43  ;;  %15342 = vmatprep.subr.bf16.mxu0 %v20999_v5  ;;  %v10202_v36 = vrot.slane %v25135_v46, %v24930_v45  ;;  %v10198_v63 = vrot.slane %v25135_v46, %v24938_v26  ;;  %v10206_v22 = vrot.slane %v25135_v46, %v24941_v35  ;;  %v21027_v50 = vld [vmem:[#allocation2 + $0xf38] ss:$368 sps:$4 sm:$0xff]   ;;  %v21032_v52 = vld [vmem:[#allocation2 + $0x1214] ss:$368 sps:$4 sm:$0xff]   ;;  %v21035_v31 = vld [vmem:[#allocation2 + $0x121c] ss:$368 sps:$4 sm:$0xff]  }
 0x5c0   :  { %v16879_v27 = vadd.f32 %v16878_v33, %v16877_v41  ;;  %v21030_v5 = vld [vmem:[#allocation2 + $0x1210] ss:$368 sps:$4 sm:$0xff]  }
 0x5c1   :  { %15252 = vmatmul.mubr.bf16.vlgmr.msra.gmra.mrb[140].mxu1 %v24896_v3  ;;  %15293 = vmatmul.mubr.bf16.vlgmr.msra.gmra.mrb[144].mxu0 %v24896_v3 }
 0x5c2   :  { %v25127_v15 = vadd.f32 %v16880_v51, %v16879_v27  ;;  %15302 = vmatpush1.bf16.msra.mxu1 %v20994_v13  ;;  %15343 = vmatpush1.bf16.msra.mxu0 %v20997_v29  ;;  %v21033_v29 = vld [vmem:[#allocation2 + $0x1218] ss:$368 sps:$4 sm:$0xff]  }
 0x5c3   :  { %15303 = vmatprep.subr.bf16.mxu1 %v21002_v0  ;;  %15344 = vmatprep.subr.bf16.mxu0 %v21005_v49  ;;  %v21038_v0 = vld [vmem:[#allocation2 + $0x14f4] ss:$368 sps:$4 sm:$0xff]  }
 0x5c4   :  { %15333 = vmatprep.mubr.bf16.mxu1 %v25712_v56  ;;  %15374 = vmatprep.mubr.bf16.mxu0 %v25712_v56 }
 0x5c6   :  { %15304 = vmatpush1.bf16.msra.mxu1 %v21000_v17  ;;  %15345 = vmatpush1.bf16.msra.mxu0 %v21003_v19  ;;  %v21041_v17 = vld [vmem:[#allocation2 + $0x14fc] ss:$368 sps:$4 sm:$0xff]  }
 0x5c7   :  { %15305 = vmatprep.subr.bf16.mxu1 %v21008_v44  ;;  %15346 = vmatprep.subr.bf16.mxu0 %v21011_v57 }
 0x5ca   :  { %15306 = vmatpush1.bf16.msra.mxu1 %v21006_v32  ;;  %15347 = vmatpush1.bf16.msra.mxu0 %v21009_v34  ;;  %v21036_v32 = vld [vmem:[#allocation2 + $0x14f0] ss:$368 sps:$4 sm:$0xff]  }
 0x5cb   :  { %15307 = vmatprep.subr.bf16.mxu1 %v21014_v12  ;;  %15348 = vmatprep.subr.bf16.mxu0 %v21017_v59  ;;  %v21039_v59 = vld [vmem:[#allocation2 + $0x14f8] ss:$368 sps:$4 sm:$0xff]  }
 0x5ce   :  { %15308 = vmatpush1.bf16.msra.mxu1 %v21012_v1  ;;  %15349 = vmatpush1.bf16.msra.mxu0 %v21015_v2 }
 0x5cf   :  { %15309 = vmatprep.subr.bf16.mxu1 %v21020_v25  ;;  %15350 = vmatprep.subr.bf16.mxu0 %v21023_v40 }
 0x5d2   :  { %15310 = vmatpush1.bf16.msra.mxu1 %v21018_v7  ;;  %15351 = vmatpush1.bf16.msra.mxu0 %v21021_v39  ;;  %v21042_v39 = vld [vmem:[#allocation2 + $0xe0] ss:$368 sps:$4 sm:$0xff]  }
 0x5d3   :  { %15311 = vmatprep.subr.bf16.mxu1 %v21026_v62  ;;  %15352 = vmatprep.subr.bf16.mxu0 %v21029_v8  ;;  %v21045_v8 = vld [vmem:[#allocation2 + $0xe8] ss:$368 sps:$4 sm:$0xff]  }
 0x5d4   :  { %v14761_v21 = vpop.f32.mrb[116].mxu1  ;;  %v14802_v30 = vpop.f32.mrb[120].mxu0 }
 0x5d5   :  { %v14762_v11 = vadd.f32 %v14761_v21, %v10194_v42  ;;  %v14803_v53 = vadd.f32 %v14802_v30, %v10202_v36  ;;  %v14763_v16 = vpop.f32.mrb[117].mxu1  ;;  %v14804_v4 = vpop.f32.mrb[121].mxu0  ;;  %v21050_v42 = vld [vmem:[#allocation2 + $0x3c4] ss:$368 sps:$4 sm:$0xff]   ;;  %v21053_v36 = vld [vmem:[#allocation2 + $0x3cc] ss:$368 sps:$4 sm:$0xff]  }
 0x5d6   :  { %v14764_v43 = vadd.f32 %v14763_v16, %v10198_v63  ;;  %v14805_v6 = vadd.f32 %v14804_v4, %v10206_v22  ;;  %v14765_v24 = vpop.f32.mrb[118].mxu1  ;;  %v14806_v23 = vpop.f32.mrb[122].mxu0  ;;  %15312 = vmatpush1.bf16.msra.mxu1 %v21024_v48  ;;  %15353 = vmatpush1.bf16.msra.mxu0 %v21027_v50  ;;  %v21048_v48 = vld [vmem:[#allocation2 + $0x3c0] ss:$368 sps:$4 sm:$0xff]   ;;  %v21051_v50 = vld [vmem:[#allocation2 + $0x3c8] ss:$368 sps:$4 sm:$0xff]  }
 0x5d7   :  { %v16674_v60 = vsub.f32 %v14762_v11, %v22437_v55  ;;  %v16676_v41 = vsub.f32 %v14803_v53, %v22443_v18  ;;  %v14766_v13 = vpop.f32.mrb[119].mxu1  ;;  %v14807_v33 = vpop.f32.mrb[123].mxu0  ;;  %15313 = vmatprep.subr.bf16.mxu1 %v21032_v52  ;;  %15354 = vmatprep.subr.bf16.mxu0 %v21035_v31  ;;  %v21056_v52 = vld [vmem:[#allocation2 + $0x6a4] ss:$368 sps:$4 sm:$0xff]   ;;  %v21059_v21 = vld [vmem:[#allocation2 + $0x6ac] ss:$368 sps:$4 sm:$0xff]  }
 0x5d8   :  { %v16315_v27 = vcombine.low %v14762_v11, %v14764_v43  ;;  %v16675_v49 = vsub.f32 %v14764_v43, %v22462_v28  ;;  %v16316_v51 = vcombine.low %v14803_v53, %v14805_v6  ;;  %v16677_v44 = vsub.f32 %v14805_v6, %v22469_v38  ;;  %v21044_v28 = vld [vmem:[#allocation2 + $0xe4] ss:$368 sps:$4 sm:$0xff]   ;;  %v21047_v38 = vld [vmem:[#allocation2 + $0xec] ss:$368 sps:$4 sm:$0xff]   ;;  %v21054_v30 = vld [vmem:[#allocation2 + $0x6a0] ss:$368 sps:$4 sm:$0xff]  }
 0x5d9   :  { %v16766_v19 = vmul.f32 %v16674_v60, %v16674_v60  ;;  %v16768_v12 = vmul.f32 %v16676_v41, %v16676_v41  ;;  %v21057_v31 = vld [vmem:[#allocation2 + $0x6a8] ss:$368 sps:$4 sm:$0xff]   ;;  %v21062_v11 = vld [vmem:[#allocation2 + $0x984] ss:$368 sps:$4 sm:$0xff]   ;;  %v21065_v53 = vld [vmem:[#allocation2 + $0x98c] ss:$368 sps:$4 sm:$0xff]   ;;  %v10210_v41 = vrot.slane %v25135_v46, %v24971_v47  ;;  %v10218_v13 = vrot.slane %v25135_v46, %v24974_v20 }
 0x5da   :  { %v16323_v57 = vrot.slane %v16315_v27, %v21741_v58  ;;  %v16767_v55 = vmul.f32 %v16675_v49, %v16675_v49  ;;  %v16330_v18 = vrot.slane %v16316_v51, %v21741_v58  ;;  %15314 = vmatpush1.bf16.msra.mxu1 %v21030_v5  ;;  %15355 = vmatpush1.bf16.msra.mxu0 %v21033_v29  ;;  %v21060_v16 = vld [vmem:[#allocation2 + $0x980] ss:$368 sps:$4 sm:$0xff]   ;;  %v21063_v4 = vld [vmem:[#allocation2 + $0x988] ss:$368 sps:$4 sm:$0xff]   ;;  %v21068_v43 = vld [vmem:[#allocation2 + $0xc64] ss:$368 sps:$4 sm:$0xff]  }
 0x5db   :  { %v16882_v34 = vsel %vm16834_vm1, %v16766_v19, 0.0  ;;  %15315 = vmatprep.subr.bf16.mxu1 %v21038_v0  ;;  %15356 = vmatprep.subr.bf16.mxu0 %v21041_v17  ;;  %v16769_v40 = vmul.f32 %v16677_v44, %v16677_v44  ;;  %v16886_v62 = vsel %vm16834_vm1, %v16768_v12, 0.0  ;;  %v21071_v6 = vld [vmem:[#allocation2 + $0xc6c] ss:$368 sps:$4 sm:$0xff]   ;;  %v21066_v24 = vld [vmem:[#allocation2 + $0xc60] ss:$368 sps:$4 sm:$0xff]   ;;  %v10214_v33 = vrot.slane %v25135_v46, %v24977_v10 }
 0x5dc   :  { %v16883_v1 = vadd.f32 %v16882_v34, %v25127_v15  ;;  %v16884_v2 = vsel %vm16834_vm1, %v16767_v55, 0.0  ;;  %v16331_v25 = vcombine.low %v16323_v57, %v16330_v18  ;;  %v21069_v23 = vld [vmem:[#allocation2 + $0xc68] ss:$368 sps:$4 sm:$0xff]   ;;  %v21074_v5 = vld [vmem:[#allocation2 + $0xf44] ss:$368 sps:$4 sm:$0xff]   ;;  %v10222_v0 = vrot.slane %v25135_v46, %v24980_v54 }
 0x5dd   :  { %v16888_v63 = vsel %vm16834_vm1, %v16769_v40, 0.0  ;;  %v21077_v60 = vld [vmem:[#allocation2 + $0xf4c] ss:$368 sps:$4 sm:$0xff]   ;;  %v21072_v29 = vld [vmem:[#allocation2 + $0xf40] ss:$368 sps:$4 sm:$0xff]  }
 0x5de   :  { %v16885_v7 = vadd.f32 %v16884_v2, %v16883_v1  ;;  %16633 = vst [vmem:[%s25586_s10 + $0x30] sm:$0xff] %v16331_v25  ;;  %15316 = vmatpush1.bf16.msra.mxu1 %v21036_v32  ;;  %15357 = vmatpush1.bf16.msra.mxu0 %v21039_v59  ;;  %v21075_v27 = vld [vmem:[#allocation2 + $0xf48] ss:$368 sps:$4 sm:$0xff]   ;;  %v21080_v49 = vld [vmem:[#allocation2 + $0x1224] ss:$368 sps:$4 sm:$0xff]  }
 0x5df   :  { %15383 = vmatprep.subr.bf16.mxu1 %v21044_v28  ;;  %15424 = vmatprep.subr.bf16.mxu0 %v21047_v38  ;;  %v21083_v17 = vld [vmem:[#allocation2 + $0x122c] ss:$368 sps:$4 sm:$0xff]   ;;  %v21078_v12 = vld [vmem:[#allocation2 + $0x1220] ss:$368 sps:$4 sm:$0xff]   ;;  %v21081_v2 = vld [vmem:[#allocation2 + $0x1228] ss:$368 sps:$4 sm:$0xff]  }
 0x5e0   :  { %v16887_v15 = vadd.f32 %v16886_v62, %v16885_v7  ;;  %v21086_v25 = vld [vmem:[#allocation2 + $0x1504] ss:$368 sps:$4 sm:$0xff]   ;;  %v21089_v62 = vld [vmem:[#allocation2 + $0x150c] ss:$368 sps:$4 sm:$0xff]  }
 0x5e1   :  { %15334 = vmatmul.mubr.bf16.vlgmr.msra.gmra.mrb[144].mxu1 %v24896_v3  ;;  %15375 = vmatmul.mubr.bf16.vlgmr.msra.gmra.mrb[148].mxu0 %v24896_v3 }
 0x5e2   :  { %v25160_v22 = vadd.f32 %v16888_v63, %v16887_v15  ;;  %15384 = vmatpush1.bf16.msra.mxu1 %v21042_v39  ;;  %15425 = vmatpush1.bf16.msra.mxu0 %v21045_v8  ;;  %v25713_v15 = vld [vmem:[#allocation8_spill] sm:$0xff] }
 0x5e3   :  { %15385 = vmatprep.subr.bf16.mxu1 %v21050_v42  ;;  %15426 = vmatprep.subr.bf16.mxu0 %v21053_v36 }
 0x5e4   :  { %15415 = vmatprep.mubr.bf16.mxu1 %v25712_v56  ;;  %15456 = vmatprep.mubr.bf16.mxu0 %v25712_v56 }
 0x5e6   :  { %15386 = vmatpush1.bf16.msra.mxu1 %v21048_v48  ;;  %15427 = vmatpush1.bf16.msra.mxu0 %v21051_v50  ;;  %v21084_v48 = vld [vmem:[#allocation2 + $0x1500] ss:$368 sps:$4 sm:$0xff]  }
 0x5e7   :  { %15387 = vmatprep.subr.bf16.mxu1 %v21056_v52  ;;  %15428 = vmatprep.subr.bf16.mxu0 %v21059_v21  ;;  %v21092_v21 = vld [vmem:[#allocation2 + $0xf4] ss:$368 sps:$4 sm:$0xff]  }
 0x5ea   :  { %15388 = vmatpush1.bf16.msra.mxu1 %v21054_v30  ;;  %15429 = vmatpush1.bf16.msra.mxu0 %v21057_v31 }
 0x5eb   :  { %15389 = vmatprep.subr.bf16.mxu1 %v21062_v11  ;;  %15430 = vmatprep.subr.bf16.mxu0 %v21065_v53  ;;  %v21095_v11 = vld [vmem:[#allocation2 + $0xfc] ss:$368 sps:$4 sm:$0xff]  }
 0x5ee   :  { %15390 = vmatpush1.bf16.msra.mxu1 %v21060_v16  ;;  %15431 = vmatpush1.bf16.msra.mxu0 %v21063_v4 }
 0x5ef   :  { %15391 = vmatprep.subr.bf16.mxu1 %v21068_v43  ;;  %15432 = vmatprep.subr.bf16.mxu0 %v21071_v6  ;;  %v21090_v43 = vld [vmem:[#allocation2 + $0xf0] ss:$368 sps:$4 sm:$0xff]  }
 0x5f2   :  { %15392 = vmatpush1.bf16.msra.mxu1 %v21066_v24  ;;  %15433 = vmatpush1.bf16.msra.mxu0 %v21069_v23  ;;  %v21093_v24 = vld [vmem:[#allocation2 + $0xf8] ss:$368 sps:$4 sm:$0xff]   ;;  %v21098_v23 = vld [vmem:[#allocation2 + $0x3d4] ss:$368 sps:$4 sm:$0xff]  }
 0x5f3   :  { %15393 = vmatprep.subr.bf16.mxu1 %v21074_v5  ;;  %15434 = vmatprep.subr.bf16.mxu0 %v21077_v60  ;;  %v21101_v5 = vld [vmem:[#allocation2 + $0x3dc] ss:$368 sps:$4 sm:$0xff]  }
 0x5f4   :  { %v14843_v51 = vpop.f32.mrb[120].mxu1  ;;  %v14884_v44 = vpop.f32.mrb[124].mxu0 }
 0x5f5   :  { %v14844_v19 = vadd.f32 %v14843_v51, %v10210_v41  ;;  %v14845_v57 = vpop.f32.mrb[121].mxu1  ;;  %v14885_v55 = vadd.f32 %v14884_v44, %v10218_v13  ;;  %v14886_v32 = vpop.f32.mrb[125].mxu0  ;;  %v21096_v13 = vld [vmem:[#allocation2 + $0x3d0] ss:$368 sps:$4 sm:$0xff]   ;;  %v21110_v51 = vld [vmem:[#allocation2 + $0x994] ss:$368 sps:$4 sm:$0xff]  }
 0x5f6   :  { %v14846_v18 = vadd.f32 %v14845_v57, %v10214_v33  ;;  %v14847_v34 = vpop.f32.mrb[122].mxu1  ;;  %15394 = vmatpush1.bf16.msra.mxu1 %v21072_v29  ;;  %v14887_v28 = vadd.f32 %v14886_v32, %v10222_v0  ;;  %v14888_v1 = vpop.f32.mrb[126].mxu0  ;;  %15435 = vmatpush1.bf16.msra.mxu0 %v21075_v27  ;;  %v21099_v33 = vld [vmem:[#allocation2 + $0x3d8] ss:$368 sps:$4 sm:$0xff]   ;;  %v21104_v29 = vld [vmem:[#allocation2 + $0x6b4] ss:$368 sps:$4 sm:$0xff]  }
 0x5f7   :  { %v16678_v59 = vsub.f32 %v14844_v19, %v22577_v9  ;;  %v14848_v46 = vpop.f32.mrb[123].mxu1  ;;  %15395 = vmatprep.subr.bf16.mxu1 %v21080_v49  ;;  %v16680_v38 = vsub.f32 %v14885_v55, %v22583_v14  ;;  %v14889_v39 = vpop.f32.mrb[127].mxu0  ;;  %15436 = vmatprep.subr.bf16.mxu0 %v21083_v17  ;;  %v21107_v0 = vld [vmem:[#allocation2 + $0x6bc] ss:$368 sps:$4 sm:$0xff]   ;;  %v21102_v27 = vld [vmem:[#allocation2 + $0x6b0] ss:$368 sps:$4 sm:$0xff]  }
 0x5f8   :  { %v16332_v40 = vcombine.low %v14844_v19, %v14846_v18  ;;  %v16679_v7 = vsub.f32 %v14846_v18, %v22602_v37  ;;  %v16333_v42 = vcombine.low %v14885_v55, %v14887_v28  ;;  %v16681_v36 = vsub.f32 %v14887_v28, %v25713_v15  ;;  %v21087_v37 = vld [vmem:[#allocation2 + $0x1508] ss:$368 sps:$4 sm:$0xff]   ;;  %v21113_v17 = vld [vmem:[#allocation2 + $0x99c] ss:$368 sps:$4 sm:$0xff]   ;;  %v21108_v19 = vld [vmem:[#allocation2 + $0x990] ss:$368 sps:$4 sm:$0xff]  }
 0x5f9   :  { %v16770_v8 = vmul.f32 %v16678_v59, %v16678_v59  ;;  %v16772_v52 = vmul.f32 %v16680_v38, %v16680_v38  ;;  %v21105_v49 = vld [vmem:[#allocation2 + $0x6b8] ss:$368 sps:$4 sm:$0xff]   ;;  %v21116_v57 = vld [vmem:[#allocation2 + $0xc74] ss:$368 sps:$4 sm:$0xff]   ;;  %v21119_v55 = vld [vmem:[#allocation2 + $0xc7c] ss:$368 sps:$4 sm:$0xff]  }
 0x5fa   :  { %v16340_v9 = vrot.slane %v16332_v40, %v21741_v58  ;;  %v16771_v63 = vmul.f32 %v16679_v7, %v16679_v7  ;;  %15396 = vmatpush1.bf16.msra.mxu1 %v21078_v12  ;;  %v16347_v14 = vrot.slane %v16333_v42, %v21741_v58  ;;  %15437 = vmatpush1.bf16.msra.mxu0 %v21081_v2  ;;  %v21111_v44 = vld [vmem:[#allocation2 + $0x998] ss:$368 sps:$4 sm:$0xff]   ;;  %v21114_v18 = vld [vmem:[#allocation2 + $0xc70] ss:$368 sps:$4 sm:$0xff]   ;;  %v21122_v12 = vld [vmem:[#allocation2 + $0xf54] ss:$368 sps:$4 sm:$0xff]  }
 0x5fb   :  { %v16890_v50 = vsel %vm16834_vm1, %v16770_v8, 0.0  ;;  %15397 = vmatprep.subr.bf16.mxu1 %v21086_v25  ;;  %15438 = vmatprep.subr.bf16.mxu0 %v21089_v62  ;;  %v16773_v16 = vmul.f32 %v16681_v36, %v16681_v36  ;;  %v16894_v6 = vsel %vm16834_vm1, %v16772_v52, 0.0  ;;  %v25196_v32 = vld [vmem:[%s25585_s9 + $0x20] sm:$0xff]  ;;  %v21117_v34 = vld [vmem:[#allocation2 + $0xc78] ss:$368 sps:$4 sm:$0xff]  }
 0x5fc   :  { %v16891_v30 = vadd.f32 %v16890_v50, %v25160_v22  ;;  %v16892_v31 = vsel %vm16834_vm1, %v16771_v63, 0.0  ;;  %v16348_v53 = vcombine.low %v16340_v9, %v16347_v14  ;;  %v21125_v59 = vld [vmem:[#allocation2 + $0xf5c] ss:$368 sps:$4 sm:$0xff]   ;;  %v10226_v28 = vrot.slane %v25196_v32, %v24927_v61  ;;  %v21120_v2 = vld [vmem:[#allocation2 + $0xf50] ss:$368 sps:$4 sm:$0xff]  }
 0x5fd   :  { %v16896_v60 = vsel %vm16834_vm1, %v16773_v16, 0.0  ;;  %v10234_v1 = vrot.slane %v25196_v32, %v24930_v45  ;;  %v10230_v46 = vrot.slane %v25196_v32, %v24938_v26  ;;  %v10238_v25 = vrot.slane %v25196_v32, %v24941_v35  ;;  %v21123_v38 = vld [vmem:[#allocation2 + $0xf58] ss:$368 sps:$4 sm:$0xff]   ;;  %v21128_v40 = vld [vmem:[#allocation2 + $0x1234] ss:$368 sps:$4 sm:$0xff]  }
 0x5fe   :  { %v16893_v4 = vadd.f32 %v16892_v31, %v16891_v30  ;;  %15398 = vmatpush1.bf16.msra.mxu1 %v21084_v48  ;;  %16634 = vst [vmem:[%s25586_s10 + $0x38] sm:$0xff] %v16348_v53  ;;  %15439 = vmatpush1.bf16.msra.mxu0 %v21087_v37  ;;  %v21131_v39 = vld [vmem:[#allocation2 + $0x123c] ss:$368 sps:$4 sm:$0xff]   ;;  %v21126_v48 = vld [vmem:[#allocation2 + $0x1230] ss:$368 sps:$4 sm:$0xff]  }
 0x5ff   :  { %15465 = vmatprep.subr.bf16.mxu1 %v21092_v21  ;;  %15506 = vmatprep.subr.bf16.mxu0 %v21095_v11  ;;  %v25714_v50 = vld [vmem:[#allocation9_spill] sm:$0xff]  ;;  %v21134_v31 = vld [vmem:[#allocation2 + $0x1514] ss:$368 sps:$4 sm:$0xff]  }
 0x600   :  { %v16895_v22 = vadd.f32 %v16894_v6, %v16893_v4  ;;  %v21129_v30 = vld [vmem:[#allocation2 + $0x1238] ss:$368 sps:$4 sm:$0xff]   ;;  %v25715_v11 = vld [vmem:[#allocation10_spill] sm:$0xff] }
 0x601   :  { %15416 = vmatmul.mubr.bf16.vlgmr.msra.gmra.mrb[148].mxu1 %v24896_v3  ;;  %15457 = vmatmul.mubr.bf16.vlgmr.msra.gmra.mrb[152].mxu0 %v24896_v3  ;;  %v25716_v4 = vld [vmem:[#allocation11_spill] sm:$0xff] }
 0x602   :  { %v25188_v41 = vadd.f32 %v16896_v60, %v16895_v22  ;;  %15466 = vmatpush1.bf16.msra.mxu1 %v21090_v43  ;;  %15507 = vmatpush1.bf16.msra.mxu0 %v21093_v24  ;;  %v21137_v24 = vld [vmem:[#allocation2 + $0x151c] ss:$368 sps:$4 sm:$0xff]  }
 0x603   :  { %15467 = vmatprep.subr.bf16.mxu1 %v21098_v23  ;;  %15508 = vmatprep.subr.bf16.mxu0 %v21101_v5  ;;  %v25717_v5 = vld [vmem:[#allocation12_spill] sm:$0xff] }
 0x604   :  { %15497 = vmatprep.mubr.bf16.mxu1 %v25712_v56  ;;  %15538 = vmatprep.mubr.bf16.mxu0 %v25712_v56 }
 0x606   :  { %15468 = vmatpush1.bf16.msra.mxu1 %v21096_v13  ;;  %15509 = vmatpush1.bf16.msra.mxu0 %v21099_v33 }
 0x607   :  { %15469 = vmatprep.subr.bf16.mxu1 %v21104_v29  ;;  %15510 = vmatprep.subr.bf16.mxu0 %v21107_v0  ;;  %v21132_v29 = vld [vmem:[#allocation2 + $0x1510] ss:$368 sps:$4 sm:$0xff]  }
 0x60a   :  { %15470 = vmatpush1.bf16.msra.mxu1 %v21102_v27  ;;  %15511 = vmatpush1.bf16.msra.mxu0 %v21105_v49 }
 0x60b   :  { %15471 = vmatprep.subr.bf16.mxu1 %v21110_v51  ;;  %15512 = vmatprep.subr.bf16.mxu0 %v21113_v17  ;;  %v21135_v51 = vld [vmem:[#allocation2 + $0x1518] ss:$368 sps:$4 sm:$0xff]   ;;  %v21140_v17 = vld [vmem:[#allocation2 + $0x104] ss:$368 sps:$4 sm:$0xff]  }
 0x60e   :  { %15472 = vmatpush1.bf16.msra.mxu1 %v21108_v19  ;;  %15513 = vmatpush1.bf16.msra.mxu0 %v21111_v44 }
 0x60f   :  { %15473 = vmatprep.subr.bf16.mxu1 %v21116_v57  ;;  %15514 = vmatprep.subr.bf16.mxu0 %v21119_v55  ;;  %v21143_v57 = vld [vmem:[#allocation2 + $0x10c] ss:$368 sps:$4 sm:$0xff]  }
 0x612   :  { %15474 = vmatpush1.bf16.msra.mxu1 %v21114_v18  ;;  %15515 = vmatpush1.bf16.msra.mxu0 %v21117_v34 }
 0x613   :  { %15475 = vmatprep.subr.bf16.mxu1 %v21122_v12  ;;  %15516 = vmatprep.subr.bf16.mxu0 %v21125_v59  ;;  %v21138_v12 = vld [vmem:[#allocation2 + $0x100] ss:$368 sps:$4 sm:$0xff]  }
 0x614   :  { %v14925_v7 = vpop.f32.mrb[124].mxu1  ;;  %v14966_v8 = vpop.f32.mrb[128].mxu0 }
 0x615   :  { %v14926_v62 = vadd.f32 %v14925_v7, %v10226_v28  ;;  %v14927_v42 = vpop.f32.mrb[125].mxu1  ;;  %v14967_v15 = vadd.f32 %v14966_v8, %v10234_v1  ;;  %v14968_v9 = vpop.f32.mrb[129].mxu0  ;;  %v21141_v28 = vld [vmem:[#allocation2 + $0x108] ss:$368 sps:$4 sm:$0xff]   ;;  %v21146_v1 = vld [vmem:[#allocation2 + $0x3e4] ss:$368 sps:$4 sm:$0xff]  }
 0x616   :  { %v14928_v36 = vadd.f32 %v14927_v42, %v10230_v46  ;;  %v14929_v63 = vpop.f32.mrb[126].mxu1  ;;  %15476 = vmatpush1.bf16.msra.mxu1 %v21120_v2  ;;  %v14969_v14 = vadd.f32 %v14968_v9, %v10238_v25  ;;  %v14970_v37 = vpop.f32.mrb[130].mxu0  ;;  %15517 = vmatpush1.bf16.msra.mxu0 %v21123_v38  ;;  %v21149_v46 = vld [vmem:[#allocation2 + $0x3ec] ss:$368 sps:$4 sm:$0xff]   ;;  %v21144_v38 = vld [vmem:[#allocation2 + $0x3e0] ss:$368 sps:$4 sm:$0xff]  }
 0x617   :  { %v16682_v52 = vsub.f32 %v14926_v62, %v25714_v50  ;;  %v14930_v21 = vpop.f32.mrb[127].mxu1  ;;  %15477 = vmatprep.subr.bf16.mxu1 %v21128_v40  ;;  %v16684_v53 = vsub.f32 %v14967_v15, %v25715_v11  ;;  %v14971_v6 = vpop.f32.mrb[131].mxu0  ;;  %15518 = vmatprep.subr.bf16.mxu0 %v21131_v39  ;;  %v21147_v40 = vld [vmem:[#allocation2 + $0x3e8] ss:$368 sps:$4 sm:$0xff]   ;;  %v21152_v7 = vld [vmem:[#allocation2 + $0x6c4] ss:$368 sps:$4 sm:$0xff]  }
 0x618   :  { %v16349_v16 = vcombine.low %v14926_v62, %v14928_v36  ;;  %v16683_v43 = vsub.f32 %v14928_v36, %v25716_v4  ;;  %v16350_v22 = vcombine.low %v14967_v15, %v14969_v14  ;;  %v16685_v60 = vsub.f32 %v14969_v14, %v25717_v5  ;;  %v21155_v39 = vld [vmem:[#allocation2 + $0x6cc] ss:$368 sps:$4 sm:$0xff]   ;;  %v21150_v62 = vld [vmem:[#allocation2 + $0x6c0] ss:$368 sps:$4 sm:$0xff]   ;;  %v21153_v8 = vld [vmem:[#allocation2 + $0x6c8] ss:$368 sps:$4 sm:$0xff]  }
 0x619   :  { %v16774_v23 = vmul.f32 %v16682_v52, %v16682_v52  ;;  %v16776_v27 = vmul.f32 %v16684_v53, %v16684_v53  ;;  %v21158_v42 = vld [vmem:[#allocation2 + $0x9a4] ss:$368 sps:$4 sm:$0xff]   ;;  %v21161_v15 = vld [vmem:[#allocation2 + $0x9ac] ss:$368 sps:$4 sm:$0xff]   ;;  %v21156_v36 = vld [vmem:[#allocation2 + $0x9a0] ss:$368 sps:$4 sm:$0xff]   ;;  %v10242_v21 = vrot.slane %v25196_v32, %v24971_v47  ;;  %v10254_v53 = vrot.slane %v25196_v32, %v24980_v54 }
 0x61a   :  { %v16357_v13 = vrot.slane %v16349_v16, %v21741_v58  ;;  %v16775_v33 = vmul.f32 %v16683_v43, %v16683_v43  ;;  %15478 = vmatpush1.bf16.msra.mxu1 %v21126_v48  ;;  %v16364_v49 = vrot.slane %v16350_v22, %v21741_v58  ;;  %15519 = vmatpush1.bf16.msra.mxu0 %v21129_v30  ;;  %v21159_v9 = vld [vmem:[#allocation2 + $0x9a8] ss:$368 sps:$4 sm:$0xff]   ;;  %v21164_v63 = vld [vmem:[#allocation2 + $0xc84] ss:$368 sps:$4 sm:$0xff]   ;;  %v21167_v48 = vld [vmem:[#allocation2 + $0xc8c] ss:$368 sps:$4 sm:$0xff]  }
 0x61b   :  { %v16898_v0 = vsel %vm16834_vm1, %v16774_v23, 0.0  ;;  %15479 = vmatprep.subr.bf16.mxu1 %v21134_v31  ;;  %15520 = vmatprep.subr.bf16.mxu0 %v21137_v24  ;;  %v16777_v18 = vmul.f32 %v16685_v60, %v16685_v60  ;;  %v16902_v59 = vsel %vm16834_vm1, %v16776_v27, 0.0  ;;  %v21162_v50 = vld [vmem:[#allocation2 + $0xc80] ss:$368 sps:$4 sm:$0xff]   ;;  %v21165_v52 = vld [vmem:[#allocation2 + $0xc88] ss:$368 sps:$4 sm:$0xff]   ;;  %v10250_v30 = vrot.slane %v25196_v32, %v24974_v20 }
 0x61c   :  { %v16899_v19 = vadd.f32 %v16898_v0, %v25188_v41  ;;  %v16900_v44 = vsel %vm16834_vm1, %v16775_v33, 0.0  ;;  %v16365_v55 = vcombine.low %v16357_v13, %v16364_v49  ;;  %v21170_v14 = vld [vmem:[#allocation2 + $0xf64] ss:$368 sps:$4 sm:$0xff]   ;;  %v21173_v37 = vld [vmem:[#allocation2 + $0xf6c] ss:$368 sps:$4 sm:$0xff]   ;;  %v10246_v31 = vrot.slane %v25196_v32, %v24977_v10 }
 0x61d   :  { %v16904_v2 = vsel %vm16834_vm1, %v16777_v18, 0.0  ;;  %v21168_v11 = vld [vmem:[#allocation2 + $0xf60] ss:$368 sps:$4 sm:$0xff]   ;;  %v21171_v16 = vld [vmem:[#allocation2 + $0xf68] ss:$368 sps:$4 sm:$0xff]  }
 0x61e   :  { %v16901_v34 = vadd.f32 %v16900_v44, %v16899_v19  ;;  %15480 = vmatpush1.bf16.msra.mxu1 %v21132_v29  ;;  %16635 = vst [vmem:[%s25586_s10 + $0x40] sm:$0xff] %v16365_v55  ;;  %15521 = vmatpush1.bf16.msra.mxu0 %v21135_v51  ;;  %v21176_v4 = vld [vmem:[#allocation2 + $0x1244] ss:$368 sps:$4 sm:$0xff]   ;;  %v21179_v6 = vld [vmem:[#allocation2 + $0x124c] ss:$368 sps:$4 sm:$0xff]  }
 0x61f   :  { %15547 = vmatprep.subr.bf16.mxu1 %v21140_v17  ;;  %15588 = vmatprep.subr.bf16.mxu0 %v21143_v57  ;;  %v21174_v29 = vld [vmem:[#allocation2 + $0x1240] ss:$368 sps:$4 sm:$0xff]   ;;  %v25718_v0 = vld [vmem:[#allocation13_spill] sm:$0xff]  ;;  %v21182_v19 = vld [vmem:[#allocation2 + $0x1524] ss:$368 sps:$4 sm:$0xff]  }
 0x620   :  { %v16903_v41 = vadd.f32 %v16902_v59, %v16901_v34  ;;  %v21177_v17 = vld [vmem:[#allocation2 + $0x1248] ss:$368 sps:$4 sm:$0xff]   ;;  %v25719_v44 = vld [vmem:[#allocation14_spill] sm:$0xff]  ;;  %v21185_v59 = vld [vmem:[#allocation2 + $0x152c] ss:$368 sps:$4 sm:$0xff]  }
 0x621   :  { %15498 = vmatmul.mubr.bf16.vlgmr.msra.gmra.mrb[152].mxu1 %v24896_v3  ;;  %15539 = vmatmul.mubr.bf16.vlgmr.msra.gmra.mrb[156].mxu0 %v24896_v3  ;;  %v25720_v18 = vld [vmem:[#allocation15_spill] sm:$0xff] }
 0x622   :  { %v25221_v25 = vadd.f32 %v16904_v2, %v16903_v41  ;;  %15548 = vmatpush1.bf16.msra.mxu1 %v21138_v12  ;;  %15589 = vmatpush1.bf16.msra.mxu0 %v21141_v28  ;;  %v25721_v41 = vld [vmem:[#allocation16_spill] sm:$0xff] }
 0x623   :  { %15549 = vmatprep.subr.bf16.mxu1 %v21146_v1  ;;  %15590 = vmatprep.subr.bf16.mxu0 %v21149_v46 }
 0x624   :  { %15579 = vmatprep.mubr.bf16.mxu1 %v25712_v56  ;;  %15620 = vmatprep.mubr.bf16.mxu0 %v25712_v56 }
 0x626   :  { %15550 = vmatpush1.bf16.msra.mxu1 %v21144_v38  ;;  %15591 = vmatpush1.bf16.msra.mxu0 %v21147_v40  ;;  %v21180_v40 = vld [vmem:[#allocation2 + $0x1520] ss:$368 sps:$4 sm:$0xff]  }
 0x627   :  { %15551 = vmatprep.subr.bf16.mxu1 %v21152_v7  ;;  %15592 = vmatprep.subr.bf16.mxu0 %v21155_v39 }
 0x62a   :  { %15552 = vmatpush1.bf16.msra.mxu1 %v21150_v62  ;;  %15593 = vmatpush1.bf16.msra.mxu0 %v21153_v8  ;;  %v21183_v8 = vld [vmem:[#allocation2 + $0x1528] ss:$368 sps:$4 sm:$0xff]  }
 0x62b   :  { %15553 = vmatprep.subr.bf16.mxu1 %v21158_v42  ;;  %15594 = vmatprep.subr.bf16.mxu0 %v21161_v15  ;;  %v21188_v42 = vld [vmem:[#allocation2 + $0x114] ss:$368 sps:$4 sm:$0xff]  }
 0x62e   :  { %15554 = vmatpush1.bf16.msra.mxu1 %v21156_v36  ;;  %15595 = vmatpush1.bf16.msra.mxu0 %v21159_v9  ;;  %v21191_v9 = vld [vmem:[#allocation2 + $0x11c] ss:$368 sps:$4 sm:$0xff]  }
 0x62f   :  { %15555 = vmatprep.subr.bf16.mxu1 %v21164_v63  ;;  %15596 = vmatprep.subr.bf16.mxu0 %v21167_v48 }
 0x632   :  { %15556 = vmatpush1.bf16.msra.mxu1 %v21162_v50  ;;  %15597 = vmatpush1.bf16.msra.mxu0 %v21165_v52  ;;  %v21186_v52 = vld [vmem:[#allocation2 + $0x110] ss:$368 sps:$4 sm:$0xff]  }
 0x633   :  { %15557 = vmatprep.subr.bf16.mxu1 %v21170_v14  ;;  %15598 = vmatprep.subr.bf16.mxu0 %v21173_v37  ;;  %v21189_v37 = vld [vmem:[#allocation2 + $0x118] ss:$368 sps:$4 sm:$0xff]  }
 0x634   :  { %v15007_v43 = vpop.f32.mrb[128].mxu1  ;;  %v15048_v23 = vpop.f32.mrb[132].mxu0 }
 0x635   :  { %v15008_v24 = vadd.f32 %v15007_v43, %v10242_v21  ;;  %v15009_v22 = vpop.f32.mrb[129].mxu1  ;;  %v15049_v5 = vadd.f32 %v15048_v23, %v10250_v30  ;;  %v15050_v13 = vpop.f32.mrb[133].mxu0  ;;  %v21194_v21 = vld [vmem:[#allocation2 + $0x3f4] ss:$368 sps:$4 sm:$0xff]   ;;  %v21197_v30 = vld [vmem:[#allocation2 + $0x3fc] ss:$368 sps:$4 sm:$0xff]  }
 0x636   :  { %v15010_v60 = vadd.f32 %v15009_v22, %v10246_v31  ;;  %v15011_v33 = vpop.f32.mrb[130].mxu1  ;;  %15558 = vmatpush1.bf16.msra.mxu1 %v21168_v11  ;;  %v15051_v49 = vadd.f32 %v15050_v13, %v10254_v53  ;;  %v15052_v51 = vpop.f32.mrb[134].mxu0  ;;  %15599 = vmatpush1.bf16.msra.mxu0 %v21171_v16  ;;  %v21192_v53 = vld [vmem:[#allocation2 + $0x3f0] ss:$368 sps:$4 sm:$0xff]   ;;  %v21195_v16 = vld [vmem:[#allocation2 + $0x3f8] ss:$368 sps:$4 sm:$0xff]  }
 0x637   :  { %v16686_v27 = vsub.f32 %v15008_v24, %v25718_v0  ;;  %v15012_v32 = vpop.f32.mrb[131].mxu1  ;;  %15559 = vmatprep.subr.bf16.mxu1 %v21176_v4  ;;  %v16688_v57 = vsub.f32 %v15049_v5, %v25719_v44  ;;  %v15053_v12 = vpop.f32.mrb[135].mxu0  ;;  %15600 = vmatprep.subr.bf16.mxu0 %v21179_v6  ;;  %v21200_v4 = vld [vmem:[#allocation2 + $0x6d4] ss:$368 sps:$4 sm:$0xff]   ;;  %v21203_v43 = vld [vmem:[#allocation2 + $0x6dc] ss:$368 sps:$4 sm:$0xff]  }
 0x638   :  { %v16366_v55 = vcombine.low %v15008_v24, %v15010_v60  ;;  %v16687_v34 = vsub.f32 %v15010_v60, %v25720_v18  ;;  %v16367_v1 = vcombine.low %v15049_v5, %v15051_v49  ;;  %v16689_v46 = vsub.f32 %v15051_v49, %v25721_v41  ;;  %v21198_v6 = vld [vmem:[#allocation2 + $0x6d0] ss:$368 sps:$4 sm:$0xff]   ;;  %v21201_v24 = vld [vmem:[#allocation2 + $0x6d8] ss:$368 sps:$4 sm:$0xff]   ;;  %v21206_v23 = vld [vmem:[#allocation2 + $0x9b4] ss:$368 sps:$4 sm:$0xff]  }
 0x639   :  { %v16778_v28 = vmul.f32 %v16686_v27, %v16686_v27  ;;  %v16780_v39 = vmul.f32 %v16688_v57, %v16688_v57  ;;  %v21209_v22 = vld [vmem:[#allocation2 + $0x9bc] ss:$368 sps:$4 sm:$0xff]   ;;  %v21204_v5 = vld [vmem:[#allocation2 + $0x9b0] ss:$368 sps:$4 sm:$0xff]   ;;  %v21207_v60 = vld [vmem:[#allocation2 + $0x9b8] ss:$368 sps:$4 sm:$0xff]  }
 0x63a   :  { %v16374_v2 = vrot.slane %v16366_v55, %v21741_v58  ;;  %v16779_v38 = vmul.f32 %v16687_v34, %v16687_v34  ;;  %15560 = vmatpush1.bf16.msra.mxu1 %v21174_v29  ;;  %v16381_v62 = vrot.slane %v16367_v1, %v21741_v58  ;;  %15601 = vmatpush1.bf16.msra.mxu0 %v21177_v17  ;;  %v21212_v13 = vld [vmem:[#allocation2 + $0xc94] ss:$368 sps:$4 sm:$0xff]   ;;  %v21215_v33 = vld [vmem:[#allocation2 + $0xc9c] ss:$368 sps:$4 sm:$0xff]   ;;  %v21210_v29 = vld [vmem:[#allocation2 + $0xc90] ss:$368 sps:$4 sm:$0xff]  }
 0x63b   :  { %v16906_v7 = vsel %vm16834_vm1, %v16778_v28, 0.0  ;;  %15561 = vmatprep.subr.bf16.mxu1 %v21182_v19  ;;  %15602 = vmatprep.subr.bf16.mxu0 %v21185_v59  ;;  %v16781_v48 = vmul.f32 %v16689_v46, %v16689_v46  ;;  %v16910_v14 = vsel %vm16834_vm1, %v16780_v39, 0.0  ;;  %v25257_v0 = vld [vmem:[%s25585_s9 + $0x28] sm:$0xff]  ;;  %v21218_v49 = vld [vmem:[#allocation2 + $0xf74] ss:$368 sps:$4 sm:$0xff]  }
 0x63c   :  { %v16907_v15 = vadd.f32 %v16906_v7, %v25221_v25  ;;  %v16908_v36 = vsel %vm16834_vm1, %v16779_v38, 0.0  ;;  %v16382_v63 = vcombine.low %v16374_v2, %v16381_v62  ;;  %v21213_v27 = vld [vmem:[#allocation2 + $0xc98] ss:$368 sps:$4 sm:$0xff]   ;;  %v21221_v51 = vld [vmem:[#allocation2 + $0xf7c] ss:$368 sps:$4 sm:$0xff]   ;;  %v10258_v32 = vrot.slane %v25257_v0, %v24927_v61 }
 0x63d   :  { %v16912_v31 = vsel %vm16834_vm1, %v16781_v48, 0.0  ;;  %v10266_v17 = vrot.slane %v25257_v0, %v24930_v45  ;;  %v10262_v19 = vrot.slane %v25257_v0, %v24938_v26  ;;  %v21216_v44 = vld [vmem:[#allocation2 + $0xf70] ss:$368 sps:$4 sm:$0xff]   ;;  %v10270_v57 = vrot.slane %v25257_v0, %v24941_v35  ;;  %v21219_v55 = vld [vmem:[#allocation2 + $0xf78] ss:$368 sps:$4 sm:$0xff]  }
 0x63e   :  { %v16909_v50 = vadd.f32 %v16908_v36, %v16907_v15  ;;  %15562 = vmatpush1.bf16.msra.mxu1 %v21180_v40  ;;  %16636 = vst [vmem:[%s25586_s10 + $0x48] sm:$0xff] %v16382_v63  ;;  %15603 = vmatpush1.bf16.msra.mxu0 %v21183_v8  ;;  %v21224_v18 = vld [vmem:[#allocation2 + $0x1254] ss:$368 sps:$4 sm:$0xff]   ;;  %v21227_v12 = vld [vmem:[#allocation2 + $0x125c] ss:$368 sps:$4 sm:$0xff]  }
 0x63f   :  { %15629 = vmatprep.subr.bf16.mxu1 %v21188_v42  ;;  %15670 = vmatprep.subr.bf16.mxu0 %v21191_v9  ;;  %v21222_v40 = vld [vmem:[#allocation2 + $0x1250] ss:$368 sps:$4 sm:$0xff]   ;;  %v25722_v7 = vld [vmem:[#allocation17_spill] sm:$0xff]  ;;  %v21230_v36 = vld [vmem:[#allocation2 + $0x1534] ss:$368 sps:$4 sm:$0xff]  }
 0x640   :  { %v16911_v25 = vadd.f32 %v16910_v14, %v16909_v50  ;;  %v21225_v15 = vld [vmem:[#allocation2 + $0x1258] ss:$368 sps:$4 sm:$0xff]   ;;  %v25723_v9 = vld [vmem:[#allocation18_spill] sm:$0xff] }
 0x641   :  { %15580 = vmatmul.mubr.bf16.vlgmr.msra.gmra.mrb[156].mxu1 %v24896_v3  ;;  %15621 = vmatmul.mubr.bf16.vlgmr.msra.gmra.mrb[160].mxu0 %v24896_v3  ;;  %v25724_v50 = vld [vmem:[#allocation19_spill] sm:$0xff] }
 0x642   :  { %v25249_v11 = vadd.f32 %v16912_v31, %v16911_v25  ;;  %15630 = vmatpush1.bf16.msra.mxu1 %v21186_v52  ;;  %15671 = vmatpush1.bf16.msra.mxu0 %v21189_v37  ;;  %v21233_v37 = vld [vmem:[#allocation2 + $0x153c] ss:$368 sps:$4 sm:$0xff]  }
 0x643   :  { %15631 = vmatprep.subr.bf16.mxu1 %v21194_v21  ;;  %15672 = vmatprep.subr.bf16.mxu0 %v21197_v30  ;;  %v25725_v30 = vld [vmem:[#allocation20_spill] sm:$0xff] }
 0x644   :  { %15661 = vmatprep.mubr.bf16.mxu1 %v25712_v56  ;;  %15702 = vmatprep.mubr.bf16.mxu0 %v25712_v56 }
 0x646   :  { %15632 = vmatpush1.bf16.msra.mxu1 %v21192_v53  ;;  %15673 = vmatpush1.bf16.msra.mxu0 %v21195_v16 }
 0x647   :  { %15633 = vmatprep.subr.bf16.mxu1 %v21200_v4  ;;  %15674 = vmatprep.subr.bf16.mxu0 %v21203_v43  ;;  %v21228_v4 = vld [vmem:[#allocation2 + $0x1530] ss:$368 sps:$4 sm:$0xff]  }
 0x64a   :  { %15634 = vmatpush1.bf16.msra.mxu1 %v21198_v6  ;;  %15675 = vmatpush1.bf16.msra.mxu0 %v21201_v24 }
 0x64b   :  { %15635 = vmatprep.subr.bf16.mxu1 %v21206_v23  ;;  %15676 = vmatprep.subr.bf16.mxu0 %v21209_v22  ;;  %v21231_v23 = vld [vmem:[#allocation2 + $0x1538] ss:$368 sps:$4 sm:$0xff]   ;;  %v21236_v22 = vld [vmem:[#allocation2 + $0x124] ss:$368 sps:$4 sm:$0xff]  }
 0x64e   :  { %15636 = vmatpush1.bf16.msra.mxu1 %v21204_v5  ;;  %15677 = vmatpush1.bf16.msra.mxu0 %v21207_v60 }
 0x64f   :  { %15637 = vmatprep.subr.bf16.mxu1 %v21212_v13  ;;  %15678 = vmatprep.subr.bf16.mxu0 %v21215_v33  ;;  %v21239_v13 = vld [vmem:[#allocation2 + $0x12c] ss:$368 sps:$4 sm:$0xff]  }
 0x652   :  { %15638 = vmatpush1.bf16.msra.mxu1 %v21210_v29  ;;  %15679 = vmatpush1.bf16.msra.mxu0 %v21213_v27 }
 0x653   :  { %15639 = vmatprep.subr.bf16.mxu1 %v21218_v49  ;;  %15680 = vmatprep.subr.bf16.mxu0 %v21221_v51  ;;  %v21234_v49 = vld [vmem:[#allocation2 + $0x120] ss:$368 sps:$4 sm:$0xff]  }
 0x654   :  { %v15089_v34 = vpop.f32.mrb[132].mxu1  ;;  %v15130_v28 = vpop.f32.mrb[136].mxu0 }
 0x655   :  { %v15090_v59 = vadd.f32 %v15089_v34, %v10258_v32  ;;  %v15091_v1 = vpop.f32.mrb[133].mxu1  ;;  %v15131_v41 = vadd.f32 %v15130_v28, %v10266_v17  ;;  %v15132_v2 = vpop.f32.mrb[137].mxu0  ;;  %v21237_v32 = vld [vmem:[#allocation2 + $0x128] ss:$368 sps:$4 sm:$0xff]   ;;  %v21242_v17 = vld [vmem:[#allocation2 + $0x404] ss:$368 sps:$4 sm:$0xff]  }
 0x656   :  { %v15092_v46 = vadd.f32 %v15091_v1, %v10262_v19  ;;  %v15093_v38 = vpop.f32.mrb[134].mxu1  ;;  %15640 = vmatpush1.bf16.msra.mxu1 %v21216_v44  ;;  %v15133_v62 = vadd.f32 %v15132_v2, %v10270_v57  ;;  %v15134_v8 = vpop.f32.mrb[138].mxu0  ;;  %15681 = vmatpush1.bf16.msra.mxu0 %v21219_v55  ;;  %v21245_v19 = vld [vmem:[#allocation2 + $0x40c] ss:$368 sps:$4 sm:$0xff]   ;;  %v21240_v55 = vld [vmem:[#allocation2 + $0x400] ss:$368 sps:$4 sm:$0xff]  }
 0x657   :  { %v16690_v39 = vsub.f32 %v15090_v59, %v25722_v7  ;;  %v15094_v42 = vpop.f32.mrb[135].mxu1  ;;  %15641 = vmatprep.subr.bf16.mxu1 %v21224_v18  ;;  %v16692_v63 = vsub.f32 %v15131_v41, %v25723_v9  ;;  %v15135_v14 = vpop.f32.mrb[139].mxu0  ;;  %15682 = vmatprep.subr.bf16.mxu0 %v21227_v12  ;;  %v21243_v18 = vld [vmem:[#allocation2 + $0x408] ss:$368 sps:$4 sm:$0xff]   ;;  %v21248_v34 = vld [vmem:[#allocation2 + $0x6e4] ss:$368 sps:$4 sm:$0xff]  }
 0x658   :  { %v16383_v48 = vcombine.low %v15090_v59, %v15092_v46  ;;  %v16691_v52 = vsub.f32 %v15092_v46, %v25724_v50  ;;  %v16384_v25 = vcombine.low %v15131_v41, %v15133_v62  ;;  %v16693_v31 = vsub.f32 %v15133_v62, %v25725_v30  ;;  %v21251_v12 = vld [vmem:[#allocation2 + $0x6ec] ss:$368 sps:$4 sm:$0xff]   ;;  %v21246_v59 = vld [vmem:[#allocation2 + $0x6e0] ss:$368 sps:$4 sm:$0xff]   ;;  %v21249_v28 = vld [vmem:[#allocation2 + $0x6e8] ss:$368 sps:$4 sm:$0xff]  }
 0x659   :  { %v16782_v21 = vmul.f32 %v16690_v39, %v16690_v39  ;;  %v16784_v6 = vmul.f32 %v16692_v63, %v16692_v63  ;;  %v21254_v1 = vld [vmem:[#allocation2 + $0x9c4] ss:$368 sps:$4 sm:$0xff]   ;;  %v21257_v41 = vld [vmem:[#allocation2 + $0x9cc] ss:$368 sps:$4 sm:$0xff]   ;;  %v21252_v46 = vld [vmem:[#allocation2 + $0x9c0] ss:$368 sps:$4 sm:$0xff]   ;;  %v10274_v42 = vrot.slane %v25257_v0, %v24971_v47  ;;  %v10286_v63 = vrot.slane %v25257_v0, %v24980_v54 }
 0x65a   :  { %v16391_v53 = vrot.slane %v16383_v48, %v21741_v58  ;;  %v16783_v16 = vmul.f32 %v16691_v52, %v16691_v52  ;;  %15642 = vmatpush1.bf16.msra.mxu1 %v21222_v40  ;;  %v16398_v24 = vrot.slane %v16384_v25, %v21741_v58  ;;  %15683 = vmatpush1.bf16.msra.mxu0 %v21225_v15  ;;  %v21255_v2 = vld [vmem:[#allocation2 + $0x9c8] ss:$368 sps:$4 sm:$0xff]   ;;  %v21260_v38 = vld [vmem:[#allocation2 + $0xca4] ss:$368 sps:$4 sm:$0xff]   ;;  %v21263_v40 = vld [vmem:[#allocation2 + $0xcac] ss:$368 sps:$4 sm:$0xff]  }
 0x65b   :  { %v16914_v43 = vsel %vm16834_vm1, %v16782_v21, 0.0  ;;  %15643 = vmatprep.subr.bf16.mxu1 %v21230_v36  ;;  %15684 = vmatprep.subr.bf16.mxu0 %v21233_v37  ;;  %v16785_v29 = vmul.f32 %v16693_v31, %v16693_v31  ;;  %v16918_v51 = vsel %vm16834_vm1, %v16784_v6, 0.0  ;;  %v21258_v7 = vld [vmem:[#allocation2 + $0xca0] ss:$368 sps:$4 sm:$0xff]   ;;  %v21261_v39 = vld [vmem:[#allocation2 + $0xca8] ss:$368 sps:$4 sm:$0xff]   ;;  %v10282_v15 = vrot.slane %v25257_v0, %v24974_v20 }
 0x65c   :  { %v16915_v5 = vadd.f32 %v16914_v43, %v25249_v11  ;;  %v16916_v60 = vsel %vm16834_vm1, %v16783_v16, 0.0  ;;  %v16399_v33 = vcombine.low %v16391_v53, %v16398_v24  ;;  %v21266_v62 = vld [vmem:[#allocation2 + $0xf84] ss:$368 sps:$4 sm:$0xff]   ;;  %v21269_v8 = vld [vmem:[#allocation2 + $0xf8c] ss:$368 sps:$4 sm:$0xff]   ;;  %v10278_v36 = vrot.slane %v25257_v0, %v24977_v10 }
 0x65d   :  { %v16920_v44 = vsel %vm16834_vm1, %v16785_v29, 0.0  ;;  %v21264_v9 = vld [vmem:[#allocation2 + $0xf80] ss:$368 sps:$4 sm:$0xff]   ;;  %v21267_v48 = vld [vmem:[#allocation2 + $0xf88] ss:$368 sps:$4 sm:$0xff]  }
 0x65e   :  { %v16917_v27 = vadd.f32 %v16916_v60, %v16915_v5  ;;  %15644 = vmatpush1.bf16.msra.mxu1 %v21228_v4  ;;  %16637 = vst [vmem:[%s25586_s10 + $0x50] sm:$0xff] %v16399_v33  ;;  %15685 = vmatpush1.bf16.msra.mxu0 %v21231_v23  ;;  %v21272_v50 = vld [vmem:[#allocation2 + $0x1264] ss:$368 sps:$4 sm:$0xff]   ;;  %v21275_v14 = vld [vmem:[#allocation2 + $0x126c] ss:$368 sps:$4 sm:$0xff]  }
 0x65f   :  { %15711 = vmatprep.subr.bf16.mxu1 %v21236_v22  ;;  %15752 = vmatprep.subr.bf16.mxu0 %v21239_v13  ;;  %v21270_v4 = vld [vmem:[#allocation2 + $0x1260] ss:$368 sps:$4 sm:$0xff]   ;;  %v25726_v43 = vld [vmem:[#allocation21_spill] sm:$0xff]  ;;  %v21278_v5 = vld [vmem:[#allocation2 + $0x1544] ss:$368 sps:$4 sm:$0xff]  }
 0x660   :  { %v16919_v11 = vadd.f32 %v16918_v51, %v16917_v27  ;;  %v21273_v22 = vld [vmem:[#allocation2 + $0x1268] ss:$368 sps:$4 sm:$0xff]   ;;  %v25727_v60 = vld [vmem:[#allocation22_spill] sm:$0xff]  ;;  %v21281_v51 = vld [vmem:[#allocation2 + $0x154c] ss:$368 sps:$4 sm:$0xff]  }
 0x661   :  { %15662 = vmatmul.mubr.bf16.vlgmr.msra.gmra.mrb[160].mxu1 %v24896_v3  ;;  %15703 = vmatmul.mubr.bf16.vlgmr.msra.gmra.mrb[164].mxu0 %v24896_v3  ;;  %v25728_v29 = vld [vmem:[#allocation23_spill] sm:$0xff] }
 0x662   :  { %v25282_v57 = vadd.f32 %v16920_v44, %v16919_v11  ;;  %15712 = vmatpush1.bf16.msra.mxu1 %v21234_v49  ;;  %15753 = vmatpush1.bf16.msra.mxu0 %v21237_v32  ;;  %v25729_v11 = vld [vmem:[#allocation24_spill] sm:$0xff] }
 0x663   :  { %15713 = vmatprep.subr.bf16.mxu1 %v21242_v17  ;;  %15754 = vmatprep.subr.bf16.mxu0 %v21245_v19 }
 0x664   :  { %15743 = vmatprep.mubr.bf16.mxu1 %v25712_v56  ;;  %15784 = vmatprep.mubr.bf16.mxu0 %v25712_v56 }
 0x666   :  { %15714 = vmatpush1.bf16.msra.mxu1 %v21240_v55  ;;  %15755 = vmatpush1.bf16.msra.mxu0 %v21243_v18  ;;  %v21276_v18 = vld [vmem:[#allocation2 + $0x1540] ss:$368 sps:$4 sm:$0xff]  }
 0x667   :  { %15715 = vmatprep.subr.bf16.mxu1 %v21248_v34  ;;  %15756 = vmatprep.subr.bf16.mxu0 %v21251_v12 }
 0x66a   :  { %15716 = vmatpush1.bf16.msra.mxu1 %v21246_v59  ;;  %15757 = vmatpush1.bf16.msra.mxu0 %v21249_v28  ;;  %v21279_v28 = vld [vmem:[#allocation2 + $0x1548] ss:$368 sps:$4 sm:$0xff]  }
 0x66b   :  { %15717 = vmatprep.subr.bf16.mxu1 %v21254_v1  ;;  %15758 = vmatprep.subr.bf16.mxu0 %v21257_v41  ;;  %v21284_v1 = vld [vmem:[#allocation2 + $0x134] ss:$368 sps:$4 sm:$0xff]  }
 0x66e   :  { %15718 = vmatpush1.bf16.msra.mxu1 %v21252_v46  ;;  %15759 = vmatpush1.bf16.msra.mxu0 %v21255_v2  ;;  %v21287_v2 = vld [vmem:[#allocation2 + $0x13c] ss:$368 sps:$4 sm:$0xff]  }
 0x66f   :  { %15719 = vmatprep.subr.bf16.mxu1 %v21260_v38  ;;  %15760 = vmatprep.subr.bf16.mxu0 %v21263_v40 }
 0x672   :  { %15720 = vmatpush1.bf16.msra.mxu1 %v21258_v7  ;;  %15761 = vmatpush1.bf16.msra.mxu0 %v21261_v39  ;;  %v21282_v39 = vld [vmem:[#allocation2 + $0x130] ss:$368 sps:$4 sm:$0xff]  }
 0x673   :  { %15721 = vmatprep.subr.bf16.mxu1 %v21266_v62  ;;  %15762 = vmatprep.subr.bf16.mxu0 %v21269_v8  ;;  %v21285_v8 = vld [vmem:[#allocation2 + $0x138] ss:$368 sps:$4 sm:$0xff]  }
 0x674   :  { %v15171_v52 = vpop.f32.mrb[136].mxu1  ;;  %v15212_v21 = vpop.f32.mrb[140].mxu0 }
 0x675   :  { %v15172_v37 = vadd.f32 %v15171_v52, %v10274_v42  ;;  %v15173_v25 = vpop.f32.mrb[137].mxu1  ;;  %v15213_v30 = vadd.f32 %v15212_v21, %v10282_v15  ;;  %v15214_v53 = vpop.f32.mrb[141].mxu0  ;;  %v21290_v42 = vld [vmem:[#allocation2 + $0x414] ss:$368 sps:$4 sm:$0xff]   ;;  %v21293_v15 = vld [vmem:[#allocation2 + $0x41c] ss:$368 sps:$4 sm:$0xff]  }
 0x676   :  { %v15174_v31 = vadd.f32 %v15173_v25, %v10278_v36  ;;  %v15175_v16 = vpop.f32.mrb[138].mxu1  ;;  %15722 = vmatpush1.bf16.msra.mxu1 %v21264_v9  ;;  %v15215_v24 = vadd.f32 %v15214_v53, %v10286_v63  ;;  %v15216_v23 = vpop.f32.mrb[142].mxu0  ;;  %15763 = vmatpush1.bf16.msra.mxu0 %v21267_v48  ;;  %v21288_v63 = vld [vmem:[#allocation2 + $0x410] ss:$368 sps:$4 sm:$0xff]   ;;  %v21291_v48 = vld [vmem:[#allocation2 + $0x418] ss:$368 sps:$4 sm:$0xff]  }
 0x677   :  { %v16694_v6 = vsub.f32 %v15172_v37, %v25726_v43  ;;  %v15176_v0 = vpop.f32.mrb[139].mxu1  ;;  %15723 = vmatprep.subr.bf16.mxu1 %v21272_v50  ;;  %v16696_v13 = vsub.f32 %v15213_v30, %v25727_v60  ;;  %v15217_v49 = vpop.f32.mrb[143].mxu0  ;;  %15764 = vmatprep.subr.bf16.mxu0 %v21275_v14  ;;  %v21296_v50 = vld [vmem:[#allocation2 + $0x6f4] ss:$368 sps:$4 sm:$0xff]   ;;  %v21299_v52 = vld [vmem:[#allocation2 + $0x6fc] ss:$368 sps:$4 sm:$0xff]  }
 0x678   :  { %v16400_v33 = vcombine.low %v15172_v37, %v15174_v31  ;;  %v16695_v27 = vsub.f32 %v15174_v31, %v25728_v29  ;;  %v16401_v17 = vcombine.low %v15213_v30, %v15215_v24  ;;  %v16697_v19 = vsub.f32 %v15215_v24, %v25729_v11  ;;  %v21294_v14 = vld [vmem:[#allocation2 + $0x6f0] ss:$368 sps:$4 sm:$0xff]   ;;  %v21297_v37 = vld [vmem:[#allocation2 + $0x6f8] ss:$368 sps:$4 sm:$0xff]   ;;  %v21302_v21 = vld [vmem:[#allocation2 + $0x9d4] ss:$368 sps:$4 sm:$0xff]  }
 0x679   :  { %v16786_v32 = vmul.f32 %v16694_v6, %v16694_v6  ;;  %v16788_v12 = vmul.f32 %v16696_v13, %v16696_v13  ;;  %v21305_v25 = vld [vmem:[#allocation2 + $0x9dc] ss:$368 sps:$4 sm:$0xff]   ;;  %v21300_v30 = vld [vmem:[#allocation2 + $0x9d0] ss:$368 sps:$4 sm:$0xff]   ;;  %v21303_v31 = vld [vmem:[#allocation2 + $0x9d8] ss:$368 sps:$4 sm:$0xff]  }
 0x67a   :  { %v16408_v44 = vrot.slane %v16400_v33, %v21741_v58  ;;  %v16787_v55 = vmul.f32 %v16695_v27, %v16695_v27  ;;  %15724 = vmatpush1.bf16.msra.mxu1 %v21270_v4  ;;  %v16415_v59 = vrot.slane %v16401_v17, %v21741_v58  ;;  %15765 = vmatpush1.bf16.msra.mxu0 %v21273_v22  ;;  %v21308_v53 = vld [vmem:[#allocation2 + $0xcb4] ss:$368 sps:$4 sm:$0xff]   ;;  %v21311_v16 = vld [vmem:[#allocation2 + $0xcbc] ss:$368 sps:$4 sm:$0xff]   ;;  %v21306_v4 = vld [vmem:[#allocation2 + $0xcb0] ss:$368 sps:$4 sm:$0xff]  }
 0x67b   :  { %v16922_v34 = vsel %vm16834_vm1, %v16786_v32, 0.0  ;;  %15725 = vmatprep.subr.bf16.mxu1 %v21278_v5  ;;  %15766 = vmatprep.subr.bf16.mxu0 %v21281_v51  ;;  %v16789_v40 = vmul.f32 %v16697_v19, %v16697_v19  ;;  %v16926_v62 = vsel %vm16834_vm1, %v16788_v12, 0.0  ;;  %v25318_v43 = vld [vmem:[%s25585_s9 + $0x30] sm:$0xff]  ;;  %v21309_v6 = vld [vmem:[#allocation2 + $0xcb8] ss:$368 sps:$4 sm:$0xff]  }
 0x67c   :  { %v16923_v41 = vadd.f32 %v16922_v34, %v25282_v57  ;;  %v16924_v46 = vsel %vm16834_vm1, %v16787_v55, 0.0  ;;  %v16416_v38 = vcombine.low %v16408_v44, %v16415_v59  ;;  %v21314_v24 = vld [vmem:[#allocation2 + $0xf94] ss:$368 sps:$4 sm:$0xff]   ;;  %v21317_v23 = vld [vmem:[#allocation2 + $0xf9c] ss:$368 sps:$4 sm:$0xff]   ;;  %v10290_v0 = vrot.slane %v25318_v43, %v24927_v61 }
 0x67d   :  { %v16928_v36 = vsel %vm16834_vm1, %v16789_v40, 0.0  ;;  %v10298_v22 = vrot.slane %v25318_v43, %v24930_v45  ;;  %v10294_v5 = vrot.slane %v25318_v43, %v24938_v26  ;;  %v21312_v60 = vld [vmem:[#allocation2 + $0xf90] ss:$368 sps:$4 sm:$0xff]   ;;  %v10302_v13 = vrot.slane %v25318_v43, %v24941_v35  ;;  %v21315_v33 = vld [vmem:[#allocation2 + $0xf98] ss:$368 sps:$4 sm:$0xff]  }
 0x67e   :  { %v16925_v7 = vadd.f32 %v16924_v46, %v16923_v41  ;;  %15726 = vmatpush1.bf16.msra.mxu1 %v21276_v18  ;;  %16638 = vst [vmem:[%s25586_s10 + $0x58] sm:$0xff] %v16416_v38  ;;  %15767 = vmatpush1.bf16.msra.mxu0 %v21279_v28  ;;  %v21320_v29 = vld [vmem:[#allocation2 + $0x1274] ss:$368 sps:$4 sm:$0xff]   ;;  %v21323_v49 = vld [vmem:[#allocation2 + $0x127c] ss:$368 sps:$4 sm:$0xff]  }
 0x67f   :  { %15793 = vmatprep.subr.bf16.mxu1 %v21284_v1  ;;  %15834 = vmatprep.subr.bf16.mxu0 %v21287_v2  ;;  %v21318_v18 = vld [vmem:[#allocation2 + $0x1270] ss:$368 sps:$4 sm:$0xff]   ;;  %v25730_v34 = vld [vmem:[#allocation25_spill] sm:$0xff]  ;;  %v21326_v46 = vld [vmem:[#allocation2 + $0x1554] ss:$368 sps:$4 sm:$0xff]  }
 0x680   :  { %v16927_v57 = vadd.f32 %v16926_v62, %v16925_v7  ;;  %v21321_v41 = vld [vmem:[#allocation2 + $0x1278] ss:$368 sps:$4 sm:$0xff]   ;;  %v25731_v2 = vld [vmem:[#allocation26_spill] sm:$0xff] }
 0x681   :  { %15744 = vmatmul.mubr.bf16.vlgmr.msra.gmra.mrb[164].mxu1 %v24896_v3  ;;  %15785 = vmatmul.mubr.bf16.vlgmr.msra.gmra.mrb[168].mxu0 %v24896_v3  ;;  %v25732_v7 = vld [vmem:[#allocation27_spill] sm:$0xff] }
 0x682   :  { %v25310_v9 = vadd.f32 %v16928_v36, %v16927_v57  ;;  %15794 = vmatpush1.bf16.msra.mxu1 %v21282_v39  ;;  %15835 = vmatpush1.bf16.msra.mxu0 %v21285_v8  ;;  %v21329_v8 = vld [vmem:[#allocation2 + $0x155c] ss:$368 sps:$4 sm:$0xff]  }
 0x683   :  { %15795 = vmatprep.subr.bf16.mxu1 %v21290_v42  ;;  %15836 = vmatprep.subr.bf16.mxu0 %v21293_v15  ;;  %v25733_v15 = vld [vmem:[#allocation28_spill] sm:$0xff] }
 0x684   :  { %15825 = vmatprep.mubr.bf16.mxu1 %v25712_v56  ;;  %15866 = vmatprep.mubr.bf16.mxu0 %v25712_v56 }
 0x686   :  { %15796 = vmatpush1.bf16.msra.mxu1 %v21288_v63  ;;  %15837 = vmatpush1.bf16.msra.mxu0 %v21291_v48 }
 0x687   :  { %15797 = vmatprep.subr.bf16.mxu1 %v21296_v50  ;;  %15838 = vmatprep.subr.bf16.mxu0 %v21299_v52  ;;  %v21324_v50 = vld [vmem:[#allocation2 + $0x1550] ss:$368 sps:$4 sm:$0xff]  }
 0x68a   :  { %15798 = vmatpush1.bf16.msra.mxu1 %v21294_v14  ;;  %15839 = vmatpush1.bf16.msra.mxu0 %v21297_v37 }
 0x68b   :  { %15799 = vmatprep.subr.bf16.mxu1 %v21302_v21  ;;  %15840 = vmatprep.subr.bf16.mxu0 %v21305_v25  ;;  %v21327_v21 = vld [vmem:[#allocation2 + $0x1558] ss:$368 sps:$4 sm:$0xff]   ;;  %v21332_v25 = vld [vmem:[#allocation2 + $0x144] ss:$368 sps:$4 sm:$0xff]  }
 0x68e   :  { %15800 = vmatpush1.bf16.msra.mxu1 %v21300_v30  ;;  %15841 = vmatpush1.bf16.msra.mxu0 %v21303_v31 }
 0x68f   :  { %15801 = vmatprep.subr.bf16.mxu1 %v21308_v53  ;;  %15842 = vmatprep.subr.bf16.mxu0 %v21311_v16  ;;  %v21335_v53 = vld [vmem:[#allocation2 + $0x14c] ss:$368 sps:$4 sm:$0xff]  }
 0x692   :  { %15802 = vmatpush1.bf16.msra.mxu1 %v21306_v4  ;;  %15843 = vmatpush1.bf16.msra.mxu0 %v21309_v6 }
 0x693   :  { %15803 = vmatprep.subr.bf16.mxu1 %v21314_v24  ;;  %15844 = vmatprep.subr.bf16.mxu0 %v21317_v23  ;;  %v21330_v24 = vld [vmem:[#allocation2 + $0x140] ss:$368 sps:$4 sm:$0xff]  }
 0x694   :  { %v15253_v27 = vpop.f32.mrb[140].mxu1  ;;  %v15294_v32 = vpop.f32.mrb[144].mxu0 }
 0x695   :  { %v15254_v51 = vadd.f32 %v15253_v27, %v10290_v0  ;;  %v15255_v17 = vpop.f32.mrb[141].mxu1  ;;  %v15295_v11 = vadd.f32 %v15294_v32, %v10298_v22  ;;  %v15296_v44 = vpop.f32.mrb[145].mxu0  ;;  %v21333_v0 = vld [vmem:[#allocation2 + $0x148] ss:$368 sps:$4 sm:$0xff]   ;;  %v21338_v22 = vld [vmem:[#allocation2 + $0x424] ss:$368 sps:$4 sm:$0xff]  }
 0x696   :  { %v15256_v19 = vadd.f32 %v15255_v17, %v10294_v5  ;;  %v15257_v55 = vpop.f32.mrb[142].mxu1  ;;  %15804 = vmatpush1.bf16.msra.mxu1 %v21312_v60  ;;  %v15297_v59 = vadd.f32 %v15296_v44, %v10302_v13  ;;  %v15298_v28 = vpop.f32.mrb[146].mxu0  ;;  %15845 = vmatpush1.bf16.msra.mxu0 %v21315_v33  ;;  %v21341_v5 = vld [vmem:[#allocation2 + $0x42c] ss:$368 sps:$4 sm:$0xff]   ;;  %v21336_v33 = vld [vmem:[#allocation2 + $0x420] ss:$368 sps:$4 sm:$0xff]  }
 0x697   :  { %v16698_v12 = vsub.f32 %v15254_v51, %v25730_v34  ;;  %v15258_v1 = vpop.f32.mrb[143].mxu1  ;;  %15805 = vmatprep.subr.bf16.mxu1 %v21320_v29  ;;  %v16700_v38 = vsub.f32 %v15295_v11, %v25731_v2  ;;  %v15299_v62 = vpop.f32.mrb[147].mxu0  ;;  %15846 = vmatprep.subr.bf16.mxu0 %v21323_v49  ;;  %v21339_v29 = vld [vmem:[#allocation2 + $0x428] ss:$368 sps:$4 sm:$0xff]   ;;  %v21344_v27 = vld [vmem:[#allocation2 + $0x704] ss:$368 sps:$4 sm:$0xff]  }
 0x698   :  { %v16417_v40 = vcombine.low %v15254_v51, %v15256_v19  ;;  %v16699_v39 = vsub.f32 %v15256_v19, %v25732_v7  ;;  %v16418_v57 = vcombine.low %v15295_v11, %v15297_v59  ;;  %v16701_v36 = vsub.f32 %v15297_v59, %v25733_v15  ;;  %v21347_v49 = vld [vmem:[#allocation2 + $0x70c] ss:$368 sps:$4 sm:$0xff]   ;;  %v21342_v51 = vld [vmem:[#allocation2 + $0x700] ss:$368 sps:$4 sm:$0xff]   ;;  %v21345_v32 = vld [vmem:[#allocation2 + $0x708] ss:$368 sps:$4 sm:$0xff]  }
 0x699   :  { %v16790_v42 = vmul.f32 %v16698_v12, %v16698_v12  ;;  %v16792_v14 = vmul.f32 %v16700_v38, %v16700_v38  ;;  %v21350_v17 = vld [vmem:[#allocation2 + $0x9e4] ss:$368 sps:$4 sm:$0xff]   ;;  %v21353_v11 = vld [vmem:[#allocation2 + $0x9ec] ss:$368 sps:$4 sm:$0xff]   ;;  %v21348_v19 = vld [vmem:[#allocation2 + $0x9e0] ss:$368 sps:$4 sm:$0xff]   ;;  %v10306_v1 = vrot.slane %v25318_v43, %v24971_v47  ;;  %v10318_v38 = vrot.slane %v25318_v43, %v24980_v54 }
 0x69a   :  { %v16425_v63 = vrot.slane %v16417_v40, %v21741_v58  ;;  %v16791_v48 = vmul.f32 %v16699_v39, %v16699_v39  ;;  %15806 = vmatpush1.bf16.msra.mxu1 %v21318_v18  ;;  %v16432_v37 = vrot.slane %v16418_v57, %v21741_v58  ;;  %15847 = vmatpush1.bf16.msra.mxu0 %v21321_v41  ;;  %v21351_v44 = vld [vmem:[#allocation2 + $0x9e8] ss:$368 sps:$4 sm:$0xff]   ;;  %v21356_v55 = vld [vmem:[#allocation2 + $0xcc4] ss:$368 sps:$4 sm:$0xff]   ;;  %v21359_v18 = vld [vmem:[#allocation2 + $0xccc] ss:$368 sps:$4 sm:$0xff]  }
 0x69b   :  { %v16930_v52 = vsel %vm16834_vm1, %v16790_v42, 0.0  ;;  %15807 = vmatprep.subr.bf16.mxu1 %v21326_v46  ;;  %15848 = vmatprep.subr.bf16.mxu0 %v21329_v8  ;;  %v16793_v4 = vmul.f32 %v16701_v36, %v16701_v36  ;;  %v16934_v23 = vsel %vm16834_vm1, %v16792_v14, 0.0  ;;  %v21354_v34 = vld [vmem:[#allocation2 + $0xcc0] ss:$368 sps:$4 sm:$0xff]   ;;  %v21357_v12 = vld [vmem:[#allocation2 + $0xcc8] ss:$368 sps:$4 sm:$0xff]   ;;  %v10314_v41 = vrot.slane %v25318_v43, %v24974_v20 }
 0x69c   :  { %v16931_v30 = vadd.f32 %v16930_v52, %v25310_v9  ;;  %v16932_v31 = vsel %vm16834_vm1, %v16791_v48, 0.0  ;;  %v16433_v16 = vcombine.low %v16425_v63, %v16432_v37  ;;  %v21362_v59 = vld [vmem:[#allocation2 + $0xfa4] ss:$368 sps:$4 sm:$0xff]   ;;  %v21365_v28 = vld [vmem:[#allocation2 + $0xfac] ss:$368 sps:$4 sm:$0xff]   ;;  %v10310_v46 = vrot.slane %v25318_v43, %v24977_v10 }
 0x69d   :  { %v16936_v60 = vsel %vm16834_vm1, %v16793_v4, 0.0  ;;  %v21360_v2 = vld [vmem:[#allocation2 + $0xfa0] ss:$368 sps:$4 sm:$0xff]   ;;  %v21363_v40 = vld [vmem:[#allocation2 + $0xfa8] ss:$368 sps:$4 sm:$0xff]  }
 0x69e   :  { %v16933_v6 = vadd.f32 %v16932_v31, %v16931_v30  ;;  %15808 = vmatpush1.bf16.msra.mxu1 %v21324_v50  ;;  %16639 = vst [vmem:[%s25586_s10 + $0x60] sm:$0xff] %v16433_v16  ;;  %15849 = vmatpush1.bf16.msra.mxu0 %v21327_v21  ;;  %v21368_v7 = vld [vmem:[#allocation2 + $0x1284] ss:$368 sps:$4 sm:$0xff]   ;;  %v21371_v62 = vld [vmem:[#allocation2 + $0x128c] ss:$368 sps:$4 sm:$0xff]  }
 0x69f   :  { %15875 = vmatprep.subr.bf16.mxu1 %v21332_v25  ;;  %15916 = vmatprep.subr.bf16.mxu0 %v21335_v53  ;;  %v21366_v50 = vld [vmem:[#allocation2 + $0x1280] ss:$368 sps:$4 sm:$0xff]   ;;  %v25734_v52 = vld [vmem:[#allocation29_spill] sm:$0xff]  ;;  %v21374_v30 = vld [vmem:[#allocation2 + $0x1564] ss:$368 sps:$4 sm:$0xff]  }
 0x6a0   :  { %v16935_v9 = vadd.f32 %v16934_v23, %v16933_v6  ;;  %v21369_v25 = vld [vmem:[#allocation2 + $0x1288] ss:$368 sps:$4 sm:$0xff]   ;;  %v25735_v31 = vld [vmem:[#allocation30_spill] sm:$0xff]  ;;  %v21377_v23 = vld [vmem:[#allocation2 + $0x156c] ss:$368 sps:$4 sm:$0xff]  }
 0x6a1   :  { %15826 = vmatmul.mubr.bf16.vlgmr.msra.gmra.mrb[168].mxu1 %v24896_v3  ;;  %15867 = vmatmul.mubr.bf16.vlgmr.msra.gmra.mrb[172].mxu0 %v24896_v3  ;;  %v25736_v4 = vld [vmem:[#allocation31_spill] sm:$0xff] }
 0x6a2   :  { %v25343_v13 = vadd.f32 %v16936_v60, %v16935_v9  ;;  %15876 = vmatpush1.bf16.msra.mxu1 %v21330_v24  ;;  %15917 = vmatpush1.bf16.msra.mxu0 %v21333_v0  ;;  %v25737_v9 = vld [vmem:[#allocation32_spill] sm:$0xff] }
 0x6a3   :  { %15877 = vmatprep.subr.bf16.mxu1 %v21338_v22  ;;  %15918 = vmatprep.subr.bf16.mxu0 %v21341_v5 }
 0x6a4   :  { %15907 = vmatprep.mubr.bf16.mxu1 %v25712_v56  ;;  %15948 = vmatprep.mubr.bf16.mxu0 %v25712_v56 }
 0x6a6   :  { %15878 = vmatpush1.bf16.msra.mxu1 %v21336_v33  ;;  %15919 = vmatpush1.bf16.msra.mxu0 %v21339_v29  ;;  %v21372_v29 = vld [vmem:[#allocation2 + $0x1560] ss:$368 sps:$4 sm:$0xff]  }
 0x6a7   :  { %15879 = vmatprep.subr.bf16.mxu1 %v21344_v27  ;;  %15920 = vmatprep.subr.bf16.mxu0 %v21347_v49 }
 0x6aa   :  { %15880 = vmatpush1.bf16.msra.mxu1 %v21342_v51  ;;  %15921 = vmatpush1.bf16.msra.mxu0 %v21345_v32  ;;  %v21375_v32 = vld [vmem:[#allocation2 + $0x1568] ss:$368 sps:$4 sm:$0xff]  }
 0x6ab   :  { %15881 = vmatprep.subr.bf16.mxu1 %v21350_v17  ;;  %15922 = vmatprep.subr.bf16.mxu0 %v21353_v11  ;;  %v21380_v17 = vld [vmem:[#allocation2 + $0x154] ss:$368 sps:$4 sm:$0xff]  }
 0x6ae   :  { %15882 = vmatpush1.bf16.msra.mxu1 %v21348_v19  ;;  %15923 = vmatpush1.bf16.msra.mxu0 %v21351_v44  ;;  %v21383_v44 = vld [vmem:[#allocation2 + $0x15c] ss:$368 sps:$4 sm:$0xff]  }
 0x6af   :  { %15883 = vmatprep.subr.bf16.mxu1 %v21356_v55  ;;  %15924 = vmatprep.subr.bf16.mxu0 %v21359_v18 }
 0x6b2   :  { %15884 = vmatpush1.bf16.msra.mxu1 %v21354_v34  ;;  %15925 = vmatpush1.bf16.msra.mxu0 %v21357_v12  ;;  %v21378_v12 = vld [vmem:[#allocation2 + $0x150] ss:$368 sps:$4 sm:$0xff]  }
 0x6b3   :  { %15885 = vmatprep.subr.bf16.mxu1 %v21362_v59  ;;  %15926 = vmatprep.subr.bf16.mxu0 %v21365_v28  ;;  %v21381_v28 = vld [vmem:[#allocation2 + $0x158] ss:$368 sps:$4 sm:$0xff]  }
 0x6b4   :  { %v15335_v39 = vpop.f32.mrb[144].mxu1  ;;  %v15376_v42 = vpop.f32.mrb[148].mxu0 }
 0x6b5   :  { %v15336_v8 = vadd.f32 %v15335_v39, %v10306_v1  ;;  %v15337_v57 = vpop.f32.mrb[145].mxu1  ;;  %v15377_v15 = vadd.f32 %v15376_v42, %v10314_v41  ;;  %v15378_v63 = vpop.f32.mrb[149].mxu0  ;;  %v21386_v1 = vld [vmem:[#allocation2 + $0x434] ss:$368 sps:$4 sm:$0xff]   ;;  %v21389_v41 = vld [vmem:[#allocation2 + $0x43c] ss:$368 sps:$4 sm:$0xff]  }
 0x6b6   :  { %v15338_v36 = vadd.f32 %v15337_v57, %v10310_v46  ;;  %v15339_v48 = vpop.f32.mrb[146].mxu1  ;;  %15886 = vmatpush1.bf16.msra.mxu1 %v21360_v2  ;;  %v15379_v37 = vadd.f32 %v15378_v63, %v10318_v38  ;;  %v15380_v21 = vpop.f32.mrb[150].mxu0  ;;  %15927 = vmatpush1.bf16.msra.mxu0 %v21363_v40  ;;  %v21384_v38 = vld [vmem:[#allocation2 + $0x430] ss:$368 sps:$4 sm:$0xff]   ;;  %v21387_v40 = vld [vmem:[#allocation2 + $0x438] ss:$368 sps:$4 sm:$0xff]  }
 0x6b7   :  { %v16702_v14 = vsub.f32 %v15336_v8, %v25734_v52  ;;  %v15340_v43 = vpop.f32.mrb[147].mxu1  ;;  %15887 = vmatprep.subr.bf16.mxu1 %v21368_v7  ;;  %v16704_v53 = vsub.f32 %v15377_v15, %v25735_v31  ;;  %v15381_v24 = vpop.f32.mrb[151].mxu0  ;;  %15928 = vmatprep.subr.bf16.mxu0 %v21371_v62  ;;  %v21392_v7 = vld [vmem:[#allocation2 + $0x714] ss:$368 sps:$4 sm:$0xff]   ;;  %v21395_v39 = vld [vmem:[#allocation2 + $0x71c] ss:$368 sps:$4 sm:$0xff]  }
 0x6b8   :  { %v16434_v16 = vcombine.low %v15336_v8, %v15338_v36  ;;  %v16703_v6 = vsub.f32 %v15338_v36, %v25736_v4  ;;  %v16435_v22 = vcombine.low %v15377_v15, %v15379_v37  ;;  %v16705_v5 = vsub.f32 %v15379_v37, %v25737_v9  ;;  %v21390_v62 = vld [vmem:[#allocation2 + $0x710] ss:$368 sps:$4 sm:$0xff]   ;;  %v21393_v8 = vld [vmem:[#allocation2 + $0x718] ss:$368 sps:$4 sm:$0xff]   ;;  %v21398_v42 = vld [vmem:[#allocation2 + $0x9f4] ss:$368 sps:$4 sm:$0xff]  }
 0x6b9   :  { %v16794_v0 = vmul.f32 %v16702_v14, %v16702_v14  ;;  %v16796_v49 = vmul.f32 %v16704_v53, %v16704_v53  ;;  %v21401_v57 = vld [vmem:[#allocation2 + $0x9fc] ss:$368 sps:$4 sm:$0xff]   ;;  %v21396_v15 = vld [vmem:[#allocation2 + $0x9f0] ss:$368 sps:$4 sm:$0xff]   ;;  %v21399_v36 = vld [vmem:[#allocation2 + $0x9f8] ss:$368 sps:$4 sm:$0xff]  }
 0x6ba   :  { %v16442_v60 = vrot.slane %v16434_v16, %v21741_v58  ;;  %v16795_v33 = vmul.f32 %v16703_v6, %v16703_v6  ;;  %15888 = vmatpush1.bf16.msra.mxu1 %v21366_v50  ;;  %v16449_v51 = vrot.slane %v16435_v22, %v21741_v58  ;;  %15929 = vmatpush1.bf16.msra.mxu0 %v21369_v25  ;;  %v21404_v63 = vld [vmem:[#allocation2 + $0xcd4] ss:$368 sps:$4 sm:$0xff]   ;;  %v21407_v48 = vld [vmem:[#allocation2 + $0xcdc] ss:$368 sps:$4 sm:$0xff]   ;;  %v21402_v50 = vld [vmem:[#allocation2 + $0xcd0] ss:$368 sps:$4 sm:$0xff]  }
 0x6bb   :  { %v16938_v27 = vsel %vm16834_vm1, %v16794_v0, 0.0  ;;  %15889 = vmatprep.subr.bf16.mxu1 %v21374_v30  ;;  %15930 = vmatprep.subr.bf16.mxu0 %v21377_v23  ;;  %v16797_v18 = vmul.f32 %v16705_v5, %v16705_v5  ;;  %v16942_v59 = vsel %vm16834_vm1, %v16796_v49, 0.0  ;;  %v25379_v52 = vld [vmem:[%s25585_s9 + $0x38] sm:$0xff]  ;;  %v21410_v37 = vld [vmem:[#allocation2 + $0xfb4] ss:$368 sps:$4 sm:$0xff]  }
 0x6bc   :  { %v16939_v11 = vadd.f32 %v16938_v27, %v25343_v13  ;;  %v16940_v19 = vsel %vm16834_vm1, %v16795_v33, 0.0  ;;  %v16450_v55 = vcombine.low %v16442_v60, %v16449_v51  ;;  %v21405_v14 = vld [vmem:[#allocation2 + $0xcd8] ss:$368 sps:$4 sm:$0xff]   ;;  %v21413_v21 = vld [vmem:[#allocation2 + $0xfbc] ss:$368 sps:$4 sm:$0xff]   ;;  %v10322_v43 = vrot.slane %v25379_v52, %v24927_v61 }
 0x6bd   :  { %v16944_v46 = vsel %vm16834_vm1, %v16797_v18, 0.0  ;;  %v10330_v25 = vrot.slane %v25379_v52, %v24930_v45  ;;  %v10326_v30 = vrot.slane %v25379_v52, %v24938_v26  ;;  %v21408_v31 = vld [vmem:[#allocation2 + $0xfb0] ss:$368 sps:$4 sm:$0xff]   ;;  %v10334_v53 = vrot.slane %v25379_v52, %v24941_v35  ;;  %v21411_v16 = vld [vmem:[#allocation2 + $0xfb8] ss:$368 sps:$4 sm:$0xff]  }
 0x6be   :  { %v16941_v34 = vadd.f32 %v16940_v19, %v16939_v11  ;;  %15890 = vmatpush1.bf16.msra.mxu1 %v21372_v29  ;;  %16640 = vst [vmem:[%s25586_s10 + $0x68] sm:$0xff] %v16450_v55  ;;  %15931 = vmatpush1.bf16.msra.mxu0 %v21375_v32  ;;  %v21416_v4 = vld [vmem:[#allocation2 + $0x1294] ss:$368 sps:$4 sm:$0xff]   ;;  %v21419_v24 = vld [vmem:[#allocation2 + $0x129c] ss:$368 sps:$4 sm:$0xff]  }
 0x6bf   :  { %15957 = vmatprep.subr.bf16.mxu1 %v21380_v17  ;;  %15998 = vmatprep.subr.bf16.mxu0 %v21383_v44  ;;  %v21414_v29 = vld [vmem:[#allocation2 + $0x1290] ss:$368 sps:$4 sm:$0xff]   ;;  %v25738_v27 = vld [vmem:[#allocation33_spill] sm:$0xff]  ;;  %v21422_v19 = vld [vmem:[#allocation2 + $0x1574] ss:$368 sps:$4 sm:$0xff]  }
 0x6c0   :  { %v16943_v13 = vadd.f32 %v16942_v59, %v16941_v34  ;;  %v21417_v11 = vld [vmem:[#allocation2 + $0x1298] ss:$368 sps:$4 sm:$0xff]   ;;  %v25739_v44 = vld [vmem:[#allocation34_spill] sm:$0xff] }
 0x6c1   :  { %15908 = vmatmul.mubr.bf16.vlgmr.msra.gmra.mrb[172].mxu1 %v24896_v3  ;;  %15949 = vmatmul.mubr.bf16.vlgmr.msra.gmra.mrb[176].mxu0 %v24896_v3  ;;  %v25740_v34 = vld [vmem:[#allocation35_spill] sm:$0xff] }
 0x6c2   :  { %v25371_v2 = vadd.f32 %v16944_v46, %v16943_v13  ;;  %15958 = vmatpush1.bf16.msra.mxu1 %v21378_v12  ;;  %15999 = vmatpush1.bf16.msra.mxu0 %v21381_v28  ;;  %v21425_v28 = vld [vmem:[#allocation2 + $0x157c] ss:$368 sps:$4 sm:$0xff]  }
 0x6c3   :  { %15959 = vmatprep.subr.bf16.mxu1 %v21386_v1  ;;  %16000 = vmatprep.subr.bf16.mxu0 %v21389_v41  ;;  %v25741_v41 = vld [vmem:[#allocation36_spill] sm:$0xff] }
 0x6c4   :  { %15989 = vmatprep.mubr.bf16.mxu1 %v25712_v56  ;;  %16030 = vmatprep.mubr.bf16.mxu0 %v25712_v56 }
 0x6c6   :  { %15960 = vmatpush1.bf16.msra.mxu1 %v21384_v38  ;;  %16001 = vmatpush1.bf16.msra.mxu0 %v21387_v40 }
 0x6c7   :  { %15961 = vmatprep.subr.bf16.mxu1 %v21392_v7  ;;  %16002 = vmatprep.subr.bf16.mxu0 %v21395_v39  ;;  %v21420_v7 = vld [vmem:[#allocation2 + $0x1570] ss:$368 sps:$4 sm:$0xff]  }
 0x6ca   :  { %15962 = vmatpush1.bf16.msra.mxu1 %v21390_v62  ;;  %16003 = vmatpush1.bf16.msra.mxu0 %v21393_v8 }
 0x6cb   :  { %15963 = vmatprep.subr.bf16.mxu1 %v21398_v42  ;;  %16004 = vmatprep.subr.bf16.mxu0 %v21401_v57  ;;  %v21423_v42 = vld [vmem:[#allocation2 + $0x1578] ss:$368 sps:$4 sm:$0xff]   ;;  %v21428_v57 = vld [vmem:[#allocation2 + $0x164] ss:$368 sps:$4 sm:$0xff]  }
 0x6ce   :  { %15964 = vmatpush1.bf16.msra.mxu1 %v21396_v15  ;;  %16005 = vmatpush1.bf16.msra.mxu0 %v21399_v36 }
 0x6cf   :  { %15965 = vmatprep.subr.bf16.mxu1 %v21404_v63  ;;  %16006 = vmatprep.subr.bf16.mxu0 %v21407_v48  ;;  %v21431_v63 = vld [vmem:[#allocation2 + $0x16c] ss:$368 sps:$4 sm:$0xff]  }
 0x6d2   :  { %15966 = vmatpush1.bf16.msra.mxu1 %v21402_v50  ;;  %16007 = vmatpush1.bf16.msra.mxu0 %v21405_v14 }
 0x6d3   :  { %15967 = vmatprep.subr.bf16.mxu1 %v21410_v37  ;;  %16008 = vmatprep.subr.bf16.mxu0 %v21413_v21  ;;  %v21426_v37 = vld [vmem:[#allocation2 + $0x160] ss:$368 sps:$4 sm:$0xff]  }
 0x6d4   :  { %v15417_v6 = vpop.f32.mrb[148].mxu1  ;;  %v15458_v0 = vpop.f32.mrb[152].mxu0 }
 0x6d5   :  { %v15418_v23 = vadd.f32 %v15417_v6, %v10322_v43  ;;  %v15419_v22 = vpop.f32.mrb[149].mxu1  ;;  %v15459_v9 = vadd.f32 %v15458_v0, %v10330_v25  ;;  %v15460_v60 = vpop.f32.mrb[153].mxu0  ;;  %v21429_v43 = vld [vmem:[#allocation2 + $0x168] ss:$368 sps:$4 sm:$0xff]   ;;  %v21434_v25 = vld [vmem:[#allocation2 + $0x444] ss:$368 sps:$4 sm:$0xff]  }
 0x6d6   :  { %v15420_v5 = vadd.f32 %v15419_v22, %v10326_v30  ;;  %v15421_v33 = vpop.f32.mrb[150].mxu1  ;;  %15968 = vmatpush1.bf16.msra.mxu1 %v21408_v31  ;;  %v15461_v51 = vadd.f32 %v15460_v60, %v10334_v53  ;;  %v15462_v32 = vpop.f32.mrb[154].mxu0  ;;  %16009 = vmatpush1.bf16.msra.mxu0 %v21411_v16  ;;  %v21437_v30 = vld [vmem:[#allocation2 + $0x44c] ss:$368 sps:$4 sm:$0xff]   ;;  %v21432_v16 = vld [vmem:[#allocation2 + $0x440] ss:$368 sps:$4 sm:$0xff]  }
 0x6d7   :  { %v16706_v49 = vsub.f32 %v15418_v23, %v25738_v27  ;;  %v15422_v17 = vpop.f32.mrb[151].mxu1  ;;  %15969 = vmatprep.subr.bf16.mxu1 %v21416_v4  ;;  %v16708_v55 = vsub.f32 %v15459_v9, %v25739_v44  ;;  %v15463_v59 = vpop.f32.mrb[155].mxu0  ;;  %16010 = vmatprep.subr.bf16.mxu0 %v21419_v24  ;;  %v21435_v4 = vld [vmem:[#allocation2 + $0x448] ss:$368 sps:$4 sm:$0xff]   ;;  %v21440_v6 = vld [vmem:[#allocation2 + $0x724] ss:$368 sps:$4 sm:$0xff]   ;;  %v10338_v32 = vrot.slane %v25379_v52, %v24971_v47 }
 0x6d8   :  { %v16451_v18 = vcombine.low %v15418_v23, %v15420_v5  ;;  %v16707_v12 = vsub.f32 %v15420_v5, %v25740_v34  ;;  %v16452_v13 = vcombine.low %v15459_v9, %v15461_v51  ;;  %v16709_v46 = vsub.f32 %v15461_v51, %v25741_v41  ;;  %v21443_v24 = vld [vmem:[#allocation2 + $0x72c] ss:$368 sps:$4 sm:$0xff]   ;;  %v21438_v23 = vld [vmem:[#allocation2 + $0x720] ss:$368 sps:$4 sm:$0xff]   ;;  %v21441_v0 = vld [vmem:[#allocation2 + $0x728] ss:$368 sps:$4 sm:$0xff]  }
 0x6d9   :  { %v16798_v1 = vmul.f32 %v16706_v49, %v16706_v49  ;;  %v16800_v62 = vmul.f32 %v16708_v55, %v16708_v55  ;;  %v21446_v22 = vld [vmem:[#allocation2 + $0xa04] ss:$368 sps:$4 sm:$0xff]   ;;  %v21449_v9 = vld [vmem:[#allocation2 + $0xa0c] ss:$368 sps:$4 sm:$0xff]   ;;  %v21444_v5 = vld [vmem:[#allocation2 + $0xa00] ss:$368 sps:$4 sm:$0xff]   ;;  %v10346_v17 = vrot.slane %v25379_v52, %v24974_v20  ;;  %v10350_v44 = vrot.slane %v25379_v52, %v24980_v54 }
 0x6da   :  { %v16459_v38 = vrot.slane %v16451_v18, %v21741_v58  ;;  %v16799_v40 = vmul.f32 %v16707_v12, %v16707_v12  ;;  %15970 = vmatpush1.bf16.msra.mxu1 %v21414_v29  ;;  %v16466_v8 = vrot.slane %v16452_v13, %v21741_v58  ;;  %16011 = vmatpush1.bf16.msra.mxu0 %v21417_v11  ;;  %v21447_v60 = vld [vmem:[#allocation2 + $0xa08] ss:$368 sps:$4 sm:$0xff]   ;;  %v21452_v33 = vld [vmem:[#allocation2 + $0xce4] ss:$368 sps:$4 sm:$0xff]   ;;  %v21455_v29 = vld [vmem:[#allocation2 + $0xcec] ss:$368 sps:$4 sm:$0xff]  }
 0x6db   :  { %v16946_v39 = vsel %vm16834_vm1, %v16798_v1, 0.0  ;;  %15971 = vmatprep.subr.bf16.mxu1 %v21422_v19  ;;  %16012 = vmatprep.subr.bf16.mxu0 %v21425_v28  ;;  %v16801_v50 = vmul.f32 %v16709_v46, %v16709_v46  ;;  %v16950_v21 = vsel %vm16834_vm1, %v16800_v62, 0.0  ;;  %v21450_v27 = vld [vmem:[#allocation2 + $0xce0] ss:$368 sps:$4 sm:$0xff]   ;;  %v21458_v49 = vld [vmem:[#allocation2 + $0xfc4] ss:$368 sps:$4 sm:$0xff]   ;;  %v10342_v11 = vrot.slane %v25379_v52, %v24977_v10 }
 0x6dc   :  { %v16947_v15 = vadd.f32 %v16946_v39, %v25371_v2  ;;  %v16948_v36 = vsel %vm16834_vm1, %v16799_v40, 0.0  ;;  %v16467_v48 = vcombine.low %v16459_v38, %v16466_v8  ;;  %v21461_v51 = vld [vmem:[#allocation2 + $0xfcc] ss:$368 sps:$4 sm:$0xff]   ;;  %v21456_v19 = vld [vmem:[#allocation2 + $0xfc0] ss:$368 sps:$4 sm:$0xff]  }
 0x6dd   :  { %v16952_v31 = vsel %vm16834_vm1, %v16801_v50, 0.0  ;;  %v21459_v55 = vld [vmem:[#allocation2 + $0xfc8] ss:$368 sps:$4 sm:$0xff]   ;;  %v21464_v18 = vld [vmem:[#allocation2 + $0x12a4] ss:$368 sps:$4 sm:$0xff]  }
 0x6de   :  { %v16949_v14 = vadd.f32 %v16948_v36, %v16947_v15  ;;  %15972 = vmatpush1.bf16.msra.mxu1 %v21420_v7  ;;  %16641 = vst [vmem:[%s25586_s10 + $0x70] sm:$0xff] %v16467_v48  ;;  %16013 = vmatpush1.bf16.msra.mxu0 %v21423_v42  ;;  %v21467_v12 = vld [vmem:[#allocation2 + $0x12ac] ss:$368 sps:$4 sm:$0xff]   ;;  %v21462_v40 = vld [vmem:[#allocation2 + $0x12a0] ss:$368 sps:$4 sm:$0xff]  }
 0x6df   :  { %16039 = vmatprep.subr.bf16.mxu1 %v21428_v57  ;;  %16080 = vmatprep.subr.bf16.mxu0 %v21431_v63  ;;  %v25742_v7 = vld [vmem:[#allocation37_spill] sm:$0xff]  ;;  %v21470_v57 = vld [vmem:[#allocation2 + $0x1584] ss:$368 sps:$4 sm:$0xff]   ;;  %v25744_v48 = vld [vmem:[#allocation39_spill] sm:$0xff] }
 0x6e0   :  { %v16951_v2 = vadd.f32 %v16950_v21, %v16949_v14  ;;  %v21465_v42 = vld [vmem:[#allocation2 + $0x12a8] ss:$368 sps:$4 sm:$0xff]   ;;  %v25743_v15 = vld [vmem:[#allocation38_spill] sm:$0xff] }
 0x6e1   :  { %15990 = vmatmul.mubr.bf16.vlgmr.msra.gmra.mrb[176].mxu1 %v24896_v3  ;;  %16031 = vmatmul.mubr.bf16.vlgmr.msra.gmra.mrb[180].mxu0 %v24896_v3 }
 0x6e2   :  { %v25404_v53 = vadd.f32 %v16952_v31, %v16951_v2  ;;  %16040 = vmatpush1.bf16.msra.mxu1 %v21426_v37  ;;  %16081 = vmatpush1.bf16.msra.mxu0 %v21429_v43  ;;  %v21473_v37 = vld [vmem:[#allocation2 + $0x158c] ss:$368 sps:$4 sm:$0xff]  }
 0x6e3   :  { %16041 = vmatprep.subr.bf16.mxu1 %v21434_v25  ;;  %16082 = vmatprep.subr.bf16.mxu0 %v21437_v30  ;;  %v25745_v25 = vld [vmem:[#allocation40_spill] sm:$0xff] }
 0x6e4   :  { %16071 = vmatprep.mubr.bf16.mxu1 %v25712_v56  ;;  %16112 = vmatprep.mubr.bf16.mxu0 %v25712_v56  ;;  %v21453_v56 = vld [vmem:[#allocation2 + $0xce8] ss:$368 sps:$4 sm:$0xff]  }
 0x6e6   :  { %16042 = vmatpush1.bf16.msra.mxu1 %v21432_v16  ;;  %16083 = vmatpush1.bf16.msra.mxu0 %v21435_v4  ;;  %v21468_v16 = vld [vmem:[#allocation2 + $0x1580] ss:$368 sps:$4 sm:$0xff]  }
 0x6e7   :  { %16043 = vmatprep.subr.bf16.mxu1 %v21440_v6  ;;  %16084 = vmatprep.subr.bf16.mxu0 %v21443_v24 }
 0x6ea   :  { %16044 = vmatpush1.bf16.msra.mxu1 %v21438_v23  ;;  %16085 = vmatpush1.bf16.msra.mxu0 %v21441_v0  ;;  %v21471_v23 = vld [vmem:[#allocation2 + $0x1588] ss:$368 sps:$4 sm:$0xff]  }
 0x6eb   :  { %16045 = vmatprep.subr.bf16.mxu1 %v21446_v22  ;;  %16086 = vmatprep.subr.bf16.mxu0 %v21449_v9 }
 0x6ee   :  { %16046 = vmatpush1.bf16.msra.mxu1 %v21444_v5  ;;  %16087 = vmatpush1.bf16.msra.mxu0 %v21447_v60 }
 0x6ef   :  { %16047 = vmatprep.subr.bf16.mxu1 %v21452_v33  ;;  %16088 = vmatprep.subr.bf16.mxu0 %v21455_v29 }
 0x6f2   :  { %16048 = vmatpush1.bf16.msra.mxu1 %v21450_v27  ;;  %16089 = vmatpush1.bf16.msra.mxu0 %v21453_v56  ;;  %v10079_v56 = vld [vmem:[%s25585_s9 + $0x40] sm:$0xff] }
 0x6f3   :  { %16049 = vmatprep.subr.bf16.mxu1 %v21458_v49  ;;  %16090 = vmatprep.subr.bf16.mxu0 %v21461_v51  ;;  %v10354_v49 = vrot.slane %v10079_v56, %v24927_v61  ;;  %v10362_v51 = vrot.slane %v10079_v56, %v24930_v45 }
 0x6f4   :  { %v15499_v34 = vpop.f32.mrb[152].mxu1  ;;  %v15540_v28 = vpop.f32.mrb[156].mxu0 }
 0x6f5   :  { %v15500_v59 = vadd.f32 %v15499_v34, %v10338_v32  ;;  %v15501_v1 = vpop.f32.mrb[153].mxu1  ;;  %v15541_v13 = vadd.f32 %v15540_v28, %v10346_v17  ;;  %v15542_v46 = vpop.f32.mrb[157].mxu0  ;;  %v10358_v32 = vrot.slane %v10079_v56, %v24938_v26  ;;  %v10366_v17 = vrot.slane %v10079_v56, %v24941_v35 }
 0x6f6   :  { %v15502_v41 = vadd.f32 %v15501_v1, %v10342_v11  ;;  %v15503_v38 = vpop.f32.mrb[154].mxu1  ;;  %16050 = vmatpush1.bf16.msra.mxu1 %v21456_v19  ;;  %v15543_v62 = vadd.f32 %v15542_v46, %v10350_v44  ;;  %v15544_v8 = vpop.f32.mrb[158].mxu0  ;;  %16091 = vmatpush1.bf16.msra.mxu0 %v21459_v55  ;;  %v25747_v46 = vld [vmem:[#allocation42_spill] sm:$0xff] }
 0x6f7   :  { %v16710_v39 = vsub.f32 %v15500_v59, %v25742_v7  ;;  %v15504_v52 = vpop.f32.mrb[155].mxu1  ;;  %16051 = vmatprep.subr.bf16.mxu1 %v21464_v18  ;;  %v16712_v36 = vsub.f32 %v15541_v13, %v25743_v15  ;;  %v15545_v14 = vpop.f32.mrb[159].mxu0  ;;  %16092 = vmatprep.subr.bf16.mxu0 %v21467_v12  ;;  %v25748_v7 = vld [vmem:[#allocation43_spill] sm:$0xff] }
 0x6f8   :  { %v16468_v63 = vcombine.low %v15500_v59, %v15502_v41  ;;  %v16711_v50 = vsub.f32 %v15502_v41, %v25744_v48  ;;  %v16469_v43 = vcombine.low %v15541_v13, %v15543_v62  ;;  %v16713_v2 = vsub.f32 %v15543_v62, %v25745_v25  ;;  %v25746_v59 = vld [vmem:[#allocation41_spill] sm:$0xff] }
 0x6f9   :  { %v16802_v21 = vmul.f32 %v16710_v39, %v16710_v39  ;;  %v16804_v6 = vmul.f32 %v16712_v36, %v16712_v36 }
 0x6fa   :  { %v16476_v30 = vrot.slane %v16468_v63, %v21741_v58  ;;  %v16803_v31 = vmul.f32 %v16711_v50, %v16711_v50  ;;  %16052 = vmatpush1.bf16.msra.mxu1 %v21462_v40  ;;  %v16483_v24 = vrot.slane %v16469_v43, %v21741_v58  ;;  %16093 = vmatpush1.bf16.msra.mxu0 %v21465_v42  ;;  %v25749_v42 = vld [vmem:[#allocation44_spill] sm:$0xff] }
 0x6fb   :  { %v16954_v4 = vsel %vm16834_vm1, %v16802_v21, 0.0  ;;  %16053 = vmatprep.subr.bf16.mxu1 %v21470_v57  ;;  %16094 = vmatprep.subr.bf16.mxu0 %v21473_v37  ;;  %v16805_v5 = vmul.f32 %v16713_v2, %v16713_v2  ;;  %v16958_v33 = vsel %vm16834_vm1, %v16804_v6, 0.0  ;;  %v10378_v6 = vrot.slane %v10079_v56, %v24974_v20 }
 0x6fc   :  { %v16955_v0 = vadd.f32 %v16954_v4, %v25404_v53  ;;  %v16956_v22 = vsel %vm16834_vm1, %v16803_v31, 0.0  ;;  %v16484_v9 = vcombine.low %v16476_v30, %v16483_v24  ;;  %v10370_v4 = vrot.slane %v10079_v56, %v24971_v47 }
 0x6fd   :  { %v16960_v27 = vsel %vm16834_vm1, %v16805_v5, 0.0  ;;  %v10374_v24 = vrot.slane %v10079_v56, %v24977_v10 }
 0x6fe   :  { %v16957_v60 = vadd.f32 %v16956_v22, %v16955_v0  ;;  %16054 = vmatpush1.bf16.msra.mxu1 %v21468_v16  ;;  %16642 = vst [vmem:[%s25586_s10 + $0x78] sm:$0xff] %v16484_v9  ;;  %16095 = vmatpush1.bf16.msra.mxu0 %v21471_v23  ;;  %v10382_v23 = vrot.slane %v10079_v56, %v24980_v54 }
 0x700   :  { %v16959_v29 = vadd.f32 %v16958_v33, %v16957_v60 }
 0x701   :  { %16072 = vmatmul.mubr.bf16.vlgmr.msra.gmra.mrb[180].mxu1 %v24896_v3  ;;  %16113 = vmatmul.mubr.bf16.vlgmr.msra.gmra.mrb[184].mxu0 %v24896_v3 }
 0x702   :  { %v16961_v53 = vadd.f32 %v16960_v27, %v16959_v29 }
 0x714   :  { %v15581_v11 = vpop.f32.mrb[156].mxu1  ;;  %v15622_v44 = vpop.f32.mrb[160].mxu0 }
 0x715   :  { %v15582_v19 = vadd.f32 %v15581_v11, %v10354_v49  ;;  %v15583_v55 = vpop.f32.mrb[157].mxu1  ;;  %v15623_v18 = vadd.f32 %v15622_v44, %v10362_v51  ;;  %v15624_v12 = vpop.f32.mrb[161].mxu0  ;;  %v25751_v11 = vld [vmem:[#allocation46_spill] sm:$0xff] }
 0x716   :  { %v15584_v34 = vadd.f32 %v15583_v55, %v10358_v32  ;;  %v15585_v3 = vpop.f32.mrb[158].mxu1  ;;  %v15625_v1 = vadd.f32 %v15624_v12, %v10366_v17  ;;  %v15626_v13 = vpop.f32.mrb[162].mxu0  ;;  %v25752_v55 = vld [vmem:[#allocation47_spill] sm:$0xff] }
 0x717   :  { %v16714_v28 = vsub.f32 %v15582_v19, %v25746_v59  ;;  %v15586_v41 = vpop.f32.mrb[159].mxu1  ;;  %v16716_v38 = vsub.f32 %v15623_v18, %v25747_v46  ;;  %v15627_v62 = vpop.f32.mrb[163].mxu0  ;;  %v25753_v3 = vld [vmem:[#allocation48_spill] sm:$0xff] }
 0x718   :  { %v16485_v40 = vcombine.low %v15582_v19, %v15584_v34  ;;  %v16715_v39 = vsub.f32 %v15584_v34, %v25748_v7  ;;  %v16486_v52 = vcombine.low %v15623_v18, %v15625_v1  ;;  %v16717_v57 = vsub.f32 %v15625_v1, %v25749_v42 }
 0x719   :  { %v16806_v8 = vmul.f32 %v16714_v28, %v16714_v28  ;;  %v16808_v48 = vmul.f32 %v16716_v38, %v16716_v38 }
 0x71a   :  { %v16493_v15 = vrot.slane %v16485_v40, %v21741_v58  ;;  %v16807_v36 = vmul.f32 %v16715_v39, %v16715_v39  ;;  %v16500_v50 = vrot.slane %v16486_v52, %v21741_v58  ;;  %v16809_v43 = vmul.f32 %v16717_v57, %v16717_v57 }
 0x71b   :  { %v16962_v63 = vsel %vm16834_vm1, %v16806_v8, 0.0  ;;  %v16966_v2 = vsel %vm16834_vm1, %v16808_v48, 0.0 }
 0x71c   :  { %v16963_v14 = vadd.f32 %v16962_v63, %v16961_v53  ;;  %v16964_v37 = vsel %vm16834_vm1, %v16807_v36, 0.0  ;;  %v16501_v21 = vcombine.low %v16493_v15, %v16500_v50  ;;  %v16968_v31 = vsel %vm16834_vm1, %v16809_v43, 0.0  ;;  %v25750_v53 = vld [vmem:[#allocation45_spill] sm:$0xff] }
 0x71d   :  { %v10080_v15 = vld [vmem:[%s25585_s9 + $0x48] sm:$0xff] }
 0x71e   :  { %v16965_v25 = vadd.f32 %v16964_v37, %v16963_v14  ;;  %16643 = vst [vmem:[%s25586_s10 + $0x80] sm:$0xff] %v16501_v21  ;;  %v10386_v36 = vrot.slane %v10080_v15, %v24927_v61  ;;  %v10394_v63 = vrot.slane %v10080_v15, %v24930_v45  ;;  %v10390_v48 = vrot.slane %v10080_v15, %v24938_v26 }
 0x71f   :  { %v10398_v50 = vrot.slane %v10080_v15, %v24941_v35 }
 0x720   :  { %v16967_v30 = vadd.f32 %v16966_v2, %v16965_v25 }
 0x722   :  { %v16969_v16 = vadd.f32 %v16968_v31, %v16967_v30 }
 0x734   :  { %v15663_v0 = vpop.f32.mrb[160].mxu1  ;;  %v15704_v9 = vpop.f32.mrb[164].mxu0 }
 0x735   :  { %v15664_v22 = vadd.f32 %v15663_v0, %v10370_v4  ;;  %v15665_v5 = vpop.f32.mrb[161].mxu1  ;;  %v15705_v60 = vadd.f32 %v15704_v9, %v10378_v6  ;;  %v15706_v29 = vpop.f32.mrb[165].mxu0  ;;  %v25755_v0 = vld [vmem:[#allocation50_spill] sm:$0xff] }
 0x736   :  { %v15666_v33 = vadd.f32 %v15665_v5, %v10374_v24  ;;  %v15667_v27 = vpop.f32.mrb[162].mxu1  ;;  %v15707_v51 = vadd.f32 %v15706_v29, %v10382_v23  ;;  %v15708_v32 = vpop.f32.mrb[166].mxu0  ;;  %v25756_v5 = vld [vmem:[#allocation51_spill] sm:$0xff] }
 0x737   :  { %v16718_v49 = vsub.f32 %v15664_v22, %v25750_v53  ;;  %v15668_v17 = vpop.f32.mrb[163].mxu1  ;;  %v16720_v19 = vsub.f32 %v15705_v60, %v25751_v11  ;;  %v15709_v34 = vpop.f32.mrb[167].mxu0  ;;  %v25757_v53 = vld [vmem:[#allocation52_spill] sm:$0xff] }
 0x738   :  { %v16502_v44 = vcombine.low %v15664_v22, %v15666_v33  ;;  %v16719_v18 = vsub.f32 %v15666_v33, %v25752_v55  ;;  %v16503_v12 = vcombine.low %v15705_v60, %v15707_v51  ;;  %v16721_v59 = vsub.f32 %v15707_v51, %v25753_v3 }
 0x739   :  { %v16810_v56 = vmul.f32 %v16718_v49, %v16718_v49  ;;  %v16812_v41 = vmul.f32 %v16720_v19, %v16720_v19 }
 0x73a   :  { %v16510_v28 = vrot.slane %v16502_v44, %v21741_v58  ;;  %v16811_v1 = vmul.f32 %v16719_v18, %v16719_v18  ;;  %v16517_v46 = vrot.slane %v16503_v12, %v21741_v58  ;;  %v16813_v39 = vmul.f32 %v16721_v59, %v16721_v59 }
 0x73b   :  { %v16970_v13 = vsel %vm16834_vm1, %v16810_v56, 0.0  ;;  %v16974_v8 = vsel %vm16834_vm1, %v16812_v41, 0.0  ;;  %v10406_v41 = vrot.slane %v10080_v15, %v24977_v10 }
 0x73c   :  { %v16971_v38 = vadd.f32 %v16970_v13, %v16969_v16  ;;  %v16972_v40 = vsel %vm16834_vm1, %v16811_v1, 0.0  ;;  %v16518_v7 = vcombine.low %v16510_v28, %v16517_v46  ;;  %v16976_v42 = vsel %vm16834_vm1, %v16813_v39, 0.0  ;;  %v25754_v16 = vld [vmem:[#allocation49_spill] sm:$0xff] }
 0x73d   :  { %v10402_v1 = vrot.slane %v10080_v15, %v24971_v47  ;;  %v10410_v13 = vrot.slane %v10080_v15, %v24974_v20  ;;  %v10414_v46 = vrot.slane %v10080_v15, %v24980_v54 }
 0x73e   :  { %v16973_v62 = vadd.f32 %v16972_v40, %v16971_v38  ;;  %16644 = vst [vmem:[%s25586_s10 + $0x88] sm:$0xff] %v16518_v7 }
 0x740   :  { %v16975_v52 = vadd.f32 %v16974_v8, %v16973_v62 }
 0x742   :  { %v16977_v57 = vadd.f32 %v16976_v42, %v16975_v52 }
 0x754   :  { %v15745_v14 = vpop.f32.mrb[164].mxu1  ;;  %v15786_v21 = vpop.f32.mrb[168].mxu0 }
 0x755   :  { %v15746_v37 = vadd.f32 %v15745_v14, %v10386_v36  ;;  %v15747_v43 = vpop.f32.mrb[165].mxu1  ;;  %v15787_v25 = vadd.f32 %v15786_v21, %v10394_v63  ;;  %v15788_v30 = vpop.f32.mrb[169].mxu0  ;;  %v25759_v14 = vld [vmem:[#allocation54_spill] sm:$0xff] }
 0x756   :  { %v15748_v2 = vadd.f32 %v15747_v43, %v10390_v48  ;;  %v15749_v31 = vpop.f32.mrb[166].mxu1  ;;  %v15789_v6 = vadd.f32 %v15788_v30, %v10398_v50  ;;  %v15790_v24 = vpop.f32.mrb[170].mxu0  ;;  %v25760_v43 = vld [vmem:[#allocation55_spill] sm:$0xff] }
 0x757   :  { %v16722_v4 = vsub.f32 %v15746_v37, %v25754_v16  ;;  %v15750_v23 = vpop.f32.mrb[167].mxu1  ;;  %v16724_v22 = vsub.f32 %v15787_v25, %v25755_v0  ;;  %v15791_v33 = vpop.f32.mrb[171].mxu0  ;;  %v25761_v31 = vld [vmem:[#allocation56_spill] sm:$0xff] }
 0x758   :  { %v16519_v9 = vcombine.low %v15746_v37, %v15748_v2  ;;  %v16723_v60 = vsub.f32 %v15748_v2, %v25756_v5  ;;  %v16520_v27 = vcombine.low %v15787_v25, %v15789_v6  ;;  %v16725_v49 = vsub.f32 %v15789_v6, %v25757_v53 }
 0x759   :  { %v16814_v29 = vmul.f32 %v16722_v4, %v16722_v4  ;;  %v16816_v11 = vmul.f32 %v16724_v22, %v16724_v22 }
 0x75a   :  { %v16527_v51 = vrot.slane %v16519_v9, %v21741_v58  ;;  %v16815_v32 = vmul.f32 %v16723_v60, %v16723_v60  ;;  %v16534_v19 = vrot.slane %v16520_v27, %v21741_v58  ;;  %v16817_v34 = vmul.f32 %v16725_v49, %v16725_v49 }
 0x75b   :  { %v16978_v17 = vsel %vm16834_vm1, %v16814_v29, 0.0  ;;  %v16982_v12 = vsel %vm16834_vm1, %v16816_v11, 0.0 }
 0x75c   :  { %v16979_v44 = vadd.f32 %v16978_v17, %v16977_v57  ;;  %v16980_v55 = vsel %vm16834_vm1, %v16815_v32, 0.0  ;;  %v16535_v18 = vcombine.low %v16527_v51, %v16534_v19  ;;  %v16984_v59 = vsel %vm16834_vm1, %v16817_v34, 0.0  ;;  %v25758_v57 = vld [vmem:[#allocation53_spill] sm:$0xff]  ;;  %v10081_v51 = vld [vmem:[%s25585_s9 + $0x50] sm:$0xff] }
 0x75d   :  { %v10418_v32 = vrot.slane %v10081_v51, %v24927_v61  ;;  %v10426_v17 = vrot.slane %v10081_v51, %v24930_v45  ;;  %v10422_v11 = vrot.slane %v10081_v51, %v24938_v26  ;;  %v10430_v19 = vrot.slane %v10081_v51, %v24941_v35 }
 0x75e   :  { %v16981_v56 = vadd.f32 %v16980_v55, %v16979_v44  ;;  %16645 = vst [vmem:[%s25586_s10 + $0x90] sm:$0xff] %v16535_v18 }
 0x760   :  { %v16983_v3 = vadd.f32 %v16982_v12, %v16981_v56 }
 0x762   :  { %v16985_v28 = vadd.f32 %v16984_v59, %v16983_v3 }
 0x774   :  { %v15827_v38 = vpop.f32.mrb[168].mxu1  ;;  %v15868_v7 = vpop.f32.mrb[172].mxu0 }
 0x775   :  { %v15828_v40 = vadd.f32 %v15827_v38, %v10402_v1  ;;  %v15829_v39 = vpop.f32.mrb[169].mxu1  ;;  %v15869_v62 = vadd.f32 %v15868_v7, %v10410_v13  ;;  %v15870_v52 = vpop.f32.mrb[173].mxu0  ;;  %v25763_v38 = vld [vmem:[#allocation58_spill] sm:$0xff] }
 0x776   :  { %v15830_v8 = vadd.f32 %v15829_v39, %v10406_v41  ;;  %v15831_v42 = vpop.f32.mrb[170].mxu1  ;;  %v15871_v63 = vadd.f32 %v15870_v52, %v10414_v46  ;;  %v15872_v48 = vpop.f32.mrb[174].mxu0  ;;  %v25764_v39 = vld [vmem:[#allocation59_spill] sm:$0xff] }
 0x777   :  { %v16726_v36 = vsub.f32 %v15828_v40, %v25758_v57  ;;  %v15832_v50 = vpop.f32.mrb[171].mxu1  ;;  %v16728_v37 = vsub.f32 %v15869_v62, %v25759_v14  ;;  %v15873_v2 = vpop.f32.mrb[175].mxu0  ;;  %v25765_v57 = vld [vmem:[#allocation60_spill] sm:$0xff] }
 0x778   :  { %v16536_v21 = vcombine.low %v15828_v40, %v15830_v8  ;;  %v16727_v25 = vsub.f32 %v15830_v8, %v25760_v43  ;;  %v16537_v30 = vcombine.low %v15869_v62, %v15871_v63  ;;  %v16729_v16 = vsub.f32 %v15871_v63, %v25761_v31 }
 0x779   :  { %v16818_v15 = vmul.f32 %v16726_v36, %v16726_v36  ;;  %v16820_v23 = vmul.f32 %v16728_v37, %v16728_v37 }
 0x77a   :  { %v16544_v4 = vrot.slane %v16536_v21, %v21741_v58  ;;  %v16819_v6 = vmul.f32 %v16727_v25, %v16727_v25  ;;  %v16551_v0 = vrot.slane %v16537_v30, %v21741_v58  ;;  %v16821_v60 = vmul.f32 %v16729_v16, %v16729_v16 }
 0x77b   :  { %v16986_v24 = vsel %vm16834_vm1, %v16818_v15, 0.0  ;;  %v16990_v29 = vsel %vm16834_vm1, %v16820_v23, 0.0  ;;  %v10438_v23 = vrot.slane %v10081_v51, %v24977_v10 }
 0x77c   :  { %v16987_v22 = vadd.f32 %v16986_v24, %v16985_v28  ;;  %v16988_v9 = vsel %vm16834_vm1, %v16819_v6, 0.0  ;;  %v16552_v5 = vcombine.low %v16544_v4, %v16551_v0  ;;  %v16992_v53 = vsel %vm16834_vm1, %v16821_v60, 0.0  ;;  %v25762_v28 = vld [vmem:[#allocation57_spill] sm:$0xff] }
 0x77d   :  { %v10434_v6 = vrot.slane %v10081_v51, %v24971_v47  ;;  %v10442_v24 = vrot.slane %v10081_v51, %v24974_v20  ;;  %v10446_v0 = vrot.slane %v10081_v51, %v24980_v54  ;;  %v25767_v47 = vld [vmem:[#allocation62_spill] sm:$0xff] }
 0x77e   :  { %v16989_v33 = vadd.f32 %v16988_v9, %v16987_v22  ;;  %16646 = vst [vmem:[%s25586_s10 + $0x98] sm:$0xff] %v16552_v5 }
 0x780   :  { %v16991_v27 = vadd.f32 %v16990_v29, %v16989_v33 }
 0x782   :  { %v16993_v49 = vadd.f32 %v16992_v53, %v16991_v27 }
 0x794   :  { %v15909_v44 = vpop.f32.mrb[172].mxu1  ;;  %v15950_v18 = vpop.f32.mrb[176].mxu0 }
 0x795   :  { %v15910_v55 = vadd.f32 %v15909_v44, %v10418_v32  ;;  %v15911_v34 = vpop.f32.mrb[173].mxu1  ;;  %v15951_v56 = vadd.f32 %v15950_v18, %v10426_v17  ;;  %v15952_v3 = vpop.f32.mrb[177].mxu0 }
 0x796   :  { %v15912_v12 = vadd.f32 %v15911_v34, %v10422_v11  ;;  %v15913_v59 = vpop.f32.mrb[174].mxu1  ;;  %v15953_v13 = vadd.f32 %v15952_v3, %v10430_v19  ;;  %v15954_v41 = vpop.f32.mrb[178].mxu0  ;;  %v25769_v34 = vld [vmem:[#allocation64_spill] sm:$0xff] }
 0x797   :  { %v16730_v1 = vsub.f32 %v15910_v55, %v25762_v28  ;;  %v15914_v46 = vpop.f32.mrb[175].mxu1  ;;  %v16732_v40 = vsub.f32 %v15951_v56, %v25763_v38  ;;  %v15955_v8 = vpop.f32.mrb[179].mxu0 }
 0x798   :  { %v16553_v7 = vcombine.low %v15910_v55, %v15912_v12  ;;  %v16731_v62 = vsub.f32 %v15912_v12, %v25764_v39  ;;  %v16554_v42 = vcombine.low %v15951_v56, %v15953_v13  ;;  %v16733_v36 = vsub.f32 %v15953_v13, %v25765_v57  ;;  %v25768_v55 = vld [vmem:[#allocation63_spill] sm:$0xff] }
 0x799   :  { %v16822_v52 = vmul.f32 %v16730_v1, %v16730_v1  ;;  %v16824_v14 = vmul.f32 %v16732_v40, %v16732_v40 }
 0x79a   :  { %v16561_v63 = vrot.slane %v16553_v7, %v21741_v58  ;;  %v16823_v48 = vmul.f32 %v16731_v62, %v16731_v62  ;;  %v16568_v37 = vrot.slane %v16554_v42, %v21741_v58  ;;  %v16825_v2 = vmul.f32 %v16733_v36, %v16733_v36 }
 0x79b   :  { %v16994_v50 = vsel %vm16834_vm1, %v16822_v52, 0.0  ;;  %v16998_v30 = vsel %vm16834_vm1, %v16824_v14, 0.0  ;;  %v10082_v52 = vld [vmem:[%s25585_s9 + $0x58] sm:$0xf] }
 0x79c   :  { %v16995_v21 = vadd.f32 %v16994_v50, %v16993_v49  ;;  %v16996_v43 = vsel %vm16834_vm1, %v16823_v48, 0.0  ;;  %v16569_v25 = vcombine.low %v16561_v63, %v16568_v37  ;;  %v17000_v16 = vsel %vm16834_vm1, %v16825_v2, 0.0  ;;  %v25766_v49 = vld [vmem:[#allocation61_spill] sm:$0xff] }
 0x79d   :  { %v10450_v42 = vrot.slane %v10082_v52, %v24927_v61  ;;  %v10458_v57 = vrot.slane %v10082_v52, %v24930_v45  ;;  %v10454_v36 = vrot.slane %v10082_v52, %v24938_v26  ;;  %v10462_v63 = vrot.slane %v10082_v52, %v24941_v35  ;;  %v25771_v61 = vld [vmem:[#allocation66_spill] sm:$0xff] }
 0x79e   :  { %v16997_v15 = vadd.f32 %v16996_v43, %v16995_v21  ;;  %16647 = vst [vmem:[%s25586_s10 + $0xa0] sm:$0xff] %v16569_v25 }
 0x7a0   :  { %v16999_v31 = vadd.f32 %v16998_v30, %v16997_v15  ;;  %v25770_v15 = vld [vmem:[#allocation65_spill] sm:$0xff] }
 0x7a2   :  { %v17001_v4 = vadd.f32 %v17000_v16, %v16999_v31 }
 0x7b4   :  { %v15991_v22 = vpop.f32.mrb[176].mxu1  ;;  %v16032_v5 = vpop.f32.mrb[180].mxu0 }
 0x7b5   :  { %v15992_v9 = vadd.f32 %v15991_v22, %v10434_v6  ;;  %v15993_v60 = vpop.f32.mrb[177].mxu1  ;;  %v16033_v33 = vadd.f32 %v16032_v5, %v10442_v24  ;;  %v16034_v27 = vpop.f32.mrb[181].mxu0  ;;  %v25772_v24 = vld [vmem:[#allocation67_spill] sm:$0xff]  ;;  %v25773_v22 = vld [vmem:[#allocation68_spill] sm:$0xff] }
 0x7b6   :  { %v15994_v29 = vadd.f32 %v15993_v60, %v10438_v23  ;;  %v15995_v53 = vpop.f32.mrb[178].mxu1  ;;  %v16035_v17 = vadd.f32 %v16034_v27, %v10446_v0  ;;  %v16036_v11 = vpop.f32.mrb[182].mxu0 }
 0x7b7   :  { %v16734_v32 = vsub.f32 %v15992_v9, %v25766_v49  ;;  %v15996_v19 = vpop.f32.mrb[179].mxu1  ;;  %v16736_v44 = vsub.f32 %v16033_v33, %v25767_v47  ;;  %v16037_v18 = vpop.f32.mrb[183].mxu0 }
 0x7b8   :  { %v16570_v20 = vcombine.low %v15992_v9, %v15994_v29  ;;  %v16735_v10 = vsub.f32 %v15994_v29, %v25768_v55  ;;  %v16571_v51 = vcombine.low %v16033_v33, %v16035_v17  ;;  %v16737_v56 = vsub.f32 %v16035_v17, %v25769_v34 }
 0x7b9   :  { %v16826_v54 = vmul.f32 %v16734_v32, %v16734_v32  ;;  %v16828_v28 = vmul.f32 %v16736_v44, %v16736_v44 }
 0x7ba   :  { %v16578_v12 = vrot.slane %v16570_v20, %v21741_v58  ;;  %v16827_v3 = vmul.f32 %v16735_v10, %v16735_v10  ;;  %v16585_v1 = vrot.slane %v16571_v51, %v21741_v58  ;;  %v16829_v38 = vmul.f32 %v16737_v56, %v16737_v56 }
 0x7bb   :  { %v17002_v59 = vsel %vm16834_vm1, %v16826_v54, 0.0  ;;  %v17006_v7 = vsel %vm16834_vm1, %v16828_v28, 0.0 }
 0x7bc   :  { %v17003_v13 = vadd.f32 %v17002_v59, %v17001_v4  ;;  %v17004_v41 = vsel %vm16834_vm1, %v16827_v3, 0.0  ;;  %v16586_v46 = vcombine.low %v16578_v12, %v16585_v1  ;;  %v17008_v62 = vsel %vm16834_vm1, %v16829_v38, 0.0 }
 0x7be   :  { %v17005_v40 = vadd.f32 %v17004_v41, %v17003_v13  ;;  %16648 = vst [vmem:[%s25586_s10 + $0xa8] sm:$0xff] %v16586_v46 }
 0x7c0   :  { %v17007_v39 = vadd.f32 %v17006_v7, %v17005_v40 }
 0x7c2   :  { %v17009_v8 = vadd.f32 %v17008_v62, %v17007_v39 }
 0x7d4   :  { %v16073_v48 = vpop.f32.mrb[180].mxu1  ;;  %v16114_v14 = vpop.f32.mrb[184].mxu0 }
 0x7d5   :  { %v16074_v50 = vadd.f32 %v16073_v48, %v10450_v42  ;;  %v16075_v37 = vpop.f32.mrb[181].mxu1  ;;  %v16115_v21 = vadd.f32 %v16114_v14, %v10458_v57  ;;  %v16116_v25 = vpop.f32.mrb[185].mxu0 }
 0x7d6   :  { %v16076_v43 = vadd.f32 %v16075_v37, %v10454_v36  ;;  %v16077_v2 = vpop.f32.mrb[182].mxu1  ;;  %v16117_v31 = vadd.f32 %v16116_v25, %v10462_v63  ;;  %v16118_v16 = vpop.f32.mrb[186].mxu0 }
 0x7d7   :  { %v16738_v30 = vsub.f32 %v16074_v50, %v25770_v15  ;;  %v16078_v4 = vpop.f32.mrb[183].mxu1  ;;  %v16740_v6 = vsub.f32 %v16115_v21, %v25771_v61  ;;  %v16119_v23 = vpop.f32.mrb[187].mxu0 }
 0x7d8   :  { %v16587_v45 = vcombine.low %v16074_v50, %v16076_v43  ;;  %v16739_v26 = vsub.f32 %v16076_v43, %v25772_v24  ;;  %v16588_v0 = vcombine.low %v16115_v21, %v16117_v31  ;;  %v16741_v9 = vsub.f32 %v16117_v31, %v25773_v22 }
 0x7d9   :  { %v16830_v35 = vmul.f32 %v16738_v30, %v16738_v30  ;;  %v16832_v29 = vmul.f32 %v16740_v6, %v16740_v6 }
 0x7da   :  { %v16595_v5 = vrot.slane %v16587_v45, %v21741_v58  ;;  %v16831_v60 = vmul.f32 %v16739_v26, %v16739_v26  ;;  %v16602_v27 = vrot.slane %v16588_v0, %v21741_v58  ;;  %v16833_v17 = vmul.f32 %v16741_v9, %v16741_v9 }
 0x7db   :  { %v17010_v33 = vsel %vm16834_vm1, %v16830_v35, 0.0  ;;  %v17014_v19 = vsel %vm16834_vm1, %v16832_v29, 0.0 }
 0x7dc   :  { %v17011_v53 = vadd.f32 %v17010_v33, %v17009_v8  ;;  %v17012_v49 = vsel %vm16834_vm1, %v16831_v60, 0.0  ;;  %v16603_v32 = vcombine.low %v16595_v5, %v16602_v27  ;;  %v17016_v44 = vsel %vm16834_vm1, %v16833_v17, 0.0 }
 0x7de   :  { %v17013_v11 = vadd.f32 %v17012_v49, %v17011_v53  ;;  %16649 = vst [vmem:[%s25586_s10 + $0xb0] sm:$0xff] %v16603_v32  ;;  %s21496_s10 = scalar_lea.hbm %s25587_s11, 16 }
 0x7df   :  { %p21497_p8 = scmp.ne.s32.totalorder %s25587_s11, %s21496_s10  ;;  %p21500_p9 = scmp.lt.u32.totalorder %s21496_s10, %s25587_s11 }
 0x7e0   :  { %v17015_v47 = vadd.f32 %v17014_v19, %v17013_v11 }
 0x7e1   :  { %p21502_p10 = pnand %p21500_p9, %p21497_p8 }
 0x7e2   :  { %v17017_v20 = vadd.f32 %v17016_v44, %v17015_v47 }
 0x7e4   :  { %17018 = vadd.xlane.f32.xlu1 %v17017_v20 }
 0x871   :  { %v17019_v55 = vpop.xlane.xlu1 %17018 }
 0x872   :  { %v17020_v10 = vrot.slane %v17019_v55, 4 }
 0x874   :  { %v17021_v58 = vadd.f32 %v17020_v10, %v17019_v55 }
 0x876   :  { %v17022_v18 = vrot.slane %v17021_v58, 2 }
 0x878   :  { %v17023_v54 = vadd.f32 %v17022_v18, %v17021_v58 }
 0x87a   :  { %v17024_v51 = vrot.slane %v17023_v54, 1 }
 0x87c   :  { %v17025_v34 = vadd.f32 %v17024_v51, %v17023_v54 }
 0x87e   :  { %19569 = vpush %v17025_v34 }
 0x8af   :  { %s19570_s20 = spop %19569 }
 0x8b0   :  { %17028 = sst [smem:[#allocation5]] %s19570_s20 }
 0x8b1   :  { %21505 = shalt.err (!%p21502_p10)
}
 0x8b2   :  { %s21517_s2 = smov [#allocation5]  }
 0x8b3   :  { %17038 = dma.smem_to_hbm %s21517_s2, 16, %s25587_s11, [#allocation4]  }
 0x8b4   :  { %21508 = dma.done.wait [#allocation4], 16  }
 0x8b5   :  { %21509 = vsyncadd [#allocation4], 4294967280 }
 0x8b6   :  { %17044 = sfence }
 0x8b7   :  { %17045 = vsyncpa [#allocation3], 1 }
 0x8b8   :  { %17046 = vsyncpa [#allocation4], 1 }

</bundles_post_ra>
